<compile_context>
chip_gen: v7x
topology: tpu7x:2x2x1
jax: 0.10.0
libtpu: 0.0.40
codegen_flags: <defaults>
</compile_context>

<pallas_src>
import functools

import jax
import jax.numpy as jnp
from jax.experimental import pallas as pl
from jax.experimental.pallas import tpu as pltpu

_F32 = jnp.float32
_BF16 = jnp.bfloat16
_LANE = 128
_SUBLANE_BF16 = 16


def _round_up(v, m):
    return ((v + m - 1) // m) * m


def _elu(x):
    # torch ELU: x if x > 0 else exp(x) - 1; clamp before exp (no inf ever).
    return jnp.where(x > 0.0, x, jnp.exp(jnp.minimum(x, 0.0)) - 1.0)


def _tree_sum(terms):
    # Balanced pairwise add: independent VPU partial sums, short dep chain.
    while len(terms) > 1:
        nxt = [terms[i] + terms[i + 1] for i in range(0, len(terms) - 1, 2)]
        if len(terms) % 2:
            nxt.append(terms[-1])
        terms = nxt
    return terms[0]


# ------------------------------ fused kernel -------------------------------

def _net_kernel(dims,
                src_ref, dst_ref, batch_ref, invdeg_ref, invcnt_ref,
                x_ref, ea_ref,
                c1_w1_ref, c1_b1_ref, c1_w2_ref, c1_b2_ref, c1_root_ref,
                c1_bias_ref,
                c2_w1_ref, c2_b1_ref, c2_w2_ref, c2_b2_ref, c2_root_ref,
                c2_bias_ref,
                h_w1_ref, h_b1_ref, h_w2_ref, h_b2_ref,
                out_ref):
    """Fused forward pass of Net.  All activations stay VMEM/vreg-resident."""
    f_in, c1_out, c2_out, num_classes, n_pad, e_pad, g_pad = dims

    # Exact {0,1} structure matrices built in-register from int32 indices
    # (no O(N*E) HBM traffic).  Padded entries are -1 -> never match iota.
    src = src_ref[...]                                    # [E, 1] i32
    dst = dst_ref[...]                                    # [1, E] i32
    bat = batch_ref[...]                                  # [1, N] i32
    gsrc = jnp.where(
        jax.lax.broadcasted_iota(jnp.int32, (e_pad, n_pad), 1) == src,
        1.0, 0.0).astype(_BF16)                           # [E, N] gather x[src]
    a01 = jnp.where(
        jax.lax.broadcasted_iota(jnp.int32, (n_pad, e_pad), 0) == dst,
        1.0, 0.0).astype(_BF16)                           # [N, E] scatter->dst
    pool = jnp.where(
        jax.lax.broadcasted_iota(jnp.int32, (g_pad, n_pad), 0) == bat,
        1.0, 0.0).astype(_BF16)                           # [G, N] pooling

    inv_deg = invdeg_ref[...]                             # [N, 1] f32
    inv_cnt = invcnt_ref[...]                             # [G, 1] f32
    ea = ea_ref[...]                                      # [E, 1] f32

    def nnconv(x, in_ch, out_ch, w1_ref, b1_ref, w2_ref, b2_ref,
               root_ref, bias_ref):
        # x: [N, in_ch] f32 (value, VMEM/vreg-resident).
        x_bf = x.astype(_BF16)
        xj = jnp.dot(gsrc, x_bf, preferred_element_type=_F32)        # [E, in]
        # Edge MLP layer 1 (Linear(1,10)+ReLU): VPU broadcast FMA (a K=1
        # matmul would waste the MXU).
        h1 = jnp.maximum(ea * w1_ref[...] + b1_ref[...], 0.0).astype(_BF16)
        # ONE flattened edge-MLP matmul (lane-dense output), bias folded in:
        #   We[e, k*out + o] = (h1 @ W2_flat)[e, k*out+o] + b2_flat[k*out+o]
        we = jnp.dot(h1, w2_ref[...], preferred_element_type=_F32) + b2_ref[...]
        # k-sum msg[e,o] = sum_k xj[e,k] * We[e, k*out+o] on the VPU:
        # independent partial products from lane slices, balanced tree-add.
        partials = [xj[:, k:k + 1] * we[:, k * out_ch:(k + 1) * out_ch]
                    for k in range(in_ch)]
        msg = _tree_sum(partials)                                     # [E, out]
        # mean aggregation over incoming edges + root transform + bias, ELU.
        aggr = jnp.dot(a01, msg.astype(_BF16),
                       preferred_element_type=_F32) * inv_deg         # [N, out]
        root = jnp.dot(x, root_ref[...], preferred_element_type=_F32)  # f32 (tiny)
        return _elu(aggr + root + bias_ref[...])

    x1 = nnconv(x_ref[...], f_in, c1_out, c1_w1_ref, c1_b1_ref, c1_w2_ref,
                c1_b2_ref, c1_root_ref, c1_bias_ref)                  # [N, 16]
    x2 = nnconv(x1, c1_out, c2_out, c2_w1_ref, c2_b1_ref, c2_w2_ref,
                c2_b2_ref, c2_root_ref, c2_bias_ref)                  # [N, 32]

    # global_mean_pool -> ELU(fc1) -> fc2 -> log_softmax on 128-lane slabs.
    pooled = jnp.dot(pool, x2.astype(_BF16),
                     preferred_element_type=_F32) * inv_cnt           # [G, 32]
    h = _elu(jnp.dot(pooled.astype(_BF16), h_w1_ref[...],
                     preferred_element_type=_F32) + h_b1_ref[...])    # [G, 128]
    logits = jnp.dot(h.astype(_BF16), h_w2_ref[...],
                     preferred_element_type=_F32) + h_b2_ref[...]     # [G, 128]
    col = jax.lax.broadcasted_iota(jnp.int32, logits.shape, 1)
    logits = jnp.where(col < num_classes, logits, -1e30)              # mask pad lanes
    m = jnp.max(logits, axis=1, keepdims=True)
    lse = jnp.log(jnp.sum(jnp.exp(logits - m), axis=1, keepdims=True)) + m
    out_ref[...] = logits - lse                                       # lane-dense store


# ------------------------------ wrapper glue -------------------------------

def init_params(key, num_features, num_classes):
    ks = jax.random.split(key, 16)
    s = 0.1

    def lin(k, shape):
        return s * jax.random.normal(k, shape, _F32)

    conv1 = dict(
        w1=lin(ks[0], (1, 10)), b1=lin(ks[1], (1, 10)),
        w2=lin(ks[2], (10, num_features * 16)),
        b2=lin(ks[3], (1, num_features * 16)),
        root=lin(ks[4], (num_features, 16)), bias=lin(ks[5], (1, 16)),
    )
    conv2 = dict(
        w1=lin(ks[6], (1, 10)), b1=lin(ks[7], (1, 10)),
        w2=lin(ks[8], (10, 16 * 32)), b2=lin(ks[9], (1, 16 * 32)),
        root=lin(ks[10], (16, 32)), bias=lin(ks[11], (1, 32)),
    )
    head = dict(
        w1=lin(ks[12], (32, 64)), b1=lin(ks[13], (1, 64)),
        w2=lin(ks[14], (64, num_classes)), b2=lin(ks[15], (1, num_classes)),
    )
    return conv1, conv2, head


def _prep_params(params, num_features, num_classes):
    """Cast / pad parameters into the kernel layout (bf16 MXU operands,
    128-lane-padded flattened edge-MLP weights, 128-lane FC head slabs)."""
    conv1, conv2, head = params

    def prep_conv(p, in_ch, out_ch):
        flat = in_ch * out_ch
        w = _round_up(flat, _LANE)
        w2 = jnp.zeros((10, w), _F32).at[:, :flat].set(p["w2"])       # [10, in*out]
        b2 = jnp.zeros((1, w), _F32).at[:, :flat].set(p["b2"])
        return (p["w1"], p["b1"], w2.astype(_BF16), b2, p["root"], p["bias"])

    c1 = prep_conv(conv1, num_features, 16)
    c2 = prep_conv(conv2, 16, 32)

    # FC head padded to full 128-lane slabs -> unmasked matmuls + final store.
    w1p = jnp.zeros((32, _LANE), _F32).at[:, :64].set(head["w1"])
    b1p = jnp.zeros((1, _LANE), _F32).at[:, :64].set(head["b1"])
    w2p = jnp.zeros((_LANE, _LANE), _F32).at[:64, :num_classes].set(head["w2"])
    b2p = jnp.zeros((1, _LANE), _F32).at[:, :num_classes].set(head["b2"])
    hd = (w1p.astype(_BF16), b1p, w2p.astype(_BF16), b2p)
    return c1 + c2 + hd


def _graph_operands(x, edge_attr, src, dst, batch, num_graphs):
    """Pad counts (lane dims -> 128, bf16 sublane dims -> 16) and build the
    tiny int32 index vectors + f32 mean normalisers (segment-sums, no dense
    matrices materialized in HBM)."""
    n, e = x.shape[0], src.shape[0]
    n_pad = _round_up(n, _LANE)            # lane dim of gsrc / pool
    e_pad = _round_up(e, _LANE)            # lane dim of a01
    g_pad = _round_up(num_graphs, _SUBLANE_BF16)

    src_p = jnp.full((e_pad, 1), -1, jnp.int32).at[:e, 0].set(src)
    dst_p = jnp.full((1, e_pad), -1, jnp.int32).at[0, :e].set(dst)
    bat_p = jnp.full((1, n_pad), -1, jnp.int32).at[0, :n].set(batch)

    deg = jnp.zeros((n_pad,), _F32).at[dst].add(1.0)
    inv_deg = (1.0 / jnp.maximum(deg, 1.0))[:, None]
    cnt = jnp.zeros((g_pad,), _F32).at[batch].add(1.0)
    inv_cnt = (1.0 / jnp.maximum(cnt, 1.0))[:, None]

    x_p = jnp.zeros((n_pad, x.shape[1]), _F32).at[:n].set(x)
    ea_p = jnp.zeros((e_pad, 1), _F32).at[:e].set(edge_attr)

    ops = (src_p, dst_p, bat_p, inv_deg, inv_cnt, x_p, ea_p)
    return ops, (n_pad, e_pad, g_pad)


def _vmem_budget_bytes(n_pad, e_pad, g_pad, f_in):
    """Size the VMEM limit from the actual footprint (dominant terms: in-kernel
    one-hot matrices + conv We temporaries), clamped to be safe on v7x."""
    struct = (2 * e_pad * n_pad + g_pad * n_pad) * 2                 # bf16 one-hots
    we = e_pad * 512 * 4 + e_pad * _round_up(f_in * 16, _LANE) * 4   # f32 We tiles
    acts = (e_pad + n_pad + g_pad) * _LANE * 4 * 4                   # misc activations
    params = 2 * 1024 * 1024
    est = 2 * (struct + we + acts + params)                          # headroom x2
    lo, hi = 16 * 1024 * 1024, 48 * 1024 * 1024                      # hi ok on v7x
    return int(min(max(est, lo), hi))


def net_forward(params, x, edge_index, edge_attr, batch, num_graphs,
                num_classes):
    num_features = x.shape[1]
    src, dst = edge_index[0], edge_index[1]
    graph_ops, (n_pad, e_pad, g_pad) = _graph_operands(
        x, edge_attr, src, dst, batch, num_graphs)
    weight_ops = _prep_params(params, num_features, num_classes)
    operands = graph_ops + weight_ops

    kernel = functools.partial(
        _net_kernel,
        (num_features, 16, 32, num_classes, n_pad, e_pad, g_pad))

    out = pl.pallas_call(
        kernel,
        out_shape=jax.ShapeDtypeStruct((g_pad, _LANE), _F32),
        in_specs=[pl.BlockSpec(memory_space=pltpu.MemorySpace.VMEM)
                  for _ in operands],
        out_specs=pl.BlockSpec(memory_space=pltpu.MemorySpace.VMEM),
        compiler_params=pltpu.CompilerParams(
            vmem_limit_bytes=_vmem_budget_bytes(n_pad, e_pad, g_pad,
                                                num_features)),
    )(*operands)
    return out[:num_graphs, :num_classes]


# ---------------------- pure-JAX reference (f32, same math) ----------------

def net_forward_ref(params, x, edge_index, edge_attr, batch, num_graphs):
    conv1, conv2, head = params
    src, dst = edge_index[0], edge_index[1]
    n = x.shape[0]

    def scatter_mean(vals, idx, size):
        summed = jnp.zeros((size, vals.shape[1]), _F32).at[idx].add(vals)
        cnt = jnp.zeros((size, 1), _F32).at[idx].add(1.0)
        return summed / jnp.maximum(cnt, 1.0)

    def layer(xv, p, in_ch, out_ch):
        xj = jnp.take(xv, src, axis=0)
        h1 = jnp.maximum(edge_attr @ p["w1"] + p["b1"], 0.0)
        we = (h1 @ p["w2"] + p["b2"]).reshape(-1, in_ch, out_ch)
        msg = jnp.einsum("ek,eko->eo", xj, we)
        return _elu(scatter_mean(msg, dst, n) + xv @ p["root"] + p["bias"])

    xv = layer(x, conv1, x.shape[1], 16)
    xv = layer(xv, conv2, 16, 32)
    pooled = scatter_mean(xv, batch, num_graphs)
    h = _elu(pooled @ head["w1"] + head["b1"])
    logits = h @ head["w2"] + head["b2"]
    return jax.nn.log_softmax(logits, axis=1)


# ----------------------------------- main -----------------------------------

if __name__ == "__main__":
    NUM_FEATURES, NUM_CLASSES = 4, 3
    N, E, G = 12, 24, 2

    key = jax.random.PRNGKey(0)
    kx, ks, kd, ke, kp = jax.random.split(key, 5)

    x = jax.random.normal(kx, (N, NUM_FEATURES), jnp.float32)
    src = jax.random.randint(ks, (E,), 0, N, jnp.int32)
    dst = jax.random.randint(kd, (E,), 0, N, jnp.int32)
    edge_index = jnp.stack([src, dst], axis=0)
    edge_attr = jax.random.uniform(ke, (E, 1), jnp.float32)
    batch = jnp.concatenate([jnp.zeros(N // 2, jnp.int32),
                             jnp.ones(N - N // 2, jnp.int32)])

    params = init_params(kp, NUM_FEATURES, NUM_CLASSES)

    out = net_forward(params, x, edge_index, edge_attr, batch, G, NUM_CLASSES)
    out = jax.block_until_ready(out)

    ref = net_forward_ref(params, x, edge_index, edge_attr, batch, G)
    assert out.shape == (G, NUM_CLASSES)
    max_diff = float(jnp.max(jnp.abs(out - ref)))
    # bf16 MXU operands (f32 accumulation) -> loosened tolerance vs f32 ref.
    assert max_diff < 0.1, f"mismatch vs reference: max|diff|={max_diff}"

    print("KERNEL_OK")
</pallas_src>

<mosaic_0001>
module attributes {stable_mosaic.version = 11 : i64} {
  func.func @_net_kernel(%arg0: memref<128x1xi32, #tpu.memory_space<vmem>>, %arg1: memref<1x128xi32, #tpu.memory_space<vmem>>, %arg2: memref<1x128xi32, #tpu.memory_space<vmem>>, %arg3: memref<128x1xf32, #tpu.memory_space<vmem>>, %arg4: memref<16x1xf32, #tpu.memory_space<vmem>>, %arg5: memref<128x4xf32, #tpu.memory_space<vmem>>, %arg6: memref<128x1xf32, #tpu.memory_space<vmem>>, %arg7: memref<1x10xf32, #tpu.memory_space<vmem>>, %arg8: memref<1x10xf32, #tpu.memory_space<vmem>>, %arg9: memref<10x128xbf16, #tpu.memory_space<vmem>>, %arg10: memref<1x128xf32, #tpu.memory_space<vmem>>, %arg11: memref<4x16xf32, #tpu.memory_space<vmem>>, %arg12: memref<1x16xf32, #tpu.memory_space<vmem>>, %arg13: memref<1x10xf32, #tpu.memory_space<vmem>>, %arg14: memref<1x10xf32, #tpu.memory_space<vmem>>, %arg15: memref<10x512xbf16, #tpu.memory_space<vmem>>, %arg16: memref<1x512xf32, #tpu.memory_space<vmem>>, %arg17: memref<16x32xf32, #tpu.memory_space<vmem>>, %arg18: memref<1x32xf32, #tpu.memory_space<vmem>>, %arg19: memref<32x128xbf16, #tpu.memory_space<vmem>>, %arg20: memref<1x128xf32, #tpu.memory_space<vmem>>, %arg21: memref<128x128xbf16, #tpu.memory_space<vmem>>, %arg22: memref<1x128xf32, #tpu.memory_space<vmem>>, %arg23: memref<16x128xf32, #tpu.memory_space<vmem>>) attributes {dimension_semantics = [], scalar_prefetch = 0 : i64, scratch_operands = 0 : i64, tpu.core_type = #tpu.core_type<tc>} {
    %c0 = arith.constant 0 : index
    %c0_0 = arith.constant 0 : index
    %0 = vector.load %arg0[%c0, %c0_0] : memref<128x1xi32, #tpu.memory_space<vmem>>, vector<128x1xi32>
    %c0_1 = arith.constant 0 : index
    %c0_2 = arith.constant 0 : index
    %1 = vector.load %arg1[%c0_1, %c0_2] : memref<1x128xi32, #tpu.memory_space<vmem>>, vector<1x128xi32>
    %c0_3 = arith.constant 0 : index
    %c0_4 = arith.constant 0 : index
    %2 = vector.load %arg2[%c0_3, %c0_4] : memref<1x128xi32, #tpu.memory_space<vmem>>, vector<1x128xi32>
    %3 = tpu.iota {dimensions = array<i32: 1>} : vector<128x128xi32>
    %4 = vector.broadcast %0 : vector<128x1xi32> to vector<128x128xi32>
    %5 = arith.cmpi eq, %3, %4 : vector<128x128xi32>
    %cst = arith.constant 1.000000e+00 : f32
    %cst_5 = arith.constant 0.000000e+00 : f32
    %6 = vector.broadcast %cst : f32 to vector<128x128xf32>
    %7 = vector.broadcast %cst_5 : f32 to vector<128x128xf32>
    %8 = arith.select %5, %6, %7 : vector<128x128xi1>, vector<128x128xf32>
    %9 = arith.truncf %8 : vector<128x128xf32> to vector<128x128xbf16>
    %10 = tpu.iota {dimensions = array<i32: 0>} : vector<128x128xi32>
    %11 = vector.broadcast %1 : vector<1x128xi32> to vector<128x128xi32>
    %12 = arith.cmpi eq, %10, %11 : vector<128x128xi32>
    %cst_6 = arith.constant 1.000000e+00 : f32
    %cst_7 = arith.constant 0.000000e+00 : f32
    %13 = vector.broadcast %cst_6 : f32 to vector<128x128xf32>
    %14 = vector.broadcast %cst_7 : f32 to vector<128x128xf32>
    %15 = arith.select %12, %13, %14 : vector<128x128xi1>, vector<128x128xf32>
    %16 = arith.truncf %15 : vector<128x128xf32> to vector<128x128xbf16>
    %17 = tpu.iota {dimensions = array<i32: 0>} : vector<16x128xi32>
    %18 = vector.broadcast %2 : vector<1x128xi32> to vector<16x128xi32>
    %19 = arith.cmpi eq, %17, %18 : vector<16x128xi32>
    %cst_8 = arith.constant 1.000000e+00 : f32
    %cst_9 = arith.constant 0.000000e+00 : f32
    %20 = vector.broadcast %cst_8 : f32 to vector<16x128xf32>
    %21 = vector.broadcast %cst_9 : f32 to vector<16x128xf32>
    %22 = arith.select %19, %20, %21 : vector<16x128xi1>, vector<16x128xf32>
    %23 = arith.truncf %22 : vector<16x128xf32> to vector<16x128xbf16>
    %c0_10 = arith.constant 0 : index
    %c0_11 = arith.constant 0 : index
    %24 = vector.load %arg3[%c0_10, %c0_11] : memref<128x1xf32, #tpu.memory_space<vmem>>, vector<128x1xf32>
    %c0_12 = arith.constant 0 : index
    %c0_13 = arith.constant 0 : index
    %25 = vector.load %arg4[%c0_12, %c0_13] : memref<16x1xf32, #tpu.memory_space<vmem>>, vector<16x1xf32>
    %c0_14 = arith.constant 0 : index
    %c0_15 = arith.constant 0 : index
    %26 = vector.load %arg6[%c0_14, %c0_15] : memref<128x1xf32, #tpu.memory_space<vmem>>, vector<128x1xf32>
    %c0_16 = arith.constant 0 : index
    %c0_17 = arith.constant 0 : index
    %27 = vector.load %arg5[%c0_16, %c0_17] : memref<128x4xf32, #tpu.memory_space<vmem>>, vector<128x4xf32>
    %28 = arith.truncf %27 : vector<128x4xf32> to vector<128x4xbf16>
    %cst_18 = arith.constant dense<0.000000e+00> : vector<128x4xf32>
    %29 = tpu.matmul %9, %28, %cst_18 {dimension_numbers = #tpu.dot_dimension_numbers<[1], [0], [0], [1], [0, 0, 1, 1], [], []>} : vector<128x128xbf16>, vector<128x4xbf16>, vector<128x4xf32> -> vector<128x4xf32>
    %c0_19 = arith.constant 0 : index
    %c0_20 = arith.constant 0 : index
    %30 = vector.load %arg7[%c0_19, %c0_20] : memref<1x10xf32, #tpu.memory_space<vmem>>, vector<1x10xf32>
    %31 = vector.broadcast %26 : vector<128x1xf32> to vector<128x10xf32>
    %32 = vector.broadcast %30 : vector<1x10xf32> to vector<128x10xf32>
    %33 = arith.mulf %31, %32 : vector<128x10xf32>
    %c0_21 = arith.constant 0 : index
    %c0_22 = arith.constant 0 : index
    %34 = vector.load %arg8[%c0_21, %c0_22] : memref<1x10xf32, #tpu.memory_space<vmem>>, vector<1x10xf32>
    %35 = vector.broadcast %34 : vector<1x10xf32> to vector<128x10xf32>
    %36 = arith.addf %33, %35 : vector<128x10xf32>
    %cst_23 = arith.constant 0.000000e+00 : f32
    %37 = vector.broadcast %cst_23 : f32 to vector<128x10xf32>
    %38 = arith.maximumf %36, %37 : vector<128x10xf32>
    %39 = arith.truncf %38 : vector<128x10xf32> to vector<128x10xbf16>
    %c0_24 = arith.constant 0 : index
    %c0_25 = arith.constant 0 : index
    %40 = vector.load %arg9[%c0_24, %c0_25] : memref<10x128xbf16, #tpu.memory_space<vmem>>, vector<10x128xbf16>
    %cst_26 = arith.constant dense<0.000000e+00> : vector<128x128xf32>
    %41 = tpu.matmul %39, %40, %cst_26 {dimension_numbers = #tpu.dot_dimension_numbers<[1], [0], [0], [1], [0, 0, 1, 1], [], []>} : vector<128x10xbf16>, vector<10x128xbf16>, vector<128x128xf32> -> vector<128x128xf32>
    %c0_27 = arith.constant 0 : index
    %c0_28 = arith.constant 0 : index
    %42 = vector.load %arg10[%c0_27, %c0_28] : memref<1x128xf32, #tpu.memory_space<vmem>>, vector<1x128xf32>
    %43 = vector.broadcast %42 : vector<1x128xf32> to vector<128x128xf32>
    %44 = arith.addf %41, %43 : vector<128x128xf32>
    %45 = vector.extract_strided_slice %29 {offsets = [0, 0], sizes = [128, 1], strides = [1, 1]} : vector<128x4xf32> to vector<128x1xf32>
    %46 = vector.extract_strided_slice %44 {offsets = [0, 0], sizes = [128, 16], strides = [1, 1]} : vector<128x128xf32> to vector<128x16xf32>
    %47 = vector.broadcast %45 : vector<128x1xf32> to vector<128x16xf32>
    %48 = arith.mulf %47, %46 : vector<128x16xf32>
    %49 = vector.extract_strided_slice %29 {offsets = [0, 1], sizes = [128, 1], strides = [1, 1]} : vector<128x4xf32> to vector<128x1xf32>
    %50 = vector.extract_strided_slice %44 {offsets = [0, 16], sizes = [128, 16], strides = [1, 1]} : vector<128x128xf32> to vector<128x16xf32>
    %51 = vector.broadcast %49 : vector<128x1xf32> to vector<128x16xf32>
    %52 = arith.mulf %51, %50 : vector<128x16xf32>
    %53 = vector.extract_strided_slice %29 {offsets = [0, 2], sizes = [128, 1], strides = [1, 1]} : vector<128x4xf32> to vector<128x1xf32>
    %54 = vector.extract_strided_slice %44 {offsets = [0, 32], sizes = [128, 16], strides = [1, 1]} : vector<128x128xf32> to vector<128x16xf32>
    %55 = vector.broadcast %53 : vector<128x1xf32> to vector<128x16xf32>
    %56 = arith.mulf %55, %54 : vector<128x16xf32>
    %57 = vector.extract_strided_slice %29 {offsets = [0, 3], sizes = [128, 1], strides = [1, 1]} : vector<128x4xf32> to vector<128x1xf32>
    %58 = vector.extract_strided_slice %44 {offsets = [0, 48], sizes = [128, 16], strides = [1, 1]} : vector<128x128xf32> to vector<128x16xf32>
    %59 = vector.broadcast %57 : vector<128x1xf32> to vector<128x16xf32>
    %60 = arith.mulf %59, %58 : vector<128x16xf32>
    %61 = arith.addf %48, %52 : vector<128x16xf32>
    %62 = arith.addf %56, %60 : vector<128x16xf32>
    %63 = arith.addf %61, %62 : vector<128x16xf32>
    %64 = arith.truncf %63 : vector<128x16xf32> to vector<128x16xbf16>
    %cst_29 = arith.constant dense<0.000000e+00> : vector<128x16xf32>
    %65 = tpu.matmul %16, %64, %cst_29 {dimension_numbers = #tpu.dot_dimension_numbers<[1], [0], [0], [1], [0, 0, 1, 1], [], []>} : vector<128x128xbf16>, vector<128x16xbf16>, vector<128x16xf32> -> vector<128x16xf32>
    %66 = vector.broadcast %24 : vector<128x1xf32> to vector<128x16xf32>
    %67 = arith.mulf %65, %66 : vector<128x16xf32>
    %c0_30 = arith.constant 0 : index
    %c0_31 = arith.constant 0 : index
    %68 = vector.load %arg11[%c0_30, %c0_31] : memref<4x16xf32, #tpu.memory_space<vmem>>, vector<4x16xf32>
    %cst_32 = arith.constant dense<0.000000e+00> : vector<128x16xf32>
    %69 = tpu.matmul %27, %68, %cst_32 {dimension_numbers = #tpu.dot_dimension_numbers<[1], [0], [0], [1], [0, 0, 1, 1], [], []>} : vector<128x4xf32>, vector<4x16xf32>, vector<128x16xf32> -> vector<128x16xf32>
    %70 = arith.addf %67, %69 : vector<128x16xf32>
    %c0_33 = arith.constant 0 : index
    %c0_34 = arith.constant 0 : index
    %71 = vector.load %arg12[%c0_33, %c0_34] : memref<1x16xf32, #tpu.memory_space<vmem>>, vector<1x16xf32>
    %72 = vector.broadcast %71 : vector<1x16xf32> to vector<128x16xf32>
    %73 = arith.addf %70, %72 : vector<128x16xf32>
    %cst_35 = arith.constant 0.000000e+00 : f32
    %74 = vector.broadcast %cst_35 : f32 to vector<128x16xf32>
    %75 = arith.cmpf ogt, %73, %74 : vector<128x16xf32>
    %cst_36 = arith.constant 0.000000e+00 : f32
    %76 = vector.broadcast %cst_36 : f32 to vector<128x16xf32>
    %77 = arith.minimumf %73, %76 : vector<128x16xf32>
    %78 = math.exp %77 : vector<128x16xf32>
    %cst_37 = arith.constant 1.000000e+00 : f32
    %79 = vector.broadcast %cst_37 : f32 to vector<128x16xf32>
    %80 = arith.subf %78, %79 : vector<128x16xf32>
    %81 = arith.select %75, %73, %80 : vector<128x16xi1>, vector<128x16xf32>
    %82 = arith.truncf %81 : vector<128x16xf32> to vector<128x16xbf16>
    %cst_38 = arith.constant dense<0.000000e+00> : vector<128x16xf32>
    %83 = tpu.matmul %9, %82, %cst_38 {dimension_numbers = #tpu.dot_dimension_numbers<[1], [0], [0], [1], [0, 0, 1, 1], [], []>} : vector<128x128xbf16>, vector<128x16xbf16>, vector<128x16xf32> -> vector<128x16xf32>
    %c0_39 = arith.constant 0 : index
    %c0_40 = arith.constant 0 : index
    %84 = vector.load %arg13[%c0_39, %c0_40] : memref<1x10xf32, #tpu.memory_space<vmem>>, vector<1x10xf32>
    %85 = vector.broadcast %26 : vector<128x1xf32> to vector<128x10xf32>
    %86 = vector.broadcast %84 : vector<1x10xf32> to vector<128x10xf32>
    %87 = arith.mulf %85, %86 : vector<128x10xf32>
    %c0_41 = arith.constant 0 : index
    %c0_42 = arith.constant 0 : index
    %88 = vector.load %arg14[%c0_41, %c0_42] : memref<1x10xf32, #tpu.memory_space<vmem>>, vector<1x10xf32>
    %89 = vector.broadcast %88 : vector<1x10xf32> to vector<128x10xf32>
    %90 = arith.addf %87, %89 : vector<128x10xf32>
    %cst_43 = arith.constant 0.000000e+00 : f32
    %91 = vector.broadcast %cst_43 : f32 to vector<128x10xf32>
    %92 = arith.maximumf %90, %91 : vector<128x10xf32>
    %93 = arith.truncf %92 : vector<128x10xf32> to vector<128x10xbf16>
    %c0_44 = arith.constant 0 : index
    %c0_45 = arith.constant 0 : index
    %94 = vector.load %arg15[%c0_44, %c0_45] : memref<10x512xbf16, #tpu.memory_space<vmem>>, vector<10x512xbf16>
    %cst_46 = arith.constant dense<0.000000e+00> : vector<128x512xf32>
    %95 = tpu.matmul %93, %94, %cst_46 {dimension_numbers = #tpu.dot_dimension_numbers<[1], [0], [0], [1], [0, 0, 1, 1], [], []>} : vector<128x10xbf16>, vector<10x512xbf16>, vector<128x512xf32> -> vector<128x512xf32>
    %c0_47 = arith.constant 0 : index
    %c0_48 = arith.constant 0 : index
    %96 = vector.load %arg16[%c0_47, %c0_48] : memref<1x512xf32, #tpu.memory_space<vmem>>, vector<1x512xf32>
    %97 = vector.broadcast %96 : vector<1x512xf32> to vector<128x512xf32>
    %98 = arith.addf %95, %97 : vector<128x512xf32>
    %99 = vector.extract_strided_slice %83 {offsets = [0, 0], sizes = [128, 1], strides = [1, 1]} : vector<128x16xf32> to vector<128x1xf32>
    %100 = vector.extract_strided_slice %98 {offsets = [0, 0], sizes = [128, 32], strides = [1, 1]} : vector<128x512xf32> to vector<128x32xf32>
    %101 = vector.broadcast %99 : vector<128x1xf32> to vector<128x32xf32>
    %102 = arith.mulf %101, %100 : vector<128x32xf32>
    %103 = vector.extract_strided_slice %83 {offsets = [0, 1], sizes = [128, 1], strides = [1, 1]} : vector<128x16xf32> to vector<128x1xf32>
    %104 = vector.extract_strided_slice %98 {offsets = [0, 32], sizes = [128, 32], strides = [1, 1]} : vector<128x512xf32> to vector<128x32xf32>
    %105 = vector.broadcast %103 : vector<128x1xf32> to vector<128x32xf32>
    %106 = arith.mulf %105, %104 : vector<128x32xf32>
    %107 = vector.extract_strided_slice %83 {offsets = [0, 2], sizes = [128, 1], strides = [1, 1]} : vector<128x16xf32> to vector<128x1xf32>
    %108 = vector.extract_strided_slice %98 {offsets = [0, 64], sizes = [128, 32], strides = [1, 1]} : vector<128x512xf32> to vector<128x32xf32>
    %109 = vector.broadcast %107 : vector<128x1xf32> to vector<128x32xf32>
    %110 = arith.mulf %109, %108 : vector<128x32xf32>
    %111 = vector.extract_strided_slice %83 {offsets = [0, 3], sizes = [128, 1], strides = [1, 1]} : vector<128x16xf32> to vector<128x1xf32>
    %112 = vector.extract_strided_slice %98 {offsets = [0, 96], sizes = [128, 32], strides = [1, 1]} : vector<128x512xf32> to vector<128x32xf32>
    %113 = vector.broadcast %111 : vector<128x1xf32> to vector<128x32xf32>
    %114 = arith.mulf %113, %112 : vector<128x32xf32>
    %115 = vector.extract_strided_slice %83 {offsets = [0, 4], sizes = [128, 1], strides = [1, 1]} : vector<128x16xf32> to vector<128x1xf32>
    %116 = vector.extract_strided_slice %98 {offsets = [0, 128], sizes = [128, 32], strides = [1, 1]} : vector<128x512xf32> to vector<128x32xf32>
    %117 = vector.broadcast %115 : vector<128x1xf32> to vector<128x32xf32>
    %118 = arith.mulf %117, %116 : vector<128x32xf32>
    %119 = vector.extract_strided_slice %83 {offsets = [0, 5], sizes = [128, 1], strides = [1, 1]} : vector<128x16xf32> to vector<128x1xf32>
    %120 = vector.extract_strided_slice %98 {offsets = [0, 160], sizes = [128, 32], strides = [1, 1]} : vector<128x512xf32> to vector<128x32xf32>
    %121 = vector.broadcast %119 : vector<128x1xf32> to vector<128x32xf32>
    %122 = arith.mulf %121, %120 : vector<128x32xf32>
    %123 = vector.extract_strided_slice %83 {offsets = [0, 6], sizes = [128, 1], strides = [1, 1]} : vector<128x16xf32> to vector<128x1xf32>
    %124 = vector.extract_strided_slice %98 {offsets = [0, 192], sizes = [128, 32], strides = [1, 1]} : vector<128x512xf32> to vector<128x32xf32>
    %125 = vector.broadcast %123 : vector<128x1xf32> to vector<128x32xf32>
    %126 = arith.mulf %125, %124 : vector<128x32xf32>
    %127 = vector.extract_strided_slice %83 {offsets = [0, 7], sizes = [128, 1], strides = [1, 1]} : vector<128x16xf32> to vector<128x1xf32>
    %128 = vector.extract_strided_slice %98 {offsets = [0, 224], sizes = [128, 32], strides = [1, 1]} : vector<128x512xf32> to vector<128x32xf32>
    %129 = vector.broadcast %127 : vector<128x1xf32> to vector<128x32xf32>
    %130 = arith.mulf %129, %128 : vector<128x32xf32>
    %131 = vector.extract_strided_slice %83 {offsets = [0, 8], sizes = [128, 1], strides = [1, 1]} : vector<128x16xf32> to vector<128x1xf32>
    %132 = vector.extract_strided_slice %98 {offsets = [0, 256], sizes = [128, 32], strides = [1, 1]} : vector<128x512xf32> to vector<128x32xf32>
    %133 = vector.broadcast %131 : vector<128x1xf32> to vector<128x32xf32>
    %134 = arith.mulf %133, %132 : vector<128x32xf32>
    %135 = vector.extract_strided_slice %83 {offsets = [0, 9], sizes = [128, 1], strides = [1, 1]} : vector<128x16xf32> to vector<128x1xf32>
    %136 = vector.extract_strided_slice %98 {offsets = [0, 288], sizes = [128, 32], strides = [1, 1]} : vector<128x512xf32> to vector<128x32xf32>
    %137 = vector.broadcast %135 : vector<128x1xf32> to vector<128x32xf32>
    %138 = arith.mulf %137, %136 : vector<128x32xf32>
    %139 = vector.extract_strided_slice %83 {offsets = [0, 10], sizes = [128, 1], strides = [1, 1]} : vector<128x16xf32> to vector<128x1xf32>
    %140 = vector.extract_strided_slice %98 {offsets = [0, 320], sizes = [128, 32], strides = [1, 1]} : vector<128x512xf32> to vector<128x32xf32>
    %141 = vector.broadcast %139 : vector<128x1xf32> to vector<128x32xf32>
    %142 = arith.mulf %141, %140 : vector<128x32xf32>
    %143 = vector.extract_strided_slice %83 {offsets = [0, 11], sizes = [128, 1], strides = [1, 1]} : vector<128x16xf32> to vector<128x1xf32>
    %144 = vector.extract_strided_slice %98 {offsets = [0, 352], sizes = [128, 32], strides = [1, 1]} : vector<128x512xf32> to vector<128x32xf32>
    %145 = vector.broadcast %143 : vector<128x1xf32> to vector<128x32xf32>
    %146 = arith.mulf %145, %144 : vector<128x32xf32>
    %147 = vector.extract_strided_slice %83 {offsets = [0, 12], sizes = [128, 1], strides = [1, 1]} : vector<128x16xf32> to vector<128x1xf32>
    %148 = vector.extract_strided_slice %98 {offsets = [0, 384], sizes = [128, 32], strides = [1, 1]} : vector<128x512xf32> to vector<128x32xf32>
    %149 = vector.broadcast %147 : vector<128x1xf32> to vector<128x32xf32>
    %150 = arith.mulf %149, %148 : vector<128x32xf32>
    %151 = vector.extract_strided_slice %83 {offsets = [0, 13], sizes = [128, 1], strides = [1, 1]} : vector<128x16xf32> to vector<128x1xf32>
    %152 = vector.extract_strided_slice %98 {offsets = [0, 416], sizes = [128, 32], strides = [1, 1]} : vector<128x512xf32> to vector<128x32xf32>
    %153 = vector.broadcast %151 : vector<128x1xf32> to vector<128x32xf32>
    %154 = arith.mulf %153, %152 : vector<128x32xf32>
    %155 = vector.extract_strided_slice %83 {offsets = [0, 14], sizes = [128, 1], strides = [1, 1]} : vector<128x16xf32> to vector<128x1xf32>
    %156 = vector.extract_strided_slice %98 {offsets = [0, 448], sizes = [128, 32], strides = [1, 1]} : vector<128x512xf32> to vector<128x32xf32>
    %157 = vector.broadcast %155 : vector<128x1xf32> to vector<128x32xf32>
    %158 = arith.mulf %157, %156 : vector<128x32xf32>
    %159 = vector.extract_strided_slice %83 {offsets = [0, 15], sizes = [128, 1], strides = [1, 1]} : vector<128x16xf32> to vector<128x1xf32>
    %160 = vector.extract_strided_slice %98 {offsets = [0, 480], sizes = [128, 32], strides = [1, 1]} : vector<128x512xf32> to vector<128x32xf32>
    %161 = vector.broadcast %159 : vector<128x1xf32> to vector<128x32xf32>
    %162 = arith.mulf %161, %160 : vector<128x32xf32>
    %163 = arith.addf %102, %106 : vector<128x32xf32>
    %164 = arith.addf %110, %114 : vector<128x32xf32>
    %165 = arith.addf %118, %122 : vector<128x32xf32>
    %166 = arith.addf %126, %130 : vector<128x32xf32>
    %167 = arith.addf %134, %138 : vector<128x32xf32>
    %168 = arith.addf %142, %146 : vector<128x32xf32>
    %169 = arith.addf %150, %154 : vector<128x32xf32>
    %170 = arith.addf %158, %162 : vector<128x32xf32>
    %171 = arith.addf %163, %164 : vector<128x32xf32>
    %172 = arith.addf %165, %166 : vector<128x32xf32>
    %173 = arith.addf %167, %168 : vector<128x32xf32>
    %174 = arith.addf %169, %170 : vector<128x32xf32>
    %175 = arith.addf %171, %172 : vector<128x32xf32>
    %176 = arith.addf %173, %174 : vector<128x32xf32>
    %177 = arith.addf %175, %176 : vector<128x32xf32>
    %178 = arith.truncf %177 : vector<128x32xf32> to vector<128x32xbf16>
    %cst_49 = arith.constant dense<0.000000e+00> : vector<128x32xf32>
    %179 = tpu.matmul %16, %178, %cst_49 {dimension_numbers = #tpu.dot_dimension_numbers<[1], [0], [0], [1], [0, 0, 1, 1], [], []>} : vector<128x128xbf16>, vector<128x32xbf16>, vector<128x32xf32> -> vector<128x32xf32>
    %180 = vector.broadcast %24 : vector<128x1xf32> to vector<128x32xf32>
    %181 = arith.mulf %179, %180 : vector<128x32xf32>
    %c0_50 = arith.constant 0 : index
    %c0_51 = arith.constant 0 : index
    %182 = vector.load %arg17[%c0_50, %c0_51] : memref<16x32xf32, #tpu.memory_space<vmem>>, vector<16x32xf32>
    %cst_52 = arith.constant dense<0.000000e+00> : vector<128x32xf32>
    %183 = tpu.matmul %81, %182, %cst_52 {dimension_numbers = #tpu.dot_dimension_numbers<[1], [0], [0], [1], [0, 0, 1, 1], [], []>} : vector<128x16xf32>, vector<16x32xf32>, vector<128x32xf32> -> vector<128x32xf32>
    %184 = arith.addf %181, %183 : vector<128x32xf32>
    %c0_53 = arith.constant 0 : index
    %c0_54 = arith.constant 0 : index
    %185 = vector.load %arg18[%c0_53, %c0_54] : memref<1x32xf32, #tpu.memory_space<vmem>>, vector<1x32xf32>
    %186 = vector.broadcast %185 : vector<1x32xf32> to vector<128x32xf32>
    %187 = arith.addf %184, %186 : vector<128x32xf32>
    %cst_55 = arith.constant 0.000000e+00 : f32
    %188 = vector.broadcast %cst_55 : f32 to vector<128x32xf32>
    %189 = arith.cmpf ogt, %187, %188 : vector<128x32xf32>
    %cst_56 = arith.constant 0.000000e+00 : f32
    %190 = vector.broadcast %cst_56 : f32 to vector<128x32xf32>
    %191 = arith.minimumf %187, %190 : vector<128x32xf32>
    %192 = math.exp %191 : vector<128x32xf32>
    %cst_57 = arith.constant 1.000000e+00 : f32
    %193 = vector.broadcast %cst_57 : f32 to vector<128x32xf32>
    %194 = arith.subf %192, %193 : vector<128x32xf32>
    %195 = arith.select %189, %187, %194 : vector<128x32xi1>, vector<128x32xf32>
    %196 = arith.truncf %195 : vector<128x32xf32> to vector<128x32xbf16>
    %cst_58 = arith.constant dense<0.000000e+00> : vector<16x32xf32>
    %197 = tpu.matmul %23, %196, %cst_58 {dimension_numbers = #tpu.dot_dimension_numbers<[1], [0], [0], [1], [0, 0, 1, 1], [], []>} : vector<16x128xbf16>, vector<128x32xbf16>, vector<16x32xf32> -> vector<16x32xf32>
    %198 = vector.broadcast %25 : vector<16x1xf32> to vector<16x32xf32>
    %199 = arith.mulf %197, %198 : vector<16x32xf32>
    %200 = arith.truncf %199 : vector<16x32xf32> to vector<16x32xbf16>
    %c0_59 = arith.constant 0 : index
    %c0_60 = arith.constant 0 : index
    %201 = vector.load %arg19[%c0_59, %c0_60] : memref<32x128xbf16, #tpu.memory_space<vmem>>, vector<32x128xbf16>
    %cst_61 = arith.constant dense<0.000000e+00> : vector<16x128xf32>
    %202 = tpu.matmul %200, %201, %cst_61 {dimension_numbers = #tpu.dot_dimension_numbers<[1], [0], [0], [1], [0, 0, 1, 1], [], []>} : vector<16x32xbf16>, vector<32x128xbf16>, vector<16x128xf32> -> vector<16x128xf32>
    %c0_62 = arith.constant 0 : index
    %c0_63 = arith.constant 0 : index
    %203 = vector.load %arg20[%c0_62, %c0_63] : memref<1x128xf32, #tpu.memory_space<vmem>>, vector<1x128xf32>
    %204 = vector.broadcast %203 : vector<1x128xf32> to vector<16x128xf32>
    %205 = arith.addf %202, %204 : vector<16x128xf32>
    %cst_64 = arith.constant 0.000000e+00 : f32
    %206 = vector.broadcast %cst_64 : f32 to vector<16x128xf32>
    %207 = arith.cmpf ogt, %205, %206 : vector<16x128xf32>
    %cst_65 = arith.constant 0.000000e+00 : f32
    %208 = vector.broadcast %cst_65 : f32 to vector<16x128xf32>
    %209 = arith.minimumf %205, %208 : vector<16x128xf32>
    %210 = math.exp %209 : vector<16x128xf32>
    %cst_66 = arith.constant 1.000000e+00 : f32
    %211 = vector.broadcast %cst_66 : f32 to vector<16x128xf32>
    %212 = arith.subf %210, %211 : vector<16x128xf32>
    %213 = arith.select %207, %205, %212 : vector<16x128xi1>, vector<16x128xf32>
    %214 = arith.truncf %213 : vector<16x128xf32> to vector<16x128xbf16>
    %c0_67 = arith.constant 0 : index
    %c0_68 = arith.constant 0 : index
    %215 = vector.load %arg21[%c0_67, %c0_68] : memref<128x128xbf16, #tpu.memory_space<vmem>>, vector<128x128xbf16>
    %cst_69 = arith.constant dense<0.000000e+00> : vector<16x128xf32>
    %216 = tpu.matmul %214, %215, %cst_69 {dimension_numbers = #tpu.dot_dimension_numbers<[1], [0], [0], [1], [0, 0, 1, 1], [], []>} : vector<16x128xbf16>, vector<128x128xbf16>, vector<16x128xf32> -> vector<16x128xf32>
    %c0_70 = arith.constant 0 : index
    %c0_71 = arith.constant 0 : index
    %217 = vector.load %arg22[%c0_70, %c0_71] : memref<1x128xf32, #tpu.memory_space<vmem>>, vector<1x128xf32>
    %218 = vector.broadcast %217 : vector<1x128xf32> to vector<16x128xf32>
    %219 = arith.addf %216, %218 : vector<16x128xf32>
    %220 = tpu.iota {dimensions = array<i32: 1>} : vector<16x128xi32>
    %c3_i32 = arith.constant 3 : i32
    %221 = vector.broadcast %c3_i32 : i32 to vector<16x128xi32>
    %222 = arith.cmpi slt, %220, %221 : vector<16x128xi32>
    %cst_72 = arith.constant -1.000000e+30 : f32
    %223 = vector.broadcast %cst_72 : f32 to vector<16x128xf32>
    %224 = arith.select %222, %219, %223 : vector<16x128xi1>, vector<16x128xf32>
    %cst_73 = arith.constant dense<0xFF800000> : vector<16xf32>
    %225 = vector.multi_reduction <maximumf>, %224, %cst_73 [1] : vector<16x128xf32> to vector<16xf32>
    %226 = vector.shape_cast %225 : vector<16xf32> to vector<16x1xf32>
    %227 = vector.broadcast %226 : vector<16x1xf32> to vector<16x128xf32>
    %228 = arith.subf %224, %227 : vector<16x128xf32>
    %229 = math.exp %228 : vector<16x128xf32>
    %cst_74 = arith.constant dense<0.000000e+00> : vector<16xf32>
    %230 = vector.multi_reduction <add>, %229, %cst_74 [1] : vector<16x128xf32> to vector<16xf32>
    %231 = vector.shape_cast %230 : vector<16xf32> to vector<16x1xf32>
    %232 = math.log %231 : vector<16x1xf32>
    %233 = arith.addf %232, %226 : vector<16x1xf32>
    %234 = vector.broadcast %233 : vector<16x1xf32> to vector<16x128xf32>
    %235 = arith.subf %224, %234 : vector<16x128xf32>
    %c0_75 = arith.constant 0 : index
    %c0_76 = arith.constant 0 : index
    %236 = vector.load %arg23[%c0_75, %c0_76] : memref<16x128xf32, #tpu.memory_space<vmem>>, vector<16x128xf32>
    tpu.vector_store %arg23[%c0_75, %c0_76], %235 {strides = array<i32>} : memref<16x128xf32, #tpu.memory_space<vmem>>, vector<16x128xf32>,
    return
  }
}

</mosaic_0001>

<bundles_post_ra>
// kernel: tpu_custom_call.1
= control target key start
LH: loop header
LB: loop body
LE: loop exit
PB: predicated region body
PF: predicated region fallthrough
CT: control target
= control target key end

     0   :  { %s10603_s0 = inlined_call_operand.vmem [shape: s32[128,1], index: 0, kind: input, shape index: {}]   ;;  %s10604_s1 = inlined_call_operand.vmem [shape: s32[1,128], index: 1, kind: input, shape index: {}]   ;;  %s10605_s2 = inlined_call_operand.vmem [shape: s32[1,128], index: 2, kind: input, shape index: {}]   ;;  %s10606_s3 = inlined_call_operand.vmem [shape: f32[128,1], index: 3, kind: input, shape index: {}]   ;;  %s10607_s4 = inlined_call_operand.vmem [shape: f32[16,1], index: 4, kind: input, shape index: {}]   ;;  %s10608_s5 = inlined_call_operand.vmem [shape: f32[128,4], index: 5, kind: input, shape index: {}]   ;;  %s10609_s6 = inlined_call_operand.vmem [shape: f32[128,1], index: 6, kind: input, shape index: {}]   ;;  %s10610_s7 = inlined_call_operand.vmem [shape: f32[1,10], index: 7, kind: input, shape index: {}]   ;;  %s10611_s8 = inlined_call_operand.vmem [shape: f32[1,10], index: 8, kind: input, shape index: {}]   ;;  %s10612_s9 = inlined_call_operand.vmem [shape: bf16[10,128], index: 9, kind: input, shape index: {}]   ;;  %s10613_s10 = inlined_call_operand.vmem [shape: f32[1,128], index: 10, kind: input, shape index: {}]   ;;  %s10614_s11 = inlined_call_operand.vmem [shape: f32[4,16], index: 11, kind: input, shape index: {}]   ;;  %s10615_s12 = inlined_call_operand.vmem [shape: f32[1,16], index: 12, kind: input, shape index: {}]   ;;  %s10616_s13 = inlined_call_operand.vmem [shape: f32[1,10], index: 13, kind: input, shape index: {}]   ;;  %s10617_s14 = inlined_call_operand.vmem [shape: f32[1,10], index: 14, kind: input, shape index: {}]   ;;  %s10618_s15 = inlined_call_operand.vmem [shape: bf16[10,512], index: 15, kind: input, shape index: {}]   ;;  %s10619_s16 = inlined_call_operand.vmem [shape: f32[1,512], index: 16, kind: input, shape index: {}]   ;;  %s10620_s17 = inlined_call_operand.vmem [shape: f32[16,32], index: 17, kind: input, shape index: {}]   ;;  %s10621_s18 = inlined_call_operand.vmem [shape: f32[1,32], index: 18, kind: input, shape index: {}]   ;;  %s10622_s19 = inlined_call_operand.vmem [shape: bf16[32,128], index: 19, kind: input, shape index: {}]   ;;  %s10623_s20 = inlined_call_operand.vmem [shape: f32[1,128], index: 20, kind: input, shape index: {}]   ;;  %s10624_s21 = inlined_call_operand.vmem [shape: bf16[128,128], index: 21, kind: input, shape index: {}]   ;;  %s10625_s22 = inlined_call_operand.vmem [shape: f32[1,128], index: 22, kind: input, shape index: {}]   ;;  %s10626_s23 = inlined_call_operand.hbm [shape: f32[16,128], index: 23, kind: output, shape index: {}]  }
   0x1   :  { %10824 = sst [smem:[#allocation282_spill]] %s10603_s0 }
   0x2   :  { %10825 = sst [smem:[#allocation283_spill]] %s10604_s1 }
   0x3   :  { %10826 = sst [smem:[#allocation284_spill]] %s10605_s2 }
   0x4   :  { %10827 = sst [smem:[#allocation285_spill]] %s10606_s3 }
   0x5   :  { %10828 = sst [smem:[#allocation286_spill]] %s10607_s4 }
   0x6   :  { %10829 = sst [smem:[#allocation287_spill]] %s10608_s5 }
   0x7   :  { %10830 = sst [smem:[#allocation288_spill]] %s10609_s6 }
   0x8   :  { %10831 = sst [smem:[#allocation289_spill]] %s10610_s7 }
   0x9   :  { %s10832_s24 = sld [smem:[#allocation282_spill]]  ;;  %v10636_v2 = vmov 0   ;;  %s10833_s27 = sld [smem:[#allocation287_spill]] }
   0xa   :  { %5937 = vset.pattern.permute.xlu1 %v10636_v2  ;;  %5936 = vset.pattern.permute.xlu0 %v10636_v2 }
   0xf   :  { %v78_v0 = vld [vmem:[%s10832_s24 + $0x10] sm:$0xff]  ;;  %v76_v1 = vld [vmem:[%s10832_s24] sm:$0xff]  ;;  %v79_v3 = vld [vmem:[%s10832_s24 + $0x18] sm:$0xff] }
  0x10   :  { %103 = vperm.xlu1 %5937, %v78_v0   ;;  %97 = vperm.xlu0 %5936, %v76_v1   ;;  %v77_v4 = vld [vmem:[%s10832_s24 + $0x8] sm:$0xff]  ;;  %v80_v6 = vld [vmem:[%s10832_s24 + $0x20] sm:$0xff]  ;;  %v83_v7 = vld [vmem:[%s10832_s24 + $0x38] sm:$0xff] }
  0x11   :  { %v81_v5 = vld [vmem:[%s10832_s24 + $0x28] sm:$0xff]  ;;  %v82_v8 = vld [vmem:[%s10832_s24 + $0x30] sm:$0xff]  ;;  %v84_v10 = vld [vmem:[%s10832_s24 + $0x40] sm:$0xff] }
  0x12   :  { %v85_v9 = vld [vmem:[%s10832_s24 + $0x48] sm:$0xff]  ;;  %v6546_v11 = vld [vmem:[%s10833_s27] sm:$0xff]  ;;  %v6556_v13 = vld [vmem:[%s10833_s27 + $0x10] sm:$0xff] }
  0x13   :  { %v6551_v12 = vld [vmem:[%s10833_s27 + $0x8] sm:$0xff]  ;;  %v6563_v15 = vld [vmem:[%s10833_s27 + $0x18] sm:$0xff]  ;;  %v6570_v17 = vld [vmem:[%s10833_s27 + $0x20] sm:$0xff] }
  0x14   :  { %106 = vperm.xlu1 %5937, %v79_v3   ;;  %100 = vperm.xlu0 %5936, %v77_v4   ;;  %v304_v14 = vpack.c.bf16 %v6551_v12, %v6546_v11  ;;  %v305_v16 = vpack.c.bf16 %v6563_v15, %v6556_v13  ;;  %v6575_v18 = vld [vmem:[%s10833_s27 + $0x28] sm:$0xff]  ;;  %v87_v19 = vld [vmem:[%s10832_s24 + $0x58] sm:$0xff]  ;;  %v86_v20 = vld [vmem:[%s10832_s24 + $0x50] sm:$0xff] }
  0x15   :  { %v6586_v21 = vld [vmem:[%s10833_s27 + $0x30] sm:$0xff]  ;;  %v89_v22 = vld [vmem:[%s10832_s24 + $0x68] sm:$0xff]  ;;  %v88_v23 = vld [vmem:[%s10832_s24 + $0x60] sm:$0xff]  ;;  %v306_v24 = vpack.c.bf16 %v6575_v18, %v6570_v17 }
  0x16   :  { %5658 = vmatprep.subr.bf16.mxu0 %v304_v14  ;;  %v6599_v25 = vld [vmem:[%s10833_s27 + $0x38] sm:$0xff]  ;;  %v6604_v26 = vld [vmem:[%s10833_s27 + $0x40] sm:$0xff]  ;;  %v6609_v27 = vld [vmem:[%s10833_s27 + $0x48] sm:$0xff] }
  0x17   :  { %5659 = vmatpush3.bf16.msra.mxu0 %v304_v14  ;;  %v91_v28 = vld [vmem:[%s10832_s24 + $0x78] sm:$0xff]  ;;  %v90_v29 = vld [vmem:[%s10832_s24 + $0x70] sm:$0xff]  ;;  %v307_v30 = vpack.c.bf16 %v6599_v25, %v6586_v21  ;;  %v308_v31 = vpack.c.bf16 %v6609_v27, %v6604_v26 }
  0x18   :  { %112 = vperm.xlu1 %5937, %v81_v5   ;;  %109 = vperm.xlu0 %5936, %v80_v6   ;;  %v6624_v32 = vld [vmem:[%s10833_s27 + $0x50] sm:$0xff]  ;;  %v6629_v33 = vld [vmem:[%s10833_s27 + $0x58] sm:$0xff] }
  0x19   :  { %5660 = vmatprep.subr.bf16.mxu0 %v305_v16 }
  0x1b   :  { %5661 = vmatpush3.bf16.msra.mxu0 %v305_v16 }
  0x1c   :  { %118 = vperm.xlu1 %5937, %v83_v7   ;;  %115 = vperm.xlu0 %5936, %v82_v8  }
  0x1d   :  { %5662 = vmatprep.subr.bf16.mxu0 %v306_v24 }
  0x1f   :  { %5663 = vmatpush3.bf16.msra.mxu0 %v306_v24 }
  0x20   :  { %124 = vperm.xlu1 %5937, %v85_v9   ;;  %121 = vperm.xlu0 %5936, %v84_v10  }
  0x21   :  { %5664 = vmatprep.subr.bf16.mxu0 %v307_v30 }
  0x24   :  { %130 = vperm.xlu1 %5937, %v87_v19   ;;  %127 = vperm.xlu0 %5936, %v86_v20  }
  0x28   :  { %136 = vperm.xlu1 %5937, %v89_v22   ;;  %133 = vperm.xlu0 %5936, %v88_v23  }
  0x2c   :  { %142 = vperm.xlu1 %5937, %v91_v28   ;;  %139 = vperm.xlu0 %5936, %v90_v29  }
  0x2d   :  { %28 = vsyncpa [#allocation3], 0  ;;  %s10834_s1 = sld [smem:[#allocation288_spill]]  ;;  %5665 = vmatpush3.bf16.msra.mxu0 %v307_v30  ;;  %v309_v36 = vpack.c.bf16 %v6629_v33, %v6624_v32  ;;  %v6642_v37 = vld [vmem:[%s10833_s27 + $0x60] sm:$0xff]  ;;  %v6647_v38 = vld [vmem:[%s10833_s27 + $0x68] sm:$0xff]  ;;  %vm10709_vm0 = vcmask 1044480   ;;  %v94_v19 = vlaneseq }
  0x2e   :  { %5666 = vmatprep.subr.bf16.mxu0 %v308_v31  ;;  %v310_v41 = vpack.c.bf16 %v6647_v38, %v6642_v37  ;;  %v6660_v42 = vld [vmem:[%s10833_s27 + $0x70] sm:$0xff]  ;;  %v6665_v43 = vld [vmem:[%s10833_s27 + $0x78] sm:$0xff]  ;;  %v6248_v47 = vld [vmem:[%s10612_s9] sm:$0x1f]   ;;  %vm1526_vm1 = vcmask 1043456   ;;  %s10835_s26 = sld [smem:[#allocation285_spill]] }
  0x2f   :  { %v311_v46 = vpack.c.bf16 %v6665_v43, %v6660_v42  ;;  %5910 = vmatprep.subr.msk.bf16.mxu1 %vm10709_vm0, %v6248_v47  ;;  %v600_v50 = vsel %vm10709_vm0, %v6248_v47, 0  ;;  %v6689_v51 = vld [vmem:[%s10614_s11] sm:$0xf]  ;;  %v6766_v23 = vand.u32 127, %v94_v19  ;;  %v10634_v24 = vmov 3   ;;  %s10860_s6 = sld [smem:[#allocation289_spill]] }
  0x30   :  { %5691 = vmatpush3.bf16.msra.mxu1 %v600_v50  ;;  %v10640_v28 = vmov 1   ;;  %s6371_s4 = smov 112   ;;  %s6372_s30 = smov 96  }
  0x31   :  { %5667 = vmatpush3.bf16.msra.mxu0 %v308_v31  ;;  %10836 = vst [vmem:[#allocation5_spill] sm:$0xff] %v6766_v23  ;;  %v10837_v31 = vmov 0  ;;  %s11744_s3 = sld [smem:[#allocation286_spill]] }
  0x32   :  { %5668 = vmatprep.subr.bf16.mxu0 %v309_v36 }
  0x33   :  { %v273_v34 = vld [vmem:[%s10834_s1 + $0x8] sm:$0xff]  ;;  %v272_v35 = vld [vmem:[%s10834_s1] sm:$0xff]  ;;  %v275_v39 = vld [vmem:[%s10834_s1 + $0x18] sm:$0xff] }
  0x34   :  { %417 = vperm.xlu1 %5937, %v273_v34   ;;  %412 = vperm.xlu0 %5936, %v272_v35   ;;  %v274_v40 = vld [vmem:[%s10834_s1 + $0x10] sm:$0xff]  ;;  %v277_v44 = vld [vmem:[%s10834_s1 + $0x28] sm:$0xff]  ;;  %v276_v45 = vld [vmem:[%s10834_s1 + $0x20] sm:$0xff] }
  0x35   :  { %5669 = vmatpush3.bf16.msra.mxu0 %v309_v36  ;;  %v279_v48 = vld [vmem:[%s10834_s1 + $0x38] sm:$0xff]  ;;  %v278_v49 = vld [vmem:[%s10834_s1 + $0x30] sm:$0xff]  ;;  %v281_v52 = vld [vmem:[%s10834_s1 + $0x48] sm:$0xff]  ;;  %v10632_v36 = vmov 1.0|1.0  }
  0x36   :  { %5670 = vmatprep.subr.bf16.mxu0 %v310_v41  ;;  %v280_v53 = vld [vmem:[%s10834_s1 + $0x40] sm:$0xff]  ;;  %v283_v54 = vld [vmem:[%s10834_s1 + $0x58] sm:$0xff]  ;;  %v282_v55 = vld [vmem:[%s10834_s1 + $0x50] sm:$0xff] }
  0x37   :  { %v285_v56 = vld [vmem:[%s10834_s1 + $0x68] sm:$0xff]  ;;  %v284_v57 = vld [vmem:[%s10834_s1 + $0x60] sm:$0xff]  ;;  %v287_v58 = vld [vmem:[%s10834_s1 + $0x78] sm:$0xff] }
  0x38   :  { %427 = vperm.xlu1 %5937, %v275_v39   ;;  %422 = vperm.xlu0 %5936, %v274_v40   ;;  %v286_v59 = vld [vmem:[%s10834_s1 + $0x70] sm:$0xff]  ;;  %v255_v60 = vld [vmem:[%s10835_s26 + $0x8] sm:$0xff]  ;;  %v254_v61 = vld [vmem:[%s10835_s26] sm:$0xff] }
  0x39   :  { %5671 = vmatpush3.bf16.msra.mxu0 %v310_v41  ;;  %v257_v62 = vld [vmem:[%s10835_s26 + $0x18] sm:$0xff]  ;;  %v256_v63 = vld [vmem:[%s10835_s26 + $0x10] sm:$0xff]  ;;  %v259_v0 = vld [vmem:[%s10835_s26 + $0x28] sm:$0xff]  ;;  %v10842_v41 = vmov 0 }
  0x3a   :  { %5672 = vmatprep.subr.bf16.mxu0 %v311_v46  ;;  %v258_v1 = vld [vmem:[%s10835_s26 + $0x20] sm:$0xff]  ;;  %v261_v3 = vld [vmem:[%s10835_s26 + $0x38] sm:$0xff]  ;;  %v260_v4 = vld [vmem:[%s10835_s26 + $0x30] sm:$0xff] }
  0x3b   :  { %v263_v5 = vld [vmem:[%s10835_s26 + $0x48] sm:$0xff]  ;;  %v262_v6 = vld [vmem:[%s10835_s26 + $0x40] sm:$0xff]  ;;  %v265_v7 = vld [vmem:[%s10835_s26 + $0x58] sm:$0xff] }
  0x3c   :  { %437 = vperm.xlu1 %5937, %v277_v44   ;;  %432 = vperm.xlu0 %5936, %v276_v45   ;;  %v264_v8 = vld [vmem:[%s10835_s26 + $0x50] sm:$0xff]  ;;  %v267_v9 = vld [vmem:[%s10835_s26 + $0x68] sm:$0xff]  ;;  %v266_v10 = vld [vmem:[%s10835_s26 + $0x60] sm:$0xff] }
  0x3d   :  { %5673 = vmatpush3.bf16.msra.mxu0 %v311_v46  ;;  %v269_v14 = vld [vmem:[%s10835_s26 + $0x78] sm:$0xff]  ;;  %v268_v16 = vld [vmem:[%s10835_s26 + $0x70] sm:$0xff]  ;;  %v10845_v46 = vmov 0  ;;  %s10941_s26 = sld [smem:[#allocation283_spill]] }
  0x3e   :  { %5740 = vmatprep.subr.msk.mxu0 %vm1526_vm1, %v6689_v51  ;;  %v6249_v35 = vld [vmem:[%s10618_s15 + $0x4] ss:$16 sps:$4 sm:$0x1f]  }
  0x40   :  { %447 = vperm.xlu1 %5937, %v279_v48   ;;  %442 = vperm.xlu0 %5936, %v278_v49   ;;  %v10848_v49 = vmov 0 }
  0x44   :  { %457 = vperm.xlu1 %5937, %v281_v52   ;;  %452 = vperm.xlu0 %5936, %v280_v53   ;;  %v10851_v52 = vmov 0 }
  0x48   :  { %467 = vperm.xlu1 %5937, %v283_v54   ;;  %462 = vperm.xlu0 %5936, %v282_v55   ;;  %v10854_v55 = vmov 0 }
  0x4c   :  { %477 = vperm.xlu1 %5937, %v285_v56   ;;  %472 = vperm.xlu0 %5936, %v284_v57  }
  0x50   :  { %487 = vperm.xlu1 %5937, %v287_v58   ;;  %482 = vperm.xlu0 %5936, %v286_v59   ;;  %v10857_v58 = vmov 0  ;;  %v6848_v59 = vld [vmem:[%s10860_s6] ss:$0 sm:$0xff] }
  0x54   :  { %1387 = vperm.xlu1 %5937, %v255_v60   ;;  %1382 = vperm.xlu0 %5936, %v254_v61  }
  0x58   :  { %1397 = vperm.xlu1 %5937, %v257_v62   ;;  %1392 = vperm.xlu0 %5936, %v256_v63   ;;  %v6857_v62 = vld [vmem:[%s10611_s8] ss:$0 sm:$0xff] }
  0x5c   :  { %1407 = vperm.xlu1 %5937, %v259_v0   ;;  %1402 = vperm.xlu0 %5936, %v258_v1  }
  0x60   :  { %1417 = vperm.xlu1 %5937, %v261_v3   ;;  %1412 = vperm.xlu0 %5936, %v260_v4  }
  0x64   :  { %1427 = vperm.xlu1 %5937, %v263_v5   ;;  %1422 = vperm.xlu0 %5936, %v262_v6   ;;  %v6251_v6 = vld [vmem:[%s10618_s15] ss:$16 sps:$4 sm:$0x1f]  }
  0x68   :  { %1437 = vperm.xlu1 %5937, %v265_v7   ;;  %1432 = vperm.xlu0 %5936, %v264_v8  }
  0x6c   :  { %1447 = vperm.xlu1 %5937, %v267_v9   ;;  %1442 = vperm.xlu0 %5936, %v266_v10  }
  0x70   :  { %1457 = vperm.xlu1 %5937, %v269_v14   ;;  %1452 = vperm.xlu0 %5936, %v268_v16  }
  0x74   :  { %5938 = vset.pattern.permute.xlu1 %v10634_v24  ;;  %5939 = vset.pattern.permute.xlu0 %v10640_v28 }
  0x8f   :  { %v104_v20 = vpop.permute.xlu1 %103  ;;  %v98_v22 = vpop.permute.xlu0 %97 }
  0x90   :  { %vm146_vm2 = vcmp.eq.s32.totalorder %v6766_v23, %v104_v20  ;;  %vm144_vm6 = vcmp.eq.s32.totalorder %v6766_v23, %v98_v22 }
  0x93   :  { %v107_v29 = vpop.permute.xlu1 %106  ;;  %v101_v30 = vpop.permute.xlu0 %100 }
  0x94   :  { %vm147_vm3 = vcmp.eq.s32.totalorder %v6766_v23, %v107_v29  ;;  %vm145_vm4 = vcmp.eq.s32.totalorder %v6766_v23, %v101_v30  ;;  %v2052_v29 = vsel %vm10709_vm0, %v6251_v6, 0 }
  0x95   :  { %vm6773_vm5 = vmpackc.low %vm147_vm3, %vm146_vm2 }
  0x96   :  { %v10838_v31 = vsel %vm6773_vm5, 4294967295, %v10837_v31  ;;  %vm6778_vm7 = vmpackc.low %vm145_vm4, %vm144_vm6 }
  0x97   :  { %10839 = vst [vmem:[#allocation6_spill] sm:$0xff] %v10838_v31  ;;  %5674 = vmatprep.mubr.msk.bf16.mxu0 %vm6778_vm7, %v10632_v36  ;;  %v113_v39 = vpop.permute.xlu1 %112  ;;  %v110_v40 = vpop.permute.xlu0 %109 }
  0x98   :  { %vm149_vm8 = vcmp.eq.s32.totalorder %v6766_v23, %v113_v39  ;;  %5675 = vmatmul.mubr.msk.bf16.vlgmr.msra.gmra.mrb[0].mxu0 %vm6773_vm5, %v10632_v36  ;;  %vm148_vm9 = vcmp.eq.s32.totalorder %v6766_v23, %v110_v40 }
  0x99   :  { %vm6793_vm10 = vmpackc.low %vm149_vm8, %vm148_vm9  ;;  %5741 = vmatpush3.msk.msra.mxu0 %vm1526_vm1, %v6689_v51 }
  0x9a   :  { %v10843_v41 = vsel %vm6793_vm10, 4294967295, %v10842_v41  ;;  %5678 = vmatprep.mubr.msk.bf16.mxu0 %vm6793_vm10, %v10632_v36  ;;  %5445 = vmatprep.subr.msk.bf16.mxu0 %vm10709_vm0, %v6249_v35 }
  0x9b   :  { %10844 = vst [vmem:[#allocation7_spill] sm:$0xff] %v10843_v41  ;;  %v119_v44 = vpop.permute.xlu1 %118  ;;  %v116_v45 = vpop.permute.xlu0 %115 }
  0x9c   :  { %vm151_vm11 = vcmp.eq.s32.totalorder %v6766_v23, %v119_v44  ;;  %vm150_vm12 = vcmp.eq.s32.totalorder %v6766_v23, %v116_v45 }
  0x9d   :  { %vm6805_vm13 = vmpackc.low %vm151_vm11, %vm150_vm12 }
  0x9e   :  { %v10846_v46 = vsel %vm6805_vm13, 4294967295, %v10845_v46 }
  0x9f   :  { %10847 = vst [vmem:[#allocation8_spill] sm:$0xff] %v10846_v46  ;;  %v125_v47 = vpop.permute.xlu1 %124  ;;  %v122_v48 = vpop.permute.xlu0 %121 }
  0xa0   :  { %vm153_vm14 = vcmp.eq.s32.totalorder %v6766_v23, %v125_v47  ;;  %5679 = vmatmul.mubr.msk.bf16.gmra.mrb[4].mxu0 %vm6805_vm13, %v10632_v36  ;;  %vm152_vm15 = vcmp.eq.s32.totalorder %v6766_v23, %v122_v48 }
  0xa1   :  { %vm6814_vm1 = vmpackc.low %vm153_vm14, %vm152_vm15  ;;  %vm1477_vm15 = vcmask 31744  }
  0xa2   :  { %v10849_v49 = vsel %vm6814_vm1, 4294967295, %v10848_v49  ;;  %5682 = vmatprep.mubr.msk.bf16.mxu0 %vm6814_vm1, %v10632_v36 }
  0xa3   :  { %10850 = vst [vmem:[#allocation9_spill] sm:$0xff] %v10849_v49  ;;  %v131_v50 = vpop.permute.xlu1 %130  ;;  %v128_v51 = vpop.permute.xlu0 %127 }
  0xa4   :  { %vm155_vm2 = vcmp.eq.s32.totalorder %v6766_v23, %v131_v50  ;;  %vm154_vm3 = vcmp.eq.s32.totalorder %v6766_v23, %v128_v51 }
  0xa5   :  { %vm6823_vm4 = vmpackc.low %vm155_vm2, %vm154_vm3  ;;  %vm10708_vm2 = vcmask 80896  }
  0xa6   :  { %v10852_v52 = vsel %vm6823_vm4, 4294967295, %v10851_v52 }
  0xa7   :  { %10853 = vst [vmem:[#allocation10_spill] sm:$0xff] %v10852_v52  ;;  %v137_v53 = vpop.permute.xlu1 %136  ;;  %v134_v54 = vpop.permute.xlu0 %133 }
  0xa8   :  { %vm157_vm6 = vcmp.eq.s32.totalorder %v6766_v23, %v137_v53  ;;  %5683 = vmatmul.mubr.msk.bf16.gmra.mrb[8].mxu0 %vm6823_vm4, %v10632_v36  ;;  %vm156_vm8 = vcmp.eq.s32.totalorder %v6766_v23, %v134_v54 }
  0xa9   :  { %vm6832_vm9 = vmpackc.low %vm157_vm6, %vm156_vm8 }
  0xaa   :  { %v10855_v55 = vsel %vm6832_vm9, 4294967295, %v10854_v55  ;;  %5686 = vmatprep.mubr.msk.bf16.mxu0 %vm6832_vm9, %v10632_v36 }
  0xab   :  { %10856 = vst [vmem:[#allocation11_spill] sm:$0xff] %v10855_v55  ;;  %v143_v56 = vpop.permute.xlu1 %142  ;;  %v140_v57 = vpop.permute.xlu0 %139 }
  0xac   :  { %vm159_vm11 = vcmp.eq.s32.totalorder %v6766_v23, %v143_v56  ;;  %vm158_vm12 = vcmp.eq.s32.totalorder %v6766_v23, %v140_v57 }
  0xad   :  { %vm6841_vm14 = vmpackc.low %vm159_vm11, %vm158_vm12 }
  0xae   :  { %v10858_v58 = vsel %vm6841_vm14, 4294967295, %v10857_v58 }
  0xaf   :  { %10859 = vst [vmem:[#allocation12_spill] sm:$0xff] %v10858_v58 }
  0xb0   :  { %5687 = vmatmul.mubr.msk.bf16.gmra.mrb[12].mxu0 %vm6841_vm14, %v10632_v36 }
  0xb1   :  { %5742 = vmatprep.mubr.msk.f32.mxu0 %vm1477_vm15, %v6546_v11 }
  0xb3   :  { %v6850_v60 = vpop.permute.xlu1 %417  ;;  %v6852_v61 = vpop.permute.xlu0 %412 }
  0xb4   :  { %v497_v63 = vmul.f32 %v6848_v59, %v6850_v60  ;;  %v496_v0 = vmul.f32 %v6848_v59, %v6852_v61 }
  0xb6   :  { %v519_v1 = vadd.f32 %v6857_v62, %v496_v0  ;;  %v520_v3 = vadd.f32 %v6857_v62, %v497_v63 }
  0xb7   :  { %v6870_v4 = vpop.permute.xlu1 %427  ;;  %v6872_v5 = vpop.permute.xlu0 %422 }
  0xb8   :  { %v499_v7 = vmul.f32 %v6848_v59, %v6870_v4  ;;  %v498_v8 = vmul.f32 %v6848_v59, %v6872_v5  ;;  %v535_v9 = vmax.f32 %v519_v1, 0.0  ;;  %v536_v11 = vmax.f32 %v520_v3, 0.0  ;;  %5743 = vmatmul.mubr.msk.f32.vlgmr.msra.gmra.mrb[16].mxu0 %vm1477_vm15, %v6551_v12 }
  0xb9   :  { %5745 = vmatprep.mubr.msk.f32.mxu0 %vm1477_vm15, %v6556_v13  ;;  %2064 = vmatpush1.bf16.msra.mxu0 %v2052_v29  ;;  %v6946_v29 = vld [vmem:[%s10616_s13] ss:$0 sm:$0xff] }
  0xba   :  { %v522_v10 = vadd.f32 %v6857_v62, %v499_v7  ;;  %v521_v14 = vadd.f32 %v6857_v62, %v498_v8  ;;  %v551_v22 = vpack.c.bf16 %v536_v11, %v535_v9 }
  0xbb   :  { %v6883_v16 = vpop.permute.xlu1 %437  ;;  %v6885_v20 = vpop.permute.xlu0 %432 }
  0xbc   :  { %v538_v30 = vmax.f32 %v522_v10, 0.0  ;;  %v501_v35 = vmul.f32 %v6848_v59, %v6883_v16  ;;  %v537_v39 = vmax.f32 %v521_v14, 0.0  ;;  %v500_v40 = vmul.f32 %v6848_v59, %v6885_v20  ;;  %5692 = vmatprep.mubr.msk.bf16.mxu1 %vm10708_vm2, %v551_v22  ;;  %5746 = vmatmul.mubr.msk.f32.gmra.mrb[18].mxu0 %vm1477_vm15, %v6563_v15 }
  0xbd   :  { %5748 = vmatprep.mubr.msk.f32.mxu0 %vm1477_vm15, %v6570_v17 }
  0xbe   :  { %v524_v44 = vadd.f32 %v6857_v62, %v501_v35  ;;  %v523_v45 = vadd.f32 %v6857_v62, %v500_v40  ;;  %v552_v50 = vpack.c.bf16 %v538_v30, %v537_v39 }
  0xbf   :  { %v6899_v47 = vpop.permute.xlu1 %447  ;;  %v6901_v48 = vpop.permute.xlu0 %442 }
  0xc0   :  { %v540_v12 = vmax.f32 %v524_v44, 0.0  ;;  %v503_v51 = vmul.f32 %v6848_v59, %v6899_v47  ;;  %v539_v53 = vmax.f32 %v523_v45, 0.0  ;;  %v502_v13 = vmul.f32 %v6848_v59, %v6901_v48  ;;  %5693 = vmatmul.mubr.msk.bf16.vlgmr.msra.gmra.mrb[0].mxu1 %vm10708_vm2, %v552_v50  ;;  %5749 = vmatmul.mubr.msk.f32.gmra.mrb[20].mxu0 %vm1477_vm15, %v6575_v18 }
  0xc1   :  { %5751 = vmatprep.mubr.msk.f32.mxu0 %vm1477_vm15, %v6586_v21  ;;  %v1923_v50 = vmul.f32 %v6946_v29, %v6850_v60 }
  0xc2   :  { %v526_v54 = vadd.f32 %v6857_v62, %v503_v51  ;;  %v525_v56 = vadd.f32 %v6857_v62, %v502_v13  ;;  %v553_v0 = vpack.c.bf16 %v540_v12, %v539_v53  ;;  %v1922_v12 = vmul.f32 %v6946_v29, %v6852_v61 }
  0xc3   :  { %v6914_v57 = vpop.permute.xlu1 %457  ;;  %v6916_v63 = vpop.permute.xlu0 %452 }
  0xc4   :  { %v542_v1 = vmax.f32 %v526_v54, 0.0  ;;  %v505_v15 = vmul.f32 %v6848_v59, %v6914_v57  ;;  %v541_v3 = vmax.f32 %v525_v56, 0.0  ;;  %v504_v17 = vmul.f32 %v6848_v59, %v6916_v63  ;;  %5696 = vmatprep.mubr.msk.bf16.mxu1 %vm10708_vm2, %v553_v0  ;;  %5752 = vmatmul.mubr.msk.f32.gmra.mrb[22].mxu0 %vm1477_vm15, %v6599_v25 }
  0xc5   :  { %5754 = vmatprep.mubr.msk.f32.mxu0 %vm1477_vm15, %v6604_v26 }
  0xc6   :  { %v528_v6 = vadd.f32 %v6857_v62, %v505_v15  ;;  %v527_v7 = vadd.f32 %v6857_v62, %v504_v17  ;;  %v554_v11 = vpack.c.bf16 %v542_v1, %v541_v3 }
  0xc7   :  { %v6929_v8 = vpop.permute.xlu1 %467  ;;  %v6931_v9 = vpop.permute.xlu0 %462 }
  0xc8   :  { %v544_v10 = vmax.f32 %v528_v6, 0.0  ;;  %v507_v18 = vmul.f32 %v6848_v59, %v6929_v8  ;;  %v543_v14 = vmax.f32 %v527_v7, 0.0  ;;  %v506_v21 = vmul.f32 %v6848_v59, %v6931_v9  ;;  %5697 = vmatmul.mubr.msk.bf16.gmra.mrb[4].mxu1 %vm10708_vm2, %v554_v11  ;;  %5755 = vmatmul.mubr.msk.f32.gmra.mrb[24].mxu0 %vm1477_vm15, %v6609_v27  ;;  %v6970_v27 = vld [vmem:[%s10617_s14] ss:$0 sm:$0xff] }
  0xc9   :  { %5757 = vmatprep.mubr.msk.f32.mxu0 %vm1477_vm15, %v6624_v32  ;;  %v1946_v1 = vadd.f32 %v6970_v27, %v1923_v50  ;;  %v1945_v15 = vadd.f32 %v6970_v27, %v1922_v12  ;;  %v1925_v11 = vmul.f32 %v6946_v29, %v6870_v4 }
  0xca   :  { %v530_v22 = vadd.f32 %v6857_v62, %v507_v18  ;;  %v529_v30 = vadd.f32 %v6857_v62, %v506_v21  ;;  %v555_v39 = vpack.c.bf16 %v544_v10, %v543_v14  ;;  %v1924_v10 = vmul.f32 %v6946_v29, %v6872_v5 }
  0xcb   :  { %v6949_v35 = vpop.permute.xlu1 %477  ;;  %v6951_v25 = vpop.permute.xlu0 %472  ;;  %v1926_v14 = vmul.f32 %v6946_v29, %v6885_v20 }
  0xcc   :  { %v546_v40 = vmax.f32 %v530_v22, 0.0  ;;  %v509_v44 = vmul.f32 %v6848_v59, %v6949_v35  ;;  %v545_v26 = vmax.f32 %v529_v30, 0.0  ;;  %v508_v45 = vmul.f32 %v6848_v59, %v6951_v25  ;;  %5700 = vmatprep.mubr.msk.bf16.mxu1 %vm10708_vm2, %v555_v39  ;;  %5758 = vmatmul.mubr.msk.f32.gmra.mrb[26].mxu0 %vm1477_vm15, %v6629_v33 }
  0xcd   :  { %5760 = vmatprep.mubr.msk.f32.mxu0 %vm1477_vm15, %v6642_v37  ;;  %v1962_v37 = vmax.f32 %v1946_v1, 0.0  ;;  %v1947_v18 = vadd.f32 %v6970_v27, %v1924_v10  ;;  %v1949_v22 = vadd.f32 %v6970_v27, %v1926_v14 }
  0xce   :  { %v532_v51 = vadd.f32 %v6857_v62, %v509_v44  ;;  %v531_v53 = vadd.f32 %v6857_v62, %v508_v45  ;;  %v556_v32 = vpack.c.bf16 %v546_v40, %v545_v26  ;;  %v1929_v44 = vmul.f32 %v6946_v29, %v6899_v47 }
  0xcf   :  { %v6973_v13 = vpop.permute.xlu1 %487  ;;  %v6975_v54 = vpop.permute.xlu0 %482  ;;  %v1963_v5 = vmax.f32 %v1947_v18, 0.0  ;;  %v1965_v40 = vmax.f32 %v1949_v22, 0.0  ;;  %v1930_v47 = vmul.f32 %v6946_v29, %v6916_v63 }
  0xd0   :  { %v548_v56 = vmax.f32 %v532_v51, 0.0  ;;  %v511_v60 = vmul.f32 %v6848_v59, %v6973_v13  ;;  %v547_v61 = vmax.f32 %v531_v53, 0.0  ;;  %v510_v0 = vmul.f32 %v6848_v59, %v6975_v54  ;;  %5701 = vmatmul.mubr.msk.bf16.gmra.mrb[8].mxu1 %vm10708_vm2, %v556_v32  ;;  %5761 = vmatmul.mubr.msk.f32.gmra.mrb[28].mxu0 %vm1477_vm15, %v6647_v38 }
  0xd1   :  { %5763 = vmatprep.mubr.msk.f32.mxu0 %vm1477_vm15, %v6660_v42  ;;  %v1961_v59 = vmax.f32 %v1945_v15, 0.0  ;;  %v1948_v42 = vadd.f32 %v6970_v27, %v1925_v11  ;;  %v1952_v20 = vadd.f32 %v6970_v27, %v1929_v44  ;;  %v1931_v51 = vmul.f32 %v6946_v29, %v6914_v57 }
  0xd2   :  { %v534_v3 = vadd.f32 %v6857_v62, %v511_v60  ;;  %v533_v17 = vadd.f32 %v6857_v62, %v510_v0  ;;  %v557_v6 = vpack.c.bf16 %v548_v56, %v547_v61  ;;  %v1953_v53 = vadd.f32 %v6970_v27, %v1930_v47 }
  0xd3   :  { %v7003_v38 = vpack.c.bf16 %v1962_v37, %v1961_v59  ;;  %v1964_v4 = vmax.f32 %v1948_v42, 0.0  ;;  %v1968_v50 = vmax.f32 %v1952_v20, 0.0  ;;  %v1933_v61 = vmul.f32 %v6946_v29, %v6929_v8 }
  0xd4   :  { %v550_v7 = vmax.f32 %v534_v3, 0.0  ;;  %v549_v33 = vmax.f32 %v533_v17, 0.0  ;;  %5704 = vmatprep.mubr.msk.bf16.mxu1 %vm10708_vm2, %v557_v6  ;;  %5764 = vmatmul.mubr.msk.f32.gmra.mrb[30].mxu0 %vm1477_vm15, %v6665_v43  ;;  %v1927_v43 = vmul.f32 %v6946_v29, %v6883_v16  ;;  %v1928_v16 = vmul.f32 %v6946_v29, %v6901_v48 }
  0xd5   :  { %2095 = vmatprep.mubr.bf16.mxu0 %v10636_v2  ;;  %10861 = vst [vmem:[#allocation13_spill] sm:$0xff] %v7003_v38  ;;  %v7016_v30 = vpack.c.bf16 %v1964_v4, %v1963_v5  ;;  %v1954_v48 = vadd.f32 %v6970_v27, %v1931_v51  ;;  %v1969_v60 = vmax.f32 %v1953_v53, 0.0  ;;  %v1932_v57 = vmul.f32 %v6946_v29, %v6931_v9 }
  0xd6   :  { %v558_v62 = vpack.c.bf16 %v550_v7, %v549_v33  ;;  %v1950_v21 = vadd.f32 %v6970_v27, %v1927_v43  ;;  %v1951_v26 = vadd.f32 %v6970_v27, %v1928_v16  ;;  %v1956_v63 = vadd.f32 %v6970_v27, %v1933_v61 }
  0xd7   :  { %10862 = vst [vmem:[#allocation14_spill] sm:$0xff] %v7016_v30  ;;  %v1970_v56 = vmax.f32 %v1954_v48, 0.0  ;;  %v1955_v0 = vadd.f32 %v6970_v27, %v1932_v57  ;;  %v1935_v17 = vmul.f32 %v6946_v29, %v6949_v35  ;;  %v1934_v8 = vmul.f32 %v6946_v29, %v6951_v25 }
  0xd8   :  { %5705 = vmatmul.mubr.msk.bf16.gmra.mrb[12].mxu1 %vm10708_vm2, %v558_v62  ;;  %5446 = vmatmul.mubr.msk.bf16.vlgmr.msra.gmra.mrb[32].mxu0 %vm10708_vm2, %v7003_v38  ;;  %v1966_v39 = vmax.f32 %v1950_v21, 0.0  ;;  %v1967_v12 = vmax.f32 %v1951_v26, 0.0  ;;  %v1972_v15 = vmax.f32 %v1956_v63, 0.0  ;;  %v1937_v59 = vmul.f32 %v6946_v29, %v6973_v13 }
  0xd9   :  { %2105 = vmatprep.mubr.bf16.mxu0 %v10636_v2  ;;  %v7049_v1 = vpack.c.bf16 %v1970_v56, %v1969_v60  ;;  %v1971_v3 = vmax.f32 %v1955_v0, 0.0  ;;  %v1958_v9 = vadd.f32 %v6970_v27, %v1935_v17  ;;  %v1957_v6 = vadd.f32 %v6970_v27, %v1934_v8 }
  0xda   :  { %v7027_v45 = vpack.c.bf16 %v1966_v39, %v1965_v40  ;;  %v7038_v32 = vpack.c.bf16 %v1968_v50, %v1967_v12  ;;  %v1936_v35 = vmul.f32 %v6946_v29, %v6975_v54  ;;  %v1960_v25 = vadd.f32 %v6970_v27, %v1937_v59 }
  0xdb   :  { %10865 = vst [vmem:[#allocation17_spill] sm:$0xff] %v7049_v1  ;;  %v7060_v7 = vpack.c.bf16 %v1972_v15, %v1971_v3  ;;  %v1974_v33 = vmax.f32 %v1958_v9, 0.0  ;;  %v1973_v37 = vmax.f32 %v1957_v6, 0.0  ;;  %v10638_v4 = vmov 2   ;;  %v7157_v9 = vld [vmem:[%s10613_s10] ss:$0 sm:$0xff] }
  0xdc   :  { %10863 = vst [vmem:[#allocation15_spill] sm:$0xff] %v7027_v45  ;;  %10864 = vst [vmem:[#allocation16_spill] sm:$0xff] %v7038_v32  ;;  %v1959_v11 = vadd.f32 %v6970_v27, %v1936_v35  ;;  %v1976_v62 = vmax.f32 %v1960_v25, 0.0 }
  0xdd   :  { %10866 = vst [vmem:[#allocation18_spill] sm:$0xff] %v7060_v7  ;;  %v7071_v10 = vpack.c.bf16 %v1974_v33, %v1973_v37 }
  0xde   :  { %v1975_v42 = vmax.f32 %v1959_v11, 0.0 }
  0xdf   :  { %10867 = vst [vmem:[#allocation19_spill] sm:$0xff] %v7071_v10 }
  0xe0   :  { %5447 = vmatmul.mubr.msk.bf16.gmra.mrb[36].mxu0 %vm10708_vm2, %v7016_v30  ;;  %v7076_v18 = vpack.c.bf16 %v1976_v62, %v1975_v42 }
  0xe1   :  { %2115 = vmatprep.mubr.bf16.mxu0 %v10636_v2 }
  0xe2   :  { %10868 = vst [vmem:[#allocation20_spill] sm:$0xff] %v7076_v18 }
  0xe8   :  { %5448 = vmatmul.mubr.msk.bf16.gmra.mrb[40].mxu0 %vm10708_vm2, %v7027_v45 }
  0xe9   :  { %2125 = vmatprep.mubr.bf16.mxu0 %v10636_v2 }
  0xf0   :  { %5449 = vmatmul.mubr.msk.bf16.gmra.mrb[44].mxu0 %vm10708_vm2, %v7038_v32 }
  0xf1   :  { %2135 = vmatprep.mubr.bf16.mxu0 %v10636_v2 }
  0xf8   :  { %5450 = vmatmul.mubr.msk.bf16.gmra.mrb[48].mxu0 %vm10708_vm2, %v7049_v1 }
  0xf9   :  { %2145 = vmatprep.mubr.bf16.mxu0 %v10636_v2 }
 0x100   :  { %5451 = vmatmul.mubr.msk.bf16.gmra.mrb[52].mxu0 %vm10708_vm2, %v7060_v7  ;;  %v10886_v7 = vmov 2  }
 0x101   :  { %2155 = vmatprep.mubr.bf16.mxu0 %v10636_v2 }
 0x108   :  { %5452 = vmatmul.mubr.msk.bf16.gmra.mrb[56].mxu0 %vm10708_vm2, %v7071_v10 }
 0x109   :  { %2165 = vmatprep.mubr.bf16.mxu0 %v10636_v2 }
 0x110   :  { %5453 = vmatmul.mubr.msk.bf16.gmra.mrb[60].mxu0 %vm10708_vm2, %v7076_v18 }
 0x16b   :  { %v5676_v13 = vpop.f32.mrb[0].mxu0 }
 0x16c   :  { %804 = vperm.xlu0 %5939, %v5676_v13   ;;  %964 = vperm.xlu1 %5938, %v5676_v13   ;;  %v346_v29 = vpop.f32.mrb[1].mxu0 }
 0x16d   :  { %v5677_v54 = vpop.f32.mrb[2].mxu0 }
 0x16e   :  { %v349_v27 = vpop.f32.mrb[3].mxu0 }
 0x170   :  { %5940 = vset.pattern.permute.xlu0 %v10638_v4  ;;  %5941 = vset.pattern.permute.xlu1 %v10636_v2 }
 0x171   :  { %884 = vperm.xlu0 %5940, %v5676_v13   ;;  %711 = vperm.xlu1 %5941, %v5676_v13  }
 0x173   :  { %v7082_v5 = vpop.f32.mrb[4].mxu0 }
 0x174   :  { %v7084_v43 = vpop.f32.mrb[5].mxu0 }
 0x175   :  { %5942 = vset.pattern.permute.xlu0 %v10634_v24  ;;  %5943 = vset.pattern.permute.xlu1 %v10640_v28  ;;  %v7088_v14 = vpop.f32.mrb[6].mxu0 }
 0x176   :  { %796 = vperm.xlu1 %5943, %v346_v29   ;;  %956 = vperm.xlu0 %5942, %v346_v29   ;;  %v7090_v21 = vpop.f32.mrb[7].mxu0 }
 0x17a   :  { %5944 = vset.pattern.permute.xlu1 %v10638_v4  ;;  %968 = vperm.xlu0 %5942, %v5677_v54  }
 0x17b   :  { %876 = vperm.xlu1 %5944, %v346_v29   ;;  %v7093_v22 = vpop.f32.mrb[8].mxu0 }
 0x17c   :  { %v7095_v39 = vpop.f32.mrb[9].mxu0 }
 0x17d   :  { %v7097_v40 = vpop.f32.mrb[10].mxu0 }
 0x17e   :  { %5950 = vset.pattern.permute.xlu0 %v10640_v28  ;;  %v7100_v44 = vpop.f32.mrb[11].mxu0 }
 0x17f   :  { %5945 = vset.pattern.permute.xlu1 %v10636_v2  ;;  %800 = vperm.xlu0 %5950, %v349_v27  }
 0x180   :  { %701 = vperm.xlu1 %5945, %v346_v29  }
 0x183   :  { %5952 = vset.pattern.permute.xlu0 %v10636_v2  ;;  %v7104_v16 = vpop.f32.mrb[12].mxu0 }
 0x184   :  { %5946 = vset.pattern.permute.xlu1 %v10640_v28  ;;  %706 = vperm.xlu0 %5952, %v349_v27   ;;  %v7107_v20 = vpop.f32.mrb[13].mxu0 }
 0x185   :  { %808 = vperm.xlu1 %5946, %v5677_v54   ;;  %v7109_v26 = vpop.f32.mrb[14].mxu0 }
 0x186   :  { %v7111_v50 = vpop.f32.mrb[15].mxu0 }
 0x188   :  { %5954 = vset.pattern.permute.xlu0 %v10640_v28 }
 0x189   :  { %5947 = vset.pattern.permute.xlu1 %v10638_v4  ;;  %820 = vperm.xlu0 %5954, %v7082_v5  }
 0x18a   :  { %888 = vperm.xlu1 %5947, %v5677_v54  }
 0x18b   :  { %v7116_v12 = vpop.f32.mrb[16].mxu0 }
 0x18c   :  { %10869 = vst [vmem:[#allocation21_spill] sm:$0xff] %v7116_v12  ;;  %v7118_v51 = vpop.f32.mrb[17].mxu0 }
 0x18d   :  { %10870 = vst [vmem:[#allocation22_spill] sm:$0xff] %v7118_v51  ;;  %5955 = vset.pattern.permute.xlu0 %v10638_v4 }
 0x18e   :  { %5948 = vset.pattern.permute.xlu1 %v10636_v2  ;;  %900 = vperm.xlu0 %5955, %v7082_v5  }
 0x18f   :  { %716 = vperm.xlu1 %5948, %v5677_v54   ;;  %v7123_v47 = vpop.f32.mrb[18].mxu0 }
 0x190   :  { %10871 = vst [vmem:[#allocation23_spill] sm:$0xff] %v7123_v47  ;;  %v7127_v53 = vpop.f32.mrb[19].mxu0 }
 0x191   :  { %10872 = vst [vmem:[#allocation24_spill] sm:$0xff] %v7127_v53 }
 0x192   :  { %5956 = vset.pattern.permute.xlu0 %v10636_v2 }
 0x193   :  { %v7125_v48 = vpop.f32.mrb[0].mxu1  ;;  %5949 = vset.pattern.permute.xlu1 %v10634_v24  ;;  %731 = vperm.xlu0 %5956, %v7082_v5   ;;  %v7138_v57 = vpop.f32.mrb[20].mxu0 }
 0x194   :  { %v7129_v56 = vpop.f32.mrb[1].mxu1  ;;  %10873 = vst [vmem:[#allocation25_spill] sm:$0xff] %v7138_v57  ;;  %960 = vperm.xlu1 %5949, %v349_v27   ;;  %v7140_v63 = vpop.f32.mrb[21].mxu0 }
 0x195   :  { %v7132_v60 = vpop.f32.mrb[2].mxu1  ;;  %10874 = vst [vmem:[#allocation26_spill] sm:$0xff] %v7140_v63 }
 0x196   :  { %v7136_v61 = vpop.f32.mrb[3].mxu1 }
 0x197   :  { %721 = vperm.xlu0 %5956, %v7084_v43   ;;  %v7143_v0 = vpop.f32.mrb[22].mxu0 }
 0x198   :  { %10875 = vst [vmem:[#allocation27_spill] sm:$0xff] %v7143_v0  ;;  %5951 = vset.pattern.permute.xlu1 %v10638_v4  ;;  %v7148_v3 = vpop.f32.mrb[23].mxu0  ;;  %v1989_v4 = vld [vmem:[%s10619_s16] sm:$0xf] }
 0x199   :  { %10876 = vst [vmem:[#allocation28_spill] sm:$0xff] %v7148_v3  ;;  %880 = vperm.xlu1 %5951, %v349_v27  }
 0x19b   :  { %v7146_v15 = vpop.f32.mrb[4].mxu1  ;;  %5959 = vset.pattern.permute.xlu0 %v10634_v24  ;;  %v7160_v33 = vpop.f32.mrb[24].mxu0 }
 0x19c   :  { %v7150_v17 = vpop.f32.mrb[5].mxu1  ;;  %10877 = vst [vmem:[#allocation29_spill] sm:$0xff] %v7160_v33  ;;  %984 = vperm.xlu0 %5959, %v7088_v14   ;;  %v7166_v59 = vpop.f32.mrb[25].mxu0 }
 0x19d   :  { %v7152_v8 = vpop.f32.mrb[6].mxu1  ;;  %10878 = vst [vmem:[#allocation30_spill] sm:$0xff] %v7166_v59  ;;  %5953 = vset.pattern.permute.xlu1 %v10634_v24 }
 0x19e   :  { %v655_v6 = vpop.f32.mrb[7].mxu1  ;;  %980 = vperm.xlu1 %5953, %v7082_v5  }
 0x19f   :  { %v7163_v37 = vadd.f32 %v7157_v9, %v655_v6  ;;  %v7170_v35 = vpop.f32.mrb[26].mxu0  ;;  %v7188_v6 = vshrl.u32 %v94_v19, 7 }
 0x1a0   :  { %10879 = vst [vmem:[#allocation31_spill] sm:$0xff] %v7170_v35  ;;  %976 = vperm.xlu0 %5959, %v7090_v21   ;;  %v7173_v11 = vpop.f32.mrb[27].mxu0 }
 0x1a1   :  { %10880 = vst [vmem:[#allocation32_spill] sm:$0xff] %v7173_v11  ;;  %10882 = vst [vmem:[#allocation34_spill] sm:$0xff] %v7188_v6  ;;  %v1993_v19 = vsub.s32 0, %v7188_v6 }
 0x1a2   :  { %972 = vperm.xlu1 %5953, %v7084_v43  }
 0x1a3   :  { %v5702_v25 = vpop.f32.mrb[8].mxu1  ;;  %v7185_v5 = vpop.f32.mrb[28].mxu0  ;;  %v7224_v45 = vrot.slane %v1989_v4, %v1993_v19  ;;  %v10893_v19 = vmov 1  }
 0x1a4   :  { %v7176_v62 = vadd.f32 %v5702_v25, %v7157_v9  ;;  %v668_v42 = vpop.f32.mrb[9].mxu1  ;;  %10881 = vst [vmem:[#allocation33_spill] sm:$0xff] %v7185_v5  ;;  %5963 = vset.pattern.permute.xlu0 %v10640_v28  ;;  %v7194_v25 = vpop.f32.mrb[29].mxu0 }
 0x1a5   :  { %v7179_v13 = vadd.f32 %v7157_v9, %v668_v42  ;;  %v5703_v29 = vpop.f32.mrb[10].mxu1  ;;  %10883 = vst [vmem:[#allocation35_spill] sm:$0xff] %v7194_v25  ;;  %816 = vperm.xlu0 %5963, %v7090_v21   ;;  %10888 = vst [vmem:[#allocation39_spill] sm:$0xff] %v7224_v45 }
 0x1a6   :  { %v7183_v54 = vadd.f32 %v5703_v29, %v7157_v9  ;;  %v671_v27 = vpop.f32.mrb[11].mxu1  ;;  %5957 = vset.pattern.permute.xlu1 %v10640_v28  ;;  %v1997_v28 = vsub.s32 1, %v7188_v6 }
 0x1a7   :  { %v7191_v36 = vadd.f32 %v7157_v9, %v671_v27  ;;  %812 = vperm.xlu1 %5957, %v7084_v43   ;;  %v7199_v42 = vpop.f32.mrb[30].mxu0 }
 0x1a8   :  { %10884 = vst [vmem:[#allocation36_spill] sm:$0xff] %v7199_v42  ;;  %v7201_v24 = vpop.f32.mrb[31].mxu0 }
 0x1a9   :  { %10885 = vst [vmem:[#allocation37_spill] sm:$0xff] %v7201_v24  ;;  %836 = vperm.xlu0 %5963, %v7093_v22  }
 0x1ab   :  { %v5706_v29 = vpop.f32.mrb[12].mxu1  ;;  %5958 = vset.pattern.permute.xlu1 %v10886_v7  ;;  %v7219_v1 = vpop.f32.mrb[32].mxu0 }
 0x1ac   :  { %v7205_v27 = vadd.f32 %v5706_v29, %v7157_v9  ;;  %v684_v2 = vpop.f32.mrb[13].mxu1  ;;  %10887 = vst [vmem:[#allocation38_spill] sm:$0xff] %v7219_v1  ;;  %892 = vperm.xlu1 %5958, %v7084_v43   ;;  %v7227_v30 = vpop.f32.mrb[33].mxu0  ;;  %v10894_v43 = vmov 0  }
 0x1ad   :  { %v7213_v23 = vadd.f32 %v7157_v9, %v684_v2  ;;  %v5707_v18 = vpop.f32.mrb[14].mxu1  ;;  %10889 = vst [vmem:[#allocation40_spill] sm:$0xff] %v7227_v30  ;;  %v7229_v2 = vrot.slane %v1989_v4, %v1997_v28  ;;  %5967 = vset.pattern.permute.xlu0 %v10886_v7  ;;  %v7257_v30 = vpop.permute.xlu1 %1387 }
 0x1ae   :  { %v7216_v10 = vadd.f32 %v5707_v18, %v7157_v9  ;;  %v687_v29 = vpop.f32.mrb[15].mxu1  ;;  %v2101_v18 = vpop.f32.mrb[34].mxu0  ;;  %916 = vperm.xlu0 %5967, %v7093_v22   ;;  %10900 = vst [vmem:[#allocation48_spill] sm:$0xff] %v7257_v30 }
 0x1af   :  { %v7222_v32 = vadd.f32 %v7157_v9, %v687_v29  ;;  %10890 = vst [vmem:[#allocation41_spill] sm:$0xff] %v7229_v2  ;;  %v7233_v38 = vadd.f32 %v2101_v18, %v7224_v45  ;;  %v2103_v1 = vpop.f32.mrb[35].mxu0 }
 0x1b0   :  { %v7237_v29 = vadd.f32 %v2103_v1, %v7229_v2  ;;  %5960 = vset.pattern.permute.xlu1 %v10893_v19 }
 0x1b1   :  { %10891 = vst [vmem:[#allocation42_spill] sm:$0xff] %v7233_v38  ;;  %824 = vperm.xlu1 %5960, %v7088_v14  }
 0x1b2   :  { %10892 = vst [vmem:[#allocation43_spill] sm:$0xff] %v7237_v29  ;;  %5968 = vset.pattern.permute.xlu0 %v10894_v43  ;;  %v10899_v29 = vmov 3  }
 0x1b3   :  { %751 = vperm.xlu0 %5968, %v7093_v22   ;;  %v7243_v28 = vpop.f32.mrb[36].mxu0 }
 0x1b4   :  { %10895 = vst [vmem:[#allocation44_spill] sm:$0xff] %v7243_v28  ;;  %v7245_v4 = vpop.f32.mrb[37].mxu0  ;;  %v7263_v28 = vpop.permute.xlu0 %1382 }
 0x1b5   :  { %10896 = vst [vmem:[#allocation45_spill] sm:$0xff] %v7245_v4  ;;  %5961 = vset.pattern.permute.xlu1 %v10886_v7  ;;  %v7248_v18 = vpop.f32.mrb[38].mxu0  ;;  %10902 = vst [vmem:[#allocation50_spill] sm:$0xff] %v7263_v28 }
 0x1b6   :  { %10897 = vst [vmem:[#allocation46_spill] sm:$0xff] %v7248_v18  ;;  %904 = vperm.xlu1 %5961, %v7088_v14   ;;  %v7251_v1 = vpop.f32.mrb[39].mxu0 }
 0x1b7   :  { %10898 = vst [vmem:[#allocation47_spill] sm:$0xff] %v7251_v1  ;;  %741 = vperm.xlu0 %5968, %v7095_v39  }
 0x1ba   :  { %5962 = vset.pattern.permute.xlu1 %v10894_v43 }
 0x1bb   :  { %736 = vperm.xlu1 %5962, %v7088_v14   ;;  %5971 = vset.pattern.permute.xlu0 %v10899_v29  ;;  %v2117_v38 = vpop.f32.mrb[40].mxu0 }
 0x1bc   :  { %v7260_v4 = vadd.f32 %v2117_v38, %v7224_v45  ;;  %1000 = vperm.xlu0 %5971, %v7097_v40   ;;  %v2119_v18 = vpop.f32.mrb[41].mxu0  ;;  %v7277_v38 = vpop.permute.xlu1 %1397 }
 0x1bd   :  { %v7266_v1 = vadd.f32 %v2119_v18, %v7229_v2  ;;  %v2121_v58 = vpop.f32.mrb[42].mxu0  ;;  %10906 = vst [vmem:[#allocation54_spill] sm:$0xff] %v7277_v38 }
 0x1be   :  { %10901 = vst [vmem:[#allocation49_spill] sm:$0xff] %v7260_v4  ;;  %v7269_v55 = vadd.f32 %v2121_v58, %v7224_v45  ;;  %v2123_v14 = vpop.f32.mrb[43].mxu0  ;;  %v7279_v4 = vpop.permute.xlu0 %1392 }
 0x1bf   :  { %10903 = vst [vmem:[#allocation51_spill] sm:$0xff] %v7266_v1  ;;  %v7272_v52 = vadd.f32 %v2123_v14, %v7229_v2  ;;  %5964 = vset.pattern.permute.xlu1 %v10886_v7  ;;  %10907 = vst [vmem:[#allocation55_spill] sm:$0xff] %v7279_v4 }
 0x1c0   :  { %10904 = vst [vmem:[#allocation52_spill] sm:$0xff] %v7269_v55  ;;  %896 = vperm.xlu1 %5964, %v7090_v21   ;;  %992 = vperm.xlu0 %5971, %v7100_v44  }
 0x1c1   :  { %10905 = vst [vmem:[#allocation53_spill] sm:$0xff] %v7272_v52 }
 0x1c3   :  { %v2127_v18 = vpop.f32.mrb[44].mxu0 }
 0x1c4   :  { %v7282_v1 = vadd.f32 %v2127_v18, %v7224_v45  ;;  %5965 = vset.pattern.permute.xlu1 %v10894_v43  ;;  %5975 = vset.pattern.permute.xlu0 %v10893_v19  ;;  %v7286_v58 = vpop.f32.mrb[45].mxu0  ;;  %v7296_v18 = vpop.permute.xlu1 %1407 }
 0x1c5   :  { %10909 = vst [vmem:[#allocation57_spill] sm:$0xff] %v7286_v58  ;;  %726 = vperm.xlu1 %5965, %v7090_v21   ;;  %832 = vperm.xlu0 %5975, %v7100_v44   ;;  %v2131_v14 = vpop.f32.mrb[46].mxu0  ;;  %10912 = vst [vmem:[#allocation60_spill] sm:$0xff] %v7296_v18 }
 0x1c6   :  { %10908 = vst [vmem:[#allocation56_spill] sm:$0xff] %v7282_v1  ;;  %v7291_v52 = vadd.f32 %v2131_v14, %v7224_v45  ;;  %v2133_v55 = vpop.f32.mrb[47].mxu0  ;;  %v7298_v1 = vpop.permute.xlu0 %1402 }
 0x1c7   :  { %v7294_v49 = vadd.f32 %v2133_v55, %v7229_v2  ;;  %10913 = vst [vmem:[#allocation61_spill] sm:$0xff] %v7298_v1 }
 0x1c8   :  { %10910 = vst [vmem:[#allocation58_spill] sm:$0xff] %v7291_v52 }
 0x1c9   :  { %10911 = vst [vmem:[#allocation59_spill] sm:$0xff] %v7294_v49  ;;  %5966 = vset.pattern.permute.xlu1 %v10899_v29  ;;  %852 = vperm.xlu0 %5975, %v7104_v16   ;;  %v7310_v49 = vpop.permute.xlu1 %1417 }
 0x1ca   :  { %996 = vperm.xlu1 %5966, %v7093_v22   ;;  %10916 = vst [vmem:[#allocation64_spill] sm:$0xff] %v7310_v49  ;;  %v7317_v41 = vpop.permute.xlu0 %1412 }
 0x1cb   :  { %v2137_v21 = vpop.f32.mrb[48].mxu0  ;;  %10918 = vst [vmem:[#allocation66_spill] sm:$0xff] %v7317_v41 }
 0x1cc   :  { %v7304_v58 = vadd.f32 %v2137_v21, %v7224_v45  ;;  %v2139_v14 = vpop.f32.mrb[49].mxu0 }
 0x1cd   :  { %v7307_v52 = vadd.f32 %v2139_v14, %v7229_v2  ;;  %5979 = vset.pattern.permute.xlu0 %v10886_v7  ;;  %v2141_v55 = vpop.f32.mrb[50].mxu0 }
 0x1ce   :  { %10914 = vst [vmem:[#allocation62_spill] sm:$0xff] %v7304_v58  ;;  %v7313_v46 = vadd.f32 %v2141_v55, %v7224_v45  ;;  %988 = vperm.xlu1 %5966, %v7095_v39   ;;  %932 = vperm.xlu0 %5979, %v7104_v16   ;;  %v2143_v22 = vpop.f32.mrb[51].mxu0  ;;  %v7326_v55 = vpop.permute.xlu1 %1427 }
 0x1cf   :  { %10915 = vst [vmem:[#allocation63_spill] sm:$0xff] %v7307_v52  ;;  %v7320_v21 = vadd.f32 %v2143_v22, %v7229_v2  ;;  %10920 = vst [vmem:[#allocation68_spill] sm:$0xff] %v7326_v55  ;;  %v7331_v52 = vpop.permute.xlu0 %1422 }
 0x1d0   :  { %10917 = vst [vmem:[#allocation65_spill] sm:$0xff] %v7313_v46  ;;  %10922 = vst [vmem:[#allocation70_spill] sm:$0xff] %v7331_v52 }
 0x1d1   :  { %10919 = vst [vmem:[#allocation67_spill] sm:$0xff] %v7320_v21 }
 0x1d2   :  { %5969 = vset.pattern.permute.xlu1 %v10893_v19  ;;  %5980 = vset.pattern.permute.xlu0 %v10894_v43 }
 0x1d3   :  { %828 = vperm.xlu1 %5969, %v7095_v39   ;;  %771 = vperm.xlu0 %5980, %v7104_v16   ;;  %v2147_v14 = vpop.f32.mrb[52].mxu0 }
 0x1d4   :  { %v7329_v46 = vadd.f32 %v2147_v14, %v7224_v45  ;;  %v2149_v58 = vpop.f32.mrb[53].mxu0  ;;  %v7345_v14 = vpop.permute.xlu1 %1437 }
 0x1d5   :  { %v7334_v22 = vadd.f32 %v2149_v58, %v7229_v2  ;;  %v2151_v21 = vpop.f32.mrb[54].mxu0  ;;  %10926 = vst [vmem:[#allocation74_spill] sm:$0xff] %v7345_v14 }
 0x1d6   :  { %10921 = vst [vmem:[#allocation69_spill] sm:$0xff] %v7329_v46  ;;  %v7337_v31 = vadd.f32 %v2151_v21, %v7224_v45  ;;  %v2153_v5 = vpop.f32.mrb[55].mxu0  ;;  %v7347_v46 = vpop.permute.xlu0 %1432 }
 0x1d7   :  { %10923 = vst [vmem:[#allocation71_spill] sm:$0xff] %v7334_v22  ;;  %v7340_v42 = vadd.f32 %v2153_v5, %v7229_v2  ;;  %5970 = vset.pattern.permute.xlu1 %v10886_v7  ;;  %761 = vperm.xlu0 %5980, %v7107_v20   ;;  %10927 = vst [vmem:[#allocation75_spill] sm:$0xff] %v7347_v46 }
 0x1d8   :  { %10924 = vst [vmem:[#allocation72_spill] sm:$0xff] %v7337_v31  ;;  %908 = vperm.xlu1 %5970, %v7095_v39  }
 0x1d9   :  { %10925 = vst [vmem:[#allocation73_spill] sm:$0xff] %v7340_v42 }
 0x1db   :  { %5983 = vset.pattern.permute.xlu0 %v10899_v29  ;;  %v2157_v58 = vpop.f32.mrb[56].mxu0 }
 0x1dc   :  { %v7351_v21 = vadd.f32 %v2157_v58, %v7224_v45  ;;  %5972 = vset.pattern.permute.xlu1 %v10893_v19  ;;  %1016 = vperm.xlu0 %5983, %v7109_v26   ;;  %v2159_v5 = vpop.f32.mrb[57].mxu0  ;;  %v7366_v58 = vpop.permute.xlu1 %1447 }
 0x1dd   :  { %v7356_v42 = vadd.f32 %v2159_v5, %v7229_v2  ;;  %840 = vperm.xlu1 %5972, %v7097_v40   ;;  %v2161_v39 = vpop.f32.mrb[58].mxu0  ;;  %10932 = vst [vmem:[#allocation80_spill] sm:$0xff] %v7366_v58 }
 0x1de   :  { %10928 = vst [vmem:[#allocation76_spill] sm:$0xff] %v7351_v21  ;;  %v7360_v31 = vadd.f32 %v2161_v39, %v7224_v45  ;;  %v2163_v22 = vpop.f32.mrb[59].mxu0  ;;  %v7368_v21 = vpop.permute.xlu0 %1442 }
 0x1df   :  { %10929 = vst [vmem:[#allocation77_spill] sm:$0xff] %v7356_v42  ;;  %v7363_v25 = vadd.f32 %v2163_v22, %v7229_v2  ;;  %10933 = vst [vmem:[#allocation81_spill] sm:$0xff] %v7368_v21 }
 0x1e0   :  { %10930 = vst [vmem:[#allocation78_spill] sm:$0xff] %v7360_v31  ;;  %1008 = vperm.xlu0 %5983, %v7111_v50   ;;  %v7384_v24 = vpop.permute.xlu1 %1457 }
 0x1e1   :  { %10931 = vst [vmem:[#allocation79_spill] sm:$0xff] %v7363_v25  ;;  %5973 = vset.pattern.permute.xlu1 %v10886_v7  ;;  %10937 = vst [vmem:[#allocation85_spill] sm:$0xff] %v7384_v24 }
 0x1e2   :  { %920 = vperm.xlu1 %5973, %v7097_v40   ;;  %v7386_v21 = vpop.permute.xlu0 %1452 }
 0x1e3   :  { %v2167_v5 = vpop.f32.mrb[60].mxu0  ;;  %10938 = vst [vmem:[#allocation86_spill] sm:$0xff] %v7386_v21 }
 0x1e4   :  { %v7373_v42 = vadd.f32 %v2167_v5, %v7224_v45  ;;  %5987 = vset.pattern.permute.xlu0 %v10893_v19  ;;  %v2169_v39 = vpop.f32.mrb[61].mxu0 }
 0x1e5   :  { %v7377_v22 = vadd.f32 %v2169_v39, %v7229_v2  ;;  %848 = vperm.xlu0 %5987, %v7111_v50   ;;  %v2171_v25 = vpop.f32.mrb[62].mxu0  ;;  %v7395_v39 = vadd.f32 %v7125_v48, %v7157_v9  ;;  %v7409_v48 = vadd.f32 %v7157_v9, %v7129_v56 }
 0x1e6   :  { %10934 = vst [vmem:[#allocation82_spill] sm:$0xff] %v7373_v42  ;;  %v7381_v31 = vadd.f32 %v2171_v25, %v7224_v45  ;;  %5974 = vset.pattern.permute.xlu1 %v10894_v43  ;;  %v2173_v58 = vpop.f32.mrb[63].mxu0 }
 0x1e7   :  { %10935 = vst [vmem:[#allocation83_spill] sm:$0xff] %v7377_v22  ;;  %v7389_v5 = vadd.f32 %v2173_v58, %v7229_v2  ;;  %756 = vperm.xlu1 %5974, %v7097_v40  }
 0x1e8   :  { %10936 = vst [vmem:[#allocation84_spill] sm:$0xff] %v7381_v31 }
 0x1e9   :  { %10939 = vst [vmem:[#allocation87_spill] sm:$0xff] %v7389_v5  ;;  %5990 = vset.pattern.permute.xlu0 %v10894_v43 }
 0x1eb   :  { %v965_v25 = vpop.permute.xlu1 %964  ;;  %5976 = vset.pattern.permute.xlu1 %v10886_v7  ;;  %v805_v31 = vpop.permute.xlu0 %804 }
 0x1ec   :  { %v861_v22 = vmul.f32 %v805_v31, %v7395_v39  ;;  %912 = vperm.xlu1 %5976, %v7100_v44   ;;  %v1021_v35 = vmul.f32 %v965_v25, %v7395_v39 }
 0x1ee   :  { %1055 = vrot.lane.b32.xlu0 %v861_v22, %s6371_s4 }
 0x1f0   :  { %v7401_v58 = vpop.permute.xlu1 %711  ;;  %5977 = vset.pattern.permute.xlu1 %v10894_v43  ;;  %v7404_v40 = vpop.permute.xlu0 %884 }
 0x1f1   :  { %746 = vperm.xlu1 %5977, %v7100_v44   ;;  %v7421_v44 = vadd.f32 %v7132_v60, %v7157_v9  ;;  %v7436_v60 = vadd.f32 %v7146_v15, %v7157_v9  ;;  %v941_v51 = vmul.f32 %v7404_v40, %v7395_v39 }
 0x1f5   :  { %v797_v5 = vpop.permute.xlu1 %796  ;;  %5978 = vset.pattern.permute.xlu1 %v10899_v29  ;;  %v957_v31 = vpop.permute.xlu0 %956 }
 0x1f6   :  { %v1019_v42 = vmul.f32 %v957_v31, %v7409_v48  ;;  %1012 = vperm.xlu1 %5978, %v7104_v16   ;;  %v859_v2 = vmul.f32 %v797_v5, %v7409_v48 }
 0x1f8   :  { %1131 = vrot.lane.b32.xlu0 %v1019_v42, %s6371_s4 }
 0x1f9   :  { %v969_v22 = vpop.permute.xlu0 %968 }
 0x1fa   :  { %v7416_v45 = vpop.permute.xlu1 %876  ;;  %1004 = vperm.xlu1 %5978, %v7107_v20   ;;  %v1022_v56 = vmul.f32 %v969_v22, %v7421_v44 }
 0x1fc   :  { %1051 = vrot.lane.b32.xlu0 %v859_v2, %s6371_s4 }
 0x1fe   :  { %5981 = vset.pattern.permute.xlu1 %v10893_v19  ;;  %v801_v16 = vpop.permute.xlu0 %800 }
 0x1ff   :  { %v7426_v31 = vpop.permute.xlu1 %701  ;;  %844 = vperm.xlu1 %5981, %v7107_v20  }
 0x200   :  { %1137 = vrot.lane.b32.xlu0 %v1022_v56, %s6371_s4 }
 0x203   :  { %5982 = vset.pattern.permute.xlu1 %v10886_v7  ;;  %v7431_v42 = vpop.permute.xlu0 %706 }
 0x204   :  { %v809_v5 = vpop.permute.xlu1 %808  ;;  %924 = vperm.xlu1 %5982, %v7107_v20  }
 0x205   :  { %v862_v14 = vmul.f32 %v809_v5, %v7421_v44 }
 0x208   :  { %5984 = vset.pattern.permute.xlu1 %v10893_v19  ;;  %v821_v2 = vpop.permute.xlu0 %820 }
 0x209   :  { %v865_v22 = vmul.f32 %v821_v2, %v7436_v60  ;;  %v7440_v29 = vpop.permute.xlu1 %888  ;;  %856 = vperm.xlu1 %5984, %v7109_v26  }
 0x20b   :  { %1063 = vrot.lane.b32.xlu0 %v865_v22, %s6371_s4 }
 0x20d   :  { %5985 = vset.pattern.permute.xlu1 %v10886_v7  ;;  %v7445_v56 = vpop.permute.xlu0 %900 }
 0x20e   :  { %v7447_v20 = vpop.permute.xlu1 %716  ;;  %936 = vperm.xlu1 %5985, %v7109_v26  }
 0x212   :  { %5986 = vset.pattern.permute.xlu1 %v10894_v43  ;;  %v7451_v15 = vpop.permute.xlu0 %731 }
 0x213   :  { %v961_v24 = vpop.permute.xlu1 %960  ;;  %776 = vperm.xlu1 %5986, %v7109_v26   ;;  %v7465_v26 = vadd.f32 %v7157_v9, %v7150_v17 }
 0x216   :  { %v7454_v2 = vpop.permute.xlu0 %721 }
 0x217   :  { %5988 = vset.pattern.permute.xlu1 %v10886_v7 }
 0x218   :  { %v7457_v22 = vpop.permute.xlu1 %880  ;;  %928 = vperm.xlu1 %5988, %v7111_v50  }
 0x21b   :  { %v985_v21 = vpop.permute.xlu0 %984 }
 0x21c   :  { %5989 = vset.pattern.permute.xlu1 %v10894_v43 }
 0x21d   :  { %v981_v33 = vpop.permute.xlu1 %980  ;;  %766 = vperm.xlu1 %5989, %v7111_v50   ;;  %v7474_v50 = vadd.f32 %v7157_v9, %v7136_v61 }
 0x21f   :  { %v977_v55 = vpop.permute.xlu0 %976  ;;  %v1020_v25 = vmul.f32 %v961_v24, %v7474_v50  ;;  %v940_v53 = vmul.f32 %v7457_v22, %v7474_v50 }
 0x221   :  { %v973_v59 = vpop.permute.xlu1 %972  ;;  %1135 = vrot.lane.b32.xlu1 %v1021_v35, %s6371_s4 }
 0x222   :  { %v1023_v7 = vmul.f32 %v973_v59, %v7465_v26  ;;  %5991 = vset.pattern.permute.xlu1 %v10893_v19  ;;  %v7481_v59 = vadd.f32 %v7152_v8, %v7157_v9 }
 0x224   :  { %1139 = vrot.lane.b32.xlu0 %v1023_v7, %s6371_s4  ;;  %v817_v43 = vpop.permute.xlu0 %816  ;;  %v860_v7 = vmul.f32 %v801_v16, %v7474_v50  ;;  %v1026_v61 = vmul.f32 %v985_v21, %v7481_v59 }
 0x225   :  { %1057 = vrot.lane.b32.xlu1 %v862_v14, %s6371_s4  ;;  %v1025_v14 = vmul.f32 %v981_v33, %v7436_v60 }
 0x226   :  { %v813_v17 = vpop.permute.xlu1 %812 }
 0x227   :  { %v863_v35 = vmul.f32 %v813_v17, %v7465_v26 }
 0x228   :  { %v837_v11 = vpop.permute.xlu0 %836 }
 0x229   :  { %1133 = vrot.lane.b32.xlu1 %v1020_v25, %s6371_s4  ;;  %1059 = vrot.lane.b32.xlu0 %v863_v35, %s6371_s4  ;;  %v869_v8 = vmul.f32 %v837_v11, %v7176_v62  ;;  %v1024_v25 = vmul.f32 %v977_v55, %v7163_v37  ;;  %v864_v35 = vmul.f32 %v817_v43, %v7163_v37 }
 0x22b   :  { %v7487_v5 = vpop.permute.xlu1 %892 }
 0x22d   :  { %1053 = vrot.lane.b32.xlu1 %v860_v7, %s6371_s4  ;;  %1145 = vrot.lane.b32.xlu0 %v1026_v61, %s6371_s4  ;;  %v7491_v24 = vpop.permute.xlu0 %916 }
 0x230   :  { %v825_v9 = vpop.permute.xlu1 %824 }
 0x231   :  { %1143 = vrot.lane.b32.xlu1 %v1025_v14, %s6371_s4  ;;  %1071 = vrot.lane.b32.xlu0 %v869_v8, %s6371_s4  ;;  %v866_v16 = vmul.f32 %v825_v9, %v7481_v59 }
 0x232   :  { %v7498_v21 = vpop.permute.xlu0 %751 }
 0x235   :  { %v7500_v17 = vpop.permute.xlu1 %904  ;;  %1065 = vrot.lane.b32.xlu1 %v866_v16, %s6371_s4 }
 0x236   :  { %v7505_v33 = vpop.permute.xlu0 %741 }
 0x239   :  { %1141 = vrot.lane.b32.xlu1 %v1024_v25, %s6371_s4 }
 0x23a   :  { %v7507_v11 = vpop.permute.xlu1 %736 }
 0x23b   :  { %v1001_v61 = vpop.permute.xlu0 %1000 }
 0x23c   :  { %v1030_v46 = vmul.f32 %v1001_v61, %v7183_v54 }
 0x23d   :  { %1061 = vrot.lane.b32.xlu1 %v864_v35, %s6371_s4 }
 0x23f   :  { %v7511_v7 = vpop.permute.xlu1 %896  ;;  %v993_v8 = vpop.permute.xlu0 %992 }
 0x244   :  { %v7513_v14 = vpop.permute.xlu1 %726  ;;  %v833_v55 = vpop.permute.xlu0 %832 }
 0x248   :  { %v853_v43 = vpop.permute.xlu0 %852 }
 0x249   :  { %v997_v9 = vpop.permute.xlu1 %996 }
 0x24a   :  { %v1029_v16 = vmul.f32 %v997_v9, %v7176_v62  ;;  %v873_v9 = vmul.f32 %v853_v43, %v7205_v27 }
 0x24c   :  { %1151 = vrot.lane.b32.xlu1 %v1029_v16, %s6371_s4 }
 0x24d   :  { %v989_v25 = vpop.permute.xlu1 %988  ;;  %v7524_v0 = vpop.permute.xlu0 %932 }
 0x24e   :  { %v1027_v19 = vmul.f32 %v989_v25, %v7179_v13 }
 0x250   :  { %1147 = vrot.lane.b32.xlu0 %v1027_v19, %s6371_s4 }
 0x252   :  { %v829_v52 = vpop.permute.xlu1 %828  ;;  %v7530_v19 = vpop.permute.xlu0 %771 }
 0x253   :  { %v867_v35 = vmul.f32 %v829_v52, %v7179_v13  ;;  %v1028_v52 = vmul.f32 %v993_v8, %v7191_v36 }
 0x255   :  { %1067 = vrot.lane.b32.xlu0 %v867_v35, %s6371_s4 }
 0x256   :  { %v7537_v35 = vpop.permute.xlu0 %761 }
 0x257   :  { %v7522_v57 = vpop.permute.xlu1 %908 }
 0x259   :  { %1153 = vrot.lane.b32.xlu0 %v1030_v46, %s6371_s4  ;;  %v868_v46 = vmul.f32 %v833_v55, %v7191_v36 }
 0x25c   :  { %v841_v16 = vpop.permute.xlu1 %840 }
 0x25d   :  { %v870_v25 = vmul.f32 %v841_v16, %v7183_v54  ;;  %1079 = vrot.lane.b32.xlu0 %v873_v9, %s6371_s4  ;;  %v1017_v16 = vpop.permute.xlu0 %1016 }
 0x25e   :  { %v1034_v12 = vmul.f32 %v1017_v16, %v7216_v10 }
 0x25f   :  { %1073 = vrot.lane.b32.xlu1 %v870_v25, %s6371_s4 }
 0x261   :  { %v7534_v61 = vpop.permute.xlu1 %920  ;;  %v1009_v18 = vpop.permute.xlu0 %1008 }
 0x263   :  { %1149 = vrot.lane.b32.xlu1 %v1028_v52, %s6371_s4 }
 0x265   :  { %v849_v8 = vpop.permute.xlu0 %848 }
 0x266   :  { %v7540_v43 = vpop.permute.xlu1 %756 }
 0x267   :  { %1069 = vrot.lane.b32.xlu1 %v868_v46, %s6371_s4 }
 0x269   :  { %v7550_v55 = vpop.permute.xlu0 %1055 }
 0x26b   :  { %v7543_v9 = vpop.permute.xlu1 %912 }
 0x26d   :  { %v1132_v41 = vpop.permute.xlu0 %1131 }
 0x270   :  { %v7545_v63 = vpop.permute.xlu1 %746 }
 0x275   :  { %v1013_v25 = vpop.permute.xlu1 %1012 }
 0x276   :  { %v1033_v49 = vmul.f32 %v1013_v25, %v7205_v27  ;;  %v7560_v25 = vpop.permute.xlu0 %1051 }
 0x278   :  { %1159 = vrot.lane.b32.xlu1 %v1033_v49, %s6371_s4  ;;  %v1032_v49 = vmul.f32 %v1009_v18, %v7222_v32 }
 0x279   :  { %v1005_v52 = vpop.permute.xlu1 %1004 }
 0x27a   :  { %v1031_v3 = vmul.f32 %v1005_v52, %v7213_v23  ;;  %v1138_v16 = vpop.permute.xlu0 %1137 }
 0x27c   :  { %1155 = vrot.lane.b32.xlu1 %v1031_v3, %s6371_s4  ;;  %v872_v3 = vmul.f32 %v849_v8, %v7222_v32 }
 0x27e   :  { %v845_v46 = vpop.permute.xlu1 %844 }
 0x27f   :  { %v871_v1 = vmul.f32 %v845_v46, %v7213_v23  ;;  %v942_v46 = vmul.f32 %v7440_v29, %v7421_v44 }
 0x281   :  { %1075 = vrot.lane.b32.xlu0 %v871_v1, %s6371_s4 }
 0x283   :  { %v7556_v47 = vpop.permute.xlu1 %924 }
 0x285   :  { %1161 = vrot.lane.b32.xlu0 %v1034_v12, %s6371_s4  ;;  %v1182_v12 = vadd.f32 %v1138_v16, %v942_v46 }
 0x288   :  { %v857_v52 = vpop.permute.xlu1 %856 }
 0x289   :  { %v874_v30 = vmul.f32 %v857_v52, %v7216_v10  ;;  %1157 = vrot.lane.b32.xlu0 %v1032_v49, %s6371_s4  ;;  %v7576_v49 = vpop.permute.xlu0 %1063 }
 0x28b   :  { %1081 = vrot.lane.b32.xlu1 %v874_v30, %s6371_s4 }
 0x28d   :  { %v7566_v1 = vpop.permute.xlu1 %936 }
 0x28f   :  { %1077 = vrot.lane.b32.xlu1 %v872_v3, %s6371_s4  ;;  %v939_v3 = vmul.f32 %v7416_v45, %v7409_v48 }
 0x292   :  { %v7571_v18 = vpop.permute.xlu1 %776 }
 0x293   :  { %1217 = vrot.lane.b32.xlu1 %v1182_v12, %s6372_s30  ;;  %v1179_v12 = vadd.f32 %v1132_v41, %v939_v3  ;;  %v943_v3 = vmul.f32 %v7487_v5, %v7465_v26  ;;  %v949_v5 = vmul.f32 %v7491_v24, %v7176_v62 }
 0x296   :  { %v1140_v8 = vpop.permute.xlu0 %1139 }
 0x297   :  { %v7574_v52 = vpop.permute.xlu1 %928 }
 0x29b   :  { %v7585_v16 = vpop.permute.xlu0 %1059 }
 0x29c   :  { %v7578_v30 = vpop.permute.xlu1 %766 }
 0x29f   :  { %v1146_v40 = vpop.permute.xlu0 %1145 }
 0x2a0   :  { %v1136_v38 = vpop.permute.xlu1 %1135 }
 0x2a1   :  { %v1181_v29 = vadd.f32 %v1136_v38, %v941_v51  ;;  %v946_v51 = vmul.f32 %v7500_v17, %v7481_v59 }
 0x2a3   :  { %1215 = vrot.lane.b32.xlu0 %v1181_v29, %s6372_s30  ;;  %v1186_v38 = vadd.f32 %v1146_v40, %v946_v51  ;;  %v945_v29 = vmul.f32 %v7445_v56, %v7436_v60  ;;  %v7611_v40 = vpop.permute.xlu0 %1071 }
 0x2a4   :  { %v7587_v46 = vpop.permute.xlu1 %1057 }
 0x2a7   :  { %1211 = vrot.lane.b32.xlu0 %v1179_v12, %s6372_s30 }
 0x2a8   :  { %v1134_v28 = vpop.permute.xlu1 %1133 }
 0x2a9   :  { %v1180_v4 = vadd.f32 %v1134_v28, %v940_v53  ;;  %v1183_v28 = vadd.f32 %v1140_v8, %v943_v3  ;;  %v947_v8 = vmul.f32 %v7522_v57, %v7179_v13 }
 0x2ab   :  { %1213 = vrot.lane.b32.xlu1 %v1180_v4, %s6372_s30  ;;  %v944_v4 = vmul.f32 %v7511_v7, %v7163_v37 }
 0x2ac   :  { %v7595_v45 = vpop.permute.xlu1 %1053 }
 0x2af   :  { %1225 = vrot.lane.b32.xlu1 %v1186_v38, %s6372_s30 }
 0x2b0   :  { %v1144_v41 = vpop.permute.xlu1 %1143 }
 0x2b1   :  { %v1185_v22 = vadd.f32 %v1144_v41, %v945_v29 }
 0x2b3   :  { %1223 = vrot.lane.b32.xlu0 %v1185_v22, %s6372_s30  ;;  %v950_v22 = vmul.f32 %v7534_v61, %v7183_v54 }
 0x2b4   :  { %v7603_v53 = vpop.permute.xlu1 %1065 }
 0x2b7   :  { %1219 = vrot.lane.b32.xlu0 %v1183_v28, %s6372_s30 }
 0x2b8   :  { %v1142_v17 = vpop.permute.xlu1 %1141 }
 0x2b9   :  { %v1184_v12 = vadd.f32 %v1142_v17, %v944_v4  ;;  %v948_v4 = vmul.f32 %v7543_v9, %v7191_v36 }
 0x2bb   :  { %1221 = vrot.lane.b32.xlu1 %v1184_v12, %s6372_s30 }
 0x2bc   :  { %v7609_v56 = vpop.permute.xlu1 %1061 }
 0x2c0   :  { %v1152_v51 = vpop.permute.xlu1 %1151 }
 0x2c1   :  { %v1189_v38 = vadd.f32 %v1152_v51, %v949_v5  ;;  %v953_v5 = vmul.f32 %v7524_v0, %v7205_v27 }
 0x2c2   :  { %v1148_v29 = vpop.permute.xlu0 %1147 }
 0x2c3   :  { %1231 = vrot.lane.b32.xlu0 %v1189_v38, %s6372_s30  ;;  %v1187_v7 = vadd.f32 %v1148_v29, %v947_v8  ;;  %v951_v38 = vmul.f32 %v7556_v47, %v7213_v23  ;;  %v7649_v47 = vld [vmem:[%s10941_s26] ss:$0 sm:$0xff] }
 0x2c4   :  { %vm205_vm3 = vcmp.eq.s32.totalorder %v7188_v6, %v7649_v47 }
 0x2c7   :  { %1227 = vrot.lane.b32.xlu0 %v1187_v7, %s6372_s30  ;;  %v7619_v41 = vpop.permute.xlu0 %1067 }
 0x2cb   :  { %v1154_v3 = vpop.permute.xlu0 %1153 }
 0x2cc   :  { %v1190_v28 = vadd.f32 %v1154_v3, %v950_v22  ;;  %v954_v22 = vmul.f32 %v7566_v1, %v7216_v10 }
 0x2ce   :  { %1233 = vrot.lane.b32.xlu1 %v1190_v28, %s6372_s30  ;;  %v7644_v28 = vadd.s32 8, %v7188_v6 }
 0x2cf   :  { %v7636_v8 = vpop.permute.xlu0 %1079 }
 0x2d0   :  { %10940 = vst [vmem:[#allocation88_spill] sm:$0xff] %v7644_v28  ;;  %vm206_vm6 = vcmp.eq.s32.totalorder %v7644_v28, %v7649_v47 }
 0x2d1   :  { %v7624_v24 = vpop.permute.xlu1 %1073  ;;  %vm5373_vm8 = vmpackc.low %vm206_vm6, %vm205_vm3 }
 0x2d5   :  { %v1150_v57 = vpop.permute.xlu1 %1149 }
 0x2d6   :  { %v1188_v17 = vadd.f32 %v1150_v57, %v948_v4  ;;  %v952_v4 = vmul.f32 %v7574_v52, %v7222_v32 }
 0x2d8   :  { %1229 = vrot.lane.b32.xlu1 %v1188_v17, %s6372_s30  ;;  %v10942_v17 = vmov 1.0|1.0  }
 0x2d9   :  { %v7629_v12 = vpop.permute.xlu1 %1069  ;;  %5724 = vmatprep.mubr.msk.bf16.mxu1 %vm5373_vm8, %v10942_v17  ;;  %5814 = vmatprep.mubr.msk.bf16.mxu0 %vm5373_vm8, %v10942_v17 }
 0x2ea   :  { %v1160_v51 = vpop.permute.xlu1 %1159 }
 0x2eb   :  { %v1193_v61 = vadd.f32 %v1160_v51, %v953_v5  ;;  %v781_v51 = vmul.f32 %v7401_v58, %v7395_v39 }
 0x2ed   :  { %1239 = vrot.lane.b32.xlu0 %v1193_v61, %s6372_s30  ;;  %v782_v61 = vmul.f32 %v7447_v20, %v7421_v44 }
 0x2ee   :  { %v1156_v29 = vpop.permute.xlu1 %1155 }
 0x2ef   :  { %v1191_v9 = vadd.f32 %v1156_v29, %v951_v38  ;;  %v1101_v29 = vadd.f32 %v7550_v55, %v781_v51 }
 0x2f1   :  { %1235 = vrot.lane.b32.xlu0 %v1191_v9, %s6372_s30  ;;  %v1102_v9 = vadd.f32 %v7587_v46, %v782_v61  ;;  %v785_v46 = vmul.f32 %v7451_v15, %v7436_v60  ;;  %v786_v61 = vmul.f32 %v7507_v11, %v7481_v59  ;;  %v784_v60 = vmul.f32 %v7513_v14, %v7163_v37 }
 0x2f3   :  { %v7639_v7 = vpop.permute.xlu0 %1075  ;;  %v1104_v11 = vadd.f32 %v7609_v56, %v784_v60  ;;  %v10955_v60 = vmov 0 }
 0x2f7   :  { %v1162_v3 = vpop.permute.xlu0 %1161 }
 0x2f8   :  { %v1194_v0 = vadd.f32 %v1162_v3, %v954_v22 }
 0x2fa   :  { %1241 = vrot.lane.b32.xlu1 %v1194_v0, %s6372_s30 }
 0x2fb   :  { %v1158_v1 = vpop.permute.xlu0 %1157 }
 0x2fc   :  { %v1192_v57 = vadd.f32 %v1158_v1, %v952_v4  ;;  %v779_v1 = vmul.f32 %v7426_v31, %v7409_v48  ;;  %v1105_v31 = vadd.f32 %v7576_v49, %v785_v46 }
 0x2fd   :  { %v7661_v5 = vpop.permute.xlu1 %1081 }
 0x2fe   :  { %1237 = vrot.lane.b32.xlu1 %v1192_v57, %s6372_s30  ;;  %v780_v57 = vmul.f32 %v7431_v42, %v7474_v50  ;;  %v1099_v39 = vadd.f32 %v7560_v25, %v779_v1  ;;  %v1106_v42 = vadd.f32 %v7603_v53, %v786_v61  ;;  %v788_v1 = vmul.f32 %v7545_v63, %v7191_v36 }
 0x2ff   :  { %v794_v36 = vmul.f32 %v7571_v18, %v7216_v10  ;;  %v188_v61 = vadd.s32 24, %v7188_v6 }
 0x300   :  { %v1100_v58 = vadd.f32 %v7595_v45, %v780_v57 }
 0x301   :  { %v7663_v52 = vpop.permute.xlu1 %1077  ;;  %vm208_vm12 = vcmp.eq.s32.totalorder %v188_v61, %v7649_v47 }
 0x305   :  { %v1218_v38 = vpop.permute.xlu1 %1217 }
 0x306   :  { %v1262_v3 = vadd.f32 %v1218_v38, %v1102_v9  ;;  %v783_v38 = vmul.f32 %v7454_v2, %v7465_v26  ;;  %v790_v2 = vmul.f32 %v7540_v43, %v7183_v54  ;;  %v1108_v54 = vadd.f32 %v7629_v12, %v788_v1  ;;  %v10969_v1 = vld [vmem:[#allocation48_spill] sm:$0xff] }
 0x307   :  { %v791_v12 = vmul.f32 %v7537_v35, %v7213_v23  ;;  %v189_v23 = vadd.s32 32, %v7188_v6  ;;  %v10943_v35 = vmov 0 }
 0x308   :  { %v1103_v59 = vadd.f32 %v7585_v16, %v783_v38  ;;  %v1110_v14 = vadd.f32 %v7624_v24, %v790_v2  ;;  %v198_v38 = vadd.s32 104, %v7188_v6  ;;  %v10965_v2 = vld [vmem:[#allocation50_spill] sm:$0xff] }
 0x309   :  { %vm209_vm15 = vcmp.eq.s32.totalorder %v189_v23, %v7649_v47 }
 0x315   :  { %v1216_v22 = vpop.permute.xlu0 %1215 }
 0x316   :  { %v1261_v0 = vadd.f32 %v1216_v22, %v1101_v29  ;;  %v789_v22 = vmul.f32 %v7498_v21, %v7176_v62 }
 0x318   :  { %v1276_v4 = vpack.c.bf16 %v1262_v3, %v1261_v0  ;;  %v1109_v26 = vadd.f32 %v7611_v40, %v789_v22 }
 0x319   :  { %v1212_v28 = vpop.permute.xlu0 %1211 }
 0x31a   :  { %v1259_v20 = vadd.f32 %v1212_v28, %v1099_v39 }
 0x31d   :  { %v1214_v44 = vpop.permute.xlu1 %1213 }
 0x31e   :  { %v1260_v55 = vadd.f32 %v1214_v44, %v1100_v58  ;;  %v792_v58 = vmul.f32 %v7578_v30, %v7222_v32  ;;  %v190_v32 = vadd.s32 40, %v7188_v6  ;;  %v10946_v30 = vmov 0 }
 0x320   :  { %v1275_v51 = vpack.c.bf16 %v1260_v55, %v1259_v20  ;;  %vm210_vm3 = vcmp.eq.s32.totalorder %v190_v32, %v7649_v47 }
 0x321   :  { %v1226_v48 = vpop.permute.xlu1 %1225  ;;  %vm7725_vm8 = vmpackc.low %vm210_vm3, %vm209_vm15 }
 0x322   :  { %5708 = vmatprep.subr.bf16.mxu1 %v1275_v51  ;;  %v1266_v25 = vadd.f32 %v1226_v48, %v1106_v42  ;;  %v10947_v30 = vsel %vm7725_vm8, 4294967295, %v10946_v30  ;;  %v193_v48 = vadd.s32 64, %v7188_v6  ;;  %v10949_v42 = vmov 0 }
 0x323   :  { %5709 = vmatpush3.bf16.msra.mxu1 %v1275_v51  ;;  %v1111_v51 = vadd.f32 %v7639_v7, %v791_v12  ;;  %10948 = vst [vmem:[#allocation90_spill] sm:$0xff] %v10947_v30  ;;  %v191_v7 = vadd.s32 48, %v7188_v6 }
 0x324   :  { %5710 = vmatprep.subr.bf16.mxu1 %v1276_v4  ;;  %vm213_vm15 = vcmp.eq.s32.totalorder %v193_v48, %v7649_v47  ;;  %v10977_v48 = vld [vmem:[#allocation60_spill] sm:$0xff] }
 0x325   :  { %v1224_v50 = vpop.permute.xlu0 %1223 }
 0x326   :  { %v1265_v45 = vadd.f32 %v1224_v50, %v1105_v31  ;;  %v194_v31 = vadd.s32 72, %v7188_v6  ;;  %v10952_v50 = vmov 0 }
 0x327   :  { %5711 = vmatpush3.bf16.msra.mxu1 %v1276_v4  ;;  %v787_v4 = vmul.f32 %v7505_v33, %v7179_v13  ;;  %v793_v13 = vmul.f32 %v7530_v19, %v7205_v27  ;;  %v1114_v33 = vadd.f32 %v7661_v5, %v794_v36  ;;  %v1112_v27 = vadd.f32 %v7663_v52, %v792_v58  ;;  %v10972_v58 = vld [vmem:[#allocation66_spill] sm:$0xff] }
 0x328   :  { %v1278_v28 = vpack.c.bf16 %v1266_v25, %v1265_v45  ;;  %v187_v5 = vadd.s32 16, %v7188_v6  ;;  %v192_v52 = vadd.s32 56, %v7188_v6  ;;  %vm214_vm3 = vcmp.eq.s32.totalorder %v194_v31, %v7649_v47 }
 0x329   :  { %v1220_v15 = vpop.permute.xlu0 %1219  ;;  %v1107_v62 = vadd.f32 %v7619_v41, %v787_v4  ;;  %v1113_v63 = vadd.f32 %v7636_v8, %v793_v13  ;;  %vm7747_vm0 = vmpackc.low %vm214_vm3, %vm213_vm15  ;;  %v195_v25 = vadd.s32 80, %v7188_v6  ;;  %v196_v45 = vadd.s32 88, %v7188_v6  ;;  %v10968_v4 = vld [vmem:[#allocation22_spill] sm:$0xff] }
 0x32a   :  { %v1263_v29 = vadd.f32 %v1220_v15, %v1103_v59  ;;  %vm207_vm11 = vcmp.eq.s32.totalorder %v187_v5, %v7649_v47  ;;  %v10953_v50 = vsel %vm7747_vm0, 4294967295, %v10952_v50  ;;  %vm218_vm3 = vcmp.eq.s32.totalorder %v198_v38, %v7649_v47  ;;  %v10975_v5 = vld [vmem:[#allocation64_spill] sm:$0xff] }
 0x32b   :  { %vm7721_vm6 = vmpackc.low %vm208_vm12, %vm207_vm11  ;;  %vm211_vm11 = vcmp.eq.s32.totalorder %v191_v7, %v7649_v47  ;;  %vm212_vm12 = vcmp.eq.s32.totalorder %v192_v52, %v7649_v47  ;;  %10954 = vst [vmem:[#allocation92_spill] sm:$0xff] %v10953_v50  ;;  %v10958_v15 = vmov 0  ;;  %v199_v59 = vadd.s32 112, %v7188_v6  ;;  %v10976_v7 = vld [vmem:[#allocation26_spill] sm:$0xff] }
 0x32c   :  { %v10944_v35 = vsel %vm7721_vm6, 4294967295, %v10943_v35  ;;  %vm7743_vm2 = vmpackc.low %vm212_vm12, %vm211_vm11  ;;  %vm215_vm11 = vcmp.eq.s32.totalorder %v195_v25, %v7649_v47  ;;  %vm216_vm12 = vcmp.eq.s32.totalorder %v196_v45, %v7649_v47  ;;  %v10978_v45 = vld [vmem:[#allocation27_spill] sm:$0xff] }
 0x32d   :  { %v1222_v49 = vpop.permute.xlu1 %1221  ;;  %10945 = vst [vmem:[#allocation89_spill] sm:$0xff] %v10944_v35  ;;  %v10950_v42 = vsel %vm7743_vm2, 4294967295, %v10949_v42  ;;  %v11058_v35 = vmov 13  }
 0x32e   :  { %v1264_v53 = vadd.f32 %v1222_v49, %v1104_v11  ;;  %10951 = vst [vmem:[#allocation91_spill] sm:$0xff] %v10950_v42  ;;  %v200_v11 = vadd.s32 120, %v7188_v6  ;;  %v10961_v49 = vmov 0 }
 0x330   :  { %v1277_v9 = vpack.c.bf16 %v1264_v53, %v1263_v29  ;;  %v10964_v53 = vld [vmem:[#allocation55_spill] sm:$0xff] }
 0x332   :  { %5712 = vmatprep.subr.bf16.mxu1 %v1277_v9 }
 0x333   :  { %5713 = vmatpush3.bf16.msra.mxu1 %v1277_v9 }
 0x334   :  { %5714 = vmatprep.subr.bf16.mxu1 %v1278_v28 }
 0x335   :  { %v1232_v37 = vpop.permute.xlu0 %1231 }
 0x336   :  { %v1269_v56 = vadd.f32 %v1232_v37, %v1109_v26 }
 0x337   :  { %5715 = vmatpush3.bf16.msra.mxu1 %v1278_v28  ;;  %v197_v28 = vadd.s32 96, %v7188_v6 }
 0x339   :  { %v1228_v57 = vpop.permute.xlu0 %1227  ;;  %vm217_vm15 = vcmp.eq.s32.totalorder %v197_v28, %v7649_v47 }
 0x33a   :  { %v1267_v43 = vadd.f32 %v1228_v57, %v1107_v62 }
 0x340   :  { %v1234_v16 = vpop.permute.xlu1 %1233 }
 0x341   :  { %v1270_v3 = vadd.f32 %v1234_v16, %v1110_v14  ;;  %v10966_v14 = vld [vmem:[#allocation24_spill] sm:$0xff] }
 0x343   :  { %v1280_v0 = vpack.c.bf16 %v1270_v3, %v1269_v56  ;;  %v10967_v56 = vld [vmem:[#allocation54_spill] sm:$0xff] }
 0x34a   :  { %v1230_v21 = vpop.permute.xlu1 %1229 }
 0x34b   :  { %v1268_v40 = vadd.f32 %v1230_v21, %v1108_v54  ;;  %v10970_v54 = vld [vmem:[#allocation23_spill] sm:$0xff] }
 0x34d   :  { %v1279_v39 = vpack.c.bf16 %v1268_v40, %v1267_v43  ;;  %v10971_v40 = vld [vmem:[#allocation21_spill] sm:$0xff] }
 0x34f   :  { %5716 = vmatprep.subr.bf16.mxu1 %v1279_v39 }
 0x350   :  { %5717 = vmatpush3.bf16.msra.mxu1 %v1279_v39 }
 0x351   :  { %5718 = vmatprep.subr.bf16.mxu1 %v1280_v0 }
 0x354   :  { %5719 = vmatpush3.bf16.msra.mxu1 %v1280_v0 }
 0x35f   :  { %v1240_v24 = vpop.permute.xlu0 %1239 }
 0x360   :  { %v1273_v44 = vadd.f32 %v1240_v24, %v1113_v63 }
 0x363   :  { %v1236_v55 = vpop.permute.xlu0 %1235 }
 0x364   :  { %v1271_v18 = vadd.f32 %v1236_v55, %v1111_v51 }
 0x36c   :  { %v1242_v41 = vpop.permute.xlu1 %1241 }
 0x36d   :  { %v1274_v20 = vadd.f32 %v1242_v41, %v1114_v33 }
 0x36f   :  { %v1282_v19 = vpack.c.bf16 %v1274_v20, %v1273_v44 }
 0x370   :  { %v1238_v10 = vpop.permute.xlu1 %1237 }
 0x371   :  { %v1272_v8 = vadd.f32 %v1238_v10, %v1112_v27  ;;  %v10973_v27 = vld [vmem:[#allocation61_spill] sm:$0xff] }
 0x373   :  { %v1281_v46 = vpack.c.bf16 %v1272_v8, %v1271_v18  ;;  %v10974_v8 = vld [vmem:[#allocation28_spill] sm:$0xff] }
 0x375   :  { %5720 = vmatprep.subr.bf16.mxu1 %v1281_v46 }
 0x376   :  { %5721 = vmatpush3.bf16.msra.mxu1 %v1281_v46 }
 0x377   :  { %5722 = vmatprep.subr.bf16.mxu1 %v1282_v19 }
 0x37a   :  { %5723 = vmatpush3.bf16.msra.mxu1 %v1282_v19 }
 0x37d   :  { %5725 = vmatmul.mubr.msk.bf16.vlgmr.msra.gmra.mrb[16].mxu1 %vm7721_vm6, %v10942_v17  ;;  %vm7769_vm6 = vmpackc.low %vm218_vm3, %vm217_vm15 }
 0x37e   :  { %5728 = vmatprep.mubr.msk.bf16.mxu1 %vm7725_vm8, %v10942_v17  ;;  %vm7765_vm8 = vmpackc.low %vm216_vm12, %vm215_vm11  ;;  %v10959_v15 = vsel %vm7769_vm6, 4294967295, %v10958_v15  ;;  %vm219_vm11 = vcmp.eq.s32.totalorder %v199_v59, %v7649_v47  ;;  %vm220_vm12 = vcmp.eq.s32.totalorder %v200_v11, %v7649_v47  ;;  %v7797_v47 = vld [vmem:[%s10615_s12] ss:$0 sm:$0xff]  ;;  %v10979_v59 = vld [vmem:[#allocation25_spill] sm:$0xff] }
 0x37f   :  { %v10956_v60 = vsel %vm7765_vm8, 4294967295, %v10955_v60  ;;  %10960 = vst [vmem:[#allocation94_spill] sm:$0xff] %v10959_v15  ;;  %vm7783_vm15 = vmpackc.low %vm220_vm12, %vm219_vm11 }
 0x380   :  { %10957 = vst [vmem:[#allocation93_spill] sm:$0xff] %v10956_v60  ;;  %v10962_v49 = vsel %vm7783_vm15, 4294967295, %v10961_v49 }
 0x381   :  { %10963 = vst [vmem:[#allocation95_spill] sm:$0xff] %v10962_v49 }
 0x385   :  { %5729 = vmatmul.mubr.msk.bf16.gmra.mrb[20].mxu1 %vm7743_vm2, %v10942_v17 }
 0x386   :  { %5732 = vmatprep.mubr.msk.bf16.mxu1 %vm7747_vm0, %v10942_v17 }
 0x38d   :  { %5733 = vmatmul.mubr.msk.bf16.gmra.mrb[24].mxu1 %vm7765_vm8, %v10942_v17 }
 0x38e   :  { %5736 = vmatprep.mubr.msk.bf16.mxu1 %vm7769_vm6, %v10942_v17 }
 0x395   :  { %5737 = vmatmul.mubr.msk.bf16.gmra.mrb[28].mxu1 %vm7783_vm15, %v10942_v17 }
 0x396   :  { %5782 = vmatprep.mubr.msk.bf16.mxu1 %vm6778_vm7, %v10942_v17 }
 0x450   :  { %v5726_v29 = vpop.f32.mrb[16].mxu1 }
 0x451   :  { %v1462_v9 = vmul.f32 %v5726_v29, %v10964_v53  ;;  %v1317_v22 = vpop.f32.mrb[17].mxu1 }
 0x452   :  { %v1460_v37 = vmul.f32 %v10965_v2, %v1317_v22  ;;  %v5727_v26 = vpop.f32.mrb[18].mxu1 }
 0x453   :  { %v1677_v16 = vadd.f32 %v10966_v14, %v1462_v9  ;;  %v1463_v3 = vmul.f32 %v5727_v26, %v10967_v56  ;;  %v1320_v0 = vpop.f32.mrb[19].mxu1  ;;  %v11050_v56 = vmov 9  }
 0x454   :  { %v1675_v34 = vadd.f32 %v10968_v4, %v1460_v37  ;;  %v1461_v57 = vmul.f32 %v10969_v1, %v1320_v0  ;;  %v11049_v1 = vmov 6  }
 0x455   :  { %v7805_v62 = vadd.f32 %v7797_v47, %v1677_v16  ;;  %v1678_v21 = vadd.f32 %v10970_v54, %v1463_v3  ;;  %v10980_v3 = vld [vmem:[#allocation75_spill] sm:$0xff]  ;;  %v10981_v54 = vld [vmem:[#allocation70_spill] sm:$0xff] }
 0x456   :  { %v7809_v43 = vadd.f32 %v7797_v47, %v1675_v34  ;;  %v1676_v39 = vadd.f32 %v10971_v40, %v1461_v57 }
 0x457   :  { %v1732_v24 = vmin.f32 %v7805_v62, 0.0  ;;  %v7814_v13 = vadd.f32 %v7797_v47, %v1678_v21  ;;  %vm1716_vm7 = vcmp.gt.f32.partialorder %v7805_v62, 0.0 }
 0x458   :  { %v1730_v36 = vmin.f32 %v7809_v43, 0.0  ;;  %v7818_v63 = vadd.f32 %v7797_v47, %v1676_v39  ;;  %v5730_v33 = vpop.f32.mrb[20].mxu1  ;;  %vm1714_vm3 = vcmp.gt.f32.partialorder %v7809_v43, 0.0 }
 0x459   :  { %v1750_v41 = vmul.f32 1.442695, %v1732_v24  ;;  %v1733_v12 = vmin.f32 %v7814_v13, 0.0  ;;  %v1466_v44 = vmul.f32 %v5730_v33, %v10972_v58  ;;  %v1333_v20 = vpop.f32.mrb[21].mxu1  ;;  %v10982_v24 = vld [vmem:[#allocation32_spill] sm:$0xff]  ;;  %v10983_v33 = vld [vmem:[#allocation74_spill] sm:$0xff] }
 0x45a   :  { %v1746_v55 = vmul.f32 1.442695, %v1730_v36  ;;  %v1731_v51 = vmin.f32 %v7818_v63, 0.0  ;;  %v1464_v19 = vmul.f32 %v10973_v27, %v1333_v20  ;;  %v5731_v10 = vpop.f32.mrb[22].mxu1  ;;  %v10984_v20 = vld [vmem:[#allocation30_spill] sm:$0xff]  ;;  %vm1717_vm11 = vcmp.gt.f32.partialorder %v7814_v13, 0.0 }
 0x45b   :  { %6265 = vpow2.f32 %v1750_v41  ;;  %v1752_v18 = vmul.f32 1.442695, %v1733_v12  ;;  %v1681_v46 = vadd.f32 %v10974_v8, %v1466_v44  ;;  %v1467_v61 = vmul.f32 %v5731_v10, %v10975_v5  ;;  %v1336_v23 = vpop.f32.mrb[23].mxu1  ;;  %v10986_v8 = vld [vmem:[#allocation31_spill] sm:$0xff] }
 0x45c   :  { %6267 = vpow2.f32 %v1746_v55  ;;  %v1748_v32 = vmul.f32 1.442695, %v1731_v51  ;;  %v1679_v52 = vadd.f32 %v10976_v7, %v1464_v19  ;;  %v1465_v31 = vmul.f32 %v10977_v48, %v1336_v23  ;;  %v10985_v51 = vld [vmem:[#allocation68_spill] sm:$0xff] }
 0x45d   :  { %6269 = vpow2.f32 %v1752_v18  ;;  %v7829_v25 = vadd.f32 %v7797_v47, %v1681_v46  ;;  %v1682_v28 = vadd.f32 %v10978_v45, %v1467_v61  ;;  %vm1715_vm12 = vcmp.gt.f32.partialorder %v7818_v63, 0.0 }
 0x45e   :  { %6271 = vpow2.f32 %v1748_v32  ;;  %v7833_v38 = vadd.f32 %v7797_v47, %v1679_v52  ;;  %v1680_v11 = vadd.f32 %v10979_v59, %v1465_v31  ;;  %v10987_v32 = vld [vmem:[#allocation29_spill] sm:$0xff]  ;;  %v11045_v48 = vmov 5  }
 0x45f   :  { %v1736_v29 = vmin.f32 %v7829_v25, 0.0  ;;  %v7838_v9 = vadd.f32 %v7797_v47, %v1682_v28 }
 0x460   :  { %v1734_v22 = vmin.f32 %v7833_v38, 0.0  ;;  %v7842_v37 = vadd.f32 %v7797_v47, %v1680_v11  ;;  %v5734_v26 = vpop.f32.mrb[24].mxu1 }
 0x461   :  { %v1758_v14 = vmul.f32 1.442695, %v1736_v29  ;;  %v1737_v16 = vmin.f32 %v7838_v9, 0.0  ;;  %v1470_v0 = vmul.f32 %v5734_v26, %v10980_v3  ;;  %v1349_v4 = vpop.f32.mrb[25].mxu1 }
 0x462   :  { %v1754_v34 = vmul.f32 1.442695, %v1734_v22  ;;  %v1735_v57 = vmin.f32 %v7842_v37, 0.0  ;;  %v1468_v21 = vmul.f32 %v10981_v54, %v1349_v4  ;;  %v5735_v40 = vpop.f32.mrb[26].mxu1 }
 0x463   :  { %6273 = vpow2.f32 %v1758_v14  ;;  %v1760_v39 = vmul.f32 1.442695, %v1737_v16  ;;  %v1685_v36 = vadd.f32 %v10982_v24, %v1470_v0  ;;  %v1471_v41 = vmul.f32 %v5735_v40, %v10983_v33  ;;  %v1352_v12 = vpop.f32.mrb[27].mxu1 }
 0x464   :  { %6275 = vpow2.f32 %v1754_v34  ;;  %v1756_v44 = vmul.f32 1.442695, %v1735_v57  ;;  %v1683_v55 = vadd.f32 %v10984_v20, %v1468_v21  ;;  %v1469_v19 = vmul.f32 %v10985_v51, %v1352_v12  ;;  %v10988_v34 = vld [vmem:[#allocation86_spill] sm:$0xff]  ;;  %v10990_v20 = vld [vmem:[#allocation37_spill] sm:$0xff] }
 0x465   :  { %v6266_v10 = vpop.eup %6265  ;;  %6277 = vpow2.f32 %v1760_v39  ;;  %v7854_v18 = vadd.f32 %v7797_v47, %v1685_v36  ;;  %v1686_v46 = vadd.f32 %v10986_v8, %v1471_v41  ;;  %v10989_v36 = vld [vmem:[#allocation81_spill] sm:$0xff] }
 0x466   :  { %v6268_v61 = vpop.eup %6267  ;;  %6279 = vpow2.f32 %v1756_v44  ;;  %v7859_v23 = vadd.f32 %v7797_v47, %v1683_v55  ;;  %v1684_v7 = vadd.f32 %v10987_v32, %v1469_v19  ;;  %v5409_v52 = vadd.f32 -1.0, %v6266_v10  ;;  %v10991_v19 = vld [vmem:[#allocation85_spill] sm:$0xff] }
 0x467   :  { %v6270_v31 = vpop.eup %6269  ;;  %v1740_v45 = vmin.f32 %v7854_v18, 0.0  ;;  %v7865_v28 = vadd.f32 %v7797_v47, %v1686_v46  ;;  %v5407_v59 = vadd.f32 -1.0, %v6268_v61  ;;  %v10992_v61 = vld [vmem:[#allocation35_spill] sm:$0xff] }
 0x468   :  { %v6272_v11 = vpop.eup %6271  ;;  %v1738_v29 = vmin.f32 %v7859_v23, 0.0  ;;  %v7870_v22 = vadd.f32 %v7797_v47, %v1684_v7  ;;  %v5738_v26 = vpop.f32.mrb[28].mxu1  ;;  %v5410_v14 = vadd.f32 -1.0, %v6270_v31  ;;  %v7875_v16 = vsel %vm1716_vm7, %v7805_v62, %v5409_v52  ;;  %v10993_v7 = vld [vmem:[#allocation80_spill] sm:$0xff] }
 0x469   :  { %v1766_v0 = vmul.f32 1.442695, %v1740_v45  ;;  %v1741_v4 = vmin.f32 %v7865_v28, 0.0  ;;  %v1474_v57 = vmul.f32 %v5738_v26, %v10988_v34  ;;  %v1365_v21 = vpop.f32.mrb[29].mxu1  ;;  %v5408_v40 = vadd.f32 -1.0, %v6272_v11 }
 0x46a   :  { %v1762_v39 = vmul.f32 1.442695, %v1738_v29  ;;  %v1739_v24 = vmin.f32 %v7870_v22, 0.0  ;;  %v1472_v41 = vmul.f32 %v10989_v36, %v1365_v21  ;;  %v5739_v12 = vpop.f32.mrb[30].mxu1  ;;  %v7884_v44 = vsel %vm1714_vm3, %v7809_v43, %v5407_v59  ;;  %v10994_v43 = vld [vmem:[#allocation36_spill] sm:$0xff] }
 0x46b   :  { %6281 = vpow2.f32 %v1766_v0  ;;  %v1768_v62 = vmul.f32 1.442695, %v1741_v4  ;;  %v1689_v55 = vadd.f32 %v10990_v20, %v1474_v57  ;;  %v1475_v10 = vmul.f32 %v5739_v12, %v10991_v19  ;;  %v1368_v8 = vpop.f32.mrb[31].mxu1  ;;  %v10995_v0 = vld [vmem:[#allocation33_spill] sm:$0xff] }
 0x46c   :  { %6283 = vpow2.f32 %v1762_v39  ;;  %v1764_v46 = vmul.f32 1.442695, %v1739_v24  ;;  %v1687_v32 = vadd.f32 %v10992_v61, %v1472_v41  ;;  %v1473_v52 = vmul.f32 %v10993_v7, %v1368_v8 }
 0x46d   :  { %v6274_v31 = vpop.eup %6273  ;;  %6285 = vpow2.f32 %v1768_v62  ;;  %v7891_v45 = vadd.f32 %v7797_v47, %v1689_v55  ;;  %v1690_v59 = vadd.f32 %v10994_v43, %v1475_v10  ;;  %v7897_v11 = vsel %vm1715_vm12, %v7818_v63, %v5408_v40 }
 0x46e   :  { %v6276_v29 = vpop.eup %6275  ;;  %6287 = vpow2.f32 %v1764_v46  ;;  %v7900_v26 = vadd.f32 %v7797_v47, %v1687_v32  ;;  %v1688_v4 = vadd.f32 %v10995_v0, %v1473_v52  ;;  %v1810_v57 = vpack.c.bf16 %v7897_v11, %v7884_v44 }
 0x46f   :  { %v6278_v21 = vpop.eup %6277  ;;  %v1744_v39 = vmin.f32 %v7891_v45, 0.0  ;;  %v7907_v24 = vadd.f32 %v7797_v47, %v1690_v59  ;;  %v7912_v63 = vsel %vm1717_vm11, %v7814_v13, %v5410_v14  ;;  %v5411_v40 = vadd.f32 -1.0, %v6276_v29 }
 0x470   :  { %v6280_v41 = vpop.eup %6279  ;;  %v1742_v12 = vmin.f32 %v7900_v26, 0.0  ;;  %v7916_v62 = vadd.f32 %v7797_v47, %v1688_v4  ;;  %5766 = vmatprep.subr.bf16.mxu1 %v1810_v57  ;;  %v1811_v20 = vpack.c.bf16 %v7912_v63, %v7875_v16  ;;  %vm1718_vm7 = vcmp.gt.f32.partialorder %v7833_v38, 0.0 }
 0x471   :  { %v1774_v55 = vmul.f32 1.442695, %v1744_v39  ;;  %v1745_v10 = vmin.f32 %v7907_v24, 0.0  ;;  %5767 = vmatpush3.bf16.msra.mxu1 %v1810_v57  ;;  %vm1719_vm3 = vcmp.gt.f32.partialorder %v7842_v37, 0.0  ;;  %v5412_v13 = vadd.f32 -1.0, %v6280_v41 }
 0x472   :  { %v1770_v14 = vmul.f32 1.442695, %v1742_v12  ;;  %v1743_v8 = vmin.f32 %v7916_v62, 0.0  ;;  %5768 = vmatprep.subr.bf16.mxu1 %v1811_v20  ;;  %v5413_v46 = vadd.f32 -1.0, %v6274_v31  ;;  %v5414_v47 = vadd.f32 -1.0, %v6278_v21 }
 0x473   :  { %6289 = vpow2.f32 %v1774_v55  ;;  %v1776_v61 = vmul.f32 1.442695, %v1745_v10  ;;  %v7925_v32 = vsel %vm1718_vm7, %v7833_v38, %v5411_v40  ;;  %v7928_v52 = vsel %vm1719_vm3, %v7842_v37, %v5412_v13 }
 0x474   :  { %6291 = vpow2.f32 %v1770_v14  ;;  %v1772_v43 = vmul.f32 1.442695, %v1743_v8  ;;  %v1812_v59 = vpack.c.bf16 %v7928_v52, %v7925_v32  ;;  %vm1721_vm11 = vcmp.gt.f32.partialorder %v7838_v9, 0.0 }
 0x475   :  { %v6282_v29 = vpop.eup %6281  ;;  %6293 = vpow2.f32 %v1776_v61  ;;  %5769 = vmatpush3.bf16.msra.mxu1 %v1811_v20  ;;  %v7934_v31 = vsel %vm1721_vm11, %v7838_v9, %v5414_v47  ;;  %vm1720_vm12 = vcmp.gt.f32.partialorder %v7829_v25, 0.0  ;;  %vm1722_vm7 = vcmp.gt.f32.partialorder %v7859_v23, 0.0 }
 0x476   :  { %v6284_v0 = vpop.eup %6283  ;;  %6295 = vpow2.f32 %v1772_v43  ;;  %5770 = vmatprep.subr.bf16.mxu1 %v1812_v59  ;;  %v7938_v37 = vsel %vm1720_vm12, %v7829_v25, %v5413_v46  ;;  %vm1723_vm3 = vcmp.gt.f32.partialorder %v7870_v22, 0.0  ;;  %v5417_v25 = vadd.f32 -1.0, %v6282_v29 }
 0x477   :  { %v6286_v38 = vpop.eup %6285  ;;  %v5415_v4 = vadd.f32 -1.0, %v6284_v0  ;;  %v1813_v21 = vpack.c.bf16 %v7934_v31, %v7938_v37  ;;  %vm1725_vm11 = vcmp.gt.f32.partialorder %v7865_v28, 0.0  ;;  %vm1724_vm12 = vcmp.gt.f32.partialorder %v7854_v18, 0.0 }
 0x478   :  { %v6288_v57 = vpop.eup %6287  ;;  %v5418_v40 = vadd.f32 -1.0, %v6286_v38  ;;  %v7958_v13 = vsel %vm1724_vm12, %v7854_v18, %v5417_v25  ;;  %vm1728_vm12 = vcmp.gt.f32.partialorder %v7891_v45, 0.0  ;;  %v4715_v38 = vld [vmem:[%s10620_s17 + $0x8] sm:$0xff]  ;;  %v11028_v25 = vmov 1  }
 0x479   :  { %5771 = vmatpush3.bf16.msra.mxu1 %v1812_v59  ;;  %v5416_v39 = vadd.f32 -1.0, %v6288_v57  ;;  %v7945_v9 = vsel %vm1722_vm7, %v7859_v23, %v5415_v4  ;;  %vm1726_vm7 = vcmp.gt.f32.partialorder %v7900_v26, 0.0  ;;  %v11038_v7 = vmov 7  }
 0x47a   :  { %5772 = vmatprep.subr.bf16.mxu1 %v1813_v21  ;;  %v7954_v55 = vsel %vm1725_vm11, %v7865_v28, %v5418_v40  ;;  %vm1729_vm11 = vcmp.gt.f32.partialorder %v7907_v24, 0.0  ;;  %v10728_v40 = vmov 9   ;;  %v11040_v34 = vmov 15  }
 0x47b   :  { %v7948_v41 = vsel %vm1723_vm3, %v7870_v22, %v5416_v39  ;;  %v1815_v8 = vpack.c.bf16 %v7954_v55, %v7958_v13  ;;  %vm1727_vm3 = vcmp.gt.f32.partialorder %v7916_v62, 0.0  ;;  %v2001_v39 = vsub.s32 2, %v7188_v6 }
 0x47c   :  { %v1814_v12 = vpack.c.bf16 %v7948_v41, %v7945_v9 }
 0x47d   :  { %v6290_v20 = vpop.eup %6289  ;;  %5773 = vmatpush3.bf16.msra.mxu1 %v1813_v21 }
 0x47e   :  { %v6292_v10 = vpop.eup %6291  ;;  %5774 = vmatprep.subr.bf16.mxu1 %v1814_v12  ;;  %v5421_v43 = vadd.f32 -1.0, %v6290_v20 }
 0x47f   :  { %v6294_v23 = vpop.eup %6293  ;;  %v5419_v22 = vadd.f32 -1.0, %v6292_v10  ;;  %v11005_v10 = vmov 0  }
 0x480   :  { %v6296_v14 = vpop.eup %6295  ;;  %v5422_v47 = vadd.f32 -1.0, %v6294_v23  ;;  %v1808_v29 = vsel %vm1728_vm12, %v7891_v45, %v5421_v43  ;;  %v11006_v23 = vld [vmem:[#allocation13_spill] sm:$0xff]  ;;  %v11018_v43 = vld [vmem:[#allocation19_spill] sm:$0xff] }
 0x481   :  { %5775 = vmatpush3.bf16.msra.mxu1 %v1814_v12  ;;  %v5420_v46 = vadd.f32 -1.0, %v6296_v14  ;;  %v1806_v28 = vsel %vm1726_vm7, %v7900_v26, %v5419_v22  ;;  %v6252_v26 = vld [vmem:[%s10618_s15 + $0xc] ss:$16 sps:$4 sm:$0x1f]   ;;  %vm10996_vm7 = vcmask 1044480   ;;  %v11010_v14 = vld [vmem:[#allocation15_spill] sm:$0xff] }
 0x482   :  { %5776 = vmatprep.subr.bf16.mxu1 %v1815_v8  ;;  %v1809_v59 = vsel %vm1729_vm11, %v7907_v24, %v5422_v47  ;;  %v4714_v24 = vld [vmem:[%s10620_s17] sm:$0xff]  ;;  %v11008_v22 = vld [vmem:[#allocation14_spill] sm:$0xff]  ;;  %vm4716_vm11 = vcmask 130048   ;;  %v2005_v12 = vsub.s32 3, %v7188_v6 }
 0x483   :  { %v1807_v61 = vsel %vm1727_vm3, %v7916_v62, %v5420_v46  ;;  %v1817_v0 = vpack.c.bf16 %v1809_v59, %v1808_v29  ;;  %v6254_v62 = vld [vmem:[%s10618_s15 + $0x8] ss:$16 sps:$4 sm:$0x1f]   ;;  %vm10997_vm3 = vmmov %vm10996_vm7  ;;  %v5906_v4 = vpack.c.bf16 %v4715_v38, %v4714_v24  ;;  %v11014_v46 = vld [vmem:[#allocation17_spill] sm:$0xff]  ;;  %v10730_v24 = vmov 4  }
 0x484   :  { %v1816_v18 = vpack.c.bf16 %v1807_v61, %v1806_v28  ;;  %v2058_v45 = vsel %vm10997_vm3, %v6254_v62, 0  ;;  %v11016_v47 = vld [vmem:[#allocation18_spill] sm:$0xff]  ;;  %v11024_v62 = vmov 2  }
 0x485   :  { %5777 = vmatpush3.bf16.msra.mxu1 %v1815_v8  ;;  %v11012_v8 = vld [vmem:[#allocation16_spill] sm:$0xff] }
 0x486   :  { %5778 = vmatprep.subr.bf16.mxu1 %v1816_v18 }
 0x489   :  { %5779 = vmatpush3.bf16.msra.mxu1 %v1816_v18  ;;  %v11020_v18 = vld [vmem:[#allocation20_spill] sm:$0xff] }
 0x48a   :  { %5780 = vmatprep.subr.bf16.mxu1 %v1817_v0 }
 0x48d   :  { %5781 = vmatpush3.bf16.msra.mxu1 %v1817_v0 }
 0x48e   :  { %5454 = vmatprep.subr.msk.bf16.mxu1 %vm10996_vm7, %v6252_v26 }
 0x490   :  { %5783 = vmatmul.mubr.msk.bf16.vlgmr.msra.gmra.mrb[32].mxu1 %vm6773_vm5, %v10942_v17  ;;  %vm11007_vm5 = vcmask 80896  }
 0x491   :  { %5786 = vmatprep.mubr.msk.bf16.mxu1 %vm6793_vm10, %v10942_v17  ;;  %2177 = vmatpush1.bf16.msra.mxu1 %v2058_v45  ;;  %vm11009_vm10 = vmmov %vm11007_vm5  ;;  %v10718_v45 = vmov 5  }
 0x492   :  { %5907 = vmatprep.subr.bf16.mxu1 %v5906_v4 }
 0x498   :  { %5787 = vmatmul.mubr.msk.bf16.gmra.mrb[36].mxu1 %vm6805_vm13, %v10942_v17  ;;  %vm11011_vm13 = vmmov %vm11007_vm5 }
 0x499   :  { %5790 = vmatprep.mubr.msk.bf16.mxu1 %vm6814_vm1, %v10942_v17  ;;  %vm11013_vm1 = vmmov %vm11007_vm5 }
 0x49a   :  { %vm11021_vm12 = vmmov %vm11013_vm1 }
 0x4a0   :  { %5791 = vmatmul.mubr.msk.bf16.gmra.mrb[40].mxu1 %vm6823_vm4, %v10942_v17  ;;  %vm11015_vm4 = vmmov %vm11013_vm1 }
 0x4a1   :  { %5794 = vmatprep.mubr.msk.bf16.mxu1 %vm6832_vm9, %v10942_v17  ;;  %vm11017_vm9 = vmmov %vm11013_vm1 }
 0x4a8   :  { %5795 = vmatmul.mubr.msk.bf16.gmra.mrb[44].mxu1 %vm6841_vm14, %v10942_v17  ;;  %vm11019_vm14 = vmmov %vm11013_vm1 }
 0x4a9   :  { %2208 = vmatprep.mubr.bf16.mxu1 %v11005_v10 }
 0x4b0   :  { %5455 = vmatmul.mubr.msk.bf16.vlgmr.msra.gmra.mrb[48].mxu1 %vm11007_vm5, %v11006_v23  ;;  %v6341_v23 = vld [vmem:[%s10619_s16] sm:$0xf]  ;;  %s6385_s16 = smov 64  }
 0x4b1   :  { %2218 = vmatprep.mubr.bf16.mxu1 %v11005_v10  ;;  %5909 = vmatpush3.bf16.msra.mxu1 %v5906_v4 }
 0x4b8   :  { %5456 = vmatmul.mubr.msk.bf16.gmra.mrb[52].mxu1 %vm11009_vm10, %v11008_v22  ;;  %v8122_v22 = vrot.slane %v6341_v23, %v2001_v39  ;;  %v10734_v39 = vmov 14  }
 0x4b9   :  { %2228 = vmatprep.mubr.bf16.mxu1 %v11005_v10 }
 0x4c0   :  { %5457 = vmatmul.mubr.msk.bf16.gmra.mrb[56].mxu1 %vm11011_vm13, %v11010_v14 }
 0x4c1   :  { %2238 = vmatprep.mubr.bf16.mxu1 %v11005_v10 }
 0x4c8   :  { %5458 = vmatmul.mubr.msk.bf16.gmra.mrb[60].mxu1 %vm11013_vm1, %v11012_v8  ;;  %v8126_v8 = vrot.slane %v6341_v23, %v2005_v12 }
 0x4c9   :  { %2248 = vmatprep.mubr.bf16.mxu1 %v11005_v10 }
 0x4d0   :  { %5459 = vmatmul.mubr.msk.bf16.gmra.mrb[64].mxu1 %vm11015_vm4, %v11014_v46 }
 0x4d1   :  { %2258 = vmatprep.mubr.bf16.mxu1 %v11005_v10 }
 0x4d8   :  { %5460 = vmatmul.mubr.msk.bf16.gmra.mrb[68].mxu1 %vm11017_vm9, %v11016_v47 }
 0x4d9   :  { %2268 = vmatprep.mubr.bf16.mxu1 %v11005_v10 }
 0x4e0   :  { %5461 = vmatmul.mubr.msk.bf16.gmra.mrb[72].mxu1 %vm11019_vm14, %v11018_v43  ;;  %v10714_v43 = vmov 10  }
 0x4e1   :  { %2278 = vmatprep.mubr.bf16.mxu1 %v11005_v10 }
 0x4e8   :  { %5462 = vmatmul.mubr.msk.bf16.gmra.mrb[76].mxu1 %vm11021_vm12, %v11020_v18 }
 0x4e9   :  { %5834 = vmatprep.mubr.msk.f32.mxu1 %vm4716_vm11, %v7884_v44 }
 0x4f0   :  { %5835 = vmatmul.mubr.msk.f32.vlgmr.msra.gmra.mrb[80].mxu1 %vm4716_vm11, %v7897_v11 }
 0x4f1   :  { %5837 = vmatprep.mubr.msk.f32.mxu1 %vm4716_vm11, %v7875_v16 }
 0x4f4   :  { %5838 = vmatmul.mubr.msk.f32.gmra.mrb[82].mxu1 %vm4716_vm11, %v7912_v63 }
 0x4f5   :  { %5840 = vmatprep.mubr.msk.f32.mxu1 %vm4716_vm11, %v7925_v32  ;;  %v11022_v32 = vmov 3  }
 0x4f8   :  { %5841 = vmatmul.mubr.msk.f32.gmra.mrb[84].mxu1 %vm4716_vm11, %v7928_v52  ;;  %v10724_v52 = vmov 7  }
 0x4f9   :  { %5843 = vmatprep.mubr.msk.f32.mxu1 %vm4716_vm11, %v7938_v37 }
 0x4fc   :  { %5844 = vmatmul.mubr.msk.f32.gmra.mrb[86].mxu1 %vm4716_vm11, %v7934_v31 }
 0x4fd   :  { %5846 = vmatprep.mubr.msk.f32.mxu1 %vm4716_vm11, %v7945_v9  ;;  %v10720_v9 = vmov 11  }
 0x500   :  { %5847 = vmatmul.mubr.msk.f32.gmra.mrb[88].mxu1 %vm4716_vm11, %v7948_v41  ;;  %v10716_v41 = vmov 6  }
 0x501   :  { %5849 = vmatprep.mubr.msk.f32.mxu1 %vm4716_vm11, %v7958_v13 }
 0x504   :  { %5850 = vmatmul.mubr.msk.f32.gmra.mrb[90].mxu1 %vm4716_vm11, %v7954_v55 }
 0x505   :  { %5852 = vmatprep.mubr.msk.f32.mxu1 %vm4716_vm11, %v1806_v28  ;;  %v10722_v28 = vmov 15  }
 0x508   :  { %5853 = vmatmul.mubr.msk.f32.gmra.mrb[92].mxu1 %vm4716_vm11, %v1807_v61  ;;  %v10712_v61 = vmov 13  }
 0x509   :  { %5855 = vmatprep.mubr.msk.f32.mxu1 %vm4716_vm11, %v1808_v29 }
 0x50c   :  { %5856 = vmatmul.mubr.msk.f32.gmra.mrb[94].mxu1 %vm4716_vm11, %v1809_v59 }
 0x563   :  { %v8057_v16 = vpop.f32.mrb[32].mxu1 }
 0x564   :  { %2394 = vperm.xlu1 %5991, %v8057_v16   ;;  %2301 = vperm.xlu0 %5990, %v8057_v16   ;;  %v8061_v44 = vpop.f32.mrb[33].mxu1 }
 0x565   :  { %v8063_v11 = vpop.f32.mrb[34].mxu1 }
 0x566   :  { %v8065_v63 = vpop.f32.mrb[35].mxu1 }
 0x568   :  { %5992 = vset.pattern.permute.xlu1 %v11022_v32  ;;  %5993 = vset.pattern.permute.xlu0 %v10724_v52  ;;  %v10732_v52 = vmov 12  }
 0x569   :  { %2554 = vperm.xlu1 %5992, %v8057_v16   ;;  %2874 = vperm.xlu0 %5993, %v8057_v16  }
 0x56b   :  { %v8071_v31 = vpop.f32.mrb[36].mxu1 }
 0x56c   :  { %v8073_v37 = vpop.f32.mrb[37].mxu1 }
 0x56d   :  { %5994 = vset.pattern.permute.xlu1 %v10720_v9  ;;  %5998 = vset.pattern.permute.xlu0 %v10716_v41  ;;  %v8077_v55 = vpop.f32.mrb[38].mxu1 }
 0x56e   :  { %3194 = vperm.xlu1 %5994, %v8057_v16   ;;  %2794 = vperm.xlu0 %5998, %v8057_v16   ;;  %v8081_v13 = vpop.f32.mrb[39].mxu1 }
 0x572   :  { %5995 = vset.pattern.permute.xlu1 %v10722_v28  ;;  %6001 = vset.pattern.permute.xlu0 %v10712_v61 }
 0x573   :  { %3514 = vperm.xlu1 %5995, %v8057_v16   ;;  %3354 = vperm.xlu0 %6001, %v8057_v16   ;;  %v8087_v59 = vpop.f32.mrb[40].mxu1 }
 0x574   :  { %v8089_v29 = vpop.f32.mrb[41].mxu1 }
 0x575   :  { %v8091_v0 = vpop.f32.mrb[42].mxu1 }
 0x576   :  { %v8093_v26 = vpop.f32.mrb[43].mxu1 }
 0x577   :  { %11023 = vst [vmem:[#allocation24_spill] sm:$0xff] %v8093_v26  ;;  %5996 = vset.pattern.permute.xlu1 %v11024_v62  ;;  %6003 = vset.pattern.permute.xlu0 %v10730_v24 }
 0x578   :  { %2474 = vperm.xlu1 %5996, %v8057_v16   ;;  %2634 = vperm.xlu0 %6003, %v8057_v16  }
 0x57b   :  { %v8099_v38 = vpop.f32.mrb[44].mxu1 }
 0x57c   :  { %11025 = vst [vmem:[#allocation22_spill] sm:$0xff] %v8099_v38  ;;  %5997 = vset.pattern.permute.xlu1 %v10718_v45  ;;  %6006 = vset.pattern.permute.xlu0 %v11005_v10  ;;  %v8103_v4 = vpop.f32.mrb[45].mxu1 }
 0x57d   :  { %11026 = vst [vmem:[#allocation23_spill] sm:$0xff] %v8103_v4  ;;  %2714 = vperm.xlu1 %5997, %v8057_v16   ;;  %2291 = vperm.xlu0 %6006, %v8061_v44   ;;  %v8107_v57 = vpop.f32.mrb[46].mxu1 }
 0x57e   :  { %11027 = vst [vmem:[#allocation21_spill] sm:$0xff] %v8107_v57  ;;  %v8109_v21 = vpop.f32.mrb[47].mxu1 }
 0x581   :  { %5999 = vset.pattern.permute.xlu1 %v10728_v40  ;;  %6007 = vset.pattern.permute.xlu0 %v11028_v25 }
 0x582   :  { %3034 = vperm.xlu1 %5999, %v8057_v16   ;;  %2386 = vperm.xlu0 %6007, %v8061_v44  }
 0x583   :  { %v8117_v20 = vpop.f32.mrb[48].mxu1 }
 0x584   :  { %v8124_v14 = vpop.f32.mrb[49].mxu1 }
 0x585   :  { %v2214_v46 = vpop.f32.mrb[50].mxu1 }
 0x586   :  { %v8129_v47 = vadd.f32 %v2214_v46, %v8122_v22  ;;  %6000 = vset.pattern.permute.xlu1 %v10714_v43  ;;  %6010 = vset.pattern.permute.xlu0 %v10720_v9  ;;  %v2216_v18 = vpop.f32.mrb[51].mxu1  ;;  %v10726_v43 = vmov 8  }
 0x587   :  { %v8134_v61 = vadd.f32 %v2216_v18, %v8126_v8  ;;  %3114 = vperm.xlu1 %6000, %v8057_v16   ;;  %3186 = vperm.xlu0 %6010, %v8061_v44  }
 0x588   :  { %11029 = vst [vmem:[#allocation28_spill] sm:$0xff] %v8129_v47 }
 0x589   :  { %11030 = vst [vmem:[#allocation26_spill] sm:$0xff] %v8134_v61 }
 0x58b   :  { %6002 = vset.pattern.permute.xlu1 %v10734_v39  ;;  %6012 = vset.pattern.permute.xlu0 %v11024_v62  ;;  %v8140_v12 = vpop.f32.mrb[52].mxu1 }
 0x58c   :  { %3434 = vperm.xlu1 %6002, %v8057_v16   ;;  %2466 = vperm.xlu0 %6012, %v8061_v44   ;;  %v8144_v23 = vpop.f32.mrb[53].mxu1 }
 0x58d   :  { %v8146_v46 = vpop.f32.mrb[54].mxu1 }
 0x58e   :  { %v8148_v18 = vpop.f32.mrb[55].mxu1 }
 0x590   :  { %6004 = vset.pattern.permute.xlu1 %v10726_v43  ;;  %6015 = vset.pattern.permute.xlu0 %v10728_v40 }
 0x591   :  { %2954 = vperm.xlu1 %6004, %v8057_v16   ;;  %3026 = vperm.xlu0 %6015, %v8061_v44  }
 0x593   :  { %v2230_v41 = vpop.f32.mrb[56].mxu1 }
 0x594   :  { %v8155_v45 = vadd.f32 %v2230_v41, %v8122_v22  ;;  %v2232_v9 = vpop.f32.mrb[57].mxu1 }
 0x595   :  { %v8158_v28 = vadd.f32 %v2232_v9, %v8126_v8  ;;  %6005 = vset.pattern.permute.xlu1 %v10732_v52  ;;  %6018 = vset.pattern.permute.xlu0 %v10734_v39  ;;  %v2234_v43 = vpop.f32.mrb[58].mxu1  ;;  %v11035_v9 = vmov 4  }
 0x596   :  { %11031 = vst [vmem:[#allocation27_spill] sm:$0xff] %v8155_v45  ;;  %v8163_v40 = vadd.f32 %v2234_v43, %v8122_v22  ;;  %3274 = vperm.xlu1 %6005, %v8057_v16   ;;  %3426 = vperm.xlu0 %6018, %v8061_v44   ;;  %v2236_v24 = vpop.f32.mrb[59].mxu1 }
 0x597   :  { %11032 = vst [vmem:[#allocation25_spill] sm:$0xff] %v8158_v28  ;;  %v8168_v41 = vadd.f32 %v2236_v24, %v8126_v8 }
 0x598   :  { %11033 = vst [vmem:[#allocation32_spill] sm:$0xff] %v8163_v40 }
 0x599   :  { %11034 = vst [vmem:[#allocation30_spill] sm:$0xff] %v8168_v41 }
 0x59a   :  { %6008 = vset.pattern.permute.xlu1 %v11022_v32  ;;  %6019 = vset.pattern.permute.xlu0 %v11035_v9 }
 0x59b   :  { %2546 = vperm.xlu1 %6008, %v8061_v44   ;;  %2626 = vperm.xlu0 %6019, %v8061_v44   ;;  %v8174_v52 = vpop.f32.mrb[60].mxu1 }
 0x59c   :  { %v8176_v43 = vpop.f32.mrb[61].mxu1 }
 0x59d   :  { %v2244_v39 = vpop.f32.mrb[62].mxu1 }
 0x59e   :  { %v8179_v16 = vadd.f32 %v2244_v39, %v8122_v22  ;;  %v2246_v6 = vpop.f32.mrb[63].mxu1  ;;  %v11041_v39 = vmov 11  }
 0x59f   :  { %v8182_v24 = vadd.f32 %v2246_v6, %v8126_v8  ;;  %6009 = vset.pattern.permute.xlu1 %v11038_v7  ;;  %6023 = vset.pattern.permute.xlu0 %v11028_v25 }
 0x5a0   :  { %11036 = vst [vmem:[#allocation31_spill] sm:$0xff] %v8179_v16  ;;  %2866 = vperm.xlu1 %6009, %v8061_v44   ;;  %2398 = vperm.xlu0 %6023, %v8063_v11  }
 0x5a1   :  { %11037 = vst [vmem:[#allocation29_spill] sm:$0xff] %v8182_v24 }
 0x5a3   :  { %v2250_v19 = vpop.f32.mrb[64].mxu1 }
 0x5a4   :  { %v8189_v36 = vadd.f32 %v2250_v19, %v8122_v22  ;;  %6011 = vset.pattern.permute.xlu1 %v11040_v34  ;;  %6026 = vset.pattern.permute.xlu0 %v11041_v39  ;;  %v2252_v51 = vpop.f32.mrb[65].mxu1 }
 0x5a5   :  { %v8194_v6 = vadd.f32 %v2252_v51, %v8126_v8  ;;  %3506 = vperm.xlu1 %6011, %v8061_v44   ;;  %3198 = vperm.xlu0 %6026, %v8063_v11   ;;  %v2254_v33 = vpop.f32.mrb[66].mxu1 }
 0x5a6   :  { %11039 = vst [vmem:[#allocation37_spill] sm:$0xff] %v8189_v36  ;;  %v8199_v54 = vadd.f32 %v2254_v33, %v8122_v22  ;;  %v2256_v3 = vpop.f32.mrb[67].mxu1 }
 0x5a7   :  { %11042 = vst [vmem:[#allocation35_spill] sm:$0xff] %v8194_v6  ;;  %v8202_v19 = vadd.f32 %v2256_v3, %v8126_v8 }
 0x5a8   :  { %11043 = vst [vmem:[#allocation36_spill] sm:$0xff] %v8199_v54  ;;  %v11064_v54 = vmov 12  }
 0x5a9   :  { %11044 = vst [vmem:[#allocation33_spill] sm:$0xff] %v8202_v19  ;;  %6013 = vset.pattern.permute.xlu1 %v11045_v48  ;;  %6028 = vset.pattern.permute.xlu0 %v11024_v62 }
 0x5aa   :  { %2706 = vperm.xlu1 %6013, %v8061_v44   ;;  %2478 = vperm.xlu0 %6028, %v8063_v11  }
 0x5ab   :  { %v2260_v51 = vpop.f32.mrb[68].mxu1 }
 0x5ac   :  { %v8209_v5 = vadd.f32 %v2260_v51, %v8122_v22  ;;  %v2262_v27 = vpop.f32.mrb[69].mxu1  ;;  %v11052_v51 = vmov 10  }
 0x5ad   :  { %v8212_v33 = vadd.f32 %v2262_v27, %v8126_v8  ;;  %v2264_v58 = vpop.f32.mrb[70].mxu1  ;;  %v11053_v27 = vmov 14  }
 0x5ae   :  { %11046 = vst [vmem:[#allocation6_spill] sm:$0xff] %v8209_v5  ;;  %v8215_v3 = vadd.f32 %v2264_v58, %v8122_v22  ;;  %6014 = vset.pattern.permute.xlu1 %v11049_v1  ;;  %6031 = vset.pattern.permute.xlu0 %v11050_v56  ;;  %v2266_v2 = vpop.f32.mrb[71].mxu1 }
 0x5af   :  { %11047 = vst [vmem:[#allocation7_spill] sm:$0xff] %v8212_v33  ;;  %v8220_v53 = vadd.f32 %v2266_v2, %v8126_v8  ;;  %2786 = vperm.xlu1 %6014, %v8061_v44   ;;  %3038 = vperm.xlu0 %6031, %v8063_v11  }
 0x5b0   :  { %11048 = vst [vmem:[#allocation8_spill] sm:$0xff] %v8215_v3 }
 0x5b1   :  { %11051 = vst [vmem:[#allocation9_spill] sm:$0xff] %v8220_v53 }
 0x5b3   :  { %6016 = vset.pattern.permute.xlu1 %v11052_v51  ;;  %6034 = vset.pattern.permute.xlu0 %v11053_v27  ;;  %v2270_v49 = vpop.f32.mrb[72].mxu1 }
 0x5b4   :  { %v8227_v58 = vadd.f32 %v2270_v49, %v8122_v22  ;;  %3106 = vperm.xlu1 %6016, %v8061_v44   ;;  %3438 = vperm.xlu0 %6034, %v8063_v11   ;;  %v2272_v15 = vpop.f32.mrb[73].mxu1  ;;  %v11059_v49 = vmov 8  }
 0x5b5   :  { %v8232_v2 = vadd.f32 %v2272_v15, %v8126_v8  ;;  %v2274_v60 = vpop.f32.mrb[74].mxu1 }
 0x5b6   :  { %11054 = vst [vmem:[#allocation10_spill] sm:$0xff] %v8227_v58  ;;  %v8235_v50 = vadd.f32 %v2274_v60, %v8122_v22  ;;  %v2276_v42 = vpop.f32.mrb[75].mxu1 }
 0x5b7   :  { %11055 = vst [vmem:[#allocation11_spill] sm:$0xff] %v8232_v2  ;;  %v8238_v30 = vadd.f32 %v2276_v42, %v8126_v8 }
 0x5b8   :  { %11056 = vst [vmem:[#allocation12_spill] sm:$0xff] %v8235_v50  ;;  %6017 = vset.pattern.permute.xlu1 %v11058_v35  ;;  %6036 = vset.pattern.permute.xlu0 %v11059_v49 }
 0x5b9   :  { %11057 = vst [vmem:[#allocation13_spill] sm:$0xff] %v8238_v30  ;;  %3346 = vperm.xlu1 %6017, %v8061_v44   ;;  %2958 = vperm.xlu0 %6036, %v8063_v11  }
 0x5bb   :  { %v2280_v17 = vpop.f32.mrb[76].mxu1 }
 0x5bc   :  { %v8245_v15 = vadd.f32 %v2280_v17, %v8122_v22  ;;  %v2282_v19 = vpop.f32.mrb[77].mxu1 }
 0x5bd   :  { %v8248_v60 = vadd.f32 %v2282_v19, %v8126_v8  ;;  %6020 = vset.pattern.permute.xlu1 %v11059_v49  ;;  %6040 = vset.pattern.permute.xlu0 %v11022_v32  ;;  %v2284_v42 = vpop.f32.mrb[78].mxu1 }
 0x5be   :  { %11060 = vst [vmem:[#allocation14_spill] sm:$0xff] %v8245_v15  ;;  %v8253_v30 = vadd.f32 %v2284_v42, %v8122_v22  ;;  %2946 = vperm.xlu1 %6020, %v8061_v44   ;;  %2550 = vperm.xlu0 %6040, %v8065_v63   ;;  %v2286_v50 = vpop.f32.mrb[79].mxu1 }
 0x5bf   :  { %11061 = vst [vmem:[#allocation15_spill] sm:$0xff] %v8248_v60  ;;  %v8258_v17 = vadd.f32 %v2286_v50, %v8126_v8 }
 0x5c0   :  { %11062 = vst [vmem:[#allocation16_spill] sm:$0xff] %v8253_v30 }
 0x5c1   :  { %11063 = vst [vmem:[#allocation17_spill] sm:$0xff] %v8258_v17 }
 0x5c2   :  { %6021 = vset.pattern.permute.xlu1 %v11064_v54  ;;  %6043 = vset.pattern.permute.xlu0 %v11040_v34 }
 0x5c3   :  { %3266 = vperm.xlu1 %6021, %v8061_v44   ;;  %3510 = vperm.xlu0 %6043, %v8065_v63   ;;  %v8264_v19 = vpop.f32.mrb[80].mxu1 }
 0x5c4   :  { %11065 = vst [vmem:[#allocation18_spill] sm:$0xff] %v8264_v19  ;;  %v8266_v42 = vpop.f32.mrb[81].mxu1 }
 0x5c5   :  { %11066 = vst [vmem:[#allocation19_spill] sm:$0xff] %v8266_v42 }
 0x5c7   :  { %6022 = vset.pattern.permute.xlu1 %v11005_v10  ;;  %6045 = vset.pattern.permute.xlu0 %v11045_v48  ;;  %v8270_v30 = vpop.f32.mrb[82].mxu1 }
 0x5c8   :  { %11067 = vst [vmem:[#allocation20_spill] sm:$0xff] %v8270_v30  ;;  %2306 = vperm.xlu1 %6022, %v8063_v11   ;;  %2710 = vperm.xlu0 %6045, %v8065_v63   ;;  %v8274_v50 = vpop.f32.mrb[83].mxu1 }
 0x5c9   :  { %11068 = vst [vmem:[#allocation96_spill] sm:$0xff] %v8274_v50 }
 0x5cb   :  { %v8276_v17 = vpop.f32.mrb[84].mxu1 }
 0x5cc   :  { %11069 = vst [vmem:[#allocation97_spill] sm:$0xff] %v8276_v17  ;;  %6024 = vset.pattern.permute.xlu1 %v11022_v32  ;;  %6048 = vset.pattern.permute.xlu0 %v11052_v51  ;;  %v8280_v44 = vpop.f32.mrb[85].mxu1 }
 0x5cd   :  { %11070 = vst [vmem:[#allocation98_spill] sm:$0xff] %v8280_v44  ;;  %2558 = vperm.xlu1 %6024, %v8063_v11   ;;  %3110 = vperm.xlu0 %6048, %v8065_v63  }
 0x5cf   :  { %v8284_v19 = vpop.f32.mrb[86].mxu1 }
 0x5d0   :  { %11071 = vst [vmem:[#allocation99_spill] sm:$0xff] %v8284_v19  ;;  %v8286_v30 = vpop.f32.mrb[87].mxu1 }
 0x5d1   :  { %11072 = vst [vmem:[#allocation100_spill] sm:$0xff] %v8286_v30  ;;  %6025 = vset.pattern.permute.xlu1 %v11038_v7  ;;  %6052 = vset.pattern.permute.xlu0 %v11059_v49 }
 0x5d2   :  { %2878 = vperm.xlu1 %6025, %v8063_v11   ;;  %2950 = vperm.xlu0 %6052, %v8065_v63  }
 0x5d3   :  { %v8292_v17 = vpop.f32.mrb[88].mxu1 }
 0x5d4   :  { %11073 = vst [vmem:[#allocation101_spill] sm:$0xff] %v8292_v17  ;;  %v8294_v42 = vpop.f32.mrb[89].mxu1 }
 0x5d5   :  { %11074 = vst [vmem:[#allocation102_spill] sm:$0xff] %v8294_v42 }
 0x5d6   :  { %6027 = vset.pattern.permute.xlu1 %v11040_v34  ;;  %6054 = vset.pattern.permute.xlu0 %v11005_v10 }
 0x5d7   :  { %3518 = vperm.xlu1 %6027, %v8063_v11   ;;  %2321 = vperm.xlu0 %6054, %v8071_v31   ;;  %v8300_v19 = vpop.f32.mrb[90].mxu1 }
 0x5d8   :  { %11075 = vst [vmem:[#allocation103_spill] sm:$0xff] %v8300_v19  ;;  %v8302_v44 = vpop.f32.mrb[91].mxu1 }
 0x5d9   :  { %11076 = vst [vmem:[#allocation104_spill] sm:$0xff] %v8302_v44 }
 0x5db   :  { %6029 = vset.pattern.permute.xlu1 %v11045_v48  ;;  %6058 = vset.pattern.permute.xlu0 %v11041_v39  ;;  %v8306_v30 = vpop.f32.mrb[92].mxu1 }
 0x5dc   :  { %11077 = vst [vmem:[#allocation105_spill] sm:$0xff] %v8306_v30  ;;  %2718 = vperm.xlu1 %6029, %v8063_v11   ;;  %3210 = vperm.xlu0 %6058, %v8071_v31   ;;  %v8310_v17 = vpop.f32.mrb[93].mxu1 }
 0x5dd   :  { %11078 = vst [vmem:[#allocation106_spill] sm:$0xff] %v8310_v17 }
 0x5df   :  { %v8312_v42 = vpop.f32.mrb[94].mxu1 }
 0x5e0   :  { %11079 = vst [vmem:[#allocation107_spill] sm:$0xff] %v8312_v42  ;;  %6030 = vset.pattern.permute.xlu1 %v11049_v1  ;;  %6060 = vset.pattern.permute.xlu0 %v11024_v62  ;;  %v8316_v19 = vpop.f32.mrb[95].mxu1 }
 0x5e1   :  { %11080 = vst [vmem:[#allocation108_spill] sm:$0xff] %v8316_v19  ;;  %2798 = vperm.xlu1 %6030, %v8063_v11   ;;  %2490 = vperm.xlu0 %6060, %v8071_v31  }
 0x5e3   :  { %v8320_v44 = vpop.permute.xlu1 %2394  ;;  %v8322_v30 = vpop.permute.xlu0 %2301 }
 0x5e4   :  { %11081 = vst [vmem:[#allocation109_spill] sm:$0xff] %v8322_v30 }
 0x5e5   :  { %6032 = vset.pattern.permute.xlu1 %v11052_v51  ;;  %6063 = vset.pattern.permute.xlu0 %v11050_v56 }
 0x5e6   :  { %3118 = vperm.xlu1 %6032, %v8063_v11   ;;  %3050 = vperm.xlu0 %6063, %v8071_v31  }
 0x5e8   :  { %v8328_v42 = vpop.permute.xlu1 %2554  ;;  %v8330_v17 = vpop.permute.xlu0 %2874 }
 0x5e9   :  { %11082 = vst [vmem:[#allocation110_spill] sm:$0xff] %v8328_v42  ;;  %11083 = vst [vmem:[#allocation111_spill] sm:$0xff] %v8330_v17 }
 0x5ea   :  { %6033 = vset.pattern.permute.xlu1 %v11058_v35  ;;  %6066 = vset.pattern.permute.xlu0 %v11053_v27 }
 0x5eb   :  { %3358 = vperm.xlu1 %6033, %v8063_v11   ;;  %3450 = vperm.xlu0 %6066, %v8071_v31  }
 0x5ed   :  { %v8336_v19 = vpop.permute.xlu1 %3194  ;;  %v8338_v50 = vpop.permute.xlu0 %2794 }
 0x5ee   :  { %11084 = vst [vmem:[#allocation112_spill] sm:$0xff] %v8336_v19  ;;  %11085 = vst [vmem:[#allocation113_spill] sm:$0xff] %v8338_v50 }
 0x5ef   :  { %6035 = vset.pattern.permute.xlu1 %v11035_v9  ;;  %6067 = vset.pattern.permute.xlu0 %v11035_v9 }
 0x5f0   :  { %2638 = vperm.xlu1 %6035, %v8063_v11   ;;  %2650 = vperm.xlu0 %6067, %v8071_v31  }
 0x5f2   :  { %v8344_v30 = vpop.permute.xlu1 %3514  ;;  %v8346_v53 = vpop.permute.xlu0 %3354 }
 0x5f3   :  { %11086 = vst [vmem:[#allocation114_spill] sm:$0xff] %v8344_v30 }
 0x5f4   :  { %6037 = vset.pattern.permute.xlu1 %v11064_v54  ;;  %6070 = vset.pattern.permute.xlu0 %v11005_v10 }
 0x5f5   :  { %3278 = vperm.xlu1 %6037, %v8063_v11   ;;  %2311 = vperm.xlu0 %6070, %v8073_v37  }
 0x5f7   :  { %v8352_v3 = vpop.permute.xlu1 %2474  ;;  %v8354_v50 = vpop.permute.xlu0 %2634 }
 0x5f8   :  { %11087 = vst [vmem:[#allocation115_spill] sm:$0xff] %v8352_v3  ;;  %11088 = vst [vmem:[#allocation116_spill] sm:$0xff] %v8354_v50 }
 0x5f9   :  { %6038 = vset.pattern.permute.xlu1 %v11005_v10  ;;  %6072 = vset.pattern.permute.xlu0 %v11022_v32 }
 0x5fa   :  { %2296 = vperm.xlu1 %6038, %v8065_v63   ;;  %2562 = vperm.xlu0 %6072, %v8073_v37  }
 0x5fc   :  { %v8360_v41 = vpop.permute.xlu1 %2714  ;;  %v8362_v40 = vpop.permute.xlu0 %2291 }
 0x5fd   :  { %11089 = vst [vmem:[#allocation117_spill] sm:$0xff] %v8362_v40 }
 0x5fe   :  { %6039 = vset.pattern.permute.xlu1 %v11028_v25  ;;  %6075 = vset.pattern.permute.xlu0 %v11040_v34 }
 0x5ff   :  { %2390 = vperm.xlu1 %6039, %v8065_v63   ;;  %3522 = vperm.xlu0 %6075, %v8073_v37  }
 0x601   :  { %v8368_v11 = vpop.permute.xlu1 %3034  ;;  %v8370_v50 = vpop.permute.xlu0 %2386 }
 0x603   :  { %6041 = vset.pattern.permute.xlu1 %v11038_v7  ;;  %6077 = vset.pattern.permute.xlu0 %v11045_v48 }
 0x604   :  { %2870 = vperm.xlu1 %6041, %v8065_v63   ;;  %2722 = vperm.xlu0 %6077, %v8073_v37  }
 0x606   :  { %v8376_v40 = vpop.permute.xlu1 %3114  ;;  %v8378_v3 = vpop.permute.xlu0 %3186 }
 0x607   :  { %11090 = vst [vmem:[#allocation118_spill] sm:$0xff] %v8376_v40 }
 0x608   :  { %6042 = vset.pattern.permute.xlu1 %v11041_v39  ;;  %6080 = vset.pattern.permute.xlu0 %v11052_v51 }
 0x609   :  { %3190 = vperm.xlu1 %6042, %v8065_v63   ;;  %3122 = vperm.xlu0 %6080, %v8073_v37  }
 0x60b   :  { %v8384_v24 = vpop.permute.xlu1 %3434  ;;  %v8386_v16 = vpop.permute.xlu0 %2466 }
 0x60c   :  { %11091 = vst [vmem:[#allocation119_spill] sm:$0xff] %v8384_v24  ;;  %11092 = vst [vmem:[#allocation120_spill] sm:$0xff] %v8386_v16 }
 0x60d   :  { %6044 = vset.pattern.permute.xlu1 %v11024_v62  ;;  %6083 = vset.pattern.permute.xlu0 %v11035_v9 }
 0x60e   :  { %2470 = vperm.xlu1 %6044, %v8065_v63   ;;  %2642 = vperm.xlu0 %6083, %v8073_v37  }
 0x610   :  { %v8392_v40 = vpop.permute.xlu1 %2954  ;;  %v8394_v61 = vpop.permute.xlu0 %3026 }
 0x611   :  { %11093 = vst [vmem:[#allocation121_spill] sm:$0xff] %v8392_v40 }
 0x612   :  { %6046 = vset.pattern.permute.xlu1 %v11049_v1  ;;  %6087 = vset.pattern.permute.xlu0 %v11028_v25 }
 0x613   :  { %2790 = vperm.xlu1 %6046, %v8065_v63   ;;  %2414 = vperm.xlu0 %6087, %v8077_v55  }
 0x615   :  { %v8400_v16 = vpop.permute.xlu1 %3274  ;;  %v8402_v24 = vpop.permute.xlu0 %3426 }
 0x616   :  { %11094 = vst [vmem:[#allocation122_spill] sm:$0xff] %v8400_v16  ;;  %11095 = vst [vmem:[#allocation123_spill] sm:$0xff] %v8402_v24 }
 0x617   :  { %6047 = vset.pattern.permute.xlu1 %v11050_v56  ;;  %6088 = vset.pattern.permute.xlu0 %v11022_v32 }
 0x618   :  { %3030 = vperm.xlu1 %6047, %v8065_v63   ;;  %2574 = vperm.xlu0 %6088, %v8077_v55  }
 0x61a   :  { %v8408_v40 = vpop.permute.xlu1 %2546  ;;  %v8410_v47 = vpop.permute.xlu0 %2626 }
 0x61b   :  { %11096 = vst [vmem:[#allocation124_spill] sm:$0xff] %v8410_v47 }
 0x61c   :  { %6049 = vset.pattern.permute.xlu1 %v11058_v35  ;;  %6091 = vset.pattern.permute.xlu0 %v11040_v34 }
 0x61d   :  { %3350 = vperm.xlu1 %6049, %v8065_v63   ;;  %3534 = vperm.xlu0 %6091, %v8077_v55  }
 0x61f   :  { %v8416_v16 = vpop.permute.xlu1 %2866  ;;  %v8418_v24 = vpop.permute.xlu0 %2398 }
 0x620   :  { %11097 = vst [vmem:[#allocation125_spill] sm:$0xff] %v8418_v24 }
 0x621   :  { %6050 = vset.pattern.permute.xlu1 %v11053_v27  ;;  %6093 = vset.pattern.permute.xlu0 %v11045_v48 }
 0x622   :  { %3430 = vperm.xlu1 %6050, %v8065_v63   ;;  %2734 = vperm.xlu0 %6093, %v8077_v55  }
 0x624   :  { %v8424_v47 = vpop.permute.xlu1 %3506  ;;  %v8426_v30 = vpop.permute.xlu0 %3198 }
 0x626   :  { %6051 = vset.pattern.permute.xlu1 %v11035_v9  ;;  %6096 = vset.pattern.permute.xlu0 %v11052_v51 }
 0x627   :  { %2630 = vperm.xlu1 %6051, %v8065_v63   ;;  %3134 = vperm.xlu0 %6096, %v8077_v55  }
 0x629   :  { %v8432_v24 = vpop.permute.xlu1 %2706  ;;  %v8434_v19 = vpop.permute.xlu0 %2478 }
 0x62a   :  { %11098 = vst [vmem:[#allocation126_spill] sm:$0xff] %v8434_v19 }
 0x62b   :  { %6053 = vset.pattern.permute.xlu1 %v11064_v54  ;;  %6100 = vset.pattern.permute.xlu0 %v11059_v49 }
 0x62c   :  { %3270 = vperm.xlu1 %6053, %v8065_v63   ;;  %2974 = vperm.xlu0 %6100, %v8077_v55  }
 0x62e   :  { %v8440_v17 = vpop.permute.xlu1 %2786  ;;  %v8442_v42 = vpop.permute.xlu0 %3038 }
 0x62f   :  { %11099 = vst [vmem:[#allocation127_spill] sm:$0xff] %v8440_v17  ;;  %11100 = vst [vmem:[#allocation128_spill] sm:$0xff] %v8442_v42 }
 0x630   :  { %6055 = vset.pattern.permute.xlu1 %v11028_v25  ;;  %6103 = vset.pattern.permute.xlu0 %v11028_v25 }
 0x631   :  { %2410 = vperm.xlu1 %6055, %v8071_v31   ;;  %2406 = vperm.xlu0 %6103, %v8081_v13  }
 0x633   :  { %v8448_v19 = vpop.permute.xlu1 %3106  ;;  %v8450_v2 = vpop.permute.xlu0 %3438 }
 0x634   :  { %11101 = vst [vmem:[#allocation129_spill] sm:$0xff] %v8448_v19  ;;  %11102 = vst [vmem:[#allocation130_spill] sm:$0xff] %v8450_v2 }
 0x635   :  { %6056 = vset.pattern.permute.xlu1 %v11022_v32  ;;  %6105 = vset.pattern.permute.xlu0 %v11038_v7 }
 0x636   :  { %2570 = vperm.xlu1 %6056, %v8071_v31   ;;  %2886 = vperm.xlu0 %6105, %v8081_v13  }
 0x638   :  { %v8456_v63 = vpop.permute.xlu1 %3346  ;;  %v8458_v17 = vpop.permute.xlu0 %2958 }
 0x639   :  { %11103 = vst [vmem:[#allocation131_spill] sm:$0xff] %v8458_v17 }
 0x63a   :  { %6057 = vset.pattern.permute.xlu1 %v11038_v7  ;;  %6110 = vset.pattern.permute.xlu0 %v11049_v1 }
 0x63b   :  { %2890 = vperm.xlu1 %6057, %v8071_v31   ;;  %2806 = vperm.xlu0 %6110, %v8081_v13  }
 0x63d   :  { %v8464_v2 = vpop.permute.xlu1 %2946  ;;  %v8466_v19 = vpop.permute.xlu0 %2550 }
 0x63e   :  { %11104 = vst [vmem:[#allocation132_spill] sm:$0xff] %v8464_v2  ;;  %11105 = vst [vmem:[#allocation133_spill] sm:$0xff] %v8466_v19 }
 0x63f   :  { %6059 = vset.pattern.permute.xlu1 %v11040_v34  ;;  %6113 = vset.pattern.permute.xlu0 %v11058_v35 }
 0x640   :  { %3530 = vperm.xlu1 %6059, %v8071_v31   ;;  %3366 = vperm.xlu0 %6113, %v8081_v13  }
 0x642   :  { %v8472_v17 = vpop.permute.xlu1 %3266  ;;  %v8474_v42 = vpop.permute.xlu0 %3510 }
 0x643   :  { %11106 = vst [vmem:[#allocation134_spill] sm:$0xff] %v8472_v17  ;;  %11107 = vst [vmem:[#allocation135_spill] sm:$0xff] %v8474_v42 }
 0x644   :  { %6061 = vset.pattern.permute.xlu1 %v11045_v48  ;;  %6116 = vset.pattern.permute.xlu0 %v11059_v49 }
 0x645   :  { %2730 = vperm.xlu1 %6061, %v8071_v31   ;;  %2966 = vperm.xlu0 %6116, %v8081_v13  }
 0x647   :  { %v8480_v2 = vpop.permute.xlu1 %2306  ;;  %v8482_v19 = vpop.permute.xlu0 %2710 }
 0x648   :  { %11108 = vst [vmem:[#allocation136_spill] sm:$0xff] %v8480_v2  ;;  %11109 = vst [vmem:[#allocation137_spill] sm:$0xff] %v8482_v19 }
 0x649   :  { %6062 = vset.pattern.permute.xlu1 %v11049_v1  ;;  %6118 = vset.pattern.permute.xlu0 %v11005_v10 }
 0x64a   :  { %2810 = vperm.xlu1 %6062, %v8071_v31   ;;  %2341 = vperm.xlu0 %6118, %v8087_v59  }
 0x64c   :  { %v8488_v17 = vpop.permute.xlu1 %2558  ;;  %v8490_v42 = vpop.permute.xlu0 %3110 }
 0x64d   :  { %11110 = vst [vmem:[#allocation138_spill] sm:$0xff] %v8490_v42 }
 0x64e   :  { %6064 = vset.pattern.permute.xlu1 %v11052_v51  ;;  %6119 = vset.pattern.permute.xlu0 %v11022_v32 }
 0x64f   :  { %3130 = vperm.xlu1 %6064, %v8071_v31   ;;  %2586 = vperm.xlu0 %6119, %v8087_v59  }
 0x651   :  { %v8496_v2 = vpop.permute.xlu1 %2878  ;;  %v8498_v19 = vpop.permute.xlu0 %2950 }
 0x652   :  { %11111 = vst [vmem:[#allocation139_spill] sm:$0xff] %v8498_v19 }
 0x653   :  { %6065 = vset.pattern.permute.xlu1 %v11058_v35  ;;  %6122 = vset.pattern.permute.xlu0 %v11040_v34 }
 0x654   :  { %3370 = vperm.xlu1 %6065, %v8071_v31   ;;  %3546 = vperm.xlu0 %6122, %v8087_v59  }
 0x656   :  { %v8504_v42 = vpop.permute.xlu1 %3518  ;;  %v8506_v58 = vpop.permute.xlu0 %2321 }
 0x657   :  { %11112 = vst [vmem:[#allocation140_spill] sm:$0xff] %v8506_v58 }
 0x658   :  { %6068 = vset.pattern.permute.xlu1 %v11059_v49  ;;  %6123 = vset.pattern.permute.xlu0 %v11028_v25 }
 0x659   :  { %2970 = vperm.xlu1 %6068, %v8071_v31   ;;  %2426 = vperm.xlu0 %6123, %v8087_v59  }
 0x65b   :  { %v8512_v19 = vpop.permute.xlu1 %2718  ;;  %v8514_v60 = vpop.permute.xlu0 %3210 }
 0x65c   :  { %11113 = vst [vmem:[#allocation141_spill] sm:$0xff] %v8512_v19 }
 0x65d   :  { %6069 = vset.pattern.permute.xlu1 %v11064_v54  ;;  %6126 = vset.pattern.permute.xlu0 %v11049_v1 }
 0x65e   :  { %3290 = vperm.xlu1 %6069, %v8071_v31   ;;  %2826 = vperm.xlu0 %6126, %v8087_v59  }
 0x660   :  { %v8520_v58 = vpop.permute.xlu1 %2798  ;;  %v8522_v15 = vpop.permute.xlu0 %2490 }
 0x661   :  { %11114 = vst [vmem:[#allocation142_spill] sm:$0xff] %v8520_v58  ;;  %11115 = vst [vmem:[#allocation143_spill] sm:$0xff] %v8522_v15 }
 0x662   :  { %6071 = vset.pattern.permute.xlu1 %v11028_v25  ;;  %6129 = vset.pattern.permute.xlu0 %v11058_v35 }
 0x663   :  { %2402 = vperm.xlu1 %6071, %v8073_v37   ;;  %3386 = vperm.xlu0 %6129, %v8087_v59  }
 0x665   :  { %v8528_v19 = vpop.permute.xlu1 %3118  ;;  %v8530_v6 = vpop.permute.xlu0 %3050 }
 0x666   :  { %11116 = vst [vmem:[#allocation144_spill] sm:$0xff] %v8528_v19 }
 0x667   :  { %6073 = vset.pattern.permute.xlu1 %v11038_v7  ;;  %6131 = vset.pattern.permute.xlu0 %v11035_v9 }
 0x668   :  { %2882 = vperm.xlu1 %6073, %v8073_v37   ;;  %2666 = vperm.xlu0 %6131, %v8087_v59  }
 0x66a   :  { %v8536_v31 = vpop.permute.xlu1 %3358  ;;  %v8538_v58 = vpop.permute.xlu0 %3450 }
 0x66b   :  { %11117 = vst [vmem:[#allocation145_spill] sm:$0xff] %v8536_v31  ;;  %11118 = vst [vmem:[#allocation146_spill] sm:$0xff] %v8538_v58 }
 0x66c   :  { %6074 = vset.pattern.permute.xlu1 %v11041_v39  ;;  %6134 = vset.pattern.permute.xlu0 %v11005_v10 }
 0x66d   :  { %3202 = vperm.xlu1 %6074, %v8073_v37   ;;  %2331 = vperm.xlu0 %6134, %v8089_v29  }
 0x66f   :  { %v8544_v19 = vpop.permute.xlu1 %2638  ;;  %v8546_v15 = vpop.permute.xlu0 %2650 }
 0x670   :  { %11119 = vst [vmem:[#allocation147_spill] sm:$0xff] %v8544_v19  ;;  %11120 = vst [vmem:[#allocation148_spill] sm:$0xff] %v8546_v15 }
 0x671   :  { %6076 = vset.pattern.permute.xlu1 %v11024_v62  ;;  %6136 = vset.pattern.permute.xlu0 %v11038_v7 }
 0x672   :  { %2482 = vperm.xlu1 %6076, %v8073_v37   ;;  %2898 = vperm.xlu0 %6136, %v8089_v29  }
 0x674   :  { %v8552_v58 = vpop.permute.xlu1 %3278  ;;  %v8554_v31 = vpop.permute.xlu0 %2311 }
 0x675   :  { %11121 = vst [vmem:[#allocation149_spill] sm:$0xff] %v8552_v58  ;;  %11122 = vst [vmem:[#allocation150_spill] sm:$0xff] %v8554_v31 }
 0x676   :  { %6078 = vset.pattern.permute.xlu1 %v11049_v1  ;;  %6141 = vset.pattern.permute.xlu0 %v11045_v48 }
 0x677   :  { %2802 = vperm.xlu1 %6078, %v8073_v37   ;;  %2738 = vperm.xlu0 %6141, %v8089_v29  }
 0x679   :  { %v8560_v15 = vpop.permute.xlu1 %2296  ;;  %v8562_v19 = vpop.permute.xlu0 %2562 }
 0x67a   :  { %11123 = vst [vmem:[#allocation151_spill] sm:$0xff] %v8560_v15 }
 0x67b   :  { %6079 = vset.pattern.permute.xlu1 %v11050_v56  ;;  %6144 = vset.pattern.permute.xlu0 %v11052_v51 }
 0x67c   :  { %3042 = vperm.xlu1 %6079, %v8073_v37   ;;  %3138 = vperm.xlu0 %6144, %v8089_v29  }
 0x67e   :  { %v8568_v31 = vpop.permute.xlu1 %2390  ;;  %v8570_v58 = vpop.permute.xlu0 %3522 }
 0x67f   :  { %11124 = vst [vmem:[#allocation152_spill] sm:$0xff] %v8568_v31  ;;  %11125 = vst [vmem:[#allocation153_spill] sm:$0xff] %v8570_v58 }
 0x680   :  { %6081 = vset.pattern.permute.xlu1 %v11058_v35  ;;  %6147 = vset.pattern.permute.xlu0 %v11035_v9 }
 0x681   :  { %3362 = vperm.xlu1 %6081, %v8073_v37   ;;  %2658 = vperm.xlu0 %6147, %v8089_v29  }
 0x683   :  { %v8576_v15 = vpop.permute.xlu1 %2870  ;;  %v8578_v36 = vpop.permute.xlu0 %2722 }
 0x684   :  { %11126 = vst [vmem:[#allocation154_spill] sm:$0xff] %v8576_v15  ;;  %11127 = vst [vmem:[#allocation155_spill] sm:$0xff] %v8578_v36 }
 0x685   :  { %6082 = vset.pattern.permute.xlu1 %v11053_v27  ;;  %6152 = vset.pattern.permute.xlu0 %v11038_v7 }
 0x686   :  { %3442 = vperm.xlu1 %6082, %v8073_v37   ;;  %2910 = vperm.xlu0 %6152, %v8091_v0  }
 0x688   :  { %v8584_v31 = vpop.permute.xlu1 %3190  ;;  %v8586_v33 = vpop.permute.xlu0 %3122 }
 0x689   :  { %11128 = vst [vmem:[#allocation156_spill] sm:$0xff] %v8584_v31  ;;  %11129 = vst [vmem:[#allocation157_spill] sm:$0xff] %v8586_v33 }
 0x68a   :  { %6084 = vset.pattern.permute.xlu1 %v11059_v49  ;;  %6156 = vset.pattern.permute.xlu0 %v11024_v62 }
 0x68b   :  { %2962 = vperm.xlu1 %6084, %v8073_v37   ;;  %2510 = vperm.xlu0 %6156, %v8091_v0  }
 0x68d   :  { %v8592_v15 = vpop.permute.xlu1 %2470  ;;  %v8594_v5 = vpop.permute.xlu0 %2642 }
 0x68e   :  { %11130 = vst [vmem:[#allocation158_spill] sm:$0xff] %v8592_v15  ;;  %11131 = vst [vmem:[#allocation159_spill] sm:$0xff] %v8594_v5 }
 0x68f   :  { %6085 = vset.pattern.permute.xlu1 %v11064_v54  ;;  %6159 = vset.pattern.permute.xlu0 %v11050_v56 }
 0x690   :  { %3282 = vperm.xlu1 %6085, %v8073_v37   ;;  %3070 = vperm.xlu0 %6159, %v8091_v0  }
 0x692   :  { %v8600_v33 = vpop.permute.xlu1 %2790  ;;  %v8602_v31 = vpop.permute.xlu0 %2414 }
 0x693   :  { %11132 = vst [vmem:[#allocation160_spill] sm:$0xff] %v8600_v33  ;;  %11133 = vst [vmem:[#allocation161_spill] sm:$0xff] %v8602_v31 }
 0x694   :  { %6086 = vset.pattern.permute.xlu1 %v11005_v10  ;;  %6162 = vset.pattern.permute.xlu0 %v11053_v27 }
 0x695   :  { %2326 = vperm.xlu1 %6086, %v8077_v55   ;;  %3470 = vperm.xlu0 %6162, %v8091_v0  }
 0x697   :  { %v8608_v5 = vpop.permute.xlu1 %3030  ;;  %v8610_v15 = vpop.permute.xlu0 %2574 }
 0x698   :  { %11134 = vst [vmem:[#allocation162_spill] sm:$0xff] %v8608_v5  ;;  %11135 = vst [vmem:[#allocation163_spill] sm:$0xff] %v8610_v15 }
 0x699   :  { %6089 = vset.pattern.permute.xlu1 %v11038_v7  ;;  %6164 = vset.pattern.permute.xlu0 %v11059_v49 }
 0x69a   :  { %2894 = vperm.xlu1 %6089, %v8077_v55   ;;  %2990 = vperm.xlu0 %6164, %v8091_v0  }
 0x69c   :  { %v8616_v37 = vpop.permute.xlu1 %3350  ;;  %v8618_v33 = vpop.permute.xlu0 %3534 }
 0x69d   :  { %11136 = vst [vmem:[#allocation164_spill] sm:$0xff] %v8616_v37  ;;  %11137 = vst [vmem:[#allocation165_spill] sm:$0xff] %v8618_v33 }
 0x69e   :  { %6090 = vset.pattern.permute.xlu1 %v11041_v39  ;;  %6169 = vset.pattern.permute.xlu0 %v11041_v39 }
 0x69f   :  { %3214 = vperm.xlu1 %6090, %v8077_v55   ;;  %3222 = vperm.xlu0 %6169, %v8093_v26  }
 0x6a1   :  { %v8624_v31 = vpop.permute.xlu1 %3430  ;;  %v8626_v15 = vpop.permute.xlu0 %2734 }
 0x6a2   :  { %11138 = vst [vmem:[#allocation166_spill] sm:$0xff] %v8624_v31  ;;  %11139 = vst [vmem:[#allocation167_spill] sm:$0xff] %v8626_v15 }
 0x6a3   :  { %6092 = vset.pattern.permute.xlu1 %v11024_v62  ;;  %6171 = vset.pattern.permute.xlu0 %v11028_v25 }
 0x6a4   :  { %2494 = vperm.xlu1 %6092, %v8077_v55   ;;  %2422 = vperm.xlu0 %6171, %v8093_v26  }
 0x6a6   :  { %v8632_v33 = vpop.permute.xlu1 %2630  ;;  %v8634_v37 = vpop.permute.xlu0 %3134 }
 0x6a7   :  { %11140 = vst [vmem:[#allocation168_spill] sm:$0xff] %v8632_v33  ;;  %11141 = vst [vmem:[#allocation169_spill] sm:$0xff] %v8634_v37 }
 0x6a8   :  { %6094 = vset.pattern.permute.xlu1 %v11049_v1  ;;  %6174 = vset.pattern.permute.xlu0 %v11049_v1 }
 0x6a9   :  { %2814 = vperm.xlu1 %6094, %v8077_v55   ;;  %2822 = vperm.xlu0 %6174, %v8093_v26  }
 0x6ab   :  { %v8640_v31 = vpop.permute.xlu1 %3270  ;;  %v8642_v15 = vpop.permute.xlu0 %2974 }
 0x6ac   :  { %11142 = vst [vmem:[#allocation170_spill] sm:$0xff] %v8640_v31  ;;  %11143 = vst [vmem:[#allocation171_spill] sm:$0xff] %v8642_v15 }
 0x6ad   :  { %6095 = vset.pattern.permute.xlu1 %v11050_v56  ;;  %6177 = vset.pattern.permute.xlu0 %v11058_v35 }
 0x6ae   :  { %3054 = vperm.xlu1 %6095, %v8077_v55   ;;  %3382 = vperm.xlu0 %6177, %v8093_v26  }
 0x6b0   :  { %v8648_v33 = vpop.permute.xlu1 %2410  ;;  %v8650_v37 = vpop.permute.xlu0 %2406 }
 0x6b1   :  { %11144 = vst [vmem:[#allocation172_spill] sm:$0xff] %v8650_v37 }
 0x6b2   :  { %6097 = vset.pattern.permute.xlu1 %v11058_v35  ;;  %6180 = vset.pattern.permute.xlu0 %v11059_v49 }
 0x6b3   :  { %3374 = vperm.xlu1 %6097, %v8077_v55   ;;  %2982 = vperm.xlu0 %6180, %v8093_v26  }
 0x6b5   :  { %v8656_v15 = vpop.permute.xlu1 %2570  ;;  %v8658_v31 = vpop.permute.xlu0 %2886 }
 0x6b6   :  { %11145 = vst [vmem:[#allocation173_spill] sm:$0xff] %v8656_v15  ;;  %11146 = vst [vmem:[#allocation174_spill] sm:$0xff] %v8658_v31 }
 0x6b7   :  { %6098 = vset.pattern.permute.xlu1 %v11053_v27  ;;  %6182 = vset.pattern.permute.xlu0 %v11005_v10 }
 0x6b8   :  { %3454 = vperm.xlu1 %6098, %v8077_v55   ;;  %2361 = vperm.xlu0 %6182, %v8099_v38  }
 0x6ba   :  { %v8664_v37 = vpop.permute.xlu1 %2890  ;;  %v8666_v5 = vpop.permute.xlu0 %2806 }
 0x6bb   :  { %11147 = vst [vmem:[#allocation175_spill] sm:$0xff] %v8666_v5 }
 0x6bc   :  { %6099 = vset.pattern.permute.xlu1 %v11035_v9  ;;  %6184 = vset.pattern.permute.xlu0 %v11038_v7 }
 0x6bd   :  { %2654 = vperm.xlu1 %6099, %v8077_v55   ;;  %2922 = vperm.xlu0 %6184, %v8099_v38  }
 0x6bf   :  { %v8672_v31 = vpop.permute.xlu1 %3530  ;;  %v8674_v15 = vpop.permute.xlu0 %3366 }
 0x6c0   :  { %11148 = vst [vmem:[#allocation176_spill] sm:$0xff] %v8674_v15 }
 0x6c1   :  { %6101 = vset.pattern.permute.xlu1 %v11064_v54  ;;  %6187 = vset.pattern.permute.xlu0 %v11028_v25 }
 0x6c2   :  { %3294 = vperm.xlu1 %6101, %v8077_v55   ;;  %2442 = vperm.xlu0 %6187, %v8099_v38  }
 0x6c4   :  { %v8680_v5 = vpop.permute.xlu1 %2730  ;;  %v8682_v26 = vpop.permute.xlu0 %2966 }
 0x6c5   :  { %11149 = vst [vmem:[#allocation177_spill] sm:$0xff] %v8682_v26 }
 0x6c6   :  { %6102 = vset.pattern.permute.xlu1 %v11005_v10  ;;  %6190 = vset.pattern.permute.xlu0 %v11049_v1 }
 0x6c7   :  { %2316 = vperm.xlu1 %6102, %v8081_v13   ;;  %2842 = vperm.xlu0 %6190, %v8099_v38  }
 0x6c9   :  { %v8688_v15 = vpop.permute.xlu1 %2810  ;;  %v8690_v36 = vpop.permute.xlu0 %2341 }
 0x6ca   :  { %11150 = vst [vmem:[#allocation178_spill] sm:$0xff] %v8688_v15  ;;  %11151 = vst [vmem:[#allocation179_spill] sm:$0xff] %v8690_v36 }
 0x6cb   :  { %6104 = vset.pattern.permute.xlu1 %v11022_v32  ;;  %6193 = vset.pattern.permute.xlu0 %v11058_v35 }
 0x6cc   :  { %2566 = vperm.xlu1 %6104, %v8081_v13   ;;  %3402 = vperm.xlu0 %6193, %v8099_v38  }
 0x6ce   :  { %v8696_v55 = vpop.permute.xlu1 %3130  ;;  %v8698_v26 = vpop.permute.xlu0 %2586 }
 0x6cf   :  { %11152 = vst [vmem:[#allocation180_spill] sm:$0xff] %v8696_v55  ;;  %11153 = vst [vmem:[#allocation181_spill] sm:$0xff] %v8698_v26 }
 0x6d0   :  { %6106 = vset.pattern.permute.xlu1 %v11041_v39  ;;  %6195 = vset.pattern.permute.xlu0 %v11035_v9 }
 0x6d1   :  { %3206 = vperm.xlu1 %6106, %v8081_v13   ;;  %2682 = vperm.xlu0 %6195, %v8099_v38  }
 0x6d3   :  { %v8704_v36 = vpop.permute.xlu1 %3370  ;;  %v8706_v15 = vpop.permute.xlu0 %3546 }
 0x6d4   :  { %11154 = vst [vmem:[#allocation182_spill] sm:$0xff] %v8706_v15 }
 0x6d5   :  { %6107 = vset.pattern.permute.xlu1 %v11040_v34  ;;  %6198 = vset.pattern.permute.xlu0 %v11005_v10 }
 0x6d6   :  { %3526 = vperm.xlu1 %6107, %v8081_v13   ;;  %2351 = vperm.xlu0 %6198, %v8103_v4  }
 0x6d8   :  { %v8712_v55 = vpop.permute.xlu1 %2970  ;;  %v8714_v26 = vpop.permute.xlu0 %2426 }
 0x6d9   :  { %11155 = vst [vmem:[#allocation183_spill] sm:$0xff] %v8712_v55  ;;  %11156 = vst [vmem:[#allocation184_spill] sm:$0xff] %v8714_v26 }
 0x6da   :  { %6108 = vset.pattern.permute.xlu1 %v11024_v62  ;;  %6201 = vset.pattern.permute.xlu0 %v11041_v39 }
 0x6db   :  { %2486 = vperm.xlu1 %6108, %v8081_v13   ;;  %3234 = vperm.xlu0 %6201, %v8103_v4  }
 0x6dd   :  { %v8720_v38 = vpop.permute.xlu1 %3290  ;;  %v8722_v15 = vpop.permute.xlu0 %2826 }
 0x6de   :  { %11157 = vst [vmem:[#allocation185_spill] sm:$0xff] %v8720_v38  ;;  %11158 = vst [vmem:[#allocation186_spill] sm:$0xff] %v8722_v15 }
 0x6df   :  { %6109 = vset.pattern.permute.xlu1 %v11045_v48  ;;  %6203 = vset.pattern.permute.xlu0 %v11028_v25 }
 0x6e0   :  { %2726 = vperm.xlu1 %6109, %v8081_v13   ;;  %2434 = vperm.xlu0 %6203, %v8103_v4  }
 0x6e2   :  { %v8728_v55 = vpop.permute.xlu1 %2402  ;;  %v8730_v26 = vpop.permute.xlu0 %3386 }
 0x6e3   :  { %11159 = vst [vmem:[#allocation187_spill] sm:$0xff] %v8728_v55  ;;  %11160 = vst [vmem:[#allocation188_spill] sm:$0xff] %v8730_v26 }
 0x6e4   :  { %6111 = vset.pattern.permute.xlu1 %v11050_v56  ;;  %6206 = vset.pattern.permute.xlu0 %v11049_v1 }
 0x6e5   :  { %3046 = vperm.xlu1 %6111, %v8081_v13   ;;  %2834 = vperm.xlu0 %6206, %v8103_v4  }
 0x6e7   :  { %v8736_v38 = vpop.permute.xlu1 %2882  ;;  %v8738_v15 = vpop.permute.xlu0 %2666 }
 0x6e8   :  { %11161 = vst [vmem:[#allocation189_spill] sm:$0xff] %v8738_v15 }
 0x6e9   :  { %6112 = vset.pattern.permute.xlu1 %v11052_v51  ;;  %6209 = vset.pattern.permute.xlu0 %v11058_v35 }
 0x6ea   :  { %3126 = vperm.xlu1 %6112, %v8081_v13   ;;  %3394 = vperm.xlu0 %6209, %v8103_v4  }
 0x6ec   :  { %v8744_v26 = vpop.permute.xlu1 %3202  ;;  %v8746_v55 = vpop.permute.xlu0 %2331 }
 0x6ed   :  { %11162 = vst [vmem:[#allocation190_spill] sm:$0xff] %v8746_v55 }
 0x6ee   :  { %6114 = vset.pattern.permute.xlu1 %v11053_v27  ;;  %6211 = vset.pattern.permute.xlu0 %v11035_v9 }
 0x6ef   :  { %3446 = vperm.xlu1 %6114, %v8081_v13   ;;  %2674 = vperm.xlu0 %6211, %v8103_v4  }
 0x6f1   :  { %v8752_v15 = vpop.permute.xlu1 %2482  ;;  %v8754_v58 = vpop.permute.xlu0 %2898 }
 0x6f2   :  { %11163 = vst [vmem:[#allocation191_spill] sm:$0xff] %v8752_v15  ;;  %11164 = vst [vmem:[#allocation192_spill] sm:$0xff] %v8754_v58 }
 0x6f3   :  { %6115 = vset.pattern.permute.xlu1 %v11035_v9  ;;  %6217 = vset.pattern.permute.xlu0 %v11041_v39 }
 0x6f4   :  { %2646 = vperm.xlu1 %6115, %v8081_v13   ;;  %3246 = vperm.xlu0 %6217, %v8107_v57  }
 0x6f6   :  { %v8760_v55 = vpop.permute.xlu1 %2802  ;;  %v8762_v28 = vpop.permute.xlu0 %2738 }
 0x6f7   :  { %11165 = vst [vmem:[#allocation193_spill] sm:$0xff] %v8760_v55  ;;  %11166 = vst [vmem:[#allocation194_spill] sm:$0xff] %v8762_v28 }
 0x6f8   :  { %6117 = vset.pattern.permute.xlu1 %v11064_v54  ;;  %6220 = vset.pattern.permute.xlu0 %v11024_v62 }
 0x6f9   :  { %3286 = vperm.xlu1 %6117, %v8081_v13   ;;  %2526 = vperm.xlu0 %6220, %v8107_v57  }
 0x6fb   :  { %v8768_v15 = vpop.permute.xlu1 %3042  ;;  %v8770_v4 = vpop.permute.xlu0 %3138 }
 0x6fc   :  { %11167 = vst [vmem:[#allocation195_spill] sm:$0xff] %v8768_v15  ;;  %11168 = vst [vmem:[#allocation196_spill] sm:$0xff] %v8770_v4  ;;  %v11190_v15 = vld [vmem:[#allocation45_spill] sm:$0xff] }
 0x6fd   :  { %6120 = vset.pattern.permute.xlu1 %v11038_v7  ;;  %6223 = vset.pattern.permute.xlu0 %v11050_v56 }
 0x6fe   :  { %2906 = vperm.xlu1 %6120, %v8087_v59   ;;  %3086 = vperm.xlu0 %6223, %v8107_v57  }
 0x700   :  { %v8776_v55 = vpop.permute.xlu1 %3362  ;;  %v8778_v28 = vpop.permute.xlu0 %2658 }
 0x701   :  { %11169 = vst [vmem:[#allocation197_spill] sm:$0xff] %v8776_v55  ;;  %11170 = vst [vmem:[#allocation198_spill] sm:$0xff] %v8778_v28 }
 0x702   :  { %6121 = vset.pattern.permute.xlu1 %v11041_v39  ;;  %6226 = vset.pattern.permute.xlu0 %v11053_v27 }
 0x703   :  { %3226 = vperm.xlu1 %6121, %v8087_v59   ;;  %3486 = vperm.xlu0 %6226, %v8107_v57  }
 0x705   :  { %v8784_v13 = vpop.permute.xlu1 %3442  ;;  %v8786_v4 = vpop.permute.xlu0 %2910 }
 0x706   :  { %11171 = vst [vmem:[#allocation199_spill] sm:$0xff] %v8784_v13  ;;  %11172 = vst [vmem:[#allocation200_spill] sm:$0xff] %v8786_v4 }
 0x707   :  { %6124 = vset.pattern.permute.xlu1 %v11024_v62  ;;  %6228 = vset.pattern.permute.xlu0 %v11059_v49 }
 0x708   :  { %2506 = vperm.xlu1 %6124, %v8087_v59   ;;  %3006 = vperm.xlu0 %6228, %v8107_v57   ;;  %v11185_v57 = vld [vmem:[#allocation39_spill] sm:$0xff] }
 0x70a   :  { %v8792_v28 = vpop.permute.xlu1 %2962  ;;  %v8794_v58 = vpop.permute.xlu0 %2510 }
 0x70b   :  { %11173 = vst [vmem:[#allocation201_spill] sm:$0xff] %v8792_v28  ;;  %11174 = vst [vmem:[#allocation202_spill] sm:$0xff] %v8794_v58 }
 0x70c   :  { %6125 = vset.pattern.permute.xlu1 %v11045_v48  ;;  %6231 = vset.pattern.permute.xlu0 %v11022_v32 }
 0x70d   :  { %2746 = vperm.xlu1 %6125, %v8087_v59   ;;  %2598 = vperm.xlu0 %6231, %v8109_v21  }
 0x70f   :  { %v8800_v13 = vpop.permute.xlu1 %3282  ;;  %v8802_v4 = vpop.permute.xlu0 %3070 }
 0x710   :  { %11175 = vst [vmem:[#allocation203_spill] sm:$0xff] %v8800_v13  ;;  %11176 = vst [vmem:[#allocation204_spill] sm:$0xff] %v8802_v4 }
 0x711   :  { %6127 = vset.pattern.permute.xlu1 %v11050_v56  ;;  %6234 = vset.pattern.permute.xlu0 %v11040_v34 }
 0x712   :  { %3066 = vperm.xlu1 %6127, %v8087_v59   ;;  %3558 = vperm.xlu0 %6234, %v8109_v21  }
 0x714   :  { %v8808_v28 = vpop.permute.xlu1 %2326  ;;  %v8810_v58 = vpop.permute.xlu0 %3470 }
 0x715   :  { %11177 = vst [vmem:[#allocation205_spill] sm:$0xff] %v8808_v28  ;;  %11178 = vst [vmem:[#allocation206_spill] sm:$0xff] %v8810_v58 }
 0x716   :  { %6128 = vset.pattern.permute.xlu1 %v11052_v51  ;;  %6236 = vset.pattern.permute.xlu0 %v11024_v62 }
 0x717   :  { %3146 = vperm.xlu1 %6128, %v8087_v59   ;;  %2518 = vperm.xlu0 %6236, %v8109_v21  }
 0x719   :  { %v8816_v13 = vpop.permute.xlu1 %2894  ;;  %v8818_v4 = vpop.permute.xlu0 %2990 }
 0x71a   :  { %11179 = vst [vmem:[#allocation207_spill] sm:$0xff] %v8816_v13  ;;  %11180 = vst [vmem:[#allocation208_spill] sm:$0xff] %v8818_v4 }
 0x71b   :  { %6130 = vset.pattern.permute.xlu1 %v11053_v27  ;;  %6239 = vset.pattern.permute.xlu0 %v11050_v56 }
 0x71c   :  { %3466 = vperm.xlu1 %6130, %v8087_v59   ;;  %3078 = vperm.xlu0 %6239, %v8109_v21  }
 0x71e   :  { %v8824_v28 = vpop.permute.xlu1 %3214  ;;  %v8826_v58 = vpop.permute.xlu0 %3222 }
 0x71f   :  { %11181 = vst [vmem:[#allocation209_spill] sm:$0xff] %v8824_v28  ;;  %11182 = vst [vmem:[#allocation210_spill] sm:$0xff] %v8826_v58  ;;  %v11186_v28 = vld [vmem:[#allocation44_spill] sm:$0xff] }
 0x720   :  { %6132 = vset.pattern.permute.xlu1 %v11059_v49  ;;  %6242 = vset.pattern.permute.xlu0 %v11053_v27  ;;  %v8840_v7 = vadd.f32 %v11186_v28, %v11185_v57 }
 0x721   :  { %2986 = vperm.xlu1 %6132, %v8087_v59   ;;  %3478 = vperm.xlu0 %6242, %v8109_v21  }
 0x722   :  { %v2451_v58 = vmul.f32 %v8320_v44, %v8840_v7 }
 0x723   :  { %v8832_v4 = vpop.permute.xlu1 %2494  ;;  %v8834_v13 = vpop.permute.xlu0 %2422 }
 0x724   :  { %11183 = vst [vmem:[#allocation211_spill] sm:$0xff] %v8832_v4  ;;  %11184 = vst [vmem:[#allocation212_spill] sm:$0xff] %v8834_v13  ;;  %v11189_v13 = vld [vmem:[#allocation41_spill] sm:$0xff] }
 0x725   :  { %6133 = vset.pattern.permute.xlu1 %v11064_v54  ;;  %6244 = vset.pattern.permute.xlu0 %v11059_v49  ;;  %v8852_v9 = vadd.f32 %v11190_v15, %v11189_v13 }
 0x726   :  { %3306 = vperm.xlu1 %6133, %v8087_v59   ;;  %2998 = vperm.xlu0 %6244, %v8109_v21  }
 0x727   :  { %v2771_v28 = vmul.f32 %v8360_v41, %v8852_v9  ;;  %v8875_v41 = vadd.f32 %v8144_v23, %v8126_v8 }
 0x728   :  { %v8846_v55 = vpop.permute.xlu1 %2814  ;;  %v8848_v4 = vpop.permute.xlu0 %2822 }
 0x729   :  { %11187 = vst [vmem:[#allocation39_spill] sm:$0xff] %v8846_v55  ;;  %11188 = vst [vmem:[#allocation44_spill] sm:$0xff] %v8848_v4  ;;  %v8866_v4 = vadd.f32 %v8140_v12, %v8122_v22  ;;  %v3411_v12 = vmul.f32 %v8346_v53, %v8875_v41  ;;  %v11196_v53 = vld [vmem:[#allocation40_spill] sm:$0xff] }
 0x72a   :  { %6135 = vset.pattern.permute.xlu1 %v11022_v32  ;;  %3605 = vrot.lane.b32.xlu0 %v2451_v58, %s6372_s30 }
 0x72b   :  { %2578 = vperm.xlu1 %6135, %v8089_v29   ;;  %6246 = vset.pattern.permute.xlu0 %v11005_v10  ;;  %v3091_v58 = vmul.f32 %v8368_v11, %v8866_v4  ;;  %v11193_v11 = vld [vmem:[#allocation38_spill] sm:$0xff] }
 0x72d   :  { %v8860_v59 = vpop.permute.xlu1 %3054  ;;  %v8862_v44 = vpop.permute.xlu0 %3382 }
 0x72e   :  { %11191 = vst [vmem:[#allocation41_spill] sm:$0xff] %v8862_v44  ;;  %3765 = vrot.lane.b32.xlu0 %v2771_v28, %s6372_s30  ;;  %v8888_v28 = vadd.f32 %v11193_v11, %v11185_v57 }
 0x72f   :  { %6137 = vset.pattern.permute.xlu1 %v11041_v39 }
 0x730   :  { %3218 = vperm.xlu1 %6137, %v8089_v29  }
 0x732   :  { %v8877_v15 = vpop.permute.xlu1 %3374  ;;  %v8879_v55 = vpop.permute.xlu0 %2982  ;;  %3925 = vrot.lane.b32.xlu0 %v3091_v58, %s6372_s30  ;;  %v2609_v58 = vmul.f32 %v8408_v40, %v8888_v28  ;;  %v8912_v40 = vadd.f32 %v8117_v20, %v8122_v22 }
 0x733   :  { %11192 = vst [vmem:[#allocation45_spill] sm:$0xff] %v8879_v55  ;;  %v8900_v55 = vadd.f32 %v11196_v53, %v11189_v13 }
 0x734   :  { %6138 = vset.pattern.permute.xlu1 %v11040_v34 }
 0x735   :  { %3538 = vperm.xlu1 %6138, %v8089_v29  }
 0x736   :  { %4085 = vrot.lane.b32.xlu0 %v3411_v12, %s6372_s30  ;;  %v2929_v12 = vmul.f32 %v8416_v16, %v8900_v55 }
 0x737   :  { %v8891_v23 = vpop.permute.xlu1 %3454  ;;  %v8893_v44 = vpop.permute.xlu0 %2361 }
 0x738   :  { %11194 = vst [vmem:[#allocation38_spill] sm:$0xff] %v8891_v23  ;;  %11195 = vst [vmem:[#allocation213_spill] sm:$0xff] %v8893_v44 }
 0x739   :  { %6139 = vset.pattern.permute.xlu1 %v11028_v25 }
 0x73a   :  { %2418 = vperm.xlu1 %6139, %v8089_v29   ;;  %3681 = vrot.lane.b32.xlu0 %v2609_v58, %s6372_s30  ;;  %v3249_v58 = vmul.f32 %v8378_v3, %v8912_v40 }
 0x73c   :  { %v8906_v11 = vpop.permute.xlu1 %2654  ;;  %v8908_v23 = vpop.permute.xlu0 %2922 }
 0x73d   :  { %11197 = vst [vmem:[#allocation40_spill] sm:$0xff] %v8906_v11  ;;  %v8925_v11 = vadd.f32 %v8124_v14, %v8126_v8 }
 0x73e   :  { %6140 = vset.pattern.permute.xlu1 %v11024_v62  ;;  %3841 = vrot.lane.b32.xlu0 %v2929_v12, %s6372_s30 }
 0x73f   :  { %2498 = vperm.xlu1 %6140, %v8089_v29   ;;  %v3569_v20 = vmul.f32 %v8424_v47, %v8925_v11 }
 0x741   :  { %v8919_v53 = vpop.permute.xlu1 %3294  ;;  %v8921_v16 = vpop.permute.xlu0 %2442 }
 0x742   :  { %11198 = vst [vmem:[#allocation214_spill] sm:$0xff] %v8919_v53  ;;  %4001 = vrot.lane.b32.xlu0 %v3249_v58, %s6372_s30  ;;  %v2449_v53 = vmul.f32 %v8370_v50, %v8888_v28  ;;  %v2769_v58 = vmul.f32 %v8432_v24, %v8900_v55  ;;  %v3089_v50 = vmul.f32 %v8394_v61, %v8912_v40 }
 0x743   :  { %6142 = vset.pattern.permute.xlu1 %v11049_v1  ;;  %v3409_v24 = vmul.f32 %v8456_v63, %v8925_v11 }
 0x744   :  { %2818 = vperm.xlu1 %6142, %v8089_v29  }
 0x746   :  { %v8932_v12 = vpop.permute.xlu1 %2316  ;;  %v8934_v3 = vpop.permute.xlu0 %2842  ;;  %4161 = vrot.lane.b32.xlu0 %v3569_v20, %s6372_s30 }
 0x747   :  { %11199 = vst [vmem:[#allocation215_spill] sm:$0xff] %v8932_v12  ;;  %11200 = vst [vmem:[#allocation216_spill] sm:$0xff] %v8934_v3 }
 0x748   :  { %6143 = vset.pattern.permute.xlu1 %v11050_v56 }
 0x749   :  { %3058 = vperm.xlu1 %6143, %v8089_v29  }
 0x74a   :  { %3601 = vrot.lane.b32.xlu0 %v2449_v53, %s6372_s30 }
 0x74b   :  { %v8942_v14 = vpop.permute.xlu1 %2566  ;;  %v8944_v47 = vpop.permute.xlu0 %3402 }
 0x74d   :  { %6145 = vset.pattern.permute.xlu1 %v11058_v35 }
 0x74e   :  { %3378 = vperm.xlu1 %6145, %v8089_v29   ;;  %3761 = vrot.lane.b32.xlu0 %v2769_v58, %s6372_s30  ;;  %v11203_v58 = vld [vmem:[#allocation46_spill] sm:$0xff] }
 0x74f   :  { %v8968_v61 = vadd.f32 %v11203_v58, %v11185_v57 }
 0x750   :  { %v8953_v20 = vpop.permute.xlu1 %3206  ;;  %v8955_v12 = vpop.permute.xlu0 %2682 }
 0x751   :  { %11201 = vst [vmem:[#allocation217_spill] sm:$0xff] %v8955_v12  ;;  %v11204_v12 = vld [vmem:[#allocation47_spill] sm:$0xff] }
 0x752   :  { %6146 = vset.pattern.permute.xlu1 %v11053_v27  ;;  %3921 = vrot.lane.b32.xlu0 %v3089_v50, %s6372_s30  ;;  %v2612_v50 = vmul.f32 %v8488_v17, %v8968_v61  ;;  %v8977_v63 = vadd.f32 %v11204_v12, %v11189_v13  ;;  %v8990_v17 = vadd.f32 %v8146_v46, %v8122_v22 }
 0x753   :  { %3458 = vperm.xlu1 %6146, %v8089_v29  }
 0x754   :  { %v2932_v57 = vmul.f32 %v8496_v2, %v8977_v63  ;;  %v3252_v58 = vmul.f32 %v8426_v30, %v8990_v17  ;;  %v9002_v2 = vadd.f32 %v8148_v18, %v8126_v8 }
 0x755   :  { %v8962_v53 = vpop.permute.xlu1 %3526  ;;  %v8964_v44 = vpop.permute.xlu0 %2351 }
 0x756   :  { %11202 = vst [vmem:[#allocation218_spill] sm:$0xff] %v8964_v44  ;;  %4081 = vrot.lane.b32.xlu0 %v3409_v24, %s6372_s30 }
 0x757   :  { %6148 = vset.pattern.permute.xlu1 %v11059_v49 }
 0x758   :  { %2978 = vperm.xlu1 %6148, %v8089_v29  }
 0x75a   :  { %v8979_v3 = vpop.permute.xlu1 %2486  ;;  %v8981_v44 = vpop.permute.xlu0 %3234  ;;  %3687 = vrot.lane.b32.xlu0 %v2612_v50, %s6372_s30 }
 0x75b   :  { %11205 = vst [vmem:[#allocation46_spill] sm:$0xff] %v8979_v3 }
 0x75c   :  { %6149 = vset.pattern.permute.xlu1 %v11064_v54 }
 0x75d   :  { %3298 = vperm.xlu1 %6149, %v8089_v29   ;;  %v3572_v29 = vmul.f32 %v8504_v42, %v9002_v2  ;;  %v9025_v42 = vadd.f32 %v8174_v52, %v8122_v22 }
 0x75e   :  { %3847 = vrot.lane.b32.xlu0 %v2932_v57, %s6372_s30  ;;  %v11207_v57 = vld [vmem:[#allocation57_spill] sm:$0xff] }
 0x75f   :  { %v8993_v12 = vpop.permute.xlu1 %2726  ;;  %v8995_v24 = vpop.permute.xlu0 %2434  ;;  %v9014_v30 = vadd.f32 %v11207_v57, %v11189_v13  ;;  %11210 = vst [vmem:[#allocation220_spill] sm:$0xff] %v9025_v42  ;;  %v3255_v13 = vmul.f32 %v8514_v60, %v9025_v42  ;;  %v11215_v57 = vld [vmem:[#allocation56_spill] sm:$0xff] }
 0x761   :  { %6150 = vset.pattern.permute.xlu1 %v11005_v10  ;;  %11208 = vst [vmem:[#allocation57_spill] sm:$0xff] %v9014_v30  ;;  %v2935_v18 = vmul.f32 %v8664_v37, %v9014_v30  ;;  %v9036_v37 = vadd.f32 %v8176_v43, %v8126_v8  ;;  %v2455_v8 = vmul.f32 %v8648_v33, %v11215_v57 }
 0x762   :  { %2346 = vperm.xlu1 %6150, %v8091_v0   ;;  %4007 = vrot.lane.b32.xlu0 %v3252_v58, %s6372_s30  ;;  %v3095_v33 = vmul.f32 %v8530_v6, %v9025_v42 }
 0x763   :  { %11211 = vst [vmem:[#allocation221_spill] sm:$0xff] %v9036_v37  ;;  %v3575_v52 = vmul.f32 %v8672_v31, %v9036_v37  ;;  %v2775_v31 = vmul.f32 %v8680_v5, %v9014_v30  ;;  %v3415_v5 = vmul.f32 %v8704_v36, %v9036_v37 }
 0x764   :  { %v9008_v46 = vpop.permute.xlu1 %3046  ;;  %v9010_v50 = vpop.permute.xlu0 %2834 }
 0x765   :  { %11206 = vst [vmem:[#allocation47_spill] sm:$0xff] %v9010_v50 }
 0x766   :  { %6151 = vset.pattern.permute.xlu1 %v11022_v32  ;;  %4167 = vrot.lane.b32.xlu0 %v3572_v29, %s6372_s30 }
 0x767   :  { %2590 = vperm.xlu1 %6151, %v8091_v0  }
 0x769   :  { %v9021_v58 = vpop.permute.xlu1 %3126  ;;  %v9027_v3 = vpop.permute.xlu0 %3394 }
 0x76a   :  { %11209 = vst [vmem:[#allocation219_spill] sm:$0xff] %v9021_v58  ;;  %3853 = vrot.lane.b32.xlu0 %v2935_v18, %s6372_s30 }
 0x76b   :  { %6153 = vset.pattern.permute.xlu1 %v11041_v39 }
 0x76c   :  { %3230 = vperm.xlu1 %6153, %v8091_v0  }
 0x76e   :  { %v9038_v29 = vpop.permute.xlu1 %3446  ;;  %4013 = vrot.lane.b32.xlu0 %v3255_v13, %s6372_s30  ;;  %v9043_v22 = vpop.permute.xlu0 %2674 }
 0x76f   :  { %11212 = vst [vmem:[#allocation222_spill] sm:$0xff] %v9038_v29  ;;  %11213 = vst [vmem:[#allocation223_spill] sm:$0xff] %v9043_v22 }
 0x770   :  { %6154 = vset.pattern.permute.xlu1 %v11040_v34 }
 0x771   :  { %3550 = vperm.xlu1 %6154, %v8091_v0  }
 0x772   :  { %4173 = vrot.lane.b32.xlu0 %v3575_v52, %s6372_s30 }
 0x773   :  { %v9048_v60 = vpop.permute.xlu1 %2646  ;;  %v9053_v43 = vpop.permute.xlu0 %3246 }
 0x774   :  { %11214 = vst [vmem:[#allocation224_spill] sm:$0xff] %v9048_v60  ;;  %11216 = vst [vmem:[#allocation225_spill] sm:$0xff] %v9053_v43  ;;  %v11222_v60 = vld [vmem:[#allocation51_spill] sm:$0xff] }
 0x775   :  { %6155 = vset.pattern.permute.xlu1 %v11028_v25  ;;  %v2933_v36 = vmul.f32 %v8736_v38, %v11222_v60  ;;  %v11226_v38 = vld [vmem:[#allocation25_spill] sm:$0xff] }
 0x776   :  { %2430 = vperm.xlu1 %6155, %v8091_v0   ;;  %3613 = vrot.lane.b32.xlu0 %v2455_v8, %s6372_s30 }
 0x778   :  { %v9059_v18 = vpop.permute.xlu1 %3286  ;;  %v9066_v13 = vpop.permute.xlu0 %2526 }
 0x779   :  { %11217 = vst [vmem:[#allocation226_spill] sm:$0xff] %v9059_v18  ;;  %11218 = vst [vmem:[#allocation227_spill] sm:$0xff] %v9066_v13  ;;  %v11220_v18 = vld [vmem:[#allocation49_spill] sm:$0xff] }
 0x77a   :  { %6157 = vset.pattern.permute.xlu1 %v11045_v48  ;;  %3773 = vrot.lane.b32.xlu0 %v2775_v31, %s6372_s30  ;;  %v2613_v6 = vmul.f32 %v8562_v19, %v11220_v18  ;;  %v3253_v19 = vmul.f32 %v8744_v26, %v8155_v45 }
 0x77b   :  { %2750 = vperm.xlu1 %6157, %v8091_v0  }
 0x77d   :  { %v2907_v52 = vpop.permute.xlu1 %2906  ;;  %v9073_v8 = vpop.permute.xlu0 %3086 }
 0x77e   :  { %3933 = vrot.lane.b32.xlu0 %v3095_v33, %s6372_s30  ;;  %11219 = vst [vmem:[#allocation228_spill] sm:$0xff] %v9073_v8 }
 0x77f   :  { %6158 = vset.pattern.permute.xlu1 %v11049_v1 }
 0x780   :  { %2830 = vperm.xlu1 %6158, %v8091_v0  }
 0x782   :  { %v3227_v31 = vpop.permute.xlu1 %3226  ;;  %4093 = vrot.lane.b32.xlu0 %v3415_v5, %s6372_s30  ;;  %v9085_v22 = vpop.permute.xlu0 %3486 }
 0x783   :  { %11223 = vst [vmem:[#allocation230_spill] sm:$0xff] %v9085_v22  ;;  %v11227_v22 = vld [vmem:[#allocation153_spill] sm:$0xff] }
 0x784   :  { %6160 = vset.pattern.permute.xlu1 %v11052_v51  ;;  %v3573_v29 = vmul.f32 %v11227_v22, %v11226_v38  ;;  %v11232_v22 = vld [vmem:[#allocation24_spill] sm:$0xff] }
 0x785   :  { %3150 = vperm.xlu1 %6160, %v8091_v0  }
 0x786   :  { %3689 = vrot.lane.b32.xlu0 %v2613_v6, %s6372_s30  ;;  %v11225_v6 = vmov 4  }
 0x787   :  { %v9081_v33 = vpop.permute.xlu1 %2506  ;;  %v9092_v13 = vpop.permute.xlu0 %3006 }
 0x788   :  { %11221 = vst [vmem:[#allocation229_spill] sm:$0xff] %v9081_v33  ;;  %11224 = vst [vmem:[#allocation231_spill] sm:$0xff] %v9092_v13 }
 0x789   :  { %6161 = vset.pattern.permute.xlu1 %v11058_v35 }
 0x78a   :  { %3390 = vperm.xlu1 %6161, %v8091_v0   ;;  %3849 = vrot.lane.b32.xlu0 %v2933_v36, %s6372_s30  ;;  %v11228_v36 = vld [vmem:[#allocation187_spill] sm:$0xff] }
 0x78b   :  { %v2453_v26 = vmul.f32 %v11228_v36, %v11220_v18 }
 0x78c   :  { %v2747_v5 = vpop.permute.xlu1 %2746  ;;  %v9103_v50 = vpop.permute.xlu0 %2598 }
 0x78d   :  { %11229 = vst [vmem:[#allocation153_spill] sm:$0xff] %v9103_v50  ;;  %v11235_v50 = vld [vmem:[#allocation195_spill] sm:$0xff] }
 0x78e   :  { %6163 = vset.pattern.permute.xlu1 %v11225_v6  ;;  %4009 = vrot.lane.b32.xlu0 %v3253_v19, %s6372_s30  ;;  %v11231_v19 = vld [vmem:[#allocation155_spill] sm:$0xff] }
 0x78f   :  { %2670 = vperm.xlu1 %6163, %v8091_v0   ;;  %v2773_v33 = vmul.f32 %v11231_v19, %v11222_v60  ;;  %v11263_v60 = vld [vmem:[#allocation22_spill] sm:$0xff] }
 0x791   :  { %v3067_v58 = vpop.permute.xlu1 %3066 }
 0x792   :  { %4169 = vrot.lane.b32.xlu0 %v3573_v29, %s6372_s30  ;;  %v9113_v29 = vpop.permute.xlu0 %3558 }
 0x793   :  { %6165 = vset.pattern.permute.xlu1 %v11064_v54  ;;  %11233 = vst [vmem:[#allocation155_spill] sm:$0xff] %v9113_v29  ;;  %v11239_v29 = vmov 7  }
 0x794   :  { %3310 = vperm.xlu1 %6165, %v8091_v0   ;;  %v3093_v0 = vmul.f32 %v11235_v50, %v8155_v45  ;;  %v11240_v50 = vld [vmem:[#allocation71_spill] sm:$0xff] }
 0x796   :  { %v9106_v13 = vpop.permute.xlu1 %3146  ;;  %3609 = vrot.lane.b32.xlu0 %v2453_v26, %s6372_s30  ;;  %v11236_v26 = vld [vmem:[#allocation197_spill] sm:$0xff] }
 0x797   :  { %11230 = vst [vmem:[#allocation187_spill] sm:$0xff] %v9106_v13  ;;  %v3413_v19 = vmul.f32 %v11236_v26, %v11226_v38  ;;  %v9125_v13 = vpop.permute.xlu0 %2518 }
 0x798   :  { %6166 = vset.pattern.permute.xlu1 %v11005_v10  ;;  %11237 = vst [vmem:[#allocation195_spill] sm:$0xff] %v9125_v13  ;;  %v11245_v13 = vld [vmem:[#allocation182_spill] sm:$0xff] }
 0x799   :  { %2336 = vperm.xlu1 %6166, %v11232_v22  }
 0x79a   :  { %3769 = vrot.lane.b32.xlu0 %v2773_v33, %s6372_s30  ;;  %v2939_v33 = vmul.f32 %v2907_v52, %v11240_v50 }
 0x79b   :  { %v9116_v36 = vpop.permute.xlu1 %3466  ;;  %v9135_v45 = vpop.permute.xlu0 %3078 }
 0x79c   :  { %11234 = vst [vmem:[#allocation24_spill] sm:$0xff] %v9116_v36  ;;  %11242 = vst [vmem:[#allocation233_spill] sm:$0xff] %v9135_v45 }
 0x79d   :  { %6167 = vset.pattern.permute.xlu1 %v11022_v32 }
 0x79e   :  { %2582 = vperm.xlu1 %6167, %v11232_v22   ;;  %3929 = vrot.lane.b32.xlu0 %v3093_v0, %s6372_s30  ;;  %v11243_v0 = vld [vmem:[#allocation6_spill] sm:$0xff] }
 0x79f   :  { %v3259_v26 = vmul.f32 %v3227_v31, %v11243_v0  ;;  %v11248_v31 = vld [vmem:[#allocation184_spill] sm:$0xff] }
 0x7a0   :  { %v9127_v8 = vpop.permute.xlu1 %2986  ;;  %v9146_v52 = vpop.permute.xlu0 %3478 }
 0x7a1   :  { %11238 = vst [vmem:[#allocation197_spill] sm:$0xff] %v9127_v8  ;;  %11246 = vst [vmem:[#allocation182_spill] sm:$0xff] %v9146_v52 }
 0x7a2   :  { %6168 = vset.pattern.permute.xlu1 %v11239_v29  ;;  %4089 = vrot.lane.b32.xlu0 %v3413_v19, %s6372_s30  ;;  %v11244_v19 = vld [vmem:[#allocation7_spill] sm:$0xff] }
 0x7a3   :  { %2902 = vperm.xlu1 %6168, %v11232_v22   ;;  %v3579_v38 = vmul.f32 %v11245_v13, %v11244_v19  ;;  %v2779_v13 = vmul.f32 %v2747_v5, %v11240_v50 }
 0x7a5   :  { %v9133_v36 = vpop.permute.xlu1 %3306  ;;  %v9154_v43 = vpop.permute.xlu0 %2998 }
 0x7a6   :  { %11241 = vst [vmem:[#allocation232_spill] sm:$0xff] %v9133_v36  ;;  %3861 = vrot.lane.b32.xlu0 %v2939_v33, %s6372_s30  ;;  %v11247_v36 = vld [vmem:[#allocation69_spill] sm:$0xff] }
 0x7a7   :  { %6170 = vset.pattern.permute.xlu1 %v11040_v34  ;;  %v2459_v45 = vmul.f32 %v11248_v31, %v11247_v36  ;;  %11249 = vst [vmem:[#allocation69_spill] sm:$0xff] %v9154_v43 }
 0x7a8   :  { %3542 = vperm.xlu1 %6170, %v11232_v22  }
 0x7a9   :  { %v9163_v31 = vpop.permute.xlu0 %3605 }
 0x7aa   :  { %v9141_v8 = vpop.permute.xlu1 %2578  ;;  %4021 = vrot.lane.b32.xlu0 %v3259_v26, %s6372_s30  ;;  %11250 = vst [vmem:[#allocation184_spill] sm:$0xff] %v9163_v31 }
 0x7ac   :  { %6172 = vset.pattern.permute.xlu1 %v11024_v62 }
 0x7ad   :  { %2502 = vperm.xlu1 %6172, %v11232_v22   ;;  %v9170_v5 = vpop.permute.xlu0 %3765 }
 0x7ae   :  { %4181 = vrot.lane.b32.xlu0 %v3579_v38, %s6372_s30  ;;  %v3099_v38 = vmul.f32 %v3067_v58, %v11243_v0  ;;  %v11255_v58 = vld [vmem:[#allocation192_spill] sm:$0xff] }
 0x7af   :  { %v3219_v33 = vpop.permute.xlu1 %3218 }
 0x7b1   :  { %6173 = vset.pattern.permute.xlu1 %v11045_v48  ;;  %v9183_v31 = vpop.permute.xlu0 %3925 }
 0x7b2   :  { %2742 = vperm.xlu1 %6173, %v11232_v22   ;;  %3621 = vrot.lane.b32.xlu0 %v2459_v45, %s6372_s30  ;;  %v11251_v45 = vld [vmem:[#allocation188_spill] sm:$0xff]  ;;  %11258 = vst [vmem:[#allocation235_spill] sm:$0xff] %v9183_v31 }
 0x7b3   :  { %v3419_v43 = vmul.f32 %v11251_v45, %v11244_v19  ;;  %11252 = vst [vmem:[#allocation188_spill] sm:$0xff] %v9170_v5  ;;  %v11257_v45 = vld [vmem:[#allocation37_spill] sm:$0xff] }
 0x7b4   :  { %v3539_v26 = vpop.permute.xlu1 %3538  ;;  %v3257_v19 = vmul.f32 %v3219_v33, %v11257_v45 }
 0x7b5   :  { %v9189_v5 = vpop.permute.xlu0 %4085 }
 0x7b6   :  { %6175 = vset.pattern.permute.xlu1 %v11050_v56  ;;  %3781 = vrot.lane.b32.xlu0 %v2779_v13, %s6372_s30  ;;  %v11254_v13 = vld [vmem:[#allocation63_spill] sm:$0xff]  ;;  %11260 = vst [vmem:[#allocation236_spill] sm:$0xff] %v9189_v5 }
 0x7b7   :  { %3062 = vperm.xlu1 %6175, %v11232_v22   ;;  %v2937_v0 = vmul.f32 %v11255_v58, %v11254_v13 }
 0x7b9   :  { %v2419_v52 = vpop.permute.xlu1 %2418 }
 0x7ba   :  { %3941 = vrot.lane.b32.xlu0 %v3099_v38, %s6372_s30 }
 0x7bb   :  { %6176 = vset.pattern.permute.xlu1 %v11052_v51 }
 0x7bc   :  { %3142 = vperm.xlu1 %6176, %v11232_v22  }
 0x7be   :  { %v9172_v50 = vpop.permute.xlu1 %2498  ;;  %4101 = vrot.lane.b32.xlu0 %v3419_v43, %s6372_s30  ;;  %v11259_v43 = vld [vmem:[#allocation35_spill] sm:$0xff] }
 0x7bf   :  { %11253 = vst [vmem:[#allocation234_spill] sm:$0xff] %v9172_v50  ;;  %v3577_v58 = vmul.f32 %v3539_v26, %v11259_v43  ;;  %v9199_v26 = vpop.permute.xlu0 %3681 }
 0x7c0   :  { %6178 = vset.pattern.permute.xlu1 %v11053_v27 }
 0x7c1   :  { %3462 = vperm.xlu1 %6178, %v11232_v22  }
 0x7c2   :  { %3857 = vrot.lane.b32.xlu0 %v2937_v0, %s6372_s30  ;;  %v11261_v0 = vld [vmem:[#allocation62_spill] sm:$0xff] }
 0x7c3   :  { %v9180_v38 = vpop.permute.xlu1 %2818  ;;  %v2457_v33 = vmul.f32 %v2419_v52, %v11261_v0  ;;  %v9208_v52 = vpop.permute.xlu0 %3841 }
 0x7c4   :  { %11256 = vst [vmem:[#allocation192_spill] sm:$0xff] %v9180_v38 }
 0x7c5   :  { %6179 = vset.pattern.permute.xlu1 %v11225_v6 }
 0x7c6   :  { %2662 = vperm.xlu1 %6179, %v11232_v22   ;;  %4017 = vrot.lane.b32.xlu0 %v3257_v19, %s6372_s30  ;;  %v11262_v19 = vld [vmem:[#allocation194_spill] sm:$0xff] }
 0x7c7   :  { %v2777_v31 = vmul.f32 %v11262_v19, %v11254_v13 }
 0x7c8   :  { %v3059_v50 = vpop.permute.xlu1 %3058 }
 0x7ca   :  { %6181 = vset.pattern.permute.xlu1 %v11064_v54  ;;  %4177 = vrot.lane.b32.xlu0 %v3577_v58, %s6372_s30 }
 0x7cb   :  { %3302 = vperm.xlu1 %6181, %v11232_v22   ;;  %v3097_v22 = vmul.f32 %v3059_v50, %v11257_v45 }
 0x7cd   :  { %v3379_v38 = vpop.permute.xlu1 %3378 }
 0x7ce   :  { %3617 = vrot.lane.b32.xlu0 %v2457_v33, %s6372_s30  ;;  %v3417_v33 = vmul.f32 %v3379_v38, %v11259_v43 }
 0x7cf   :  { %6183 = vset.pattern.permute.xlu1 %v11022_v32 }
 0x7d0   :  { %2602 = vperm.xlu1 %6183, %v11263_v60  }
 0x7d2   :  { %v9202_v5 = vpop.permute.xlu1 %3458  ;;  %3777 = vrot.lane.b32.xlu0 %v2777_v31, %s6372_s30  ;;  %v9217_v31 = vpop.permute.xlu0 %4001 }
 0x7d3   :  { %11264 = vst [vmem:[#allocation62_spill] sm:$0xff] %v9202_v5 }
 0x7d4   :  { %6185 = vset.pattern.permute.xlu1 %v11041_v39 }
 0x7d5   :  { %3242 = vperm.xlu1 %6185, %v11263_v60  }
 0x7d6   :  { %3937 = vrot.lane.b32.xlu0 %v3097_v22, %s6372_s30  ;;  %v9225_v22 = vpop.permute.xlu0 %4161 }
 0x7d7   :  { %v9211_v58 = vpop.permute.xlu1 %2978 }
 0x7d8   :  { %11265 = vst [vmem:[#allocation194_spill] sm:$0xff] %v9211_v58 }
 0x7d9   :  { %6186 = vset.pattern.permute.xlu1 %v11040_v34 }
 0x7da   :  { %3562 = vperm.xlu1 %6186, %v11263_v60   ;;  %4097 = vrot.lane.b32.xlu0 %v3417_v33, %s6372_s30  ;;  %v9231_v58 = vpop.permute.xlu0 %3601 }
 0x7db   :  { %11268 = vst [vmem:[#allocation238_spill] sm:$0xff] %v9231_v58 }
 0x7dc   :  { %v9219_v50 = vpop.permute.xlu1 %3298 }
 0x7dd   :  { %11266 = vst [vmem:[#allocation22_spill] sm:$0xff] %v9219_v50 }
 0x7de   :  { %6188 = vset.pattern.permute.xlu1 %v11024_v62  ;;  %v9238_v50 = vpop.permute.xlu0 %3761 }
 0x7df   :  { %2522 = vperm.xlu1 %6188, %v11263_v60   ;;  %11269 = vst [vmem:[#allocation239_spill] sm:$0xff] %v9238_v50 }
 0x7e1   :  { %v9223_v19 = vpop.permute.xlu1 %2346 }
 0x7e2   :  { %11267 = vst [vmem:[#allocation237_spill] sm:$0xff] %v9223_v19  ;;  %v9245_v5 = vpop.permute.xlu0 %3921 }
 0x7e3   :  { %6189 = vset.pattern.permute.xlu1 %v11045_v48  ;;  %11270 = vst [vmem:[#allocation240_spill] sm:$0xff] %v9245_v5  ;;  %v11274_v5 = vld [vmem:[#allocation23_spill] sm:$0xff] }
 0x7e4   :  { %2762 = vperm.xlu1 %6189, %v11263_v60  }
 0x7e6   :  { %v9229_v38 = vpop.permute.xlu1 %2590  ;;  %v9251_v45 = vpop.permute.xlu0 %4081 }
 0x7e7   :  { %11271 = vst [vmem:[#allocation241_spill] sm:$0xff] %v9251_v45 }
 0x7e8   :  { %6191 = vset.pattern.permute.xlu1 %v11050_v56 }
 0x7e9   :  { %3082 = vperm.xlu1 %6191, %v11263_v60  }
 0x7ea   :  { %v9259_v58 = vpop.permute.xlu0 %3687 }
 0x7eb   :  { %v9235_v33 = vpop.permute.xlu1 %3230  ;;  %11273 = vst [vmem:[#allocation243_spill] sm:$0xff] %v9259_v58 }
 0x7ed   :  { %6192 = vset.pattern.permute.xlu1 %v11052_v51 }
 0x7ee   :  { %3162 = vperm.xlu1 %6192, %v11263_v60   ;;  %v9265_v37 = vpop.permute.xlu0 %3847 }
 0x7ef   :  { %11276 = vst [vmem:[#allocation244_spill] sm:$0xff] %v9265_v37 }
 0x7f0   :  { %v9241_v19 = vpop.permute.xlu1 %3550 }
 0x7f2   :  { %6194 = vset.pattern.permute.xlu1 %v11053_v27 }
 0x7f3   :  { %3482 = vperm.xlu1 %6194, %v11263_v60  }
 0x7f5   :  { %v9247_v43 = vpop.permute.xlu1 %2430 }
 0x7f7   :  { %6196 = vset.pattern.permute.xlu1 %v11059_v49 }
 0x7f8   :  { %3002 = vperm.xlu1 %6196, %v11263_v60  }
 0x7fa   :  { %v9253_v13 = vpop.permute.xlu1 %2750 }
 0x7fc   :  { %6197 = vset.pattern.permute.xlu1 %v11064_v54 }
 0x7fd   :  { %3322 = vperm.xlu1 %6197, %v11263_v60   ;;  %v9272_v60 = vpop.permute.xlu0 %4007 }
 0x7fe   :  { %11277 = vst [vmem:[#allocation245_spill] sm:$0xff] %v9272_v60 }
 0x7ff   :  { %v9257_v50 = vpop.permute.xlu1 %2830 }
 0x800   :  { %11272 = vst [vmem:[#allocation242_spill] sm:$0xff] %v9257_v50 }
 0x801   :  { %6199 = vset.pattern.permute.xlu1 %v11022_v32 }
 0x802   :  { %2594 = vperm.xlu1 %6199, %v11274_v5  }
 0x804   :  { %v9263_v18 = vpop.permute.xlu1 %3150 }
 0x805   :  { %11275 = vst [vmem:[#allocation23_spill] sm:$0xff] %v9263_v18  ;;  %v9279_v18 = vpop.permute.xlu0 %4167 }
 0x806   :  { %6200 = vset.pattern.permute.xlu1 %v11239_v29  ;;  %11279 = vst [vmem:[#allocation247_spill] sm:$0xff] %v9279_v18 }
 0x807   :  { %2914 = vperm.xlu1 %6200, %v11274_v5  }
 0x809   :  { %v9269_v45 = vpop.permute.xlu1 %3390  ;;  %v9285_v58 = vpop.permute.xlu0 %3853 }
 0x80a   :  { %11281 = vst [vmem:[#allocation249_spill] sm:$0xff] %v9285_v58 }
 0x80b   :  { %6202 = vset.pattern.permute.xlu1 %v11040_v34 }
 0x80c   :  { %3554 = vperm.xlu1 %6202, %v11274_v5  }
 0x80e   :  { %v9275_v50 = vpop.permute.xlu1 %2670 }
 0x80f   :  { %11278 = vst [vmem:[#allocation246_spill] sm:$0xff] %v9275_v50 }
 0x810   :  { %6204 = vset.pattern.permute.xlu1 %v11024_v62  ;;  %v9293_v62 = vpop.permute.xlu0 %4013 }
 0x811   :  { %2514 = vperm.xlu1 %6204, %v11274_v5   ;;  %11283 = vst [vmem:[#allocation251_spill] sm:$0xff] %v9293_v62 }
 0x813   :  { %v9281_v37 = vpop.permute.xlu1 %3310 }
 0x814   :  { %11280 = vst [vmem:[#allocation248_spill] sm:$0xff] %v9281_v37  ;;  %v9299_v18 = vpop.permute.xlu0 %4173 }
 0x815   :  { %6205 = vset.pattern.permute.xlu1 %v11045_v48  ;;  %11284 = vst [vmem:[#allocation252_spill] sm:$0xff] %v9299_v18 }
 0x816   :  { %2754 = vperm.xlu1 %6205, %v11274_v5  }
 0x818   :  { %v9287_v42 = vpop.permute.xlu1 %2336 }
 0x819   :  { %11282 = vst [vmem:[#allocation250_spill] sm:$0xff] %v9287_v42 }
 0x81a   :  { %6207 = vset.pattern.permute.xlu1 %v11050_v56  ;;  %v9306_v56 = vpop.permute.xlu0 %3613 }
 0x81b   :  { %3074 = vperm.xlu1 %6207, %v11274_v5   ;;  %11286 = vst [vmem:[#allocation254_spill] sm:$0xff] %v9306_v56 }
 0x81d   :  { %v9291_v50 = vpop.permute.xlu1 %2582 }
 0x81e   :  { %v9313_v62 = vpop.permute.xlu0 %3773 }
 0x81f   :  { %6208 = vset.pattern.permute.xlu1 %v11052_v51  ;;  %11288 = vst [vmem:[#allocation256_spill] sm:$0xff] %v9313_v62 }
 0x820   :  { %3154 = vperm.xlu1 %6208, %v11274_v5  }
 0x822   :  { %v9297_v37 = vpop.permute.xlu1 %2902  ;;  %v9319_v58 = vpop.permute.xlu0 %3933 }
 0x824   :  { %6210 = vset.pattern.permute.xlu1 %v11053_v27  ;;  %v11290_v27 = vld [vmem:[#allocation21_spill] sm:$0xff] }
 0x825   :  { %3474 = vperm.xlu1 %6210, %v11274_v5   ;;  %11291 = vst [vmem:[#allocation21_spill] sm:$0xff] %v9319_v58 }
 0x827   :  { %v9303_v42 = vpop.permute.xlu1 %3542 }
 0x828   :  { %11285 = vst [vmem:[#allocation253_spill] sm:$0xff] %v9303_v42 }
 0x829   :  { %6212 = vset.pattern.permute.xlu1 %v11059_v49 }
 0x82a   :  { %2994 = vperm.xlu1 %6212, %v11274_v5  }
 0x82c   :  { %v9309_v60 = vpop.permute.xlu1 %2502 }
 0x82d   :  { %11287 = vst [vmem:[#allocation255_spill] sm:$0xff] %v9309_v60  ;;  %v9327_v60 = vpop.permute.xlu0 %4093 }
 0x82e   :  { %6213 = vset.pattern.permute.xlu1 %v11064_v54  ;;  %11294 = vst [vmem:[#allocation260_spill] sm:$0xff] %v9327_v60 }
 0x82f   :  { %3314 = vperm.xlu1 %6213, %v11274_v5  }
 0x831   :  { %v9315_v18 = vpop.permute.xlu1 %2742  ;;  %v9333_v62 = vpop.permute.xlu0 %3689 }
 0x832   :  { %11289 = vst [vmem:[#allocation257_spill] sm:$0xff] %v9315_v18  ;;  %11296 = vst [vmem:[#allocation262_spill] sm:$0xff] %v9333_v62 }
 0x833   :  { %6214 = vset.pattern.permute.xlu1 %v11005_v10 }
 0x834   :  { %2366 = vperm.xlu1 %6214, %v11290_v27  }
 0x836   :  { %v9321_v49 = vpop.permute.xlu1 %3062 }
 0x837   :  { %11292 = vst [vmem:[#allocation258_spill] sm:$0xff] %v9321_v49 }
 0x838   :  { %6215 = vset.pattern.permute.xlu1 %v11022_v32  ;;  %v9340_v32 = vpop.permute.xlu0 %3849 }
 0x839   :  { %2606 = vperm.xlu1 %6215, %v11290_v27   ;;  %11298 = vst [vmem:[#allocation264_spill] sm:$0xff] %v9340_v32 }
 0x83b   :  { %v9325_v56 = vpop.permute.xlu1 %3142 }
 0x83c   :  { %11293 = vst [vmem:[#allocation259_spill] sm:$0xff] %v9325_v56 }
 0x83d   :  { %6216 = vset.pattern.permute.xlu1 %v11239_v29 }
 0x83e   :  { %2926 = vperm.xlu1 %6216, %v11290_v27  }
 0x840   :  { %v9331_v5 = vpop.permute.xlu1 %3462 }
 0x841   :  { %11295 = vst [vmem:[#allocation261_spill] sm:$0xff] %v9331_v5  ;;  %v9347_v5 = vpop.permute.xlu0 %4009 }
 0x842   :  { %6218 = vset.pattern.permute.xlu1 %v11040_v34  ;;  %11300 = vst [vmem:[#allocation266_spill] sm:$0xff] %v9347_v5  ;;  %v11301_v34 = vld [vmem:[#allocation82_spill] sm:$0xff] }
 0x843   :  { %3566 = vperm.xlu1 %6218, %v11290_v27   ;;  %v11304_v5 = vld [vmem:[#allocation14_spill] sm:$0xff] }
 0x845   :  { %v9337_v58 = vpop.permute.xlu1 %2662  ;;  %v9355_v49 = vpop.permute.xlu0 %4169 }
 0x846   :  { %11297 = vst [vmem:[#allocation263_spill] sm:$0xff] %v9337_v58  ;;  %v11302_v58 = vld [vmem:[#allocation83_spill] sm:$0xff]  ;;  %11303 = vst [vmem:[#allocation267_spill] sm:$0xff] %v9355_v49 }
 0x847   :  { %6219 = vset.pattern.permute.xlu1 %v11028_v25  ;;  %v2943_v32 = vmul.f32 %v8908_v23, %v11302_v58 }
 0x848   :  { %2446 = vperm.xlu1 %6219, %v11290_v27  }
 0x849   :  { %v9361_v18 = vpop.permute.xlu0 %3609 }
 0x84a   :  { %v9343_v60 = vpop.permute.xlu1 %3302  ;;  %11305 = vst [vmem:[#allocation268_spill] sm:$0xff] %v9361_v18 }
 0x84b   :  { %11299 = vst [vmem:[#allocation265_spill] sm:$0xff] %v9343_v60 }
 0x84c   :  { %6221 = vset.pattern.permute.xlu1 %v11045_v48 }
 0x84d   :  { %2766 = vperm.xlu1 %6221, %v11290_v27   ;;  %v9372_v42 = vpop.permute.xlu0 %3769 }
 0x84e   :  { %11308 = vst [vmem:[#allocation270_spill] sm:$0xff] %v9372_v42 }
 0x84f   :  { %v2603_v56 = vpop.permute.xlu1 %2602 }
 0x850   :  { %v2623_v62 = vmul.f32 %v2603_v56, %v11301_v34 }
 0x851   :  { %6222 = vset.pattern.permute.xlu1 %v11049_v1 }
 0x852   :  { %2846 = vperm.xlu1 %6222, %v11290_v27   ;;  %3709 = vrot.lane.b32.xlu0 %v2623_v62, %s6372_s30  ;;  %v11306_v62 = vld [vmem:[#allocation15_spill] sm:$0xff] }
 0x854   :  { %v3243_v60 = vpop.permute.xlu1 %3242 }
 0x855   :  { %v3263_v56 = vmul.f32 %v3243_v60, %v11304_v5 }
 0x856   :  { %6224 = vset.pattern.permute.xlu1 %v11052_v51  ;;  %3869 = vrot.lane.b32.xlu0 %v2943_v32, %s6372_s30  ;;  %v2463_v32 = vmul.f32 %v8921_v16, %v11301_v34 }
 0x857   :  { %3166 = vperm.xlu1 %6224, %v11290_v27  }
 0x859   :  { %v3563_v30 = vpop.permute.xlu1 %3562 }
 0x85a   :  { %4029 = vrot.lane.b32.xlu0 %v3263_v56, %s6372_s30  ;;  %v3583_v23 = vmul.f32 %v3563_v30, %v11306_v62  ;;  %v9379_v56 = vpop.permute.xlu0 %3929 }
 0x85b   :  { %6225 = vset.pattern.permute.xlu1 %v11058_v35  ;;  %11309 = vst [vmem:[#allocation271_spill] sm:$0xff] %v9379_v56 }
 0x85c   :  { %3406 = vperm.xlu1 %6225, %v11290_v27  }
 0x85e   :  { %v9367_v49 = vpop.permute.xlu1 %2522  ;;  %4189 = vrot.lane.b32.xlu0 %v3583_v23, %s6372_s30 }
 0x85f   :  { %11307 = vst [vmem:[#allocation269_spill] sm:$0xff] %v9367_v49  ;;  %v11363_v49 = vld [vmem:[#allocation163_spill] sm:$0xff] }
 0x860   :  { %6227 = vset.pattern.permute.xlu1 %v11225_v6 }
 0x861   :  { %2686 = vperm.xlu1 %6227, %v11290_v27  }
 0x862   :  { %3629 = vrot.lane.b32.xlu0 %v2463_v32, %s6372_s30  ;;  %v9387_v32 = vpop.permute.xlu0 %4089 }
 0x863   :  { %v2763_v60 = vpop.permute.xlu1 %2762  ;;  %11310 = vst [vmem:[#allocation272_spill] sm:$0xff] %v9387_v32  ;;  %v11316_v32 = vld [vmem:[#allocation77_spill] sm:$0xff] }
 0x864   :  { %v2783_v30 = vmul.f32 %v2763_v60, %v11302_v58  ;;  %v3423_v60 = vmul.f32 %v8944_v47, %v11306_v62 }
 0x865   :  { %6229 = vset.pattern.permute.xlu1 %v11064_v54 }
 0x866   :  { %3326 = vperm.xlu1 %6229, %v11290_v27   ;;  %3789 = vrot.lane.b32.xlu0 %v2783_v30, %s6372_s30  ;;  %v9396_v27 = vpop.permute.xlu0 %3861 }
 0x868   :  { %v3083_v16 = vpop.permute.xlu1 %3082 }
 0x869   :  { %v3103_v23 = vmul.f32 %v3083_v16, %v11304_v5 }
 0x86a   :  { %6230 = vset.pattern.permute.xlu1 %v11005_v10 }
 0x86b   :  { %2356 = vperm.xlu1 %6230, %v8109_v21   ;;  %3949 = vrot.lane.b32.xlu0 %v3103_v23, %s6372_s30  ;;  %v9404_v23 = vpop.permute.xlu0 %4021 }
 0x86d   :  { %v9391_v42 = vpop.permute.xlu1 %3162 }
 0x86e   :  { %11311 = vst [vmem:[#allocation273_spill] sm:$0xff] %v9391_v42 }
 0x86f   :  { %6232 = vset.pattern.permute.xlu1 %v11239_v29  ;;  %4109 = vrot.lane.b32.xlu0 %v3423_v60, %s6372_s30  ;;  %v9410_v29 = vpop.permute.xlu0 %4181 }
 0x870   :  { %2918 = vperm.xlu1 %6232, %v8109_v21  }
 0x872   :  { %v9398_v30 = vpop.permute.xlu1 %3482 }
 0x873   :  { %11312 = vst [vmem:[#allocation274_spill] sm:$0xff] %v9398_v30  ;;  %v9416_v18 = vpop.permute.xlu0 %3621 }
 0x874   :  { %6233 = vset.pattern.permute.xlu1 %v11041_v39  ;;  %v11314_v39 = vld [vmem:[#allocation76_spill] sm:$0xff]  ;;  %11315 = vst [vmem:[#allocation276_spill] sm:$0xff] %v9416_v18 }
 0x875   :  { %3238 = vperm.xlu1 %6233, %v8109_v21  }
 0x877   :  { %v9402_v16 = vpop.permute.xlu1 %3002 }
 0x879   :  { %6235 = vset.pattern.permute.xlu1 %v11028_v25 }
 0x87a   :  { %2438 = vperm.xlu1 %6235, %v8109_v21  }
 0x87c   :  { %v9408_v47 = vpop.permute.xlu1 %3322 }
 0x87d   :  { %11313 = vst [vmem:[#allocation275_spill] sm:$0xff] %v9408_v47 }
 0x87e   :  { %6237 = vset.pattern.permute.xlu1 %v11045_v48  ;;  %v9424_v48 = vpop.permute.xlu0 %3781 }
 0x87f   :  { %2758 = vperm.xlu1 %6237, %v8109_v21   ;;  %11317 = vst [vmem:[#allocation277_spill] sm:$0xff] %v9424_v48 }
 0x881   :  { %v2595_v60 = vpop.permute.xlu1 %2594 }
 0x882   :  { %v2621_v56 = vmul.f32 %v2595_v60, %v11314_v39  ;;  %v11318_v60 = vld [vmem:[#allocation10_spill] sm:$0xff]  ;;  %v9432_v18 = vpop.permute.xlu0 %3941 }
 0x883   :  { %6238 = vset.pattern.permute.xlu1 %v11049_v1  ;;  %v3261_v1 = vmul.f32 %v8981_v44, %v11318_v60  ;;  %11320 = vst [vmem:[#allocation278_spill] sm:$0xff] %v9432_v18  ;;  %v2461_v44 = vmul.f32 %v8995_v24, %v11314_v39 }
 0x884   :  { %2838 = vperm.xlu1 %6238, %v8109_v21   ;;  %3705 = vrot.lane.b32.xlu0 %v2621_v56, %s6372_s30  ;;  %v11319_v56 = vld [vmem:[#allocation11_spill] sm:$0xff] }
 0x886   :  { %v2915_v25 = vpop.permute.xlu1 %2914 }
 0x887   :  { %v2941_v47 = vmul.f32 %v2915_v25, %v11316_v32 }
 0x888   :  { %6240 = vset.pattern.permute.xlu1 %v11052_v51 }
 0x889   :  { %3158 = vperm.xlu1 %6240, %v8109_v21   ;;  %3865 = vrot.lane.b32.xlu0 %v2941_v47, %s6372_s30  ;;  %v9442_v47 = vpop.permute.xlu0 %4101 }
 0x88a   :  { %11322 = vst [vmem:[#allocation280_spill] sm:$0xff] %v9442_v47 }
 0x88b   :  { %v3555_v30 = vpop.permute.xlu1 %3554 }
 0x88c   :  { %v3581_v25 = vmul.f32 %v3555_v30, %v11319_v56 }
 0x88d   :  { %6241 = vset.pattern.permute.xlu1 %v11058_v35  ;;  %4025 = vrot.lane.b32.xlu0 %v3261_v1, %s6372_s30  ;;  %v9451_v18 = vpop.permute.xlu0 %3857 }
 0x88e   :  { %3398 = vperm.xlu1 %6241, %v8109_v21  }
 0x890   :  { %v9434_v51 = vpop.permute.xlu1 %2514 }
 0x891   :  { %11321 = vst [vmem:[#allocation279_spill] sm:$0xff] %v9434_v51  ;;  %4185 = vrot.lane.b32.xlu0 %v3581_v25, %s6372_s30 }
 0x892   :  { %6243 = vset.pattern.permute.xlu1 %v11225_v6  ;;  %v11323_v6 = vld [vmem:[#allocation110_spill] sm:$0xff] }
 0x893   :  { %2678 = vperm.xlu1 %6243, %v8109_v21   ;;  %v2611_v1 = vmul.f32 %v11323_v6, %v8840_v7 }
 0x895   :  { %v2755_v35 = vpop.permute.xlu1 %2754  ;;  %3625 = vrot.lane.b32.xlu0 %v2461_v44, %s6372_s30 }
 0x896   :  { %v2781_v30 = vmul.f32 %v2755_v35, %v11316_v32 }
 0x897   :  { %6245 = vset.pattern.permute.xlu1 %v11064_v54  ;;  %v11324_v54 = vld [vmem:[#allocation111_spill] sm:$0xff] }
 0x898   :  { %3318 = vperm.xlu1 %6245, %v8109_v21   ;;  %v2931_v44 = vmul.f32 %v11324_v54, %v8852_v9  ;;  %v3421_v21 = vmul.f32 %v9027_v3, %v11319_v56 }
 0x899   :  { %3785 = vrot.lane.b32.xlu0 %v2781_v30, %s6372_s30  ;;  %v11326_v30 = vld [vmem:[#allocation112_spill] sm:$0xff] }
 0x89a   :  { %v3075_v25 = vpop.permute.xlu1 %3074  ;;  %v3251_v6 = vmul.f32 %v11326_v30, %v8866_v4  ;;  %v11332_v30 = vld [vmem:[#allocation141_spill] sm:$0xff] }
 0x89b   :  { %v3101_v24 = vmul.f32 %v3075_v25, %v11318_v60  ;;  %v2772_v47 = vmul.f32 %v11332_v30, %v8977_v63  ;;  %v11339_v30 = vld [vmem:[#allocation42_spill] sm:$0xff] }
 0x89c   :  { %3685 = vrot.lane.b32.xlu1 %v2611_v1, %s6372_s30  ;;  %v9466_v1 = vpop.permute.xlu0 %4017 }
 0x89d   :  { %3945 = vrot.lane.b32.xlu0 %v3101_v24, %s6372_s30  ;;  %6247 = vset.pattern.permute.xlu1 %v11005_v10  ;;  %v11328_v10 = vld [vmem:[#allocation114_spill] sm:$0xff] }
 0x89e   :  { %v3571_v24 = vmul.f32 %v11328_v10, %v8875_v41  ;;  %v11335_v10 = vld [vmem:[#allocation128_spill] sm:$0xff] }
 0x89f   :  { %v9460_v35 = vpop.permute.xlu1 %3154  ;;  %v3092_v62 = vmul.f32 %v11335_v10, %v8990_v17 }
 0x8a0   :  { %11325 = vst [vmem:[#allocation110_spill] sm:$0xff] %v9460_v35  ;;  %3845 = vrot.lane.b32.xlu1 %v2931_v44, %s6372_s30  ;;  %v9473_v54 = vpop.permute.xlu0 %4177  ;;  %v11331_v44 = vld [vmem:[#allocation125_spill] sm:$0xff]  ;;  %v11346_v35 = vld [vmem:[#allocation156_spill] sm:$0xff] }
 0x8a1   :  { %4105 = vrot.lane.b32.xlu0 %v3421_v21, %s6372_s30  ;;  %11329 = vst [vmem:[#allocation112_spill] sm:$0xff] %v9473_v54  ;;  %v2452_v21 = vmul.f32 %v11331_v44, %v8968_v61  ;;  %v11338_v44 = vld [vmem:[#allocation145_spill] sm:$0xff] }
 0x8a2   :  { %v11371_v54 = vld [vmem:[#allocation29_spill] sm:$0xff] }
 0x8a4   :  { %v9468_v25 = vpop.permute.xlu1 %3474  ;;  %4005 = vrot.lane.b32.xlu1 %v3251_v6, %s6372_s30  ;;  %v9483_v48 = vpop.permute.xlu0 %3617 }
 0x8a5   :  { %11327 = vst [vmem:[#allocation111_spill] sm:$0xff] %v9468_v25  ;;  %11333 = vst [vmem:[#allocation125_spill] sm:$0xff] %v9483_v48  ;;  %v11340_v48 = vld [vmem:[#allocation133_spill] sm:$0xff] }
 0x8a8   :  { %4165 = vrot.lane.b32.xlu1 %v3571_v24, %s6372_s30 }
 0x8a9   :  { %v9476_v3 = vpop.permute.xlu1 %2994 }
 0x8aa   :  { %11330 = vst [vmem:[#allocation114_spill] sm:$0xff] %v9476_v3  ;;  %v9492_v3 = vpop.permute.xlu0 %3777 }
 0x8ab   :  { %11337 = vst [vmem:[#allocation281_spill] sm:$0xff] %v9492_v3  ;;  %v11343_v3 = vld [vmem:[#allocation154_spill] sm:$0xff] }
 0x8ac   :  { %3607 = vrot.lane.b32.xlu1 %v2452_v21, %s6372_s30  ;;  %v3412_v21 = vmul.f32 %v11338_v44, %v9002_v2  ;;  %v11345_v44 = vld [vmem:[#allocation28_spill] sm:$0xff] }
 0x8ad   :  { %v3250_v60 = vmul.f32 %v11346_v35, %v11345_v44 }
 0x8ae   :  { %v9485_v6 = vpop.permute.xlu1 %3314 }
 0x8af   :  { %11334 = vst [vmem:[#allocation141_spill] sm:$0xff] %v9485_v6  ;;  %v2610_v6 = vmul.f32 %v11340_v48, %v11339_v30 }
 0x8b0   :  { %3767 = vrot.lane.b32.xlu1 %v2772_v47, %s6372_s30  ;;  %v9502_v47 = vpop.permute.xlu0 %3937 }
 0x8b1   :  { %11341 = vst [vmem:[#allocation145_spill] sm:$0xff] %v9502_v47  ;;  %v11348_v47 = vld [vmem:[#allocation26_spill] sm:$0xff] }
 0x8b3   :  { %v9490_v24 = vpop.permute.xlu1 %2366 }
 0x8b4   :  { %11336 = vst [vmem:[#allocation128_spill] sm:$0xff] %v9490_v24  ;;  %3927 = vrot.lane.b32.xlu1 %v3092_v62, %s6372_s30  ;;  %v11342_v24 = vld [vmem:[#allocation43_spill] sm:$0xff]  ;;  %v9509_v62 = vpop.permute.xlu0 %4097 }
 0x8b5   :  { %v2930_v56 = vmul.f32 %v11343_v3, %v11342_v24  ;;  %11344 = vst [vmem:[#allocation42_spill] sm:$0xff] %v9509_v62 }
 0x8b8   :  { %v9497_v25 = vpop.permute.xlu1 %2606  ;;  %4087 = vrot.lane.b32.xlu1 %v3412_v21, %s6372_s30 }
 0x8bc   :  { %3683 = vrot.lane.b32.xlu1 %v2610_v6, %s6372_s30  ;;  %v11349_v6 = vld [vmem:[#allocation135_spill] sm:$0xff] }
 0x8bd   :  { %v9505_v10 = vpop.permute.xlu1 %2926  ;;  %v3570_v32 = vmul.f32 %v11349_v6, %v11348_v47 }
 0x8c0   :  { %3843 = vrot.lane.b32.xlu1 %v2930_v56, %s6372_s30  ;;  %v11351_v56 = vld [vmem:[#allocation152_spill] sm:$0xff] }
 0x8c1   :  { %v2450_v62 = vmul.f32 %v11351_v56, %v11339_v30 }
 0x8c2   :  { %v9514_v21 = vpop.permute.xlu1 %3566 }
 0x8c4   :  { %4003 = vrot.lane.b32.xlu1 %v3250_v60, %s6372_s30  ;;  %v9517_v48 = vpop.permute.xlu0 %3709  ;;  %v11353_v60 = vld [vmem:[#allocation137_spill] sm:$0xff] }
 0x8c5   :  { %11347 = vst [vmem:[#allocation133_spill] sm:$0xff] %v9517_v48  ;;  %v2770_v42 = vmul.f32 %v11353_v60, %v11342_v24 }
 0x8c7   :  { %v9521_v51 = vpop.permute.xlu1 %2446 }
 0x8c8   :  { %4163 = vrot.lane.b32.xlu1 %v3570_v32, %s6372_s30  ;;  %v9524_v3 = vpop.permute.xlu0 %3869  ;;  %v11356_v32 = vld [vmem:[#allocation162_spill] sm:$0xff] }
 0x8c9   :  { %11350 = vst [vmem:[#allocation43_spill] sm:$0xff] %v9524_v3  ;;  %v3090_v3 = vmul.f32 %v11356_v32, %v11345_v44  ;;  %v3023_v32 = vmul.f32 %v9402_v16, %v11304_v5  ;;  %v11369_v16 = vld [vmem:[#allocation31_spill] sm:$0xff]  ;;  %v11370_v5 = vld [vmem:[#allocation209_spill] sm:$0xff] }
 0x8cc   :  { %v9528_v39 = vpop.permute.xlu1 %2766  ;;  %3603 = vrot.lane.b32.xlu1 %v2450_v62, %s6372_s30  ;;  %v9531_v35 = vpop.permute.xlu0 %4029  ;;  %v11358_v62 = vld [vmem:[#allocation164_spill] sm:$0xff] }
 0x8cd   :  { %11352 = vst [vmem:[#allocation154_spill] sm:$0xff] %v9531_v35  ;;  %v3410_v48 = vmul.f32 %v11358_v62, %v11348_v47 }
 0x8d0   :  { %3763 = vrot.lane.b32.xlu1 %v2770_v42, %s6372_s30  ;;  %v9536_v6 = vpop.permute.xlu0 %4189  ;;  %v11361_v42 = vld [vmem:[#allocation173_spill] sm:$0xff] }
 0x8d1   :  { %11354 = vst [vmem:[#allocation28_spill] sm:$0xff] %v9536_v6  ;;  %v9538_v58 = vpop.permute.xlu1 %2846  ;;  %v2615_v6 = vmul.f32 %v11361_v42, %v11215_v57 }
 0x8d2   :  { %11355 = vst [vmem:[#allocation156_spill] sm:$0xff] %v9538_v58 }
 0x8d4   :  { %3923 = vrot.lane.b32.xlu1 %v3090_v3, %s6372_s30  ;;  %v9543_v56 = vpop.permute.xlu0 %3629 }
 0x8d5   :  { %11357 = vst [vmem:[#allocation135_spill] sm:$0xff] %v9543_v56  ;;  %v11362_v56 = vld [vmem:[#allocation58_spill] sm:$0xff] }
 0x8d6   :  { %v9547_v35 = vpop.permute.xlu1 %3166  ;;  %v2616_v62 = vmul.f32 %v11363_v49, %v11362_v56  ;;  %v11372_v49 = vld [vmem:[#allocation165_spill] sm:$0xff] }
 0x8d7   :  { %11359 = vst [vmem:[#allocation152_spill] sm:$0xff] %v9547_v35 }
 0x8d8   :  { %4083 = vrot.lane.b32.xlu1 %v3410_v48, %s6372_s30  ;;  %v9550_v60 = vpop.permute.xlu0 %3789  ;;  %v11366_v48 = vld [vmem:[#allocation59_spill] sm:$0xff] }
 0x8d9   :  { %11360 = vst [vmem:[#allocation137_spill] sm:$0xff] %v9550_v60  ;;  %v11367_v60 = vld [vmem:[#allocation207_spill] sm:$0xff] }
 0x8da   :  { %v2936_v42 = vmul.f32 %v11367_v60, %v11366_v48 }
 0x8db   :  { %v9554_v58 = vpop.permute.xlu1 %3406 }
 0x8dc   :  { %3693 = vrot.lane.b32.xlu1 %v2615_v6, %s6372_s30  ;;  %v3256_v6 = vmul.f32 %v11370_v5, %v11369_v16 }
 0x8dd   :  { %v3950_v3 = vpop.permute.xlu0 %3949 }
 0x8de   :  { %v9561_v47 = vadd.f32 %v3950_v3, %v3023_v32  ;;  %v3576_v32 = vmul.f32 %v11372_v49, %v11371_v54 }
 0x8e0   :  { %11364 = vst [vmem:[#allocation162_spill] sm:$0xff] %v9561_v47  ;;  %v9563_v35 = vpop.permute.xlu1 %2686  ;;  %3695 = vrot.lane.b32.xlu1 %v2616_v62, %s6372_s30  ;;  %v11374_v62 = vld [vmem:[#allocation161_spill] sm:$0xff] }
 0x8e1   :  { %11365 = vst [vmem:[#allocation164_spill] sm:$0xff] %v9563_v35  ;;  %v2456_v47 = vmul.f32 %v11374_v62, %v11362_v56 }
 0x8e4   :  { %3855 = vrot.lane.b32.xlu1 %v2936_v42, %s6372_s30  ;;  %v11375_v42 = vld [vmem:[#allocation167_spill] sm:$0xff] }
 0x8e5   :  { %v9569_v34 = vpop.permute.xlu1 %3326 }
 0x8e6   :  { %11368 = vst [vmem:[#allocation173_spill] sm:$0xff] %v9569_v34  ;;  %v2776_v34 = vmul.f32 %v11375_v42, %v11366_v48 }
 0x8e8   :  { %4015 = vrot.lane.b32.xlu1 %v3256_v6, %s6372_s30  ;;  %v3096_v6 = vmul.f32 %v8860_v59, %v11369_v16 }
 0x8ea   :  { %v9576_v3 = vpop.permute.xlu1 %2356 }
 0x8eb   :  { %11373 = vst [vmem:[#allocation58_spill] sm:$0xff] %v9576_v3  ;;  %v11378_v3 = vld [vmem:[#allocation174_spill] sm:$0xff] }
 0x8ec   :  { %4175 = vrot.lane.b32.xlu1 %v3576_v32, %s6372_s30  ;;  %v3416_v32 = vmul.f32 %v8877_v15, %v11371_v54 }
 0x8ef   :  { %v9581_v60 = vpop.permute.xlu1 %2918 }
 0x8f0   :  { %3615 = vrot.lane.b32.xlu1 %v2456_v47, %s6372_s30  ;;  %v11376_v47 = vld [vmem:[#allocation52_spill] sm:$0xff] }
 0x8f1   :  { %v2614_v62 = vmul.f32 %v8942_v14, %v11376_v47 }
 0x8f4   :  { %v9586_v5 = vpop.permute.xlu1 %3238  ;;  %3775 = vrot.lane.b32.xlu1 %v2776_v34, %s6372_s30  ;;  %v11377_v34 = vld [vmem:[#allocation53_spill] sm:$0xff] }
 0x8f5   :  { %v2934_v35 = vmul.f32 %v11378_v3, %v11377_v34  ;;  %v11383_v3 = vld [vmem:[#allocation172_spill] sm:$0xff] }
 0x8f6   :  { %v2454_v54 = vmul.f32 %v11383_v3, %v11376_v47  ;;  %v11387_v3 = vld [vmem:[#allocation176_spill] sm:$0xff] }
 0x8f8   :  { %3935 = vrot.lane.b32.xlu1 %v3096_v6, %s6372_s30  ;;  %v11380_v6 = vld [vmem:[#allocation32_spill] sm:$0xff] }
 0x8f9   :  { %v9592_v49 = vpop.permute.xlu1 %2438  ;;  %v3254_v16 = vmul.f32 %v8953_v20, %v11380_v6 }
 0x8fc   :  { %4095 = vrot.lane.b32.xlu1 %v3416_v32, %s6372_s30  ;;  %v11382_v32 = vld [vmem:[#allocation30_spill] sm:$0xff] }
 0x8fd   :  { %v3574_v14 = vmul.f32 %v8962_v53, %v11382_v32 }
 0x8fe   :  { %v9599_v42 = vpop.permute.xlu1 %2758 }
 0x900   :  { %3691 = vrot.lane.b32.xlu1 %v2614_v62, %s6372_s30 }
 0x903   :  { %v9604_v59 = vpop.permute.xlu1 %2838 }
 0x904   :  { %11379 = vst [vmem:[#allocation163_spill] sm:$0xff] %v9604_v59  ;;  %3851 = vrot.lane.b32.xlu1 %v2934_v35, %s6372_s30  ;;  %v2774_v35 = vmul.f32 %v8993_v12, %v11377_v34  ;;  %v11388_v12 = vld [vmem:[#allocation113_spill] sm:$0xff] }
 0x908   :  { %v9609_v15 = vpop.permute.xlu1 %3158  ;;  %4011 = vrot.lane.b32.xlu1 %v3254_v16, %s6372_s30  ;;  %v3094_v16 = vmul.f32 %v9008_v46, %v11380_v6 }
 0x909   :  { %11381 = vst [vmem:[#allocation59_spill] sm:$0xff] %v9609_v15 }
 0x90c   :  { %4171 = vrot.lane.b32.xlu1 %v3574_v14, %s6372_s30  ;;  %v11386_v14 = vld [vmem:[#allocation115_spill] sm:$0xff] }
 0x90d   :  { %v9615_v62 = vpop.permute.xlu1 %3398  ;;  %v2531_v15 = vmul.f32 %v11386_v14, %v8840_v7  ;;  %v11390_v14 = vld [vmem:[#allocation118_spill] sm:$0xff] }
 0x910   :  { %3611 = vrot.lane.b32.xlu1 %v2454_v54, %s6372_s30  ;;  %v3414_v54 = vmul.f32 %v11387_v3, %v11382_v32  ;;  %v3171_v3 = vmul.f32 %v11390_v14, %v8866_v4  ;;  %v11395_v32 = vld [vmem:[#allocation200_spill] sm:$0xff] }
 0x912   :  { %v9622_v20 = vpop.permute.xlu1 %2678 }
 0x913   :  { %11384 = vst [vmem:[#allocation207_spill] sm:$0xff] %v9622_v20  ;;  %v11389_v20 = vld [vmem:[#allocation181_spill] sm:$0xff] }
 0x914   :  { %3771 = vrot.lane.b32.xlu1 %v2774_v35, %s6372_s30  ;;  %v2851_v35 = vmul.f32 %v11388_v12, %v8852_v9  ;;  %v2619_v46 = vmul.f32 %v11389_v20, %v11247_v36  ;;  %v11391_v20 = vld [vmem:[#allocation119_spill] sm:$0xff] }
 0x915   :  { %v3491_v12 = vmul.f32 %v11391_v20, %v8875_v41  ;;  %v11398_v20 = vld [vmem:[#allocation8_spill] sm:$0xff] }
 0x917   :  { %v9627_v53 = vpop.permute.xlu1 %3318 }
 0x918   :  { %11385 = vst [vmem:[#allocation209_spill] sm:$0xff] %v9627_v53  ;;  %3931 = vrot.lane.b32.xlu1 %v3094_v16, %s6372_s30 }
 0x91b   :  { %v3686_v59 = vpop.permute.xlu1 %3685 }
 0x91c   :  { %v3731_v47 = vadd.f32 %v3686_v59, %v2531_v15  ;;  %4091 = vrot.lane.b32.xlu1 %v3414_v54, %s6372_s30  ;;  %v2617_v59 = vmul.f32 %v9141_v8, %v11261_v0  ;;  %v11393_v8 = vld [vmem:[#allocation120_spill] sm:$0xff] }
 0x91d   :  { %v2529_v14 = vmul.f32 %v11393_v8, %v8888_v28 }
 0x91e   :  { %4245 = vrot.lane.b32.xlu0 %v3731_v47, %s6385_s16  ;;  %v11392_v47 = vld [vmem:[#allocation72_spill] sm:$0xff] }
 0x91f   :  { %v3846_v16 = vpop.permute.xlu1 %3845 }
 0x920   :  { %v3891_v53 = vadd.f32 %v3846_v16, %v2851_v35  ;;  %3701 = vrot.lane.b32.xlu1 %v2619_v46, %s6372_s30  ;;  %v2620_v35 = vmul.f32 %v9229_v38, %v11392_v47  ;;  %v11397_v38 = vld [vmem:[#allocation127_spill] sm:$0xff] }
 0x922   :  { %4325 = vrot.lane.b32.xlu0 %v3891_v53, %s6385_s16  ;;  %v11394_v53 = vld [vmem:[#allocation73_spill] sm:$0xff] }
 0x923   :  { %v4006_v15 = vpop.permute.xlu1 %4005 }
 0x924   :  { %v4051_v54 = vadd.f32 %v4006_v15, %v3171_v3  ;;  %3697 = vrot.lane.b32.xlu1 %v2617_v59, %s6372_s30  ;;  %v2940_v3 = vmul.f32 %v11395_v32, %v11394_v53  ;;  %v3729_v15 = vadd.f32 %v9199_v26, %v2529_v14  ;;  %v11401_v26 = vld [vmem:[#allocation9_spill] sm:$0xff] }
 0x925   :  { %v3580_v8 = vmul.f32 %v9241_v19, %v11401_v26 }
 0x926   :  { %4405 = vrot.lane.b32.xlu0 %v4051_v54, %s6385_s16  ;;  %v2849_v54 = vmul.f32 %v11397_v38, %v8900_v55 }
 0x927   :  { %v4166_v46 = vpop.permute.xlu1 %4165 }
 0x928   :  { %v4211_v16 = vadd.f32 %v4166_v46, %v3491_v12  ;;  %3703 = vrot.lane.b32.xlu1 %v2620_v35, %s6372_s30  ;;  %v3260_v12 = vmul.f32 %v9235_v33, %v11398_v20  ;;  %v3889_v32 = vadd.f32 %v9208_v52, %v2849_v54  ;;  %v11400_v46 = vld [vmem:[#allocation129_spill] sm:$0xff]  ;;  %v2460_v52 = vmul.f32 %v9247_v43, %v11392_v47 }
 0x929   :  { %v2780_v54 = vmul.f32 %v9253_v13, %v11394_v53  ;;  %v11406_v13 = vld [vmem:[#allocation65_spill] sm:$0xff] }
 0x92a   :  { %4485 = vrot.lane.b32.xlu0 %v4211_v16, %s6385_s16  ;;  %v3169_v16 = vmul.f32 %v11400_v46, %v8912_v40 }
 0x92b   :  { %v9658_v59 = vpop.permute.xlu1 %3607 }
 0x92c   :  { %11396 = vst [vmem:[#allocation165_spill] sm:$0xff] %v9658_v59  ;;  %3863 = vrot.lane.b32.xlu1 %v2940_v3, %s6372_s30  ;;  %v4049_v33 = vadd.f32 %v9217_v31, %v3169_v16  ;;  %v11403_v3 = vld [vmem:[#allocation123_spill] sm:$0xff]  ;;  %v2618_v16 = vmul.f32 %v9291_v50, %v11406_v13  ;;  %v11413_v50 = vld [vmem:[#allocation253_spill] sm:$0xff]  ;;  %v9739_v59 = vpop.permute.xlu0 %4109 }
 0x92d   :  { %11422 = vst [vmem:[#allocation176_spill] sm:$0xff] %v9739_v59  ;;  %v11428_v59 = vld [vmem:[#allocation221_spill] sm:$0xff] }
 0x92e   :  { %4241 = vrot.lane.b32.xlu0 %v3729_v15, %s6385_s16  ;;  %v3489_v15 = vmul.f32 %v11403_v3, %v8925_v11 }
 0x92f   :  { %v9667_v35 = vpop.permute.xlu1 %3767 }
 0x930   :  { %11399 = vst [vmem:[#allocation161_spill] sm:$0xff] %v9667_v35  ;;  %4023 = vrot.lane.b32.xlu1 %v3260_v12, %s6372_s30  ;;  %v4209_v19 = vadd.f32 %v9225_v22, %v3489_v15  ;;  %v11405_v12 = vld [vmem:[#allocation204_spill] sm:$0xff]  ;;  %v3420_v22 = vmul.f32 %v9269_v45, %v11401_v26  ;;  %v11410_v45 = vld [vmem:[#allocation210_spill] sm:$0xff]  ;;  %v11439_v26 = vld [vmem:[#allocation225_spill] sm:$0xff] }
 0x931   :  { %v3100_v43 = vmul.f32 %v11405_v12, %v11398_v20  ;;  %v11412_v12 = vld [vmem:[#allocation33_spill] sm:$0xff]  ;;  %v11421_v35 = vld [vmem:[#allocation258_spill] sm:$0xff] }
 0x932   :  { %4321 = vrot.lane.b32.xlu0 %v3889_v32, %s6385_s16 }
 0x933   :  { %v9676_v14 = vpop.permute.xlu1 %3927 }
 0x934   :  { %11402 = vst [vmem:[#allocation167_spill] sm:$0xff] %v9676_v14  ;;  %4183 = vrot.lane.b32.xlu1 %v3580_v8, %s6372_s30 }
 0x936   :  { %4401 = vrot.lane.b32.xlu0 %v4049_v33, %s6385_s16  ;;  %v11407_v33 = vld [vmem:[#allocation67_spill] sm:$0xff] }
 0x937   :  { %v9685_v38 = vpop.permute.xlu1 %4087  ;;  %v2938_v3 = vmul.f32 %v9297_v37, %v11407_v33  ;;  %v11415_v37 = vld [vmem:[#allocation212_spill] sm:$0xff] }
 0x938   :  { %11404 = vst [vmem:[#allocation53_spill] sm:$0xff] %v9685_v38  ;;  %3623 = vrot.lane.b32.xlu1 %v2460_v52, %s6372_s30  ;;  %v11409_v52 = vld [vmem:[#allocation36_spill] sm:$0xff] }
 0x93a   :  { %4481 = vrot.lane.b32.xlu0 %v4209_v19, %s6385_s16  ;;  %v3258_v19 = vmul.f32 %v11410_v45, %v11409_v52 }
 0x93b   :  { %v9692_v31 = vpop.permute.xlu1 %3683 }
 0x93c   :  { %3783 = vrot.lane.b32.xlu1 %v2780_v54, %s6372_s30 }
 0x93f   :  { %v9697_v32 = vpop.permute.xlu1 %3843 }
 0x940   :  { %3943 = vrot.lane.b32.xlu1 %v3100_v43, %s6372_s30  ;;  %v3578_v43 = vmul.f32 %v11413_v50, %v11412_v12  ;;  %v11419_v50 = vld [vmem:[#allocation57_spill] sm:$0xff] }
 0x943   :  { %v9702_v46 = vpop.permute.xlu1 %4003 }
 0x944   :  { %4103 = vrot.lane.b32.xlu1 %v3420_v22, %s6372_s30 }
 0x947   :  { %v9707_v8 = vpop.permute.xlu1 %4163 }
 0x948   :  { %3699 = vrot.lane.b32.xlu1 %v2618_v16, %s6372_s30  ;;  %v2458_v16 = vmul.f32 %v11415_v37, %v11406_v13  ;;  %v3098_v37 = vmul.f32 %v11421_v35, %v11409_v52  ;;  %v11438_v13 = vld [vmem:[#allocation16_spill] sm:$0xff] }
 0x94b   :  { %v9712_v15 = vpop.permute.xlu1 %3603 }
 0x94c   :  { %11408 = vst [vmem:[#allocation174_spill] sm:$0xff] %v9712_v15  ;;  %3859 = vrot.lane.b32.xlu1 %v2938_v3, %s6372_s30  ;;  %v11417_v3 = vld [vmem:[#allocation143_spill] sm:$0xff] }
 0x94d   :  { %v2535_v45 = vmul.f32 %v11417_v3, %v11215_v57  ;;  %v11423_v3 = vld [vmem:[#allocation249_spill] sm:$0xff] }
 0x94f   :  { %v9717_v54 = vpop.permute.xlu1 %3763 }
 0x950   :  { %11411 = vst [vmem:[#allocation32_spill] sm:$0xff] %v9717_v54  ;;  %4019 = vrot.lane.b32.xlu1 %v3258_v19, %s6372_s30  ;;  %v11418_v54 = vld [vmem:[#allocation257_spill] sm:$0xff] }
 0x951   :  { %v2778_v19 = vmul.f32 %v11418_v54, %v11407_v33  ;;  %v11424_v54 = vld [vmem:[#allocation220_spill] sm:$0xff] }
 0x953   :  { %v9722_v22 = vpop.permute.xlu1 %3923 }
 0x954   :  { %11414 = vst [vmem:[#allocation172_spill] sm:$0xff] %v9722_v22  ;;  %4179 = vrot.lane.b32.xlu1 %v3578_v43, %s6372_s30  ;;  %v11420_v22 = vld [vmem:[#allocation178_spill] sm:$0xff] }
 0x955   :  { %v2855_v43 = vmul.f32 %v11420_v22, %v11419_v50  ;;  %v9750_v22 = vpop.permute.xlu0 %3705  ;;  %v11427_v50 = vld [vmem:[#allocation251_spill] sm:$0xff] }
 0x957   :  { %v9727_v15 = vpop.permute.xlu1 %4083  ;;  %v3895_v57 = vadd.f32 %v11423_v3, %v2855_v43  ;;  %v11429_v43 = vld [vmem:[#allocation146_spill] sm:$0xff] }
 0x958   :  { %11416 = vst [vmem:[#allocation115_spill] sm:$0xff] %v9727_v15  ;;  %3619 = vrot.lane.b32.xlu1 %v2458_v16, %s6372_s30  ;;  %v3495_v3 = vmul.f32 %v11429_v43, %v11428_v59  ;;  %v11436_v59 = vld [vmem:[#allocation51_spill] sm:$0xff] }
 0x95b   :  { %v3694_v38 = vpop.permute.xlu1 %3693 }
 0x95c   :  { %v3735_v14 = vadd.f32 %v3694_v38, %v2535_v45  ;;  %3779 = vrot.lane.b32.xlu1 %v2778_v19, %s6372_s30  ;;  %v11425_v38 = vld [vmem:[#allocation180_spill] sm:$0xff]  ;;  %v11426_v19 = vld [vmem:[#allocation41_spill] sm:$0xff] }
 0x95d   :  { %v3175_v45 = vmul.f32 %v11425_v38, %v11424_v54  ;;  %v3418_v15 = vmul.f32 %v11426_v19, %v11412_v12  ;;  %v11431_v19 = vld [vmem:[#allocation252_spill] sm:$0xff]  ;;  %v9765_v12 = vpop.permute.xlu0 %3865 }
 0x95e   :  { %4253 = vrot.lane.b32.xlu0 %v3735_v14, %s6385_s16  ;;  %v4215_v54 = vadd.f32 %v11431_v19, %v3495_v3  ;;  %v11437_v3 = vld [vmem:[#allocation193_spill] sm:$0xff] }
 0x95f   :  { %v9742_v16 = vpop.permute.xlu1 %3695  ;;  %v4055_v14 = vadd.f32 %v11427_v50, %v3175_v45  ;;  %v11433_v50 = vld [vmem:[#allocation191_spill] sm:$0xff]  ;;  %v2853_v19 = vmul.f32 %v11437_v3, %v11436_v59 }
 0x960   :  { %3939 = vrot.lane.b32.xlu1 %v3098_v37, %s6372_s30  ;;  %v11430_v37 = vld [vmem:[#allocation84_spill] sm:$0xff] }
 0x961   :  { %v2624_v52 = vmul.f32 %v9497_v25, %v11430_v37  ;;  %v11435_v25 = vld [vmem:[#allocation262_spill] sm:$0xff]  ;;  %v9781_v20 = vpop.permute.xlu0 %4025 }
 0x962   :  { %4333 = vrot.lane.b32.xlu0 %v3895_v57, %s6385_s16  ;;  %v11432_v57 = vld [vmem:[#allocation49_spill] sm:$0xff] }
 0x963   :  { %v9753_v35 = vpop.permute.xlu1 %3855  ;;  %v2533_v45 = vmul.f32 %v11433_v50, %v11432_v57  ;;  %v11442_v57 = vld [vmem:[#allocation27_spill] sm:$0xff] }
 0x964   :  { %4099 = vrot.lane.b32.xlu1 %v3418_v15, %s6372_s30  ;;  %v11434_v15 = vld [vmem:[#allocation87_spill] sm:$0xff] }
 0x965   :  { %v2944_v33 = vmul.f32 %v9505_v10, %v11434_v15  ;;  %v11441_v10 = vld [vmem:[#allocation264_spill] sm:$0xff]  ;;  %v9796_v47 = vpop.permute.xlu0 %4185 }
 0x966   :  { %4413 = vrot.lane.b32.xlu0 %v4055_v14, %s6385_s16  ;;  %v3733_v14 = vadd.f32 %v11435_v25, %v2533_v45  ;;  %v11443_v45 = vld [vmem:[#allocation157_spill] sm:$0xff] }
 0x967   :  { %v9762_v38 = vpop.permute.xlu1 %4015  ;;  %v3173_v25 = vmul.f32 %v11443_v45, %v11442_v57  ;;  %v11463_v57 = vld [vmem:[#allocation109_spill] sm:$0xff] }
 0x968   :  { %3711 = vrot.lane.b32.xlu1 %v2624_v52, %s6372_s30  ;;  %v3264_v52 = vmul.f32 %v11439_v26, %v11438_v13  ;;  %v11446_v26 = vld [vmem:[#allocation266_spill] sm:$0xff] }
 0x969   :  { %v4053_v59 = vadd.f32 %v11446_v26, %v3173_v25  ;;  %v2784_v25 = vmul.f32 %v9528_v39, %v11434_v15  ;;  %v9810_v26 = vpop.permute.xlu0 %3625 }
 0x96a   :  { %4493 = vrot.lane.b32.xlu0 %v4215_v54, %s6385_s16  ;;  %v3893_v54 = vadd.f32 %v11441_v10, %v2853_v19  ;;  %v11448_v19 = vld [vmem:[#allocation199_spill] sm:$0xff]  ;;  %11451 = vst [vmem:[#allocation119_spill] sm:$0xff] %v9810_v26 }
 0x96b   :  { %v9773_v43 = vpop.permute.xlu1 %4175  ;;  %v11466_v26 = vld [vmem:[#allocation155_spill] sm:$0xff] }
 0x96c   :  { %3871 = vrot.lane.b32.xlu1 %v2944_v33, %s6372_s30  ;;  %v11444_v33 = vld [vmem:[#allocation17_spill] sm:$0xff] }
 0x96d   :  { %v3584_v53 = vmul.f32 %v9514_v21, %v11444_v33  ;;  %v11450_v21 = vld [vmem:[#allocation267_spill] sm:$0xff]  ;;  %v3424_v39 = vmul.f32 %v9554_v58, %v11444_v33  ;;  %v11461_v58 = vld [vmem:[#allocation12_spill] sm:$0xff] }
 0x96e   :  { %4249 = vrot.lane.b32.xlu0 %v3733_v14, %s6385_s16  ;;  %v11447_v14 = vld [vmem:[#allocation25_spill] sm:$0xff] }
 0x96f   :  { %v9784_v50 = vpop.permute.xlu1 %3615  ;;  %v3493_v10 = vmul.f32 %v11448_v19, %v11447_v14 }
 0x970   :  { %11440 = vst [vmem:[#allocation113_spill] sm:$0xff] %v9784_v50  ;;  %4031 = vrot.lane.b32.xlu1 %v3264_v52, %s6372_s30  ;;  %v2464_v52 = vmul.f32 %v9521_v51, %v11430_v37  ;;  %v11453_v51 = vld [vmem:[#allocation228_spill] sm:$0xff] }
 0x972   :  { %4329 = vrot.lane.b32.xlu0 %v3893_v54, %s6385_s16  ;;  %v4213_v54 = vadd.f32 %v11450_v21, %v3493_v10  ;;  %v11456_v21 = vld [vmem:[#allocation153_spill] sm:$0xff] }
 0x973   :  { %v9793_v3 = vpop.permute.xlu1 %3775 }
 0x974   :  { %11445 = vst [vmem:[#allocation181_spill] sm:$0xff] %v9793_v3  ;;  %4191 = vrot.lane.b32.xlu1 %v3584_v53, %s6372_s30 }
 0x976   :  { %4409 = vrot.lane.b32.xlu0 %v4053_v59, %s6385_s16  ;;  %v3104_v59 = vmul.f32 %v11453_v51, %v11438_v13  ;;  %v11458_v51 = vld [vmem:[#allocation79_spill] sm:$0xff] }
 0x977   :  { %v9804_v45 = vpop.permute.xlu1 %3935  ;;  %v2942_v50 = vmul.f32 %v9581_v60, %v11458_v51 }
 0x978   :  { %11449 = vst [vmem:[#allocation118_spill] sm:$0xff] %v9804_v45  ;;  %3631 = vrot.lane.b32.xlu1 %v2464_v52, %s6372_s30  ;;  %v9820_v45 = vpop.permute.xlu0 %3785  ;;  %v11455_v52 = vld [vmem:[#allocation78_spill] sm:$0xff] }
 0x979   :  { %11454 = vst [vmem:[#allocation200_spill] sm:$0xff] %v9820_v45  ;;  %v11465_v45 = vld [vmem:[#allocation13_spill] sm:$0xff] }
 0x97a   :  { %4489 = vrot.lane.b32.xlu0 %v4213_v54, %s6385_s16  ;;  %v2622_v54 = vmul.f32 %v11456_v21, %v11455_v52  ;;  %v3582_v33 = vmul.f32 %v11466_v26, %v11465_v45  ;;  %v11469_v26 = vld [vmem:[#allocation121_spill] sm:$0xff] }
 0x97b   :  { %v9813_v53 = vpop.permute.xlu1 %4095 }
 0x97c   :  { %11452 = vst [vmem:[#allocation120_spill] sm:$0xff] %v9813_v53  ;;  %3791 = vrot.lane.b32.xlu1 %v2784_v25, %s6372_s30  ;;  %v9830_v25 = vpop.permute.xlu0 %3945 }
 0x97d   :  { %11457 = vst [vmem:[#allocation127_spill] sm:$0xff] %v9830_v25  ;;  %v11464_v25 = vld [vmem:[#allocation116_spill] sm:$0xff] }
 0x97e   :  { %v2691_v60 = vmul.f32 %v11464_v25, %v8852_v9  ;;  %v11470_v25 = vld [vmem:[#allocation122_spill] sm:$0xff] }
 0x97f   :  { %v9818_v19 = vpop.permute.xlu1 %3691 }
 0x980   :  { %3951 = vrot.lane.b32.xlu1 %v3104_v59, %s6372_s30  ;;  %v9839_v53 = vpop.permute.xlu0 %4105 }
 0x981   :  { %11460 = vst [vmem:[#allocation123_spill] sm:$0xff] %v9839_v53  ;;  %v11467_v53 = vld [vmem:[#allocation184_spill] sm:$0xff] }
 0x983   :  { %v9825_v10 = vpop.permute.xlu1 %3851 }
 0x984   :  { %4111 = vrot.lane.b32.xlu1 %v3424_v39, %s6372_s30  ;;  %v3262_v39 = vmul.f32 %v9586_v5, %v11461_v58 }
 0x987   :  { %v9832_v3 = vpop.permute.xlu1 %4011 }
 0x988   :  { %3707 = vrot.lane.b32.xlu1 %v2622_v54, %s6372_s30  ;;  %v2371_v54 = vmul.f32 %v11463_v57, %v8840_v7  ;;  %v2462_v7 = vmul.f32 %v9592_v49, %v11455_v52 }
 0x98a   :  { %v3651_v13 = vadd.f32 %v11467_v53, %v2371_v54  ;;  %v3011_v53 = vmul.f32 %v11469_v26, %v8866_v4  ;;  %v3331_v54 = vmul.f32 %v11470_v25, %v8875_v41 }
 0x98b   :  { %v9837_v59 = vpop.permute.xlu1 %4171 }
 0x98c   :  { %11459 = vst [vmem:[#allocation129_spill] sm:$0xff] %v9837_v59  ;;  %3867 = vrot.lane.b32.xlu1 %v2942_v50, %s6372_s30  ;;  %v11468_v50 = vld [vmem:[#allocation188_spill] sm:$0xff] }
 0x98d   :  { %v3811_v37 = vadd.f32 %v11468_v50, %v2691_v60 }
 0x98f   :  { %v9844_v14 = vpop.permute.xlu1 %3611 }
 0x990   :  { %11462 = vst [vmem:[#allocation204_spill] sm:$0xff] %v9844_v14  ;;  %4027 = vrot.lane.b32.xlu1 %v3262_v39, %s6372_s30  ;;  %v4246_v21 = vpop.permute.xlu0 %4245 }
 0x991   :  { %v4291_v39 = vadd.f32 %v4246_v21, %v3651_v13  ;;  %v11471_v13 = vld [vmem:[#allocation235_spill] sm:$0xff]  ;;  %v11472_v21 = vld [vmem:[#allocation236_spill] sm:$0xff] }
 0x992   :  { %v4131_v60 = vadd.f32 %v11472_v21, %v3331_v54  ;;  %v11475_v54 = vld [vmem:[#allocation117_spill] sm:$0xff] }
 0x993   :  { %v9855_v15 = vpop.permute.xlu1 %3771 }
 0x994   :  { %4187 = vrot.lane.b32.xlu1 %v3582_v33, %s6372_s30  ;;  %v4326_v5 = vpop.permute.xlu0 %4325  ;;  %v2782_v33 = vmul.f32 %v9599_v42, %v11458_v51 }
 0x995   :  { %v4371_v14 = vadd.f32 %v4326_v5, %v3811_v37  ;;  %v3971_v37 = vadd.f32 %v11471_v13, %v3011_v53  ;;  %v2369_v13 = vmul.f32 %v11475_v54, %v8888_v28  ;;  %v11481_v28 = vld [vmem:[#allocation126_spill] sm:$0xff] }
 0x997   :  { %v4547_v57 = vadd.f32 %v4371_v14, %v4291_v39  ;;  %v9860_v59 = vpop.permute.xlu1 %3931  ;;  %v11473_v39 = vld [vmem:[#allocation229_spill] sm:$0xff] }
 0x998   :  { %3627 = vrot.lane.b32.xlu1 %v2462_v7, %s6372_s30  ;;  %v4406_v9 = vpop.permute.xlu0 %4405  ;;  %v2539_v4 = vmul.f32 %v11473_v39, %v11247_v36  ;;  %v11474_v7 = vld [vmem:[#allocation233_spill] sm:$0xff]  ;;  %v3422_v39 = vmul.f32 %v9615_v62, %v11465_v45 }
 0x999   :  { %v4451_v50 = vadd.f32 %v4406_v9, %v3971_v37  ;;  %v3102_v41 = vmul.f32 %v11474_v7, %v11461_v58  ;;  %v11477_v37 = vld [vmem:[#allocation71_spill] sm:$0xff] }
 0x99b   :  { %v9871_v49 = vpop.permute.xlu1 %4091 }
 0x99c   :  { %3787 = vrot.lane.b32.xlu1 %v2782_v33, %s6372_s30  ;;  %v4486_v14 = vpop.permute.xlu0 %4485  ;;  %v11476_v33 = vld [vmem:[#allocation124_spill] sm:$0xff] }
 0x99d   :  { %v4531_v5 = vadd.f32 %v4486_v14, %v4131_v60  ;;  %v2689_v21 = vmul.f32 %v11476_v33, %v8900_v55  ;;  %v11478_v60 = vld [vmem:[#allocation186_spill] sm:$0xff] }
 0x99e   :  { %v2859_v14 = vmul.f32 %v11478_v60, %v11477_v37  ;;  %v11482_v33 = vld [vmem:[#allocation6_spill] sm:$0xff]  ;;  %v11483_v60 = vld [vmem:[#allocation187_spill] sm:$0xff] }
 0x99f   :  { %v4563_v26 = vadd.f32 %v4531_v5, %v4451_v50  ;;  %v3702_v25 = vpop.permute.xlu1 %3701  ;;  %v11479_v50 = vld [vmem:[#allocation238_spill] sm:$0xff]  ;;  %v3179_v62 = vmul.f32 %v11483_v60, %v11482_v33  ;;  %v11484_v37 = vld [vmem:[#allocation243_spill] sm:$0xff]  ;;  %v11492_v60 = vld [vmem:[#allocation241_spill] sm:$0xff] }
 0x9a0   :  { %v3739_v42 = vadd.f32 %v3702_v25, %v2539_v4  ;;  %3947 = vrot.lane.b32.xlu1 %v3102_v41, %s6372_s30  ;;  %v4242_v53 = vpop.permute.xlu0 %4241  ;;  %v3649_v5 = vadd.f32 %v11479_v50, %v2369_v13  ;;  %v11480_v4 = vld [vmem:[#allocation239_spill] sm:$0xff]  ;;  %v2532_v25 = vmul.f32 %v11481_v28, %v8968_v61  ;;  %v3899_v55 = vadd.f32 %v9396_v27, %v2859_v14  ;;  %v11485_v50 = vld [vmem:[#allocation142_spill] sm:$0xff]  ;;  %v11489_v28 = vld [vmem:[#allocation24_spill] sm:$0xff] }
 0x9a1   :  { %v9883_v9 = vadd.f32 %v4563_v26, %v4547_v57  ;;  %v3809_v7 = vadd.f32 %v11480_v4, %v2689_v21  ;;  %v2852_v4 = vmul.f32 %v11485_v50, %v8977_v63  ;;  %v4059_v27 = vadd.f32 %v9404_v23, %v3179_v62 }
 0x9a2   :  { %4261 = vrot.lane.b32.xlu0 %v3739_v42, %s6385_s16  ;;  %v4289_v26 = vadd.f32 %v4242_v53, %v3649_v5  ;;  %v3732_v42 = vadd.f32 %v11484_v37, %v2532_v25  ;;  %v11486_v53 = vld [vmem:[#allocation132_spill] sm:$0xff]  ;;  %v11487_v5 = vld [vmem:[#allocation134_spill] sm:$0xff]  ;;  %v11488_v37 = vld [vmem:[#allocation7_spill] sm:$0xff] }
 0x9a3   :  { %v3698_v41 = vpop.permute.xlu1 %3697  ;;  %v3499_v25 = vmul.f32 %v11489_v28, %v11488_v37 }
 0x9a4   :  { %4107 = vrot.lane.b32.xlu1 %v3422_v39, %s6372_s30  ;;  %v4322_v57 = vpop.permute.xlu0 %4321  ;;  %v3009_v39 = vmul.f32 %v11486_v53, %v8912_v40  ;;  %s11777_s30 = sld [smem:[#allocation284_spill]] }
 0x9a5   :  { %v4369_v54 = vadd.f32 %v4322_v57, %v3809_v7  ;;  %v3329_v7 = vmul.f32 %v11487_v5, %v8925_v11  ;;  %v4219_v40 = vadd.f32 %v9410_v29, %v3499_v25  ;;  %v11498_v25 = vld [vmem:[#allocation192_spill] sm:$0xff] }
 0x9a6   :  { %4341 = vrot.lane.b32.xlu0 %v3899_v55, %s6385_s16  ;;  %v11490_v55 = vld [vmem:[#allocation244_spill] sm:$0xff] }
 0x9a7   :  { %v4545_v13 = vadd.f32 %v4369_v54, %v4289_v26  ;;  %v9900_v21 = vpop.permute.xlu1 %3703  ;;  %v3892_v57 = vadd.f32 %v11490_v55, %v2852_v4  ;;  %v11491_v26 = vld [vmem:[#allocation240_spill] sm:$0xff]  ;;  %v4129_v23 = vadd.f32 %v11492_v60, %v3329_v7  ;;  %v11494_v4 = vld [vmem:[#allocation234_spill] sm:$0xff] }
 0x9a8   :  { %4247 = vrot.lane.b32.xlu1 %v3732_v42, %s6385_s16  ;;  %v4402_v14 = vpop.permute.xlu0 %4401  ;;  %v3969_v54 = vadd.f32 %v11491_v26, %v3009_v39  ;;  %v11493_v42 = vld [vmem:[#allocation144_spill] sm:$0xff]  ;;  %v2537_v28 = vmul.f32 %v11494_v4, %v11261_v0  ;;  %v11496_v26 = vld [vmem:[#allocation130_spill] sm:$0xff] }
 0x9a9   :  { %v3172_v50 = vmul.f32 %v11493_v42, %v8990_v17  ;;  %v3492_v60 = vmul.f32 %v11496_v26, %v9002_v2  ;;  %v11505_v26 = vld [vmem:[#allocation35_spill] sm:$0xff] }
 0x9aa   :  { %4421 = vrot.lane.b32.xlu0 %v4059_v27, %s6385_s16  ;;  %v4449_v53 = vadd.f32 %v4402_v14, %v3969_v54  ;;  %v11495_v27 = vld [vmem:[#allocation245_spill] sm:$0xff]  ;;  %v3737_v42 = vadd.f32 %v3698_v41, %v2537_v28  ;;  %v11497_v14 = vld [vmem:[#allocation63_spill] sm:$0xff] }
 0x9ab   :  { %v9916_v62 = vpop.permute.xlu1 %3863  ;;  %v4052_v55 = vadd.f32 %v11495_v27, %v3172_v50  ;;  %v11499_v54 = vld [vmem:[#allocation247_spill] sm:$0xff]  ;;  %v11501_v41 = vld [vmem:[#allocation37_spill] sm:$0xff]  ;;  %v11504_v27 = vld [vmem:[#allocation160_spill] sm:$0xff] }
 0x9ac   :  { %4327 = vrot.lane.b32.xlu1 %v3892_v57, %s6385_s16  ;;  %v4482_v11 = vpop.permute.xlu0 %4481  ;;  %v2857_v57 = vmul.f32 %v11498_v25, %v11497_v14 }
 0x9ad   :  { %v4529_v5 = vadd.f32 %v4482_v11, %v4129_v23  ;;  %v4212_v23 = vadd.f32 %v11499_v54, %v3492_v60  ;;  %v11509_v54 = vld [vmem:[#allocation112_spill] sm:$0xff] }
 0x9ae   :  { %4501 = vrot.lane.b32.xlu0 %v4219_v40, %s6385_s16  ;;  %v11500_v40 = vld [vmem:[#allocation158_spill] sm:$0xff] }
 0x9af   :  { %v4561_v39 = vadd.f32 %v4529_v5, %v4449_v53  ;;  %v9926_v7 = vpop.permute.xlu1 %4023  ;;  %v2530_v11 = vmul.f32 %v11500_v40, %v11339_v30  ;;  %v3897_v53 = vadd.f32 %v9451_v18, %v2857_v57  ;;  %v11502_v5 = vld [vmem:[#allocation196_spill] sm:$0xff]  ;;  %v11506_v18 = vld [vmem:[#allocation62_spill] sm:$0xff] }
 0x9b0   :  { %4407 = vrot.lane.b32.xlu1 %v4052_v55, %s6385_s16  ;;  %v2850_v55 = vmul.f32 %v11504_v27, %v11342_v24  ;;  %v3497_v60 = vmul.f32 %v11506_v18, %v11505_v26  ;;  %v11510_v40 = vld [vmem:[#allocation82_spill] sm:$0xff]  ;;  %v11515_v27 = vld [vmem:[#allocation133_spill] sm:$0xff]  ;;  %v11517_v18 = vld [vmem:[#allocation216_spill] sm:$0xff] }
 0x9b1   :  { %v9931_v29 = vadd.f32 %v4561_v39, %v4545_v13  ;;  %v3177_v13 = vmul.f32 %v11502_v5, %v11501_v41  ;;  %v3730_v4 = vadd.f32 %v9692_v31, %v2530_v11  ;;  %v11508_v31 = vld [vmem:[#allocation138_spill] sm:$0xff] }
 0x9b2   :  { %4257 = vrot.lane.b32.xlu0 %v3737_v42, %s6385_s16  ;;  %v3890_v42 = vadd.f32 %v9697_v32, %v2850_v55  ;;  %v3170_v57 = vmul.f32 %v11508_v31, %v11345_v44  ;;  %v11513_v32 = vld [vmem:[#allocation26_spill] sm:$0xff] }
 0x9b3   :  { %v9937_v50 = vpop.permute.xlu1 %4183  ;;  %v4057_v39 = vadd.f32 %v9466_v1, %v3177_v13  ;;  %v11511_v1 = vld [vmem:[#allocation269_spill] sm:$0xff]  ;;  %v11514_v13 = vld [vmem:[#allocation166_spill] sm:$0xff] }
 0x9b4   :  { %4487 = vrot.lane.b32.xlu1 %v4212_v23, %s6385_s16  ;;  %v4217_v23 = vadd.f32 %v11509_v54, %v3497_v60  ;;  %v2543_v11 = vmul.f32 %v11511_v1, %v11510_v40  ;;  %v11520_v54 = vld [vmem:[#allocation43_spill] sm:$0xff]  ;;  %v11521_v1 = vld [vmem:[#allocation14_spill] sm:$0xff] }
 0x9b6   :  { %4337 = vrot.lane.b32.xlu0 %v3897_v53, %s6385_s16  ;;  %v4050_v53 = vadd.f32 %v9702_v46, %v3170_v57  ;;  %v3743_v55 = vadd.f32 %v11515_v27, %v2543_v11  ;;  %v11519_v46 = vld [vmem:[#allocation211_spill] sm:$0xff]  ;;  %v11522_v11 = vld [vmem:[#allocation273_spill] sm:$0xff] }
 0x9b7   :  { %v9947_v28 = vpop.permute.xlu1 %3623  ;;  %v2536_v57 = vmul.f32 %v11519_v46, %v11362_v56  ;;  %v11525_v46 = vld [vmem:[#allocation76_spill] sm:$0xff] }
 0x9b8   :  { %11503 = vst [vmem:[#allocation210_spill] sm:$0xff] %v9947_v28  ;;  %4243 = vrot.lane.b32.xlu1 %v3730_v4, %s6385_s16  ;;  %v3490_v4 = vmul.f32 %v11514_v13, %v11513_v32  ;;  %v3183_v13 = vmul.f32 %v11522_v11, %v11521_v1  ;;  %v11538_v28 = vld [vmem:[#allocation111_spill] sm:$0xff] }
 0x9ba   :  { %4417 = vrot.lane.b32.xlu0 %v4057_v39, %s6385_s16  ;;  %v11516_v39 = vld [vmem:[#allocation83_spill] sm:$0xff] }
 0x9bb   :  { %v9957_v25 = vpop.permute.xlu1 %3783  ;;  %v2863_v60 = vmul.f32 %v11517_v18, %v11516_v39 }
 0x9bc   :  { %11507 = vst [vmem:[#allocation253_spill] sm:$0xff] %v9957_v25  ;;  %4323 = vrot.lane.b32.xlu1 %v3890_v42, %s6385_s16  ;;  %v4210_v42 = vadd.f32 %v9707_v8, %v3490_v4  ;;  %v11523_v8 = vld [vmem:[#allocation39_spill] sm:$0xff] }
 0x9bd   :  { %v2856_v4 = vmul.f32 %v11523_v8, %v11366_v48  ;;  %v11529_v8 = vld [vmem:[#allocation77_spill] sm:$0xff] }
 0x9be   :  { %4497 = vrot.lane.b32.xlu0 %v4217_v23, %s6385_s16  ;;  %v3903_v23 = vadd.f32 %v11520_v54, %v2863_v60  ;;  %v11526_v60 = vld [vmem:[#allocation279_spill] sm:$0xff] }
 0x9bf   :  { %v9967_v5 = vpop.permute.xlu1 %3943  ;;  %v2541_v54 = vmul.f32 %v11526_v60, %v11525_v46 }
 0x9c0   :  { %11512 = vst [vmem:[#allocation212_spill] sm:$0xff] %v9967_v5  ;;  %4403 = vrot.lane.b32.xlu1 %v4050_v53, %s6385_s16  ;;  %v3736_v53 = vadd.f32 %v9742_v16, %v2536_v57  ;;  %v11527_v16 = vld [vmem:[#allocation31_spill] sm:$0xff]  ;;  %v11528_v57 = vld [vmem:[#allocation169_spill] sm:$0xff] }
 0x9c1   :  { %v3741_v11 = vadd.f32 %v9750_v22, %v2541_v54  ;;  %v11534_v22 = vld [vmem:[#allocation110_spill] sm:$0xff] }
 0x9c2   :  { %4269 = vrot.lane.b32.xlu0 %v3743_v55, %s6385_s16  ;;  %v11524_v55 = vld [vmem:[#allocation154_spill] sm:$0xff] }
 0x9c3   :  { %v9977_v31 = vpop.permute.xlu1 %4103  ;;  %v4063_v18 = vadd.f32 %v11524_v55, %v3183_v13  ;;  %v11530_v13 = vld [vmem:[#allocation47_spill] sm:$0xff] }
 0x9c4   :  { %11518 = vst [vmem:[#allocation143_spill] sm:$0xff] %v9977_v31  ;;  %4483 = vrot.lane.b32.xlu1 %v4210_v42, %s6385_s16  ;;  %v3896_v42 = vadd.f32 %v9753_v35, %v2856_v4  ;;  %v2861_v55 = vmul.f32 %v11530_v13, %v11529_v8  ;;  %v11531_v35 = vld [vmem:[#allocation29_spill] sm:$0xff]  ;;  %v11532_v4 = vld [vmem:[#allocation38_spill] sm:$0xff] }
 0x9c6   :  { %4349 = vrot.lane.b32.xlu0 %v3903_v23, %s6385_s16  ;;  %v3176_v23 = vmul.f32 %v11528_v57, %v11527_v16  ;;  %v3901_v5 = vadd.f32 %v9765_v12, %v2861_v55  ;;  %v11533_v57 = vld [vmem:[#allocation10_spill] sm:$0xff] }
 0x9c7   :  { %v9987_v27 = vpop.permute.xlu1 %3699  ;;  %v3181_v54 = vmul.f32 %v11534_v22, %v11533_v57  ;;  %v11541_v22 = vld [vmem:[#allocation15_spill] sm:$0xff] }
 0x9c8   :  { %4255 = vrot.lane.b32.xlu1 %v3736_v53, %s6385_s16  ;;  %v4056_v53 = vadd.f32 %v9762_v38, %v3176_v23  ;;  %v11535_v38 = vld [vmem:[#allocation52_spill] sm:$0xff]  ;;  %v11536_v23 = vld [vmem:[#allocation46_spill] sm:$0xff] }
 0x9c9   :  { %v4061_v25 = vadd.f32 %v9781_v20, %v3181_v54  ;;  %v11542_v20 = vld [vmem:[#allocation274_spill] sm:$0xff] }
 0x9ca   :  { %4429 = vrot.lane.b32.xlu0 %v4063_v18, %s6385_s16  ;;  %v3496_v18 = vmul.f32 %v11532_v4, %v11531_v35  ;;  %v11537_v4 = vld [vmem:[#allocation11_spill] sm:$0xff]  ;;  %v3503_v54 = vmul.f32 %v11542_v20, %v11541_v22 }
 0x9cb   :  { %v9997_v1 = vpop.permute.xlu1 %3859  ;;  %v3501_v12 = vmul.f32 %v11538_v28, %v11537_v4 }
 0x9cc   :  { %4335 = vrot.lane.b32.xlu1 %v3896_v42, %s6385_s16  ;;  %v4216_v42 = vadd.f32 %v9773_v43, %v3496_v18  ;;  %v11540_v43 = vld [vmem:[#allocation175_spill] sm:$0xff] }
 0x9cd   :  { %v4221_v18 = vadd.f32 %v9796_v47, %v3501_v12 }
 0x9ce   :  { %4265 = vrot.lane.b32.xlu0 %v3741_v11, %s6385_s16  ;;  %v2534_v11 = vmul.f32 %v11536_v23, %v11535_v38  ;;  %v11545_v23 = vld [vmem:[#allocation28_spill] sm:$0xff] }
 0x9cf   :  { %v10007_v60 = vpop.permute.xlu1 %4019 }
 0x9d0   :  { %4415 = vrot.lane.b32.xlu1 %v4056_v53, %s6385_s16  ;;  %v3734_v55 = vadd.f32 %v9818_v19, %v2534_v11  ;;  %v11544_v19 = vld [vmem:[#allocation219_spill] sm:$0xff]  ;;  %v4223_v11 = vadd.f32 %v11545_v23, %v3503_v54  ;;  %v11553_v23 = vld [vmem:[#allocation73_spill] sm:$0xff] }
 0x9d2   :  { %4345 = vrot.lane.b32.xlu0 %v3901_v5, %s6385_s16  ;;  %v2854_v5 = vmul.f32 %v11540_v43, %v11377_v34  ;;  %v11548_v43 = vld [vmem:[#allocation222_spill] sm:$0xff] }
 0x9d3   :  { %v4180_v13 = vpop.permute.xlu1 %4179 }
 0x9d4   :  { %4495 = vrot.lane.b32.xlu1 %v4216_v42, %s6385_s16  ;;  %v3894_v42 = vadd.f32 %v9825_v10, %v2854_v5  ;;  %v11549_v5 = vld [vmem:[#allocation129_spill] sm:$0xff] }
 0x9d6   :  { %4425 = vrot.lane.b32.xlu0 %v4061_v25, %s6385_s16  ;;  %v3174_v25 = vmul.f32 %v11544_v19, %v11380_v6  ;;  %v11551_v19 = vld [vmem:[#allocation72_spill] sm:$0xff] }
 0x9d7   :  { %v10025_v53 = vpop.permute.xlu1 %3619 }
 0x9d8   :  { %11539 = vst [vmem:[#allocation257_spill] sm:$0xff] %v10025_v53  ;;  %4251 = vrot.lane.b32.xlu1 %v3734_v55, %s6385_s16  ;;  %v4054_v47 = vadd.f32 %v9832_v3, %v3174_v25  ;;  %v11547_v55 = vld [vmem:[#allocation30_spill] sm:$0xff] }
 0x9d9   :  { %v3494_v10 = vmul.f32 %v11548_v43, %v11547_v55 }
 0x9da   :  { %4505 = vrot.lane.b32.xlu0 %v4221_v18, %s6385_s16 }
 0x9db   :  { %v10035_v28 = vpop.permute.xlu1 %3779  ;;  %v4214_v18 = vadd.f32 %v11549_v5, %v3494_v10  ;;  %v11555_v10 = vld [vmem:[#allocation8_spill] sm:$0xff]  ;;  %v11556_v5 = vld [vmem:[#allocation23_spill] sm:$0xff] }
 0x9dc   :  { %11543 = vst [vmem:[#allocation178_spill] sm:$0xff] %v10035_v28  ;;  %4331 = vrot.lane.b32.xlu1 %v3894_v42, %s6385_s16  ;;  %v11552_v28 = vld [vmem:[#allocation202_spill] sm:$0xff]  ;;  %v10055_v42 = vpop.permute.xlu0 %4253 }
 0x9dd   :  { %v2540_v54 = vmul.f32 %v11552_v28, %v11551_v19 }
 0x9de   :  { %4509 = vrot.lane.b32.xlu0 %v4223_v11, %s6385_s16  ;;  %v11554_v11 = vld [vmem:[#allocation242_spill] sm:$0xff] }
 0x9df   :  { %v10043_v12 = vpop.permute.xlu1 %3939  ;;  %v3740_v3 = vadd.f32 %v9900_v21, %v2540_v54  ;;  %v11558_v54 = vld [vmem:[#allocation206_spill] sm:$0xff] }
 0x9e0   :  { %11546 = vst [vmem:[#allocation258_spill] sm:$0xff] %v10043_v12  ;;  %4411 = vrot.lane.b32.xlu1 %v4054_v47, %s6385_s16  ;;  %v2860_v12 = vmul.f32 %v11554_v11, %v11553_v23  ;;  %v10063_v53 = vpop.permute.xlu0 %4333  ;;  %v11560_v23 = vld [vmem:[#allocation255_spill] sm:$0xff] }
 0x9e2   :  { %v3900_v47 = vadd.f32 %v9916_v62, %v2860_v12  ;;  %v11559_v12 = vld [vmem:[#allocation65_spill] sm:$0xff] }
 0x9e3   :  { %v10049_v20 = vpop.permute.xlu1 %4099 }
 0x9e4   :  { %11550 = vst [vmem:[#allocation249_spill] sm:$0xff] %v10049_v20  ;;  %4491 = vrot.lane.b32.xlu1 %v4214_v18, %s6385_s16  ;;  %v3180_v20 = vmul.f32 %v11556_v5, %v11555_v10  ;;  %v11557_v18 = vld [vmem:[#allocation9_spill] sm:$0xff]  ;;  %v10071_v11 = vpop.permute.xlu0 %4413  ;;  %v2538_v5 = vmul.f32 %v11560_v23, %v11559_v12  ;;  %v11566_v23 = vld [vmem:[#allocation36_spill] sm:$0xff]  ;;  %v11567_v12 = vld [vmem:[#allocation259_spill] sm:$0xff] }
 0x9e5   :  { %v3500_v31 = vmul.f32 %v11558_v54, %v11557_v18 }
 0x9e6   :  { %v4060_v21 = vadd.f32 %v9926_v7, %v3180_v20  ;;  %v11562_v7 = vld [vmem:[#allocation67_spill] sm:$0xff]  ;;  %v11563_v20 = vld [vmem:[#allocation44_spill] sm:$0xff] }
 0x9e7   :  { %v3712_v25 = vpop.permute.xlu1 %3711  ;;  %v2858_v26 = vmul.f32 %v11563_v20, %v11562_v7 }
 0x9e8   :  { %4263 = vrot.lane.b32.xlu1 %v3740_v3, %s6385_s16  ;;  %v4220_v3 = vadd.f32 %v9937_v50, %v3500_v31  ;;  %v10081_v54 = vpop.permute.xlu0 %4493  ;;  %v11564_v50 = vld [vmem:[#allocation87_spill] sm:$0xff]  ;;  %v11565_v31 = vld [vmem:[#allocation164_spill] sm:$0xff] }
 0x9e9   :  { %v3898_v18 = vadd.f32 %v9997_v1, %v2858_v26 }
 0x9eb   :  { %v3872_v43 = vpop.permute.xlu1 %3871 }
 0x9ec   :  { %4343 = vrot.lane.b32.xlu1 %v3900_v47, %s6385_s16  ;;  %v3738_v47 = vadd.f32 %v9987_v27, %v2538_v5  ;;  %v10093_v5 = vpop.permute.xlu0 %4249 }
 0x9ef   :  { %v4032_v28 = vpop.permute.xlu1 %4031 }
 0x9f0   :  { %4423 = vrot.lane.b32.xlu1 %v4060_v21, %s6385_s16  ;;  %v2704_v21 = vmul.f32 %v11565_v31, %v11564_v50  ;;  %v11573_v31 = vld [vmem:[#allocation84_spill] sm:$0xff] }
 0x9f3   :  { %v4192_v62 = vpop.permute.xlu1 %4191 }
 0x9f4   :  { %4503 = vrot.lane.b32.xlu1 %v4220_v3, %s6385_s16  ;;  %v3178_v3 = vmul.f32 %v11567_v12, %v11566_v23  ;;  %v11574_v12 = vld [vmem:[#allocation227_spill] sm:$0xff] }
 0x9f6   :  { %v4058_v27 = vadd.f32 %v10007_v60, %v3178_v3  ;;  %v11575_v3 = vld [vmem:[#allocation156_spill] sm:$0xff] }
 0x9f7   :  { %v10077_v19 = vpop.permute.xlu1 %3631 }
 0x9f8   :  { %11561 = vst [vmem:[#allocation180_spill] sm:$0xff] %v10077_v19  ;;  %4259 = vrot.lane.b32.xlu1 %v3738_v47, %s6385_s16  ;;  %v11570_v47 = vld [vmem:[#allocation33_spill] sm:$0xff] }
 0x9f9   :  { %v11571_v19 = vld [vmem:[#allocation261_spill] sm:$0xff] }
 0x9fa   :  { %v3498_v7 = vmul.f32 %v11571_v19, %v11570_v47 }
 0x9fb   :  { %v3792_v41 = vpop.permute.xlu1 %3791 }
 0x9fc   :  { %v10089_v37 = vadd.f32 %v3792_v41, %v2704_v21  ;;  %4339 = vrot.lane.b32.xlu1 %v3898_v18, %s6385_s16  ;;  %v4218_v26 = vadd.f32 %v4180_v13, %v3498_v7  ;;  %v2544_v41 = vmul.f32 %v11574_v12, %v11573_v31  ;;  %v10104_v21 = vpop.permute.xlu0 %4329  ;;  %v11576_v7 = vld [vmem:[#allocation16_spill] sm:$0xff] }
 0x9fe   :  { %11568 = vst [vmem:[#allocation41_spill] sm:$0xff] %v10089_v37  ;;  %v3744_v60 = vadd.f32 %v3712_v25, %v2544_v41 }
 0x9ff   :  { %v10095_v20 = vpop.permute.xlu1 %3951 }
 0xa00   :  { %11569 = vst [vmem:[#allocation251_spill] sm:$0xff] %v10095_v20  ;;  %4419 = vrot.lane.b32.xlu1 %v4058_v27, %s6385_s16  ;;  %v2864_v20 = vmul.f32 %v11575_v3, %v11564_v50  ;;  %v10110_v19 = vpop.permute.xlu0 %4409  ;;  %v11579_v3 = vld [vmem:[#allocation163_spill] sm:$0xff] }
 0xa02   :  { %v3904_v27 = vadd.f32 %v3872_v43, %v2864_v20  ;;  %v2862_v43 = vmul.f32 %v11579_v3, %v11458_v51  ;;  %v11585_v3 = vld [vmem:[#allocation182_spill] sm:$0xff] }
 0xa03   :  { %v10100_v1 = vpop.permute.xlu1 %4111 }
 0xa04   :  { %11572 = vst [vmem:[#allocation146_spill] sm:$0xff] %v10100_v1  ;;  %4499 = vrot.lane.b32.xlu1 %v4218_v26, %s6385_s16  ;;  %v11577_v1 = vld [vmem:[#allocation152_spill] sm:$0xff]  ;;  %v11578_v26 = vld [vmem:[#allocation195_spill] sm:$0xff]  ;;  %v10117_v41 = vpop.permute.xlu0 %4489 }
 0xa05   :  { %v3184_v37 = vmul.f32 %v11577_v1, %v11576_v7  ;;  %v2542_v25 = vmul.f32 %v11578_v26, %v11455_v52 }
 0xa07   :  { %v3708_v18 = vpop.permute.xlu1 %3707  ;;  %v4064_v12 = vadd.f32 %v4032_v28, %v3184_v37  ;;  %v11582_v37 = vld [vmem:[#allocation59_spill] sm:$0xff] }
 0xa08   :  { %4271 = vrot.lane.b32.xlu1 %v3744_v60, %s6385_s16  ;;  %v3742_v50 = vadd.f32 %v3708_v18, %v2542_v25  ;;  %v3182_v28 = vmul.f32 %v11582_v37, %v11461_v58  ;;  %v11584_v18 = vld [vmem:[#allocation207_spill] sm:$0xff]  ;;  %v11590_v58 = vld [vmem:[#allocation230_spill] sm:$0xff] }
 0xa0b   :  { %v3868_v13 = vpop.permute.xlu1 %3867 }
 0xa0c   :  { %4351 = vrot.lane.b32.xlu1 %v3904_v27, %s6385_s16  ;;  %v3902_v1 = vadd.f32 %v3868_v13, %v2862_v43 }
 0xa0f   :  { %v4028_v31 = vpop.permute.xlu1 %4027 }
 0xa10   :  { %4431 = vrot.lane.b32.xlu1 %v4064_v12, %s6385_s16  ;;  %v2702_v12 = vmul.f32 %v11584_v18, %v11458_v51  ;;  %v4062_v25 = vadd.f32 %v4028_v31, %v3182_v28 }
 0xa13   :  { %v4188_v60 = vpop.permute.xlu1 %4187 }
 0xa14   :  { %4267 = vrot.lane.b32.xlu1 %v3742_v50, %s6385_s16  ;;  %v10123_v20 = vpop.permute.xlu0 %4261  ;;  %v3502_v50 = vmul.f32 %v11585_v3, %v11465_v45 }
 0xa15   :  { %11580 = vst [vmem:[#allocation252_spill] sm:$0xff] %v10123_v20  ;;  %v11600_v20 = vld [vmem:[#allocation131_spill] sm:$0xff] }
 0xa16   :  { %v4222_v43 = vadd.f32 %v4188_v60, %v3502_v50 }
 0xa17   :  { %v10125_v27 = vpop.permute.xlu1 %3627 }
 0xa18   :  { %11581 = vst [vmem:[#allocation191_spill] sm:$0xff] %v10125_v27  ;;  %4347 = vrot.lane.b32.xlu1 %v3902_v1, %s6385_s16  ;;  %v10130_v26 = vpop.permute.xlu0 %4341  ;;  %v11589_v1 = vld [vmem:[#allocation17_spill] sm:$0xff] }
 0xa19   :  { %11583 = vst [vmem:[#allocation262_spill] sm:$0xff] %v10130_v26  ;;  %v3504_v27 = vmul.f32 %v11590_v58, %v11589_v1  ;;  %v11597_v58 = vld [vmem:[#allocation165_spill] sm:$0xff] }
 0xa1a   :  { %v11598_v1 = vld [vmem:[#allocation161_spill] sm:$0xff] }
 0xa1b   :  { %v3788_v7 = vpop.permute.xlu1 %3787  ;;  %v4224_v31 = vadd.f32 %v4192_v62, %v3504_v27 }
 0xa1c   :  { %v10136_v52 = vadd.f32 %v3788_v7, %v2702_v12  ;;  %4427 = vrot.lane.b32.xlu1 %v4062_v25, %s6385_s16  ;;  %v10139_v13 = vpop.permute.xlu0 %4421  ;;  %v11594_v12 = vld [vmem:[#allocation136_spill] sm:$0xff]  ;;  %v11595_v25 = vld [vmem:[#allocation147_spill] sm:$0xff] }
 0xa1d   :  { %11587 = vst [vmem:[#allocation225_spill] sm:$0xff] %v10139_v13  ;;  %v2372_v60 = vmul.f32 %v11594_v12, %v8968_v61  ;;  %v2692_v3 = vmul.f32 %v11595_v25, %v8977_v63  ;;  %v11601_v61 = vld [vmem:[#allocation149_spill] sm:$0xff]  ;;  %v11603_v25 = vld [vmem:[#allocation167_spill] sm:$0xff] }
 0xa1e   :  { %11586 = vst [vmem:[#allocation193_spill] sm:$0xff] %v10136_v52  ;;  %v3332_v12 = vmul.f32 %v11601_v61, %v9002_v2  ;;  %v11608_v2 = vld [vmem:[#allocation137_spill] sm:$0xff] }
 0xa1f   :  { %v10141_v37 = vpop.permute.xlu1 %3947 }
 0xa20   :  { %11588 = vst [vmem:[#allocation264_spill] sm:$0xff] %v10141_v37  ;;  %4507 = vrot.lane.b32.xlu1 %v4222_v43, %s6385_s16  ;;  %v10146_v51 = vpop.permute.xlu0 %4501  ;;  %v3652_v43 = vadd.f32 %v11597_v58, %v2372_v60  ;;  %v3812_v37 = vadd.f32 %v11598_v1, %v2692_v3  ;;  %v11604_v60 = vld [vmem:[#allocation53_spill] sm:$0xff] }
 0xa21   :  { %11591 = vst [vmem:[#allocation157_spill] sm:$0xff] %v10146_v51  ;;  %v4132_v58 = vadd.f32 %v11604_v60, %v3332_v12 }
 0xa23   :  { %v10148_v28 = vpop.permute.xlu1 %4107 }
 0xa24   :  { %11592 = vst [vmem:[#allocation266_spill] sm:$0xff] %v10148_v28  ;;  %4511 = vrot.lane.b32.xlu1 %v4224_v31, %s6385_s16  ;;  %v10151_v7 = vpop.permute.xlu0 %4257 }
 0xa25   :  { %11593 = vst [vmem:[#allocation199_spill] sm:$0xff] %v10151_v7  ;;  %v3012_v7 = vmul.f32 %v11600_v20, %v8990_v17  ;;  %v11607_v20 = vld [vmem:[#allocation135_spill] sm:$0xff] }
 0xa27   :  { %v4248_v18 = vpop.permute.xlu1 %4247  ;;  %v3972_v13 = vadd.f32 %v11603_v25, %v3012_v7 }
 0xa28   :  { %v10157_v50 = vpop.permute.xlu0 %4337  ;;  %v4292_v27 = vadd.f32 %v4248_v18, %v3652_v43  ;;  %v11605_v43 = vld [vmem:[#allocation213_spill] sm:$0xff] }
 0xa29   :  { %11596 = vst [vmem:[#allocation267_spill] sm:$0xff] %v10157_v50 }
 0xa2b   :  { %v4328_v62 = vpop.permute.xlu1 %4327 }
 0xa2c   :  { %v4372_v28 = vadd.f32 %v4328_v62, %v3812_v37  ;;  %v10161_v45 = vpop.permute.xlu0 %4417  ;;  %v11606_v62 = vld [vmem:[#allocation217_spill] sm:$0xff] }
 0xa2d   :  { %11599 = vst [vmem:[#allocation228_spill] sm:$0xff] %v10161_v45 }
 0xa2e   :  { %v4548_v31 = vadd.f32 %v4372_v28, %v4292_v27  ;;  %v2383_v28 = vmul.f32 %v11605_v43, %v11510_v40  ;;  %v2703_v27 = vmul.f32 %v11606_v62, %v11516_v39  ;;  %v11609_v40 = vld [vmem:[#allocation168_spill] sm:$0xff]  ;;  %v11610_v39 = vld [vmem:[#allocation139_spill] sm:$0xff] }
 0xa2f   :  { %v4408_v52 = vpop.permute.xlu1 %4407 }
 0xa30   :  { %v10167_v63 = vpop.permute.xlu0 %4497  ;;  %v4452_v3 = vadd.f32 %v4408_v52, %v3972_v13  ;;  %v3663_v50 = vadd.f32 %v11607_v20, %v2383_v28  ;;  %v3823_v61 = vadd.f32 %v11608_v2, %v2703_v27 }
 0xa31   :  { %11602 = vst [vmem:[#allocation153_spill] sm:$0xff] %v10167_v63 }
 0xa33   :  { %v4488_v1 = vpop.permute.xlu1 %4487 }
 0xa34   :  { %v4532_v18 = vadd.f32 %v4488_v1, %v4132_v58  ;;  %v4270_v37 = vpop.permute.xlu0 %4269  ;;  %v2690_v1 = vmul.f32 %v11609_v40, %v11342_v24  ;;  %v11616_v24 = vld [vmem:[#allocation174_spill] sm:$0xff] }
 0xa35   :  { %v4303_v25 = vadd.f32 %v4270_v37, %v3663_v50  ;;  %v11613_v50 = vld [vmem:[#allocation32_spill] sm:$0xff] }
 0xa36   :  { %v4564_v17 = vadd.f32 %v4532_v18, %v4452_v3  ;;  %v3010_v3 = vmul.f32 %v11610_v39, %v11345_v44  ;;  %v11611_v18 = vld [vmem:[#allocation151_spill] sm:$0xff]  ;;  %v3810_v37 = vadd.f32 %v11613_v50, %v2690_v1  ;;  %v11620_v39 = vld [vmem:[#allocation200_spill] sm:$0xff] }
 0xa37   :  { %v4244_v45 = vpop.permute.xlu1 %4243  ;;  %v2370_v28 = vmul.f32 %v11611_v18, %v11339_v30  ;;  %v11618_v44 = vld [vmem:[#allocation115_spill] sm:$0xff] }
 0xa38   :  { %v4580_v51 = vadd.f32 %v4564_v17, %v4548_v31  ;;  %v4350_v7 = vpop.permute.xlu0 %4349  ;;  %v11612_v31 = vld [vmem:[#allocation170_spill] sm:$0xff]  ;;  %v11615_v17 = vld [vmem:[#allocation223_spill] sm:$0xff] }
 0xa39   :  { %v4383_v12 = vadd.f32 %v4350_v7, %v3823_v61  ;;  %v3330_v62 = vmul.f32 %v11612_v31, %v11513_v32  ;;  %v2701_v20 = vmul.f32 %v11615_v17, %v11529_v8  ;;  %v3650_v2 = vadd.f32 %v11616_v24, %v2370_v28  ;;  %v11617_v61 = vld [vmem:[#allocation172_spill] sm:$0xff]  ;;  %v11619_v30 = vld [vmem:[#allocation119_spill] sm:$0xff] }
 0xa3a   :  { %v4594_v52 = vpack.c.bf16 %v4580_v51, %v9883_v9  ;;  %v11614_v9 = vld [vmem:[#allocation218_spill] sm:$0xff]  ;;  %v3970_v7 = vadd.f32 %v11617_v61, %v3010_v3 }
 0xa3b   :  { %v4559_v13 = vadd.f32 %v4383_v12, %v4303_v25  ;;  %v4324_v60 = vpop.permute.xlu1 %4323  ;;  %v2381_v51 = vmul.f32 %v11614_v9, %v11525_v46  ;;  %v4130_v25 = vadd.f32 %v11618_v44, %v3330_v62  ;;  %v3821_v32 = vadd.f32 %v11620_v39, %v2701_v20 }
 0xa3c   :  { %v4430_v58 = vpop.permute.xlu0 %4429  ;;  %v4370_v12 = vadd.f32 %v4324_v60, %v3810_v37  ;;  %v4290_v1 = vadd.f32 %v4244_v45, %v3650_v2  ;;  %v11621_v60 = vld [vmem:[#allocation114_spill] sm:$0xff]  ;;  %v11622_v37 = vld [vmem:[#allocation141_spill] sm:$0xff]  ;;  %v11624_v2 = vld [vmem:[#allocation123_spill] sm:$0xff] }
 0xa3d   :  { %v3661_v40 = vadd.f32 %v11619_v30, %v2381_v51  ;;  %v3021_v62 = vmul.f32 %v11621_v60, %v11533_v57  ;;  %v3341_v51 = vmul.f32 %v11622_v37, %v11537_v4  ;;  %v11626_v57 = vld [vmem:[#allocation176_spill] sm:$0xff]  ;;  %v11633_v37 = vld [vmem:[#allocation150_spill] sm:$0xff] }
 0xa3e   :  { %v4546_v63 = vadd.f32 %v4370_v12, %v4290_v1 }
 0xa3f   :  { %v4404_v43 = vpop.permute.xlu1 %4403 }
 0xa40   :  { %v4266_v27 = vpop.permute.xlu0 %4265  ;;  %v4450_v31 = vadd.f32 %v4404_v43, %v3970_v7  ;;  %v11623_v43 = vld [vmem:[#allocation127_spill] sm:$0xff] }
 0xa41   :  { %v4301_v46 = vadd.f32 %v4266_v27, %v3661_v40  ;;  %v3981_v20 = vadd.f32 %v11623_v43, %v3021_v62  ;;  %v4141_v27 = vadd.f32 %v11624_v2, %v3341_v51  ;;  %v11625_v7 = vld [vmem:[#allocation275_spill] sm:$0xff]  ;;  %v11632_v62 = vld [vmem:[#allocation49_spill] sm:$0xff]  ;;  %v11638_v2 = vld [vmem:[#allocation220_spill] sm:$0xff] }
 0xa42   :  { %v3343_v44 = vmul.f32 %v11625_v7, %v11541_v22  ;;  %v2373_v51 = vmul.f32 %v11633_v37, %v11632_v62  ;;  %v11636_v43 = vld [vmem:[#allocation171_spill] sm:$0xff]  ;;  %v11640_v7 = vld [vmem:[#allocation221_spill] sm:$0xff]  ;;  %v11650_v62 = vld [vmem:[#allocation224_spill] sm:$0xff] }
 0xa43   :  { %v4484_v18 = vpop.permute.xlu1 %4483  ;;  %v2694_v37 = vmul.f32 %v11650_v62, %v11377_v34  ;;  %v11660_v34 = vld [vmem:[#allocation120_spill] sm:$0xff]  ;;  %v11662_v62 = vld [vmem:[#allocation181_spill] sm:$0xff] }
 0xa44   :  { %v4530_v50 = vadd.f32 %v4484_v18, %v4130_v25  ;;  %v4346_v26 = vpop.permute.xlu0 %4345  ;;  %v4143_v12 = vadd.f32 %v11626_v57, %v3343_v44  ;;  %v11641_v44 = vld [vmem:[#allocation185_spill] sm:$0xff] }
 0xa45   :  { %v4381_v9 = vadd.f32 %v4346_v26, %v3821_v32  ;;  %v11643_v57 = vld [vmem:[#allocation201_spill] sm:$0xff] }
 0xa46   :  { %v4562_v8 = vadd.f32 %v4530_v50, %v4450_v31 }
 0xa47   :  { %v4557_v17 = vadd.f32 %v4381_v9, %v4301_v46  ;;  %v10196_v28 = vpop.permute.xlu1 %4255  ;;  %v11628_v46 = vld [vmem:[#allocation56_spill] sm:$0xff] }
 0xa48   :  { %v4578_v3 = vadd.f32 %v4562_v8, %v4546_v63  ;;  %v4426_v24 = vpop.permute.xlu0 %4425  ;;  %v11629_v9 = vld [vmem:[#allocation140_spill] sm:$0xff] }
 0xa49   :  { %v4461_v63 = vadd.f32 %v4426_v24, %v3981_v20  ;;  %v2375_v8 = vmul.f32 %v11629_v9, %v11628_v46  ;;  %v11631_v24 = vld [vmem:[#allocation148_spill] sm:$0xff]  ;;  %v11637_v20 = vld [vmem:[#allocation177_spill] sm:$0xff] }
 0xa4a   :  { %v4593_v45 = vpack.c.bf16 %v4578_v3, %v9931_v29  ;;  %v11627_v29 = vld [vmem:[#allocation162_spill] sm:$0xff]  ;;  %v11630_v3 = vld [vmem:[#allocation57_spill] sm:$0xff] }
 0xa4b   :  { %v4336_v26 = vpop.permute.xlu1 %4335  ;;  %v4463_v39 = vadd.f32 %v4430_v58, %v11627_v29  ;;  %v2695_v60 = vmul.f32 %v11631_v24, %v11630_v3  ;;  %v11635_v58 = vld [vmem:[#allocation159_spill] sm:$0xff] }
 0xa4c   :  { %v4506_v61 = vpop.permute.xlu0 %4505  ;;  %5798 = vmatprep.subr.bf16.mxu0 %v4593_v45  ;;  %v11649_v3 = vld [vmem:[#allocation215_spill] sm:$0xff] }
 0xa4d   :  { %v4541_v25 = vadd.f32 %v4506_v61, %v4141_v27  ;;  %5799 = vmatpush3.bf16.msra.mxu0 %v4593_v45  ;;  %v11634_v45 = vld [vmem:[#allocation51_spill] sm:$0xff]  ;;  %v2374_v24 = vmul.f32 %v11649_v3, %v11535_v38  ;;  %v11661_v3 = vld [vmem:[#allocation113_spill] sm:$0xff] }
 0xa4e   :  { %5800 = vmatprep.subr.bf16.mxu0 %v4594_v52  ;;  %v11639_v27 = vld [vmem:[#allocation183_spill] sm:$0xff] }
 0xa4f   :  { %v4573_v30 = vadd.f32 %v4541_v25, %v4461_v63  ;;  %v4416_v4 = vpop.permute.xlu1 %4415  ;;  %v3015_v61 = vmul.f32 %v11639_v27, %v11638_v2  ;;  %v3335_v63 = vmul.f32 %v11641_v44, %v11640_v7  ;;  %v11642_v25 = vld [vmem:[#allocation27_spill] sm:$0xff]  ;;  %v11653_v2 = vld [vmem:[#allocation256_spill] sm:$0xff]  ;;  %v11654_v27 = vld [vmem:[#allocation21_spill] sm:$0xff] }
 0xa50   :  { %v4510_v40 = vpop.permute.xlu0 %4509 }
 0xa51   :  { %v10209_v32 = vadd.f32 %v4573_v30, %v4557_v17  ;;  %v4543_v18 = vadd.f32 %v4510_v40, %v4143_v12  ;;  %5801 = vmatpush3.bf16.msra.mxu0 %v4594_v52  ;;  %v2693_v17 = vmul.f32 %v11635_v58, %v11634_v45  ;;  %v3016_v52 = vmul.f32 %v11636_v43, %v11527_v16  ;;  %v11644_v30 = vld [vmem:[#allocation25_spill] sm:$0xff]  ;;  %v11645_v40 = vld [vmem:[#allocation203_spill] sm:$0xff]  ;;  %v11647_v16 = vld [vmem:[#allocation40_spill] sm:$0xff] }
 0xa52   :  { %v3013_v12 = vmul.f32 %v11643_v57, %v11642_v25  ;;  %v3333_v29 = vmul.f32 %v11645_v40, %v11644_v30  ;;  %v11651_v45 = vld [vmem:[#allocation226_spill] sm:$0xff]  ;;  %v3975_v7 = vadd.f32 %v11654_v27, %v3015_v61  ;;  %v11656_v25 = vld [vmem:[#allocation272_spill] sm:$0xff] }
 0xa53   :  { %v4575_v1 = vadd.f32 %v4543_v18, %v4463_v39  ;;  %v4496_v31 = vpop.permute.xlu1 %4495  ;;  %v11646_v39 = vld [vmem:[#allocation205_spill] sm:$0xff]  ;;  %v3334_v58 = vmul.f32 %v11651_v45, %v11547_v55  ;;  %v11652_v43 = vld [vmem:[#allocation254_spill] sm:$0xff]  ;;  %v11657_v57 = vld [vmem:[#allocation268_spill] sm:$0xff] }
 0xa54   :  { %v2376_v18 = vmul.f32 %v11646_v39, %v11362_v56  ;;  %v3815_v56 = vadd.f32 %v11653_v2, %v2695_v60  ;;  %v3653_v30 = vadd.f32 %v11657_v57, %v2373_v51  ;;  %v11658_v40 = vld [vmem:[#allocation270_spill] sm:$0xff]  ;;  %v11659_v39 = vld [vmem:[#allocation271_spill] sm:$0xff] }
 0xa55   :  { %v10211_v50 = vadd.f32 %v4575_v1, %v4559_v13  ;;  %v3014_v13 = vmul.f32 %v11637_v20, %v11380_v6  ;;  %v2696_v1 = vmul.f32 %v11647_v16, %v11366_v48  ;;  %v11648_v6 = vld [vmem:[#allocation214_spill] sm:$0xff]  ;;  %v3655_v20 = vadd.f32 %v11652_v43, %v2375_v8  ;;  %v11655_v48 = vld [vmem:[#allocation260_spill] sm:$0xff] }
 0xa56   :  { %v3336_v46 = vmul.f32 %v11648_v6, %v11531_v35  ;;  %v4135_v44 = vadd.f32 %v11655_v48, %v3335_v63  ;;  %v4133_v35 = vadd.f32 %v11656_v25, %v3333_v29  ;;  %v3813_v38 = vadd.f32 %v11658_v40, %v2693_v17  ;;  %v11663_v45 = vld [vmem:[#allocation118_spill] sm:$0xff]  ;;  %v11664_v63 = vld [vmem:[#allocation204_spill] sm:$0xff] }
 0xa57   :  { %v4252_v22 = vpop.permute.xlu1 %4251  ;;  %v3973_v16 = vadd.f32 %v11659_v39, %v3013_v12  ;;  %v3656_v55 = vadd.f32 %v11661_v3, %v2376_v18  ;;  %v3816_v8 = vadd.f32 %v11662_v62, %v2696_v1  ;;  %v3976_v60 = vadd.f32 %v11663_v45, %v3016_v52  ;;  %v11667_v39 = vld [vmem:[#allocation189_spill] sm:$0xff]  ;;  %v11669_v3 = vld [vmem:[#allocation198_spill] sm:$0xff]  ;;  %v11670_v62 = vld [vmem:[#allocation208_spill] sm:$0xff] }
 0xa58   :  { %v4136_v6 = vadd.f32 %v11660_v34, %v3336_v46  ;;  %v4533_v61 = vadd.f32 %v10117_v41, %v4133_v35  ;;  %v3654_v2 = vadd.f32 %v11664_v63, %v2374_v24  ;;  %v3814_v29 = vadd.f32 %v9855_v15, %v2694_v37  ;;  %v11668_v34 = vld [vmem:[#allocation190_spill] sm:$0xff]  ;;  %v11671_v45 = vld [vmem:[#allocation45_spill] sm:$0xff]  ;;  %v11673_v63 = vld [vmem:[#allocation7_spill] sm:$0xff] }
 0xa59   :  { %v3974_v51 = vadd.f32 %v9860_v59, %v3014_v13  ;;  %v4134_v12 = vadd.f32 %v9871_v49, %v3334_v58  ;;  %v4375_v46 = vadd.f32 %v10063_v53, %v3815_v56  ;;  %v4535_v18 = vadd.f32 %v10081_v54, %v4135_v44 }
 0xa5a   :  { %v4536_v17 = vadd.f32 %v4496_v31, %v4136_v6  ;;  %v4453_v1 = vadd.f32 %v10110_v19, %v3973_v16  ;;  %v4373_v52 = vadd.f32 %v10104_v21, %v3813_v38  ;;  %v4376_v27 = vadd.f32 %v4336_v26, %v3816_v8  ;;  %v11666_v38 = vld [vmem:[#allocation71_spill] sm:$0xff] }
 0xa5b   :  { %v4332_v9 = vpop.permute.xlu1 %4331  ;;  %v4456_v41 = vadd.f32 %v4416_v4, %v3976_v60  ;;  %v4455_v24 = vadd.f32 %v10071_v11, %v3975_v7  ;;  %v4293_v15 = vadd.f32 %v10093_v5, %v3653_v30  ;;  %v4296_v59 = vadd.f32 %v10196_v28, %v3656_v55  ;;  %v11665_v30 = vld [vmem:[#allocation179_spill] sm:$0xff] }
 0xa5c   :  { %v4374_v48 = vadd.f32 %v4332_v9, %v3814_v29  ;;  %v4565_v37 = vadd.f32 %v4533_v61, %v4453_v1  ;;  %v4294_v13 = vadd.f32 %v4252_v22, %v3654_v2  ;;  %v4295_v54 = vadd.f32 %v10055_v42, %v3655_v20  ;;  %v11672_v61 = vld [vmem:[#allocation197_spill] sm:$0xff] }
 0xa5d   :  { %v4568_v49 = vadd.f32 %v4536_v17, %v4456_v41  ;;  %v4567_v19 = vadd.f32 %v4535_v18, %v4455_v24  ;;  %v4549_v56 = vadd.f32 %v4373_v52, %v4293_v15  ;;  %v4552_v21 = vadd.f32 %v4376_v27, %v4296_v59  ;;  %v11675_v29 = vld [vmem:[#allocation37_spill] sm:$0xff]  ;;  %v11679_v18 = vld [vmem:[#allocation72_spill] sm:$0xff]  ;;  %v11686_v15 = vld [vmem:[#allocation250_spill] sm:$0xff] }
 0xa5e   :  { %v4550_v26 = vadd.f32 %v4374_v48, %v4294_v13  ;;  %v4551_v44 = vadd.f32 %v4375_v46, %v4295_v54  ;;  %v2379_v40 = vmul.f32 %v11665_v30, %v11247_v36  ;;  %v2699_v16 = vmul.f32 %v11667_v39, %v11666_v38  ;;  %v11674_v36 = vld [vmem:[#allocation232_spill] sm:$0xff]  ;;  %v11681_v52 = vld [vmem:[#allocation73_spill] sm:$0xff]  ;;  %v11698_v38 = vld [vmem:[#allocation143_spill] sm:$0xff] }
 0xa5f   :  { %v4412_v43 = vpop.permute.xlu1 %4411  ;;  %v4581_v11 = vadd.f32 %v4565_v37, %v4549_v56  ;;  %v4584_v7 = vadd.f32 %v4568_v49, %v4552_v21  ;;  %v2377_v6 = vmul.f32 %v11668_v34, %v11261_v0  ;;  %v2697_v55 = vmul.f32 %v11669_v3, %v11497_v14  ;;  %v11678_v0 = vld [vmem:[#allocation22_spill] sm:$0xff]  ;;  %v11680_v14 = vld [vmem:[#allocation237_spill] sm:$0xff]  ;;  %v11687_v59 = vld [vmem:[#allocation276_spill] sm:$0xff] }
 0xa60   :  { %v4454_v53 = vadd.f32 %v4412_v43, %v3974_v51  ;;  %v4583_v25 = vadd.f32 %v4567_v19, %v4551_v44  ;;  %v3020_v8 = vmul.f32 %v11670_v62, %v11555_v10  ;;  %v3018_v60 = vmul.f32 %v11671_v45, %v11566_v23  ;;  %v11676_v51 = vld [vmem:[#allocation194_spill] sm:$0xff]  ;;  %v11683_v41 = vld [vmem:[#allocation9_spill] sm:$0xff]  ;;  %v11684_v23 = vld [vmem:[#allocation248_spill] sm:$0xff] }
 0xa61   :  { %v3019_v43 = vmul.f32 %v11672_v61, %v11482_v33  ;;  %v3339_v2 = vmul.f32 %v11674_v36, %v11673_v63  ;;  %v3017_v17 = vmul.f32 %v11676_v51, %v11675_v29  ;;  %v2380_v1 = vmul.f32 %v11680_v14, %v11679_v18  ;;  %v11682_v10 = vld [vmem:[#allocation246_spill] sm:$0xff]  ;;  %v11685_v33 = vld [vmem:[#allocation65_spill] sm:$0xff]  ;;  %v11690_v54 = vld [vmem:[#allocation280_spill] sm:$0xff] }
 0xa62   :  { %v4596_v57 = vpack.c.bf16 %v4584_v7, %v4583_v25  ;;  %v2700_v27 = vmul.f32 %v11682_v10, %v11681_v52  ;;  %v3340_v48 = vmul.f32 %v11684_v23, %v11683_v41  ;;  %v2378_v37 = vmul.f32 %v11686_v15, %v11685_v33  ;;  %v11688_v49 = vld [vmem:[#allocation277_spill] sm:$0xff]  ;;  %v11691_v56 = vld [vmem:[#allocation67_spill] sm:$0xff]  ;;  %v11701_v45 = vld [vmem:[#allocation212_spill] sm:$0xff] }
 0xa63   :  { %v4492_v31 = vpop.permute.xlu1 %4491  ;;  %v3819_v13 = vadd.f32 %v11688_v49, %v2699_v16  ;;  %v4139_v19 = vadd.f32 %v11690_v54, %v3339_v2  ;;  %v11692_v21 = vld [vmem:[#allocation263_spill] sm:$0xff]  ;;  %v11697_v30 = vld [vmem:[#allocation145_spill] sm:$0xff]  ;;  %v11699_v16 = vld [vmem:[#allocation210_spill] sm:$0xff]  ;;  %v3980_v61 = vadd.f32 %v11701_v45, %v3020_v8 }
 0xa64   :  { %v4534_v58 = vadd.f32 %v4492_v31, %v4134_v12  ;;  %v11677_v12 = vld [vmem:[#allocation35_spill] sm:$0xff]  ;;  %v3659_v31 = vadd.f32 %v11687_v59, %v2379_v40  ;;  %v3977_v40 = vadd.f32 %v11697_v30, %v3017_v17  ;;  %v4140_v39 = vadd.f32 %v11698_v38, %v3340_v48  ;;  %v11700_v3 = vld [vmem:[#allocation253_spill] sm:$0xff]  ;;  %v11704_v29 = vld [vmem:[#allocation178_spill] sm:$0xff] }
 0xa65   :  { %v3337_v46 = vmul.f32 %v11678_v0, %v11677_v12  ;;  %v3660_v34 = vadd.f32 %v11699_v16, %v2380_v1  ;;  %v3820_v62 = vadd.f32 %v11700_v3, %v2700_v27  ;;  %v11706_v0 = vld [vmem:[#allocation249_spill] sm:$0xff]  ;;  %v11709_v52 = vld [vmem:[#allocation228_spill] sm:$0xff]  ;;  %v11710_v27 = vld [vmem:[#allocation267_spill] sm:$0xff] }
 0xa66   :  { %v4566_v4 = vadd.f32 %v4534_v58, %v4454_v53  ;;  %v11689_v53 = vld [vmem:[#allocation278_spill] sm:$0xff]  ;;  %v11708_v14 = vld [vmem:[#allocation157_spill] sm:$0xff]  ;;  %v4457_v10 = vadd.f32 %v11709_v52, %v3977_v40  ;;  %v11726_v52 = vld [vmem:[#allocation264_spill] sm:$0xff] }
 0xa67   :  { %v4264_v9 = vpop.permute.xlu1 %4263  ;;  %v3979_v58 = vadd.f32 %v11689_v53, %v3019_v43  ;;  %v11702_v43 = vld [vmem:[#allocation153_spill] sm:$0xff]  ;;  %v4539_v1 = vadd.f32 %v11708_v14, %v4139_v19 }
 0xa68   :  { %v4582_v5 = vadd.f32 %v4566_v4, %v4550_v26  ;;  %v2698_v26 = vmul.f32 %v11692_v21, %v11691_v56  ;;  %v11693_v4 = vld [vmem:[#allocation265_spill] sm:$0xff]  ;;  %v11713_v21 = vld [vmem:[#allocation252_spill] sm:$0xff] }
 0xa69   :  { %v3338_v44 = vmul.f32 %v11693_v4, %v11570_v47  ;;  %v11703_v47 = vld [vmem:[#allocation257_spill] sm:$0xff]  ;;  %v4299_v19 = vadd.f32 %v11713_v21, %v3659_v31 }
 0xa6a   :  { %v4595_v35 = vpack.c.bf16 %v4582_v5, %v4581_v11  ;;  %v11694_v11 = vld [vmem:[#allocation42_spill] sm:$0xff]  ;;  %v11695_v5 = vld [vmem:[#allocation125_spill] sm:$0xff]  ;;  %v3658_v2 = vadd.f32 %v11703_v47, %v2378_v37  ;;  %v3818_v51 = vadd.f32 %v11704_v29, %v2698_v26  ;;  %v11712_v37 = vld [vmem:[#allocation199_spill] sm:$0xff] }
 0xa6b   :  { %v4344_v28 = vpop.permute.xlu1 %4343  ;;  %v4137_v7 = vadd.f32 %v11694_v11, %v3337_v46  ;;  %v3657_v25 = vadd.f32 %v11695_v5, %v2377_v6  ;;  %v11705_v6 = vld [vmem:[#allocation258_spill] sm:$0xff]  ;;  %v4138_v17 = vadd.f32 %v11706_v0, %v3338_v44  ;;  %v11711_v33 = vld [vmem:[#allocation225_spill] sm:$0xff]  ;;  %v11722_v0 = vld [vmem:[#allocation12_spill] sm:$0xff] }
 0xa6c   :  { %5802 = vmatprep.subr.bf16.mxu0 %v4595_v35  ;;  %v3978_v12 = vadd.f32 %v11705_v6, %v3018_v60  ;;  %v11707_v46 = vld [vmem:[#allocation262_spill] sm:$0xff]  ;;  %v4380_v41 = vadd.f32 %v4344_v28, %v3820_v62  ;;  %v4459_v15 = vadd.f32 %v11711_v33, %v3979_v58  ;;  %v4300_v60 = vadd.f32 %v4264_v9, %v3660_v34  ;;  %v11717_v31 = vld [vmem:[#allocation41_spill] sm:$0xff] }
 0xa6d   :  { %5803 = vmatpush3.bf16.msra.mxu0 %v4595_v35  ;;  %v11696_v35 = vld [vmem:[#allocation281_spill] sm:$0xff]  ;;  %v4537_v63 = vadd.f32 %v11702_v43, %v4137_v7  ;;  %v4379_v18 = vadd.f32 %v11707_v46, %v3819_v13  ;;  %v4297_v59 = vadd.f32 %v11712_v37, %v3657_v25  ;;  %v11719_v43 = vld [vmem:[#allocation58_spill] sm:$0xff] }
 0xa6e   :  { %5804 = vmatprep.subr.bf16.mxu0 %v4596_v57  ;;  %v4571_v26 = vadd.f32 %v4539_v1, %v4459_v15  ;;  %v4556_v44 = vadd.f32 %v4380_v41, %v4300_v60  ;;  %v11725_v14 = vld [vmem:[#allocation209_spill] sm:$0xff] }
 0xa6f   :  { %v4424_v22 = vpop.permute.xlu1 %4423  ;;  %v4569_v49 = vadd.f32 %v4537_v63, %v4457_v10  ;;  %v4555_v5 = vadd.f32 %v4379_v18, %v4299_v19  ;;  %v11724_v18 = vld [vmem:[#allocation13_spill] sm:$0xff] }
 0xa70   :  { %v4460_v23 = vadd.f32 %v4424_v22, %v3980_v61  ;;  %v11714_v22 = vld [vmem:[#allocation84_spill] sm:$0xff]  ;;  %v11718_v61 = vld [vmem:[#allocation78_spill] sm:$0xff]  ;;  %v3342_v1 = vmul.f32 %v11725_v14, %v11724_v18  ;;  %v11730_v15 = vld [vmem:[#allocation17_spill] sm:$0xff] }
 0xa71   :  { %5805 = vmatpush3.bf16.msra.mxu0 %v4596_v57  ;;  %v3817_v57 = vadd.f32 %v11696_v35, %v2697_v55  ;;  %v2382_v63 = vmul.f32 %v11719_v43, %v11718_v61  ;;  %v11731_v37 = vld [vmem:[#allocation173_spill] sm:$0xff]  ;;  %v11748_v61 = vld [vmem:[#allocation54_spill] sm:$0xff] }
 0xa73   :  { %v4504_v42 = vpop.permute.xlu1 %4503  ;;  %v4377_v8 = vadd.f32 %v11710_v27, %v3817_v57  ;;  %v11716_v57 = vld [vmem:[#allocation180_spill] sm:$0xff]  ;;  %v11727_v27 = vld [vmem:[#allocation266_spill] sm:$0xff] }
 0xa74   :  { %v4540_v55 = vadd.f32 %v4504_v42, %v4140_v39 }
 0xa75   :  { %v4553_v4 = vadd.f32 %v4377_v8, %v4297_v59  ;;  %v4142_v8 = vadd.f32 %v11727_v27, %v3342_v1  ;;  %v3344_v59 = vmul.f32 %v11731_v37, %v11730_v15 }
 0xa76   :  { %v4572_v53 = vadd.f32 %v4540_v55, %v4460_v23  ;;  %v11728_v23 = vld [vmem:[#allocation16_spill] sm:$0xff] }
 0xa77   :  { %v4260_v20 = vpop.permute.xlu1 %4259  ;;  %v4585_v25 = vadd.f32 %v4569_v49, %v4553_v4 }
 0xa78   :  { %v4298_v54 = vadd.f32 %v4260_v20, %v3658_v2  ;;  %v4588_v35 = vadd.f32 %v4572_v53, %v4556_v44  ;;  %v4587_v20 = vadd.f32 %v4571_v26, %v4555_v5 }
 0xa7a   :  { %v4598_v34 = vpack.c.bf16 %v4588_v35, %v4587_v20 }
 0xa7b   :  { %v4340_v24 = vpop.permute.xlu1 %4339 }
 0xa7c   :  { %v4378_v48 = vadd.f32 %v4340_v24, %v3818_v51  ;;  %v11715_v24 = vld [vmem:[#allocation128_spill] sm:$0xff]  ;;  %v11721_v51 = vld [vmem:[#allocation193_spill] sm:$0xff] }
 0xa7d   :  { %v2384_v7 = vmul.f32 %v11715_v24, %v11714_v22  ;;  %v11734_v24 = vmov 1.0|1.0  }
 0xa7e   :  { %v4554_v11 = vadd.f32 %v4378_v48, %v4298_v54  ;;  %v11729_v48 = vld [vmem:[#allocation231_spill] sm:$0xff]  ;;  %v11733_v54 = vld [vmem:[#allocation146_spill] sm:$0xff] }
 0xa7f   :  { %v4420_v36 = vpop.permute.xlu1 %4419  ;;  %v3664_v30 = vadd.f32 %v11716_v57, %v2384_v7  ;;  %v3024_v33 = vmul.f32 %v11729_v48, %v11728_v23  ;;  %v11735_v7 = vld [vmem:[#allocation89_spill] sm:$0xff]  ;;  %v271_v57 = vld [vmem:[%s11744_s3 + $0x8] sm:$0xff] }
 0xa80   :  { %v4458_v56 = vadd.f32 %v4420_v36, %v3978_v12  ;;  %v11720_v36 = vld [vmem:[#allocation191_spill] sm:$0xff]  ;;  %vm11736_vm7 = vnez %v11735_v7  ;;  %5101 = vperm.xlu1 %6247, %v271_v57   ;;  %v11760_v7 = vld [vmem:[#allocation97_spill] sm:$0xff] }
 0xa81   :  { %v3662_v47 = vadd.f32 %v11720_v36, %v2382_v63  ;;  %v11749_v36 = vld [vmem:[#allocation19_spill] sm:$0xff] }
 0xa83   :  { %v4500_v42 = vpop.permute.xlu1 %4499 }
 0xa84   :  { %v4538_v13 = vadd.f32 %v4500_v42, %v4138_v17  ;;  %v11723_v17 = vld [vmem:[#allocation69_spill] sm:$0xff]  ;;  %v11732_v42 = vld [vmem:[#allocation251_spill] sm:$0xff] }
 0xa85   :  { %v3022_v46 = vmul.f32 %v11723_v17, %v11722_v0  ;;  %v3984_v53 = vadd.f32 %v11732_v42, %v3024_v33  ;;  %v11752_v0 = vld [vmem:[#allocation18_spill] sm:$0xff]  ;;  %v11754_v33 = vld [vmem:[#allocation61_spill] sm:$0xff] }
 0xa86   :  { %v4570_v28 = vadd.f32 %v4538_v13, %v4458_v56  ;;  %v4144_v56 = vadd.f32 %v11733_v54, %v3344_v59  ;;  %v11755_v59 = vld [vmem:[#allocation100_spill] sm:$0xff] }
 0xa87   :  { %v4272_v58 = vpop.permute.xlu1 %4271  ;;  %v3982_v10 = vadd.f32 %v11726_v52, %v3022_v46 }
 0xa88   :  { %v4586_v9 = vadd.f32 %v4570_v28, %v4554_v11  ;;  %v4304_v39 = vadd.f32 %v4272_v58, %v3664_v30  ;;  %v11737_v58 = vld [vmem:[#allocation90_spill] sm:$0xff]  ;;  %v270_v30 = vld [vmem:[%s11744_s3] sm:$0xff] }
 0xa89   :  { %vm11738_vm3 = vnez %v11737_v58  ;;  %5096 = vperm.xlu0 %6246, %v270_v30  }
 0xa8a   :  { %v4597_v40 = vpack.c.bf16 %v4586_v9, %v4585_v25  ;;  %v6386_v9 = vmov 0.0  }
 0xa8b   :  { %v4352_v38 = vpop.permute.xlu1 %4351  ;;  %5858 = vmatprep.subr.bf16.mxu1 %v6386_v9 }
 0xa8c   :  { %v4384_v16 = vadd.f32 %v4352_v38, %v11717_v31  ;;  %5806 = vmatprep.subr.bf16.mxu0 %v4597_v40  ;;  %v10385_v31 = vld [vmem:[%s10621_s18] ss:$0 sm:$0xff] }
 0xa8d   :  { %5807 = vmatpush3.bf16.msra.mxu0 %v4597_v40  ;;  %v11745_v40 = vld [vmem:[#allocation55_spill] sm:$0xff] }
 0xa8e   :  { %v4560_v3 = vadd.f32 %v4384_v16, %v4304_v39  ;;  %5808 = vmatprep.subr.bf16.mxu0 %v4598_v34  ;;  %v11746_v16 = vld [vmem:[#allocation50_spill] sm:$0xff] }
 0xa8f   :  { %v4432_v62 = vpop.permute.xlu1 %4431 }
 0xa90   :  { %v4464_v19 = vadd.f32 %v4432_v62, %v3984_v53  ;;  %v11747_v62 = vld [vmem:[#allocation96_spill] sm:$0xff] }
 0xa91   :  { %5809 = vmatpush3.bf16.msra.mxu0 %v4598_v34 }
 0xa93   :  { %v4268_v45 = vpop.permute.xlu1 %4267 }
 0xa94   :  { %v4302_v29 = vadd.f32 %v4268_v45, %v3662_v47 }
 0xa97   :  { %v4348_v2 = vpop.permute.xlu1 %4347 }
 0xa98   :  { %v4382_v6 = vadd.f32 %v4348_v2, %v11721_v51  ;;  %v11750_v2 = vld [vmem:[#allocation48_spill] sm:$0xff] }
 0xa9a   :  { %v4558_v12 = vadd.f32 %v4382_v6, %v4302_v29  ;;  %v11751_v6 = vld [vmem:[#allocation20_spill] sm:$0xff] }
 0xa9b   :  { %v4428_v55 = vpop.permute.xlu1 %4427 }
 0xa9c   :  { %v4462_v49 = vadd.f32 %v4428_v55, %v3982_v10  ;;  %v11753_v10 = vld [vmem:[#allocation66_spill] sm:$0xff] }
 0xa9f   :  { %v4508_v41 = vpop.permute.xlu1 %4507 }
 0xaa0   :  { %v4542_v60 = vadd.f32 %v4508_v41, %v4142_v8 }
 0xaa2   :  { %v4574_v13 = vadd.f32 %v4542_v60, %v4462_v49  ;;  %v11756_v60 = vld [vmem:[#allocation64_spill] sm:$0xff] }
 0xaa3   :  { %v4512_v21 = vpop.permute.xlu1 %4511 }
 0xaa4   :  { %v4590_v26 = vadd.f32 %v4574_v13, %v4558_v12  ;;  %v4544_v4 = vadd.f32 %v4512_v21, %v4144_v56  ;;  %v11757_v56 = vld [vmem:[#allocation98_spill] sm:$0xff]  ;;  %v11758_v21 = vld [vmem:[#allocation60_spill] sm:$0xff] }
 0xaa6   :  { %v4576_v44 = vadd.f32 %v4544_v4, %v4464_v19  ;;  %v4599_v11 = vpack.c.bf16 %v4590_v26, %v10209_v32 }
 0xaa8   :  { %v4592_v28 = vadd.f32 %v4576_v44, %v4560_v3  ;;  %5810 = vmatprep.subr.bf16.mxu0 %v4599_v11  ;;  %v11759_v44 = vld [vmem:[#allocation99_spill] sm:$0xff] }
 0xaa9   :  { %5811 = vmatpush3.bf16.msra.mxu0 %v4599_v11 }
 0xaaa   :  { %v4600_v22 = vpack.c.bf16 %v4592_v28, %v10211_v50 }
 0xaac   :  { %5812 = vmatprep.subr.bf16.mxu0 %v4600_v22 }
 0xaad   :  { %5813 = vmatpush3.bf16.msra.mxu0 %v4600_v22 }
 0xaae   :  { %5886 = vmatprep.subr.bf16.mxu0 %v6386_v9 }
 0xab0   :  { %5815 = vmatmul.mubr.msk.bf16.vlgmr.msra.gmra.mrb[64].mxu0 %vm11736_vm7, %v11734_v24 }
 0xab1   :  { %5818 = vmatprep.mubr.msk.bf16.mxu0 %vm11738_vm3, %v11734_v24 }
 0xab8   :  { %5819 = vmatmul.mubr.msk.bf16.gmra.mrb[68].mxu0 %vm7743_vm2, %v11734_v24  ;;  %vm6387_vm2 = vmmov 0  }
 0xab9   :  { %5822 = vmatprep.mubr.msk.bf16.mxu0 %vm7747_vm0, %v11734_v24  ;;  %5874 = vmatprep.mubr.msk.bf16.mxu1 %vm6387_vm2, %v6386_v9 }
 0xac0   :  { %5823 = vmatmul.mubr.msk.bf16.gmra.mrb[72].mxu0 %vm7765_vm8, %v11734_v24 }
 0xac1   :  { %5826 = vmatprep.mubr.msk.bf16.mxu0 %vm7769_vm6, %v11734_v24 }
 0xac8   :  { %5827 = vmatmul.mubr.msk.bf16.gmra.mrb[76].mxu0 %vm7783_vm15, %v11734_v24 }
 0xac9   :  { %5902 = vmatprep.mubr.msk.bf16.mxu0 %vm6387_vm2, %v6386_v9 }
 0xb83   :  { %v5816_v20 = vpop.f32.mrb[64].mxu0 }
 0xb84   :  { %v4700_v38 = vmul.f32 %v5816_v20, %v11745_v40  ;;  %v4635_v39 = vpop.f32.mrb[65].mxu0  ;;  %v11761_v20 = vld [vmem:[#allocation75_spill] sm:$0xff] }
 0xb85   :  { %v4698_v34 = vmul.f32 %v4635_v39, %v11746_v16  ;;  %v5817_v3 = vpop.f32.mrb[66].mxu0 }
 0xb86   :  { %v4912_v45 = vadd.f32 %v11747_v62, %v4700_v38  ;;  %v4701_v43 = vmul.f32 %v5817_v3, %v11748_v61  ;;  %v4638_v63 = vpop.f32.mrb[67].mxu0  ;;  %v11763_v61 = vld [vmem:[#allocation104_spill] sm:$0xff] }
 0xb87   :  { %v4910_v47 = vadd.f32 %v11749_v36, %v4698_v34  ;;  %v4699_v29 = vmul.f32 %v4638_v63, %v11750_v2  ;;  %v11762_v34 = vld [vmem:[#allocation70_spill] sm:$0xff] }
 0xb88   :  { %v10393_v51 = vadd.f32 %v10385_v31, %v4912_v45  ;;  %v4913_v12 = vadd.f32 %v11751_v6, %v4701_v43  ;;  %v11764_v63 = vld [vmem:[#allocation74_spill] sm:$0xff] }
 0xb89   :  { %v10397_v55 = vadd.f32 %v10385_v31, %v4910_v47  ;;  %v4911_v17 = vadd.f32 %v11752_v0, %v4699_v29  ;;  %v11765_v29 = vld [vmem:[#allocation102_spill] sm:$0xff] }
 0xb8a   :  { %v10401_v46 = vadd.f32 %v10385_v31, %v4913_v12  ;;  %v4967_v52 = vmin.f32 %v10393_v51, 0.0  ;;  %v11766_v12 = vld [vmem:[#allocation68_spill] sm:$0xff]  ;;  %vm4951_vm8 = vcmp.gt.f32.partialorder %v10393_v51, 0.0 }
 0xb8b   :  { %v4965_v18 = vmin.f32 %v10397_v55, 0.0  ;;  %v10405_v14 = vadd.f32 %v10385_v31, %v4911_v17  ;;  %v5820_v1 = vpop.f32.mrb[68].mxu0  ;;  %vm4949_vm0 = vcmp.gt.f32.partialorder %v10397_v55, 0.0 }
 0xb8c   :  { %v4704_v27 = vmul.f32 %v5820_v1, %v11753_v10  ;;  %v4651_v8 = vpop.f32.mrb[69].mxu0  ;;  %v4968_v23 = vmin.f32 %v10401_v46, 0.0  ;;  %v4985_v26 = vmul.f32 1.442695, %v4967_v52  ;;  %vm4952_vm15 = vcmp.gt.f32.partialorder %v10401_v46, 0.0 }
 0xb8d   :  { %v4981_v41 = vmul.f32 1.442695, %v4965_v18  ;;  %v4966_v48 = vmin.f32 %v10405_v14, 0.0  ;;  %v4702_v15 = vmul.f32 %v4651_v8, %v11754_v33  ;;  %v5821_v37 = vpop.f32.mrb[70].mxu0  ;;  %v11767_v18 = vld [vmem:[#allocation103_spill] sm:$0xff]  ;;  %vm4950_vm6 = vcmp.gt.f32.partialorder %v10405_v14, 0.0 }
 0xb8e   :  { %v4916_v49 = vadd.f32 %v11755_v59, %v4704_v27  ;;  %v4705_v42 = vmul.f32 %v5821_v37, %v11756_v60  ;;  %v4654_v53 = vpop.f32.mrb[71].mxu0  ;;  %v4987_v28 = vmul.f32 1.442695, %v4968_v23  ;;  %v11768_v27 = vld [vmem:[#allocation101_spill] sm:$0xff] }
 0xb8f   :  { %6297 = vpow2.f32 %v4981_v41  ;;  %v4983_v54 = vmul.f32 1.442695, %v4966_v48  ;;  %v4914_v13 = vadd.f32 %v11757_v56, %v4702_v15  ;;  %v4703_v19 = vmul.f32 %v4654_v53, %v11758_v21 }
 0xb90   :  { %v10417_v4 = vadd.f32 %v10385_v31, %v4916_v49  ;;  %v4917_v11 = vadd.f32 %v11759_v44, %v4705_v42 }
 0xb91   :  { %6299 = vpow2.f32 %v4983_v54  ;;  %v10421_v22 = vadd.f32 %v10385_v31, %v4914_v13  ;;  %v4915_v58 = vadd.f32 %v11760_v7, %v4703_v19  ;;  %v11769_v13 = vld [vmem:[#allocation86_spill] sm:$0xff]  ;;  %v11771_v7 = vld [vmem:[#allocation85_spill] sm:$0xff] }
 0xb92   :  { %v4971_v5 = vmin.f32 %v10417_v4, 0.0  ;;  %v10426_v32 = vadd.f32 %v10385_v31, %v4917_v11  ;;  %6301 = vpow2.f32 %v4985_v26  ;;  %v11770_v11 = vld [vmem:[#allocation81_spill] sm:$0xff]  ;;  %vm4955_vm5 = vcmp.gt.f32.partialorder %v10417_v4, 0.0 }
 0xb93   :  { %v4969_v50 = vmin.f32 %v10421_v22, 0.0  ;;  %v10430_v25 = vadd.f32 %v10385_v31, %v4915_v58  ;;  %v5824_v35 = vpop.f32.mrb[72].mxu0  ;;  %6303 = vpow2.f32 %v4987_v28  ;;  %vm4953_vm10 = vcmp.gt.f32.partialorder %v10421_v22, 0.0 }
 0xb94   :  { %v4993_v57 = vmul.f32 1.442695, %v4971_v5  ;;  %v4972_v30 = vmin.f32 %v10426_v32, 0.0  ;;  %v4708_v40 = vmul.f32 %v5824_v35, %v11761_v20  ;;  %v4667_v38 = vpop.f32.mrb[73].mxu0  ;;  %v11773_v20 = vld [vmem:[#allocation80_spill] sm:$0xff]  ;;  %vm4956_vm13 = vcmp.gt.f32.partialorder %v10426_v32, 0.0 }
 0xb95   :  { %v4989_v39 = vmul.f32 1.442695, %v4969_v50  ;;  %v4970_v16 = vmin.f32 %v10430_v25, 0.0  ;;  %v4706_v3 = vmul.f32 %v4667_v38, %v11762_v34  ;;  %v5825_v62 = vpop.f32.mrb[74].mxu0  ;;  %v11775_v34 = vld [vmem:[#allocation107_spill] sm:$0xff]  ;;  %vm4954_vm1 = vcmp.gt.f32.partialorder %v10430_v25, 0.0 }
 0xb96   :  { %6305 = vpow2.f32 %v4993_v57  ;;  %v4995_v45 = vmul.f32 1.442695, %v4972_v30  ;;  %v4920_v43 = vadd.f32 %v11763_v61, %v4708_v40  ;;  %v4709_v36 = vmul.f32 %v5825_v62, %v11764_v63  ;;  %v4670_v47 = vpop.f32.mrb[75].mxu0  ;;  %v11772_v57 = vld [vmem:[#allocation108_spill] sm:$0xff]  ;;  %v11776_v61 = vld [vmem:[#allocation105_spill] sm:$0xff] }
 0xb97   :  { %6307 = vpow2.f32 %v4989_v39  ;;  %v4991_v2 = vmul.f32 1.442695, %v4970_v16  ;;  %v4918_v6 = vadd.f32 %v11765_v29, %v4706_v3  ;;  %v4707_v0 = vmul.f32 %v4670_v47, %v11766_v12  ;;  %v11774_v39 = vld [vmem:[#allocation106_spill] sm:$0xff] }
 0xb98   :  { %6309 = vpow2.f32 %v4995_v45  ;;  %v10441_v17 = vadd.f32 %v10385_v31, %v4920_v43  ;;  %v4921_v1 = vadd.f32 %v11767_v18, %v4709_v36 }
 0xb99   :  { %v6298_v52 = vpop.eup %6297  ;;  %6311 = vpow2.f32 %v4991_v2  ;;  %v10445_v10 = vadd.f32 %v10385_v31, %v4918_v6  ;;  %v4919_v8 = vadd.f32 %v11768_v27, %v4707_v0 }
 0xb9a   :  { %v4975_v41 = vmin.f32 %v10441_v17, 0.0  ;;  %v10450_v23 = vadd.f32 %v10385_v31, %v4921_v1  ;;  %v5496_v59 = vadd.f32 -1.0, %v6298_v52  ;;  %vm4959_vm4 = vcmp.gt.f32.partialorder %v10441_v17, 0.0 }
 0xb9b   :  { %v6300_v48 = vpop.eup %6299  ;;  %v4973_v33 = vmin.f32 %v10445_v10, 0.0  ;;  %v10455_v15 = vadd.f32 %v10385_v31, %v4919_v8  ;;  %v5828_v37 = vpop.f32.mrb[76].mxu0  ;;  %vm4957_vm14 = vcmp.gt.f32.partialorder %v10445_v10, 0.0 }
 0xb9c   :  { %v5001_v49 = vmul.f32 1.442695, %v4975_v41  ;;  %v4976_v60 = vmin.f32 %v10450_v23, 0.0  ;;  %v4683_v42 = vpop.f32.mrb[77].mxu0  ;;  %v5497_v53 = vadd.f32 -1.0, %v6300_v48  ;;  %v4712_v21 = vmul.f32 %v5828_v37, %v11769_v13  ;;  %v6302_v26 = vpop.eup %6301 }
 0xb9d   :  { %v4997_v54 = vmul.f32 1.442695, %v4973_v33  ;;  %v4974_v56 = vmin.f32 %v10455_v15, 0.0  ;;  %v5829_v19 = vpop.f32.mrb[78].mxu0  ;;  %v4710_v28 = vmul.f32 %v4683_v42, %v11770_v11  ;;  %v6304_v50 = vpop.eup %6303  ;;  %v5498_v36 = vadd.f32 -1.0, %v6302_v26 }
 0xb9e   :  { %6313 = vpow2.f32 %v5001_v49  ;;  %v5003_v44 = vmul.f32 1.442695, %v4976_v60  ;;  %v4713_v58 = vmul.f32 %v5829_v19, %v11771_v7  ;;  %v4686_v5 = vpop.f32.mrb[79].mxu0  ;;  %v4924_v30 = vadd.f32 %v11772_v57, %v4712_v21 }
 0xb9f   :  { %6315 = vpow2.f32 %v4997_v54  ;;  %v4999_v35 = vmul.f32 1.442695, %v4974_v56  ;;  %v4711_v40 = vmul.f32 %v4686_v5, %v11773_v20  ;;  %v4922_v16 = vadd.f32 %v11774_v39, %v4710_v28 }
 0xba0   :  { %v6306_v38 = vpop.eup %6305  ;;  %6317 = vpow2.f32 %v5003_v44  ;;  %v4925_v3 = vadd.f32 %v11775_v34, %v4713_v58  ;;  %v10474_v45 = vadd.f32 %v10385_v31, %v4924_v30  ;;  %v5499_v47 = vadd.f32 -1.0, %v6304_v50 }
 0xba1   :  { %v6308_v62 = vpop.eup %6307  ;;  %6319 = vpow2.f32 %v4999_v35  ;;  %v4923_v43 = vadd.f32 %v11776_v61, %v4711_v40  ;;  %v10478_v2 = vadd.f32 %v10385_v31, %v4922_v16  ;;  %v5029_v18 = vsel %vm4949_vm0, %v10397_v55, %v5496_v59  ;;  %v5344_v61 = vld [vmem:[%s11777_s30] ss:$0 sm:$0xff] }
 0xba2   :  { %v6310_v63 = vpop.eup %6309  ;;  %v10481_v29 = vadd.f32 %v10385_v31, %v4925_v3  ;;  %v4979_v12 = vmin.f32 %v10474_v45, 0.0  ;;  %v5030_v1 = vsel %vm4950_vm6, %v10405_v14, %v5497_v53  ;;  %v5502_v52 = vadd.f32 -1.0, %v6306_v38 }
 0xba3   :  { %v6312_v6 = vpop.eup %6311  ;;  %v10485_v0 = vadd.f32 %v10385_v31, %v4923_v43  ;;  %v5500_v27 = vadd.f32 -1.0, %v6308_v62  ;;  %v4977_v41 = vmin.f32 %v10478_v2, 0.0  ;;  %v5503_v48 = vadd.f32 -1.0, %v6310_v63  ;;  %v11779_v43 = vld [vmem:[#allocation34_spill] sm:$0xff]  ;;  %v6255_v63 = vld [vmem:[%s10622_s19] sm:$0xff]  }
 0xba4   :  { %v5501_v8 = vadd.f32 -1.0, %v6312_v6  ;;  %v5009_v33 = vmul.f32 1.442695, %v4979_v12  ;;  %v4980_v37 = vmin.f32 %v10481_v29, 0.0  ;;  %v5045_v60 = vpack.c.bf16 %v5030_v1, %v5029_v18  ;;  %v5097_v6 = vpop.permute.xlu0 %5096 }
 0xba5   :  { %v4978_v31 = vmin.f32 %v10485_v0, 0.0  ;;  %v5005_v49 = vmul.f32 1.442695, %v4977_v41  ;;  %v5031_v55 = vsel %vm4951_vm8, %v10393_v51, %v5498_v36  ;;  %v5032_v14 = vsel %vm4952_vm15, %v10401_v46, %v5499_v47  ;;  %v6256_v36 = vld [vmem:[%s10622_s19 + $0x8] sm:$0xff]   ;;  %v6257_v47 = vld [vmem:[%s10624_s21] sm:$0xff]   ;;  %v6260_v41 = vld [vmem:[%s10624_s21 + $0x18] sm:$0xff]  }
 0xba6   :  { %6321 = vpow2.f32 %v5009_v33  ;;  %v5011_v59 = vmul.f32 1.442695, %v4980_v37  ;;  %v5046_v53 = vpack.c.bf16 %v5032_v14, %v5031_v55  ;;  %5859 = vmatpush3.bf16.msra.mxu1 %v5045_v60  ;;  %v5033_v56 = vsel %vm4953_vm10, %v10421_v22, %v5500_v27  ;;  %5887 = vmatpush3.bf16.msra.mxu0 %v6257_v47  ;;  %v6262_v33 = vld [vmem:[%s10624_s21 + $0x28] sm:$0xff]   ;;  %v6263_v37 = vld [vmem:[%s10624_s21 + $0x30] sm:$0xff]  }
 0xba7   :  { %v5007_v42 = vmul.f32 1.442695, %v4978_v31  ;;  %6323 = vpow2.f32 %v5005_v49  ;;  %v5034_v13 = vsel %vm4954_vm1, %v10430_v25, %v5501_v8  ;;  %v5035_v51 = vsel %vm4955_vm5, %v10417_v4, %v5502_v52  ;;  %5860 = vmatprep.subr.bf16.mxu1 %v6386_v9  ;;  %5888 = vmatprep.subr.bf16.mxu0 %v6386_v9  ;;  %v6259_v8 = vld [vmem:[%s10624_s21 + $0x10] sm:$0xff]   ;;  %v6264_v31 = vld [vmem:[%s10624_s21 + $0x38] sm:$0xff]   ;;  %v5514_v49 = vld [vmem:[%s10623_s20] ss:$0 sm:$0xff] }
 0xba8   :  { %v6314_v54 = vpop.eup %6313  ;;  %6325 = vpow2.f32 %v5011_v59  ;;  %v5047_v19 = vpack.c.bf16 %v5034_v13, %v5033_v56  ;;  %v5036_v26 = vsel %vm4956_vm13, %v10426_v32, %v5503_v48  ;;  %vm4960_vm9 = vcmp.gt.f32.partialorder %v10450_v23, 0.0  ;;  %v6261_v48 = vld [vmem:[%s10624_s21 + $0x20] sm:$0xff]  }
 0xba9   :  { %v6316_v46 = vpop.eup %6315  ;;  %v5506_v21 = vadd.f32 -1.0, %v6314_v54  ;;  %6327 = vpow2.f32 %v5007_v42  ;;  %v5048_v11 = vpack.c.bf16 %v5036_v26, %v5035_v51  ;;  %vm4958_vm11 = vcmp.gt.f32.partialorder %v10455_v15, 0.0 }
 0xbaa   :  { %v6318_v44 = vpop.eup %6317  ;;  %v5504_v22 = vadd.f32 -1.0, %v6316_v46  ;;  %5861 = vmatpush3.bf16.msra.mxu1 %v5046_v53  ;;  %vm4963_vm12 = vcmp.gt.f32.partialorder %v10474_v45, 0.0  ;;  %vm4964_vm7 = vcmp.gt.f32.partialorder %v10481_v29, 0.0  ;;  %vm4961_vm3 = vcmp.gt.f32.partialorder %v10478_v2, 0.0 }
 0xbab   :  { %v6320_v28 = vpop.eup %6319  ;;  %v5507_v25 = vadd.f32 -1.0, %v6318_v44  ;;  %5862 = vmatprep.subr.bf16.mxu1 %v6386_v9  ;;  %v5039_v32 = vsel %vm4959_vm4, %v10441_v17, %v5506_v21  ;;  %vm4962_vm0 = vcmp.gt.f32.partialorder %v10485_v0, 0.0  ;;  %vm249_vm8 = vcmp.eq.s32.totalorder %v11779_v43, %v5344_v61 }
 0xbac   :  { %v5505_v4 = vadd.f32 -1.0, %v6320_v28  ;;  %v5037_v58 = vsel %vm4957_vm14, %v10445_v10, %v5504_v22 }
 0xbad   :  { %v5040_v7 = vsel %vm4960_vm9, %v10450_v23, %v5507_v25  ;;  %v11780_v25 = vld [vmem:[#allocation5_spill] sm:$0xff] }
 0xbae   :  { %v5038_v5 = vsel %vm4958_vm11, %v10455_v15, %v5505_v4  ;;  %v5050_v50 = vpack.c.bf16 %v5040_v7, %v5039_v32  ;;  %5863 = vmatpush3.bf16.msra.mxu1 %v5047_v19  ;;  %vm5300_vm13 = vcmp.lt.s32.totalorder %v11780_v25, 3 }
 0xbaf   :  { %v5049_v35 = vpack.c.bf16 %v5038_v5, %v5037_v58  ;;  %5864 = vmatprep.subr.bf16.mxu1 %v6386_v9 }
 0xbb0   :  { %v6322_v57 = vpop.eup %6321 }
 0xbb1   :  { %v6324_v30 = vpop.eup %6323  ;;  %v5510_v20 = vadd.f32 -1.0, %v6322_v57 }
 0xbb2   :  { %v6326_v40 = vpop.eup %6325  ;;  %v5508_v38 = vadd.f32 -1.0, %v6324_v30  ;;  %5865 = vmatpush3.bf16.msra.mxu1 %v5048_v11  ;;  %v5520_v11 = vld [vmem:[%s10625_s22] ss:$0 sm:$0xff]  ;;  %s6388_s22 = smov [#allocation2]  }
 0xbb3   :  { %v6328_v39 = vpop.eup %6327  ;;  %v5511_v16 = vadd.f32 -1.0, %v6326_v40  ;;  %5866 = vmatprep.subr.bf16.mxu1 %v6386_v9  ;;  %v5043_v10 = vsel %vm4963_vm12, %v10474_v45, %v5510_v20  ;;  %v11778_v45 = vld [vmem:[#allocation88_spill] sm:$0xff]  ;;  %s5332_s10 = sshll.u32 %s6388_s22, 4  ;;  %s5333_s10 = int_to_ptr.vmem [resolvable:$true] %s5332_s10 }
 0xbb4   :  { %v5509_v17 = vadd.f32 -1.0, %v6328_v39  ;;  %v5041_v15 = vsel %vm4961_vm3, %v10478_v2, %v5508_v38  ;;  %vm250_vm6 = vcmp.eq.s32.totalorder %v11778_v45, %v5344_v61  ;;  %v5102_v2 = vpop.permute.xlu1 %5101  ;;  %s6342_s0 = scalar_lea.vmem %s5333_s10, 256  ;;  %p6347_p1 = scmp.lt.s32.totalorder %s5333_s10, %s5333_s10 }
 0xbb5   :  { %v5044_v23 = vsel %vm4964_vm7, %v10481_v29, %v5511_v16  ;;  %vm5512_vm15 = vmpackc.low %vm250_vm6, %vm249_vm8  ;;  %p6343_p0 = scmp.ne.s32.totalorder %s5333_s10, %s6342_s0  ;;  %p6348_p2 = scmp.lt.s32.totalorder %s6342_s0, %s6342_s0 }
 0xbb6   :  { %v5042_v34 = vsel %vm4962_vm0, %v10485_v0, %v5509_v17  ;;  %v5052_v3 = vpack.c.bf16 %v5044_v23, %v5043_v10  ;;  %5867 = vmatpush3.bf16.msra.mxu1 %v5049_v35 }
 0xbb7   :  { %v5051_v62 = vpack.c.bf16 %v5042_v34, %v5041_v15  ;;  %5868 = vmatprep.subr.bf16.mxu1 %v6386_v9  ;;  %p6349_p3 = por %p6348_p2, %p6347_p1 }
 0xbb9   :  { %p6350_p4 = pnand %p6349_p3, %p6343_p0 }
 0xbba   :  { %5869 = vmatpush3.bf16.msra.mxu1 %v5050_v50 }
 0xbbb   :  { %5870 = vmatprep.subr.bf16.mxu1 %v6386_v9 }
 0xbbe   :  { %5871 = vmatpush3.bf16.msra.mxu1 %v5051_v62 }
 0xbbf   :  { %5872 = vmatprep.subr.bf16.mxu1 %v6386_v9 }
 0xbc2   :  { %5873 = vmatpush3.bf16.msra.mxu1 %v5052_v3 }
 0xbc3   :  { %5878 = vmatprep.subr.bf16.mxu1 %v6386_v9 }
 0xbc5   :  { %5875 = vmatmul.mubr.msk.bf16.vlgmr.msra.gmra.mrb[96].mxu1 %vm5512_vm15, %v11734_v24  ;;  %v6258_v24 = vld [vmem:[%s10624_s21 + $0x8] sm:$0xff]  }
 0xbc6   :  { %5882 = vmatprep.mubr.msk.bf16.mxu1 %vm6387_vm2, %v6386_v9  ;;  %5879 = vmatpush3.bf16.msra.mxu1 %v6255_v63  ;;  %vm5130_vm2 = vcmask 261120  }
 0xbc7   :  { %5880 = vmatprep.subr.bf16.mxu1 %v6386_v9  ;;  %5889 = vmatpush3.bf16.msra.mxu0 %v6258_v24 }
 0xbc8   :  { %5890 = vmatprep.subr.bf16.mxu0 %v6386_v9 }
 0xbca   :  { %5881 = vmatpush3.bf16.msra.mxu1 %v6256_v36 }
 0xbcb   :  { %5891 = vmatpush3.bf16.msra.mxu0 %v6259_v8 }
 0xbcc   :  { %5892 = vmatprep.subr.bf16.mxu0 %v6386_v9 }
 0xbcf   :  { %5893 = vmatpush3.bf16.msra.mxu0 %v6260_v41 }
 0xbd0   :  { %5894 = vmatprep.subr.bf16.mxu0 %v6386_v9 }
 0xbd3   :  { %5895 = vmatpush3.bf16.msra.mxu0 %v6261_v48 }
 0xbd4   :  { %5896 = vmatprep.subr.bf16.mxu0 %v6386_v9 }
 0xbd7   :  { %5897 = vmatpush3.bf16.msra.mxu0 %v6262_v33 }
 0xbd8   :  { %5898 = vmatprep.subr.bf16.mxu0 %v6386_v9 }
 0xbdb   :  { %5899 = vmatpush3.bf16.msra.mxu0 %v6263_v37 }
 0xbdc   :  { %5900 = vmatprep.subr.bf16.mxu0 %v6386_v9 }
 0xbdf   :  { %5901 = vmatpush3.bf16.msra.mxu0 %v6264_v31 }
 0xc98   :  { %v5087_v29 = vpop.f32.mrb[96].mxu1 }
 0xc99   :  { %v5876_v12 = vpop.f32.mrb[97].mxu1  ;;  %v5104_v18 = vmul.f32 %v5097_v6, %v5087_v29 }
 0xc9a   :  { %v5090_v0 = vpop.f32.mrb[98].mxu1 }
 0xc9b   :  { %v5105_v1 = vmul.f32 %v5102_v2, %v5090_v0  ;;  %v5877_v52 = vpop.f32.mrb[99].mxu1 }
 0xc9d   :  { %v5106_v27 = vpack.c.bf16 %v5105_v1, %v5104_v18 }
 0xc9f   :  { %5883 = vmatmul.mubr.msk.bf16.vlgmr.msra.gmra.mrb[100].mxu1 %vm5130_vm2, %v5106_v27 }
 0xd72   :  { %v5168_v60 = vpop.f32.mrb[100].mxu1 }
 0xd73   :  { %v5169_v55 = vadd.f32 %v5514_v49, %v5168_v60  ;;  %v5884_v14 = vpop.f32.mrb[101].mxu1 }
 0xd74   :  { %v5171_v59 = vpop.f32.mrb[102].mxu1 }
 0xd75   :  { %v5177_v42 = vmin.f32 %v5169_v55, 0.0  ;;  %v5172_v53 = vadd.f32 %v5514_v49, %v5171_v59  ;;  %v5885_v54 = vpop.f32.mrb[103].mxu1  ;;  %vm5175_vm5 = vcmp.gt.f32.partialorder %v5169_v55, 0.0 }
 0xd77   :  { %v5179_v56 = vmul.f32 1.442695, %v5177_v42  ;;  %v5178_v13 = vmin.f32 %v5172_v53, 0.0  ;;  %vm5176_vm10 = vcmp.gt.f32.partialorder %v5172_v53, 0.0 }
 0xd79   :  { %6329 = vpow2.f32 %v5179_v56  ;;  %v5181_v9 = vmul.f32 1.442695, %v5178_v13 }
 0xd7b   :  { %6331 = vpow2.f32 %v5181_v9 }
 0xd83   :  { %v6330_v51 = vpop.eup %6329 }
 0xd84   :  { %v5518_v46 = vadd.f32 -1.0, %v6330_v51 }
 0xd85   :  { %v6332_v21 = vpop.eup %6331 }
 0xd86   :  { %v5519_v19 = vadd.f32 -1.0, %v6332_v21  ;;  %v5185_v26 = vsel %vm5175_vm5, %v5169_v55, %v5518_v46 }
 0xd88   :  { %v5186_v44 = vsel %vm5176_vm10, %v5172_v53, %v5519_v19 }
 0xd89   :  { %v5187_v22 = vpack.c.bf16 %v5186_v44, %v5185_v26 }
 0xd8b   :  { %5903 = vmatmul.mubr.bf16.vlgmr.msra.gmra.mrb[80].mxu0 %v5187_v22 }
 0xe5e   :  { %v5293_v28 = vpop.f32.mrb[80].mxu0 }
 0xe5f   :  { %v5294_v4 = vadd.f32 %v5520_v11, %v5293_v28  ;;  %v5904_v32 = vpop.f32.mrb[81].mxu0 }
 0xe60   :  { %v5296_v7 = vpop.f32.mrb[82].mxu0 }
 0xe61   :  { %v5297_v58 = vadd.f32 %v5520_v11, %v5296_v7  ;;  %v5905_v5 = vpop.f32.mrb[83].mxu0  ;;  %v5301_v50 = vsel %vm5300_vm13, %v5294_v4, -1e+30 }
 0xe62   :  { %5303 = vmax.xlane.f32.xlu1 %v5301_v50 }
 0xe63   :  { %v5302_v35 = vsel %vm5300_vm13, %v5297_v58, -1e+30 }
 0xe64   :  { %5305 = vmax.xlane.f32.xlu0 %v5302_v35 }
 0xeef   :  { %v5304_v57 = vpop.xlane.xlu1 %5303 }
 0xef0   :  { %v5307_v30 = vsub.f32 %v5301_v50, %v5304_v57 }
 0xef1   :  { %v5306_v20 = vpop.xlane.xlu0 %5305 }
 0xef2   :  { %v5309_v40 = vmul.f32 1.442695, %v5307_v30  ;;  %v5308_v38 = vsub.f32 %v5302_v35, %v5306_v20 }
 0xef4   :  { %6333 = vpow2.f32 %v5309_v40  ;;  %v5311_v39 = vmul.f32 1.442695, %v5308_v38 }
 0xef6   :  { %6335 = vpow2.f32 %v5311_v39 }
 0xefe   :  { %v6334_v16 = vpop.eup %6333 }
 0xeff   :  { %5313 = vadd.xlane.f32.xlu0 %v6334_v16 }
 0xf00   :  { %v6336_v17 = vpop.eup %6335 }
 0xf01   :  { %5315 = vadd.xlane.f32.xlu1 %v6336_v17 }
 0xf8c   :  { %v5314_v10 = vpop.xlane.xlu0 %5313 }
 0xf8d   :  { %6337 = vlog2.f32 %v5314_v10 }
 0xf8e   :  { %v5316_v23 = vpop.xlane.xlu1 %5315 }
 0xf8f   :  { %6339 = vlog2.f32 %v5316_v23 }
 0xf97   :  { %v6338_v15 = vpop.eup %6337 }
 0xf98   :  { %v5318_v34 = vmul.f32 0.6931472, %v6338_v15 }
 0xf99   :  { %v6340_v3 = vpop.eup %6339 }
 0xf9a   :  { %v5321_v62 = vadd.f32 %v5318_v34, %v5304_v57  ;;  %v5320_v61 = vmul.f32 0.6931472, %v6340_v3 }
 0xf9c   :  { %v5323_v45 = vsub.f32 %v5301_v50, %v5321_v62  ;;  %v5322_v43 = vadd.f32 %v5320_v61, %v5306_v20 }
 0xf9e   :  { %5325 = vst [vmem:[#allocation2] sm:$0xff] %v5323_v45  ;;  %v5324_v63 = vsub.f32 %v5302_v35, %v5322_v43 }
 0xfa0   :  { %5326 = vst [vmem:[#allocation2 + $0x8] sm:$0xff] %v5324_v63 }
 0xfa1   :  { %6353 = shalt.err (!%p6350_p4)
}
 0xfa2   :  { %s6354_s30 = scalar_lea.hbm %s10626_s23, 256 }
 0xfa3   :  { %p6355_p5 = scmp.ne.s32.totalorder %s10626_s23, %s6354_s30  ;;  %p6358_p6 = scmp.lt.u32.totalorder %s6354_s30, %s10626_s23 }
 0xfa5   :  { %p6360_p7 = pnand %p6358_p6, %p6355_p5 }
 0xfa7   :  { %6363 = shalt.err (!%p6360_p7)
}
 0xfa8   :  { %s6389_s5 = smov 128   ;;  %s6390_s12 = smov 8  }
 0xfa9   :  { %5338 = dma.vmem_to_hbm [thread:$0]  %s5333_s10, 256, %s10626_s23, [#allocation3], %s6389_s5, %s6389_s5, %s6390_s12  }
 0xfaa   :  { %6364 = dma.done.wait [#allocation3], 256  }
 0xfab   :  { %6365 = vsyncadd [#allocation3], 4294967040 }
 0xfac   :  { %5342 = vsyncpa [#allocation3], 1 }

</bundles_post_ra>
